<compile_context>
chip_gen: v7x
topology: tpu7x:2x2x1
jax: 0.10.0
libtpu: 0.0.40
codegen_flags: <defaults>
</compile_context>

<pallas_src>
import functools

import numpy as np

import jax
import jax.numpy as jnp
from jax import lax
from jax.experimental import pallas as pl
from jax.experimental.pallas import tpu as pltpu


# For ConvTranspose(k=3, s=2, p=1, output_padding=1) the output index o = 2*i+q
# reads input i+s with flipped-kernel tap kappa:
#   q=0 -> (s=0, kappa=1) ; q=1 -> (s=0, kappa=0) and (s=1, kappa=2)
_TAPS = {0: ((0, 1),), 1: ((0, 0), (1, 2))}

# Fixed stacking order of the 8 shifted variants (s_idx = 4*sd + 2*sh + sw).
_S_ORDER = [(sd, sh, sw) for sd in (0, 1) for sh in (0, 1) for sw in (0, 1)]


def _shift_plan(level, tdims, nbatch):
    """Host-side plan for 'actual spatial index + 1' on parity-blocked columns.

    Activations entering layer `level` are stored as (C, M) with the flat
    column index enumerating
        (q^{L-1}_d, q^{L-1}_h, q^{L-1}_w, ..., q^{1}_d, q^{1}_h, q^{1}_w,
         batch, t_d, t_u, t_v)                      (newest parity outermost)
    and actual_d = 2^{L-1} * t_d + sum_j 2^{L-1-j} * q^{j}_d  (same for h, w).
    Incrementing an actual index is a ripple-carry over those digits, i.e. one
    masked flat column shift per carry case.  Batch sits between the parity
    bits and the block coordinate, so no shift ever crosses a batch boundary.

    Returns (masks float32 (3*level, M), deltas[dim][case] static int shifts,
             valid[dim][case] bools).
    """
    td, tu, tv = tdims
    tprod = td * tu * tv
    m = (8 ** (level - 1)) * nbatch * tprod
    n = np.arange(m)
    t_stride = (tu * tv, tv, 1)
    t_size = (td, tu, tv)
    dim_f = (4, 2, 1)

    masks = np.zeros((3 * level, m), np.float32)
    deltas = [[0] * level for _ in range(3)]
    valid = [[False] * level for _ in range(3)]
    for dim in range(3):
        # stride of q^{(j)}_dim, j = 1 (oldest) .. level-1 (newest)
        q_stride = [(8 ** (j - 1)) * nbatch * tprod * dim_f[dim]
                    for j in range(1, level)]
        qbits = [(n // s) % 2 for s in q_stride]
        tcoord = (n // t_stride[dim]) % t_size[dim]
        for case in range(level):
            if case < level - 1:
                ones_idx = [level - 2 - i for i in range(case)]  # newest `case` bits
                flip_idx = level - 2 - case                      # bit that flips 0->1
                mask = qbits[flip_idx] == 0
                delta = q_stride[flip_idx]
                for i in ones_idx:
                    mask &= qbits[i] == 1
                    delta -= q_stride[i]
            else:  # carry into the block coordinate t
                mask = tcoord < (t_size[dim] - 1)
                delta = t_stride[dim]
                for i in range(level - 1):
                    mask &= qbits[i] == 1
                    delta -= q_stride[i]
            has = bool(mask.any())
            masks[dim * level + case] = mask.astype(np.float32)
            deltas[dim][case] = int(delta) if has else 0
            valid[dim][case] = has
    return masks, deltas, valid


def _shift_cols(a, delta):
    """b[:, n] = a[:, n + delta], zero-filled OOB (fallback for tiny widths)."""
    if delta == 0:
        return a
    c, m = a.shape
    z = jnp.zeros((c, abs(delta)), a.dtype)
    if delta > 0:
        return jnp.concatenate([a[:, delta:], z], axis=1)
    return jnp.concatenate([z, a[:, :m + delta]], axis=1)


def _shifted_variants(a, mask_ref, deltas, valid, level, use_roll):
    """All 8 (s_d, s_h, s_w) in {0,1}^3 'input shifted by s' variants of a."""
    c, m = a.shape

    # Hoist mask loads / broadcasts / compares: one full-shape bool per case.
    bmask = {}
    for dim in range(3):
        for case in range(level):
            if not valid[dim][case]:
                continue
            row = mask_ref[dim * level + case:dim * level + case + 1, :]   # (1, M)
            bmask[(dim, case)] = jnp.broadcast_to(row, (c, m)) > 0.5

    def shift_one(x, dim):
        out = jnp.zeros_like(x)
        for case in range(level):
            if not valid[dim][case]:
                continue
            delta = deltas[dim][case]
            if use_roll:
                # cyclic roll (XLU); wrapped garbage is masked off by `bmask`
                shifted = pltpu.roll(x, shift=(-delta) % m, axis=1)
            else:
                shifted = _shift_cols(x, delta)
            out = jnp.where(bmask[(dim, case)], shifted, out)   # cases are disjoint
        return out

    xs = {(0, 0, 0): a}
    xs[(1, 0, 0)] = shift_one(a, 0)
    xs[(0, 1, 0)] = shift_one(a, 1)
    xs[(0, 0, 1)] = shift_one(a, 2)
    xs[(1, 1, 0)] = shift_one(xs[(1, 0, 0)], 1)
    xs[(1, 0, 1)] = shift_one(xs[(1, 0, 0)], 2)
    xs[(0, 1, 1)] = shift_one(xs[(0, 1, 0)], 2)
    xs[(1, 1, 1)] = shift_one(xs[(1, 1, 0)], 2)
    return xs


def _deconv_layer(a, w_ref, b_ref, mask_ref, deltas, valid, level, act):
    """One ConvTranspose3d(k3,s2,p1,op1) + activation on a (Cin, M) activation.

    w_ref: (8, Cout, 8*Cin) per-parity K-stacked taps. Returns (Cout, 8*M) in
    parity-blocked column order (new parity bits become the outermost columns).
    """
    m = a.shape[-1]
    use_roll = (m % 128 == 0)          # native lane roll only for 128-multiples
    xs = _shifted_variants(a, mask_ref, deltas, valid, level, use_roll)

    # One stacked activation per layer: (8*Cin, M), shift order = _S_ORDER.
    xstack = jnp.concatenate([xs[s] for s in _S_ORDER], axis=0)

    # One MXU matmul per output parity (K = 8*Cin, zero blocks are free MACs).
    slabs = [jnp.dot(w_ref[q], xstack, preferred_element_type=jnp.float32)
             for q in range(8)]
    y = jnp.concatenate(slabs, axis=1) + b_ref[...]      # (Cout, 8*M) + (Cout, 1)

    if act == "relu":
        return jnp.maximum(y, 0.0)
    # sigmoid: exp goes to the EUP; exact reciprocal keeps 1e-4 parity.
    return pl.reciprocal(1.0 + jnp.exp(-y))


def _decoder_kernel(x_ref, w1_ref, b1_ref, m1_ref, w2_ref, b2_ref, m2_ref,
                    w3_ref, b3_ref, m3_ref, o_ref, *, deltas, valids, acts):
    a = x_ref[...]                                                           # (64, M)
    a = _deconv_layer(a, w1_ref, b1_ref, m1_ref, deltas[0], valids[0], 1, acts[0])  # (32, 8M)
    a = _deconv_layer(a, w2_ref, b2_ref, m2_ref, deltas[1], valids[1], 2, acts[1])  # (16, 64M)
    a = _deconv_layer(a, w3_ref, b3_ref, m3_ref, deltas[2], valids[2], 3, acts[2])  # (1, 512M)
    o_ref[...] = a


def _stack_parity_weights(wp):
    """(Cin, Cout, 3,3,3) ConvTranspose3d weight -> (8, Cout, 8*Cin) per-parity
    K-stacked flipped taps (zero blocks for (parity, shift) pairs with no tap)."""
    cin, cout = wp.shape[0], wp.shape[1]
    # flipped (correlation) taps, transposed for (Cout,Cin)@(Cin,M) matmuls.
    w_t = jnp.flip(wp, axis=(2, 3, 4)).transpose(2, 3, 4, 1, 0).astype(jnp.float32)
    wq = jnp.zeros((8, cout, 8 * cin), jnp.float32)
    for qd in (0, 1):
        for qh in (0, 1):
            for qw in (0, 1):
                qidx = qd * 4 + qh * 2 + qw
                for sd, kd in _TAPS[qd]:
                    for sh, kh in _TAPS[qh]:
                        for sw, kw in _TAPS[qw]:
                            sidx = sd * 4 + sh * 2 + sw
                            wq = wq.at[qidx, :, sidx * cin:(sidx + 1) * cin].set(
                                w_t[kd, kh, kw])
    return wq


def init_decoder_params(key):
    # Deterministic synthetic init (shapes from nn.ConvTranspose3d in __init__).
    layer_shapes = [
        ((64, 32, 3, 3, 3), (32,)),
        ((32, 16, 3, 3, 3), (16,)),
        ((16, 1, 3, 3, 3), (1,)),
    ]
    params = []
    for i, (ws, bs) in enumerate(layer_shapes):
        kw, kb = jax.random.split(jax.random.fold_in(key, i))
        fan = ws[1] * 27
        scale = 1.0 / jnp.sqrt(jnp.float32(fan))
        w = jax.random.uniform(kw, ws, jnp.float32, -scale, scale)
        b = jax.random.uniform(kb, bs, jnp.float32, -scale, scale)
        params.append((w, b))
    return params


def decoder_forward(params, x_ncdhw):
    """PyTorch-equivalent forward: NCDHW in, NCDHW out, one fused Pallas call."""
    x = jnp.asarray(x_ncdhw, jnp.float32)
    n, c_in, d, h, w = x.shape
    tdims = (d, h, w)
    tprod = d * h * w
    m1 = n * tprod                      # batch folded onto the lane axis
    m_final = 512 * m1                  # 8x upsample per spatial dim
    c_last = params[-1][1].shape[0]

    wqs, biases, masks, deltas_all, valid_all = [], [], [], [], []
    for li, (wp, bp) in enumerate(params):
        cout = wp.shape[1]
        wqs.append(_stack_parity_weights(wp))
        biases.append(bp.reshape(cout, 1).astype(jnp.float32))
        mk, dl, vd = _shift_plan(li + 1, tdims, n)
        masks.append(jnp.asarray(mk))
        deltas_all.append(dl)
        valid_all.append(vd)

    # (C, batch-major flattened spatial): columns ordered (b, t_d, t_h, t_w).
    x_cm = x.transpose(1, 0, 2, 3, 4).reshape(c_in, m1)

    in_specs = [pl.BlockSpec(x_cm.shape, lambda i: (0, 0))]
    operands = [x_cm]
    for li in range(3):
        in_specs.append(pl.BlockSpec(wqs[li].shape, lambda i: (0, 0, 0)))
        in_specs.append(pl.BlockSpec(biases[li].shape, lambda i: (0, 0)))
        in_specs.append(pl.BlockSpec(masks[li].shape, lambda i: (0, 0)))
        operands += [wqs[li], biases[li], masks[li]]

    kernel = functools.partial(
        _decoder_kernel,
        deltas=deltas_all,
        valids=valid_all,
        acts=("relu", "relu", "sigmoid"),
    )

    # Advisory cost estimate so XLA schedules neighbours around the tiny call.
    flops = 0
    bytes_accessed = x_cm.size * 4 + c_last * m_final * 4
    for li, (wp, _) in enumerate(params):
        cin, cout = wp.shape[0], wp.shape[1]
        flops += 2 * 27 * cout * cin * ((8 ** li) * m1)
        bytes_accessed += (wqs[li].size + biases[li].size + masks[li].size) * 4

    out = pl.pallas_call(
        kernel,
        out_shape=jax.ShapeDtypeStruct((c_last, m_final), jnp.float32),
        grid_spec=pltpu.PrefetchScalarGridSpec(
            num_scalar_prefetch=0,
            grid=(1,),
            in_specs=in_specs,
            out_specs=pl.BlockSpec((c_last, m_final), lambda i: (0, 0)),
        ),
        compiler_params=pltpu.CompilerParams(
            dimension_semantics=("arbitrary",)),
        cost_estimate=pl.CostEstimate(
            flops=int(flops),
            transcendentals=int(c_last * m_final),
            bytes_accessed=int(bytes_accessed)),
    )(*operands)

    # De-scramble parity-blocked columns -> interleaved (D, H, W).
    # column axes: (q3d,q3h,q3w, q2d,q2h,q2w, q1d,q1h,q1w, b, td,th,tw);
    # actual D = 8*td + 4*q1d + 2*q2d + q3d (same for H, W).  Kept as one tiny
    # XLA transpose (32 KB); an in-kernel version would need a full 8192-lane
    # permutation for no measurable gain on this launch-bound pipeline.
    y = out.reshape(c_last, 2, 2, 2, 2, 2, 2, 2, 2, 2, n, d, h, w)
    y = y.transpose(10, 0, 11, 7, 4, 1, 12, 8, 5, 2, 13, 9, 6, 3)
    return y.reshape(n, c_last, 8 * d, 8 * h, 8 * w)


def decoder_forward_ref(params, x_ncdhw):
    # Pure-JAX reference (lax.conv_general_dilated) for validation.
    x = jnp.transpose(x_ncdhw, (0, 2, 3, 4, 1))
    for (w, b), act in zip(params, ("relu", "relu", "sigmoid")):
        wf = jnp.flip(w, axis=(2, 3, 4)).transpose(2, 3, 4, 0, 1)
        y = lax.conv_general_dilated(
            x, wf, window_strides=(1, 1, 1),
            padding=((1, 2), (1, 2), (1, 2)),
            lhs_dilation=(2, 2, 2),
            dimension_numbers=("NDHWC", "DHWIO", "NDHWC"))
        y = y + b
        x = jnp.maximum(y, 0.0) if act == "relu" else jax.nn.sigmoid(y)
    return jnp.transpose(x, (0, 4, 1, 2, 3))


if __name__ == "__main__":
    key = jax.random.PRNGKey(0)
    params = init_decoder_params(jax.random.fold_in(key, 123))
    # Small latent consistent with the module: (N=2, C=64, D=H=W=2) -> (2, 1, 16, 16, 16)
    x = jax.random.normal(jax.random.fold_in(key, 7), (2, 64, 2, 2, 2), jnp.float32)

    out = jax.jit(decoder_forward)(params, x)
    out = jax.block_until_ready(out)
    assert out.shape == (2, 1, 16, 16, 16), out.shape

    ref = decoder_forward_ref(params, x)
    max_err = float(jnp.max(jnp.abs(out - ref)))
    assert jnp.allclose(out, ref, atol=1e-4, rtol=1e-4), max_err

    print("KERNEL_OK")
</pallas_src>

<mosaic_0001>
module attributes {stable_mosaic.version = 11 : i64} {
  func.func @_decoder_kernel(%arg0: i32, %arg1: memref<64x16xf32, #tpu.memory_space<vmem>>, %arg2: memref<8x32x512xf32, #tpu.memory_space<vmem>>, %arg3: memref<32x1xf32, #tpu.memory_space<vmem>>, %arg4: memref<3x16xf32, #tpu.memory_space<vmem>>, %arg5: memref<8x16x256xf32, #tpu.memory_space<vmem>>, %arg6: memref<16x1xf32, #tpu.memory_space<vmem>>, %arg7: memref<6x128xf32, #tpu.memory_space<vmem>>, %arg8: memref<8x1x128xf32, #tpu.memory_space<vmem>>, %arg9: memref<1x1xf32, #tpu.memory_space<vmem>>, %arg10: memref<9x1024xf32, #tpu.memory_space<vmem>>, %arg11: memref<1x8192xf32, #tpu.memory_space<vmem>>) attributes {dimension_semantics = [#tpu.dimension_semantics<arbitrary>], iteration_bounds = array<i64: 1>, scalar_prefetch = 0 : i64, scratch_operands = 0 : i64, tpu.core_type = #tpu.core_type<tc>, window_params = [{pipeline_mode = #tpu.pipeline_mode<synchronous>, transform_indices = @transform_0, window_bounds = array<i64: 64, 16>}, {pipeline_mode = #tpu.pipeline_mode<synchronous>, transform_indices = @transform_1, window_bounds = array<i64: 8, 32, 512>}, {pipeline_mode = #tpu.pipeline_mode<synchronous>, transform_indices = @transform_2, window_bounds = array<i64: 32, 1>}, {pipeline_mode = #tpu.pipeline_mode<synchronous>, transform_indices = @transform_3, window_bounds = array<i64: 3, 16>}, {pipeline_mode = #tpu.pipeline_mode<synchronous>, transform_indices = @transform_4, window_bounds = array<i64: 8, 16, 256>}, {pipeline_mode = #tpu.pipeline_mode<synchronous>, transform_indices = @transform_5, window_bounds = array<i64: 16, 1>}, {pipeline_mode = #tpu.pipeline_mode<synchronous>, transform_indices = @transform_6, window_bounds = array<i64: 6, 128>}, {pipeline_mode = #tpu.pipeline_mode<synchronous>, transform_indices = @transform_7, window_bounds = array<i64: 8, 1, 128>}, {pipeline_mode = #tpu.pipeline_mode<synchronous>, transform_indices = @transform_8, window_bounds = array<i64: 1, 1>}, {pipeline_mode = #tpu.pipeline_mode<synchronous>, transform_indices = @transform_9, window_bounds = array<i64: 9, 1024>}, {pipeline_mode = #tpu.pipeline_mode<synchronous>, transform_indices = @transform_10, window_bounds = array<i64: 1, 8192>}]} {
    %c0 = arith.constant 0 : index
    %c0_0 = arith.constant 0 : index
    %0 = vector.load %arg1[%c0, %c0_0] : memref<64x16xf32, #tpu.memory_space<vmem>>, vector<64x16xf32>
    %c0_1 = arith.constant 0 : index
    %c0_2 = arith.constant 0 : index
    %1 = vector.load %arg4[%c0_1, %c0_2] : memref<3x16xf32, #tpu.memory_space<vmem>>, vector<1x16xf32>
    %2 = vector.shape_cast %1 : vector<1x16xf32> to vector<1x16xf32>
    %3 = vector.broadcast %2 : vector<1x16xf32> to vector<64x16xf32>
    %cst = arith.constant 5.000000e-01 : f32
    %4 = vector.broadcast %cst : f32 to vector<64x16xf32>
    %5 = arith.cmpf ogt, %3, %4 : vector<64x16xf32>
    %c1 = arith.constant 1 : index
    %c0_3 = arith.constant 0 : index
    %6 = vector.load %arg4[%c1, %c0_3] : memref<3x16xf32, #tpu.memory_space<vmem>>, vector<1x16xf32>
    %7 = vector.shape_cast %6 : vector<1x16xf32> to vector<1x16xf32>
    %8 = vector.broadcast %7 : vector<1x16xf32> to vector<64x16xf32>
    %cst_4 = arith.constant 5.000000e-01 : f32
    %9 = vector.broadcast %cst_4 : f32 to vector<64x16xf32>
    %10 = arith.cmpf ogt, %8, %9 : vector<64x16xf32>
    %c2 = arith.constant 2 : index
    %c0_5 = arith.constant 0 : index
    %11 = vector.load %arg4[%c2, %c0_5] : memref<3x16xf32, #tpu.memory_space<vmem>>, vector<1x16xf32>
    %12 = vector.shape_cast %11 : vector<1x16xf32> to vector<1x16xf32>
    %13 = vector.broadcast %12 : vector<1x16xf32> to vector<64x16xf32>
    %cst_6 = arith.constant 5.000000e-01 : f32
    %14 = vector.broadcast %cst_6 : f32 to vector<64x16xf32>
    %15 = arith.cmpf ogt, %13, %14 : vector<64x16xf32>
    %cst_7 = arith.constant 0.000000e+00 : f32
    %16 = vector.broadcast %cst_7 : f32 to vector<64x16xf32>
    %cst_8 = arith.constant 0.000000e+00 : f32
    %17 = vector.broadcast %cst_8 : f32 to vector<64x4xf32>
    %18 = vector.extract_strided_slice %0 {offsets = [0, 4], sizes = [64, 12], strides = [1, 1]} : vector<64x16xf32> to vector<64x12xf32>
    %19 = tpu.concatenate %18, %17 in 1 : vector<64x12xf32>, vector<64x4xf32> -> vector<64x16xf32>
    %20 = arith.select %5, %19, %16 : vector<64x16xi1>, vector<64x16xf32>
    %cst_9 = arith.constant 0.000000e+00 : f32
    %21 = vector.broadcast %cst_9 : f32 to vector<64x16xf32>
    %cst_10 = arith.constant 0.000000e+00 : f32
    %22 = vector.broadcast %cst_10 : f32 to vector<64x2xf32>
    %23 = vector.extract_strided_slice %0 {offsets = [0, 2], sizes = [64, 14], strides = [1, 1]} : vector<64x16xf32> to vector<64x14xf32>
    %24 = tpu.concatenate %23, %22 in 1 : vector<64x14xf32>, vector<64x2xf32> -> vector<64x16xf32>
    %25 = arith.select %10, %24, %21 : vector<64x16xi1>, vector<64x16xf32>
    %cst_11 = arith.constant 0.000000e+00 : f32
    %26 = vector.broadcast %cst_11 : f32 to vector<64x16xf32>
    %cst_12 = arith.constant 0.000000e+00 : f32
    %27 = vector.broadcast %cst_12 : f32 to vector<64x1xf32>
    %28 = vector.extract_strided_slice %0 {offsets = [0, 1], sizes = [64, 15], strides = [1, 1]} : vector<64x16xf32> to vector<64x15xf32>
    %29 = tpu.concatenate %28, %27 in 1 : vector<64x15xf32>, vector<64x1xf32> -> vector<64x16xf32>
    %30 = arith.select %15, %29, %26 : vector<64x16xi1>, vector<64x16xf32>
    %cst_13 = arith.constant 0.000000e+00 : f32
    %31 = vector.broadcast %cst_13 : f32 to vector<64x16xf32>
    %cst_14 = arith.constant 0.000000e+00 : f32
    %32 = vector.broadcast %cst_14 : f32 to vector<64x2xf32>
    %33 = vector.extract_strided_slice %20 {offsets = [0, 2], sizes = [64, 14], strides = [1, 1]} : vector<64x16xf32> to vector<64x14xf32>
    %34 = tpu.concatenate %33, %32 in 1 : vector<64x14xf32>, vector<64x2xf32> -> vector<64x16xf32>
    %35 = arith.select %10, %34, %31 : vector<64x16xi1>, vector<64x16xf32>
    %cst_15 = arith.constant 0.000000e+00 : f32
    %36 = vector.broadcast %cst_15 : f32 to vector<64x16xf32>
    %cst_16 = arith.constant 0.000000e+00 : f32
    %37 = vector.broadcast %cst_16 : f32 to vector<64x1xf32>
    %38 = vector.extract_strided_slice %20 {offsets = [0, 1], sizes = [64, 15], strides = [1, 1]} : vector<64x16xf32> to vector<64x15xf32>
    %39 = tpu.concatenate %38, %37 in 1 : vector<64x15xf32>, vector<64x1xf32> -> vector<64x16xf32>
    %40 = arith.select %15, %39, %36 : vector<64x16xi1>, vector<64x16xf32>
    %cst_17 = arith.constant 0.000000e+00 : f32
    %41 = vector.broadcast %cst_17 : f32 to vector<64x16xf32>
    %cst_18 = arith.constant 0.000000e+00 : f32
    %42 = vector.broadcast %cst_18 : f32 to vector<64x1xf32>
    %43 = vector.extract_strided_slice %25 {offsets = [0, 1], sizes = [64, 15], strides = [1, 1]} : vector<64x16xf32> to vector<64x15xf32>
    %44 = tpu.concatenate %43, %42 in 1 : vector<64x15xf32>, vector<64x1xf32> -> vector<64x16xf32>
    %45 = arith.select %15, %44, %41 : vector<64x16xi1>, vector<64x16xf32>
    %cst_19 = arith.constant 0.000000e+00 : f32
    %46 = vector.broadcast %cst_19 : f32 to vector<64x16xf32>
    %cst_20 = arith.constant 0.000000e+00 : f32
    %47 = vector.broadcast %cst_20 : f32 to vector<64x1xf32>
    %48 = vector.extract_strided_slice %35 {offsets = [0, 1], sizes = [64, 15], strides = [1, 1]} : vector<64x16xf32> to vector<64x15xf32>
    %49 = tpu.concatenate %48, %47 in 1 : vector<64x15xf32>, vector<64x1xf32> -> vector<64x16xf32>
    %50 = arith.select %15, %49, %46 : vector<64x16xi1>, vector<64x16xf32>
    %51 = tpu.concatenate %0, %30, %25, %45, %20, %40, %35, %50 in 0 : vector<64x16xf32>, vector<64x16xf32>, vector<64x16xf32>, vector<64x16xf32>, vector<64x16xf32>, vector<64x16xf32>, vector<64x16xf32>, vector<64x16xf32> -> vector<512x16xf32>
    %c0_21 = arith.constant 0 : index
    %c0_22 = arith.constant 0 : index
    %c0_23 = arith.constant 0 : index
    %52 = vector.load %arg2[%c0_21, %c0_22, %c0_23] : memref<8x32x512xf32, #tpu.memory_space<vmem>>, vector<1x32x512xf32>
    %53 = vector.shape_cast %52 : vector<1x32x512xf32> to vector<32x512xf32>
    %cst_24 = arith.constant dense<0.000000e+00> : vector<32x16xf32>
    %54 = tpu.matmul %53, %51, %cst_24 {dimension_numbers = #tpu.dot_dimension_numbers<[1], [0], [0], [1], [0, 0, 1, 1], [], []>} : vector<32x512xf32>, vector<512x16xf32>, vector<32x16xf32> -> vector<32x16xf32>
    %c1_25 = arith.constant 1 : index
    %c0_26 = arith.constant 0 : index
    %c0_27 = arith.constant 0 : index
    %55 = vector.load %arg2[%c1_25, %c0_26, %c0_27] : memref<8x32x512xf32, #tpu.memory_space<vmem>>, vector<1x32x512xf32>
    %56 = vector.shape_cast %55 : vector<1x32x512xf32> to vector<32x512xf32>
    %cst_28 = arith.constant dense<0.000000e+00> : vector<32x16xf32>
    %57 = tpu.matmul %56, %51, %cst_28 {dimension_numbers = #tpu.dot_dimension_numbers<[1], [0], [0], [1], [0, 0, 1, 1], [], []>} : vector<32x512xf32>, vector<512x16xf32>, vector<32x16xf32> -> vector<32x16xf32>
    %c2_29 = arith.constant 2 : index
    %c0_30 = arith.constant 0 : index
    %c0_31 = arith.constant 0 : index
    %58 = vector.load %arg2[%c2_29, %c0_30, %c0_31] : memref<8x32x512xf32, #tpu.memory_space<vmem>>, vector<1x32x512xf32>
    %59 = vector.shape_cast %58 : vector<1x32x512xf32> to vector<32x512xf32>
    %cst_32 = arith.constant dense<0.000000e+00> : vector<32x16xf32>
    %60 = tpu.matmul %59, %51, %cst_32 {dimension_numbers = #tpu.dot_dimension_numbers<[1], [0], [0], [1], [0, 0, 1, 1], [], []>} : vector<32x512xf32>, vector<512x16xf32>, vector<32x16xf32> -> vector<32x16xf32>
    %c3 = arith.constant 3 : index
    %c0_33 = arith.constant 0 : index
    %c0_34 = arith.constant 0 : index
    %61 = vector.load %arg2[%c3, %c0_33, %c0_34] : memref<8x32x512xf32, #tpu.memory_space<vmem>>, vector<1x32x512xf32>
    %62 = vector.shape_cast %61 : vector<1x32x512xf32> to vector<32x512xf32>
    %cst_35 = arith.constant dense<0.000000e+00> : vector<32x16xf32>
    %63 = tpu.matmul %62, %51, %cst_35 {dimension_numbers = #tpu.dot_dimension_numbers<[1], [0], [0], [1], [0, 0, 1, 1], [], []>} : vector<32x512xf32>, vector<512x16xf32>, vector<32x16xf32> -> vector<32x16xf32>
    %c4 = arith.constant 4 : index
    %c0_36 = arith.constant 0 : index
    %c0_37 = arith.constant 0 : index
    %64 = vector.load %arg2[%c4, %c0_36, %c0_37] : memref<8x32x512xf32, #tpu.memory_space<vmem>>, vector<1x32x512xf32>
    %65 = vector.shape_cast %64 : vector<1x32x512xf32> to vector<32x512xf32>
    %cst_38 = arith.constant dense<0.000000e+00> : vector<32x16xf32>
    %66 = tpu.matmul %65, %51, %cst_38 {dimension_numbers = #tpu.dot_dimension_numbers<[1], [0], [0], [1], [0, 0, 1, 1], [], []>} : vector<32x512xf32>, vector<512x16xf32>, vector<32x16xf32> -> vector<32x16xf32>
    %c5 = arith.constant 5 : index
    %c0_39 = arith.constant 0 : index
    %c0_40 = arith.constant 0 : index
    %67 = vector.load %arg2[%c5, %c0_39, %c0_40] : memref<8x32x512xf32, #tpu.memory_space<vmem>>, vector<1x32x512xf32>
    %68 = vector.shape_cast %67 : vector<1x32x512xf32> to vector<32x512xf32>
    %cst_41 = arith.constant dense<0.000000e+00> : vector<32x16xf32>
    %69 = tpu.matmul %68, %51, %cst_41 {dimension_numbers = #tpu.dot_dimension_numbers<[1], [0], [0], [1], [0, 0, 1, 1], [], []>} : vector<32x512xf32>, vector<512x16xf32>, vector<32x16xf32> -> vector<32x16xf32>
    %c6 = arith.constant 6 : index
    %c0_42 = arith.constant 0 : index
    %c0_43 = arith.constant 0 : index
    %70 = vector.load %arg2[%c6, %c0_42, %c0_43] : memref<8x32x512xf32, #tpu.memory_space<vmem>>, vector<1x32x512xf32>
    %71 = vector.shape_cast %70 : vector<1x32x512xf32> to vector<32x512xf32>
    %cst_44 = arith.constant dense<0.000000e+00> : vector<32x16xf32>
    %72 = tpu.matmul %71, %51, %cst_44 {dimension_numbers = #tpu.dot_dimension_numbers<[1], [0], [0], [1], [0, 0, 1, 1], [], []>} : vector<32x512xf32>, vector<512x16xf32>, vector<32x16xf32> -> vector<32x16xf32>
    %c7 = arith.constant 7 : index
    %c0_45 = arith.constant 0 : index
    %c0_46 = arith.constant 0 : index
    %73 = vector.load %arg2[%c7, %c0_45, %c0_46] : memref<8x32x512xf32, #tpu.memory_space<vmem>>, vector<1x32x512xf32>
    %74 = vector.shape_cast %73 : vector<1x32x512xf32> to vector<32x512xf32>
    %cst_47 = arith.constant dense<0.000000e+00> : vector<32x16xf32>
    %75 = tpu.matmul %74, %51, %cst_47 {dimension_numbers = #tpu.dot_dimension_numbers<[1], [0], [0], [1], [0, 0, 1, 1], [], []>} : vector<32x512xf32>, vector<512x16xf32>, vector<32x16xf32> -> vector<32x16xf32>
    %76 = tpu.concatenate %54, %57, %60, %63, %66, %69, %72, %75 in 1 : vector<32x16xf32>, vector<32x16xf32>, vector<32x16xf32>, vector<32x16xf32>, vector<32x16xf32>, vector<32x16xf32>, vector<32x16xf32>, vector<32x16xf32> -> vector<32x128xf32>
    %c0_48 = arith.constant 0 : index
    %c0_49 = arith.constant 0 : index
    %77 = vector.load %arg3[%c0_48, %c0_49] : memref<32x1xf32, #tpu.memory_space<vmem>>, vector<32x1xf32>
    %78 = vector.broadcast %77 : vector<32x1xf32> to vector<32x128xf32>
    %79 = arith.addf %76, %78 : vector<32x128xf32>
    %cst_50 = arith.constant 0.000000e+00 : f32
    %80 = vector.broadcast %cst_50 : f32 to vector<32x128xf32>
    %81 = arith.maximumf %79, %80 : vector<32x128xf32>
    %c0_51 = arith.constant 0 : index
    %c0_52 = arith.constant 0 : index
    %82 = vector.load %arg7[%c0_51, %c0_52] : memref<6x128xf32, #tpu.memory_space<vmem>>, vector<1x128xf32>
    %83 = vector.shape_cast %82 : vector<1x128xf32> to vector<1x128xf32>
    %84 = vector.broadcast %83 : vector<1x128xf32> to vector<32x128xf32>
    %cst_53 = arith.constant 5.000000e-01 : f32
    %85 = vector.broadcast %cst_53 : f32 to vector<32x128xf32>
    %86 = arith.cmpf ogt, %84, %85 : vector<32x128xf32>
    %c1_54 = arith.constant 1 : index
    %c0_55 = arith.constant 0 : index
    %87 = vector.load %arg7[%c1_54, %c0_55] : memref<6x128xf32, #tpu.memory_space<vmem>>, vector<1x128xf32>
    %88 = vector.shape_cast %87 : vector<1x128xf32> to vector<1x128xf32>
    %89 = vector.broadcast %88 : vector<1x128xf32> to vector<32x128xf32>
    %cst_56 = arith.constant 5.000000e-01 : f32
    %90 = vector.broadcast %cst_56 : f32 to vector<32x128xf32>
    %91 = arith.cmpf ogt, %89, %90 : vector<32x128xf32>
    %c2_57 = arith.constant 2 : index
    %c0_58 = arith.constant 0 : index
    %92 = vector.load %arg7[%c2_57, %c0_58] : memref<6x128xf32, #tpu.memory_space<vmem>>, vector<1x128xf32>
    %93 = vector.shape_cast %92 : vector<1x128xf32> to vector<1x128xf32>
    %94 = vector.broadcast %93 : vector<1x128xf32> to vector<32x128xf32>
    %cst_59 = arith.constant 5.000000e-01 : f32
    %95 = vector.broadcast %cst_59 : f32 to vector<32x128xf32>
    %96 = arith.cmpf ogt, %94, %95 : vector<32x128xf32>
    %c3_60 = arith.constant 3 : index
    %c0_61 = arith.constant 0 : index
    %97 = vector.load %arg7[%c3_60, %c0_61] : memref<6x128xf32, #tpu.memory_space<vmem>>, vector<1x128xf32>
    %98 = vector.shape_cast %97 : vector<1x128xf32> to vector<1x128xf32>
    %99 = vector.broadcast %98 : vector<1x128xf32> to vector<32x128xf32>
    %cst_62 = arith.constant 5.000000e-01 : f32
    %100 = vector.broadcast %cst_62 : f32 to vector<32x128xf32>
    %101 = arith.cmpf ogt, %99, %100 : vector<32x128xf32>
    %c4_63 = arith.constant 4 : index
    %c0_64 = arith.constant 0 : index
    %102 = vector.load %arg7[%c4_63, %c0_64] : memref<6x128xf32, #tpu.memory_space<vmem>>, vector<1x128xf32>
    %103 = vector.shape_cast %102 : vector<1x128xf32> to vector<1x128xf32>
    %104 = vector.broadcast %103 : vector<1x128xf32> to vector<32x128xf32>
    %cst_65 = arith.constant 5.000000e-01 : f32
    %105 = vector.broadcast %cst_65 : f32 to vector<32x128xf32>
    %106 = arith.cmpf ogt, %104, %105 : vector<32x128xf32>
    %c5_66 = arith.constant 5 : index
    %c0_67 = arith.constant 0 : index
    %107 = vector.load %arg7[%c5_66, %c0_67] : memref<6x128xf32, #tpu.memory_space<vmem>>, vector<1x128xf32>
    %108 = vector.shape_cast %107 : vector<1x128xf32> to vector<1x128xf32>
    %109 = vector.broadcast %108 : vector<1x128xf32> to vector<32x128xf32>
    %cst_68 = arith.constant 5.000000e-01 : f32
    %110 = vector.broadcast %cst_68 : f32 to vector<32x128xf32>
    %111 = arith.cmpf ogt, %109, %110 : vector<32x128xf32>
    %cst_69 = arith.constant 0.000000e+00 : f32
    %112 = vector.broadcast %cst_69 : f32 to vector<32x128xf32>
    %c64_i32 = arith.constant 64 : i32
    %113 = tpu.dynamic_rotate %81 by %c64_i32 dim 1 : vector<32x128xf32>, i32 -> vector<32x128xf32>
    %114 = arith.select %86, %113, %112 : vector<32x128xi1>, vector<32x128xf32>
    %c60_i32 = arith.constant 60 : i32
    %115 = tpu.dynamic_rotate %81 by %c60_i32 dim 1 : vector<32x128xf32>, i32 -> vector<32x128xf32>
    %116 = arith.select %91, %115, %114 : vector<32x128xi1>, vector<32x128xf32>
    %cst_70 = arith.constant 0.000000e+00 : f32
    %117 = vector.broadcast %cst_70 : f32 to vector<32x128xf32>
    %c96_i32 = arith.constant 96 : i32
    %118 = tpu.dynamic_rotate %81 by %c96_i32 dim 1 : vector<32x128xf32>, i32 -> vector<32x128xf32>
    %119 = arith.select %96, %118, %117 : vector<32x128xi1>, vector<32x128xf32>
    %c30_i32 = arith.constant 30 : i32
    %120 = tpu.dynamic_rotate %81 by %c30_i32 dim 1 : vector<32x128xf32>, i32 -> vector<32x128xf32>
    %121 = arith.select %101, %120, %119 : vector<32x128xi1>, vector<32x128xf32>
    %cst_71 = arith.constant 0.000000e+00 : f32
    %122 = vector.broadcast %cst_71 : f32 to vector<32x128xf32>
    %c112_i32 = arith.constant 112 : i32
    %123 = tpu.dynamic_rotate %81 by %c112_i32 dim 1 : vector<32x128xf32>, i32 -> vector<32x128xf32>
    %124 = arith.select %106, %123, %122 : vector<32x128xi1>, vector<32x128xf32>
    %c15_i32 = arith.constant 15 : i32
    %125 = tpu.dynamic_rotate %81 by %c15_i32 dim 1 : vector<32x128xf32>, i32 -> vector<32x128xf32>
    %126 = arith.select %111, %125, %124 : vector<32x128xi1>, vector<32x128xf32>
    %cst_72 = arith.constant 0.000000e+00 : f32
    %127 = vector.broadcast %cst_72 : f32 to vector<32x128xf32>
    %c96_i32_73 = arith.constant 96 : i32
    %128 = tpu.dynamic_rotate %116 by %c96_i32_73 dim 1 : vector<32x128xf32>, i32 -> vector<32x128xf32>
    %129 = arith.select %96, %128, %127 : vector<32x128xi1>, vector<32x128xf32>
    %c30_i32_74 = arith.constant 30 : i32
    %130 = tpu.dynamic_rotate %116 by %c30_i32_74 dim 1 : vector<32x128xf32>, i32 -> vector<32x128xf32>
    %131 = arith.select %101, %130, %129 : vector<32x128xi1>, vector<32x128xf32>
    %cst_75 = arith.constant 0.000000e+00 : f32
    %132 = vector.broadcast %cst_75 : f32 to vector<32x128xf32>
    %c112_i32_76 = arith.constant 112 : i32
    %133 = tpu.dynamic_rotate %116 by %c112_i32_76 dim 1 : vector<32x128xf32>, i32 -> vector<32x128xf32>
    %134 = arith.select %106, %133, %132 : vector<32x128xi1>, vector<32x128xf32>
    %c15_i32_77 = arith.constant 15 : i32
    %135 = tpu.dynamic_rotate %116 by %c15_i32_77 dim 1 : vector<32x128xf32>, i32 -> vector<32x128xf32>
    %136 = arith.select %111, %135, %134 : vector<32x128xi1>, vector<32x128xf32>
    %cst_78 = arith.constant 0.000000e+00 : f32
    %137 = vector.broadcast %cst_78 : f32 to vector<32x128xf32>
    %c112_i32_79 = arith.constant 112 : i32
    %138 = tpu.dynamic_rotate %121 by %c112_i32_79 dim 1 : vector<32x128xf32>, i32 -> vector<32x128xf32>
    %139 = arith.select %106, %138, %137 : vector<32x128xi1>, vector<32x128xf32>
    %c15_i32_80 = arith.constant 15 : i32
    %140 = tpu.dynamic_rotate %121 by %c15_i32_80 dim 1 : vector<32x128xf32>, i32 -> vector<32x128xf32>
    %141 = arith.select %111, %140, %139 : vector<32x128xi1>, vector<32x128xf32>
    %cst_81 = arith.constant 0.000000e+00 : f32
    %142 = vector.broadcast %cst_81 : f32 to vector<32x128xf32>
    %c112_i32_82 = arith.constant 112 : i32
    %143 = tpu.dynamic_rotate %131 by %c112_i32_82 dim 1 : vector<32x128xf32>, i32 -> vector<32x128xf32>
    %144 = arith.select %106, %143, %142 : vector<32x128xi1>, vector<32x128xf32>
    %c15_i32_83 = arith.constant 15 : i32
    %145 = tpu.dynamic_rotate %131 by %c15_i32_83 dim 1 : vector<32x128xf32>, i32 -> vector<32x128xf32>
    %146 = arith.select %111, %145, %144 : vector<32x128xi1>, vector<32x128xf32>
    %147 = tpu.concatenate %81, %126, %121, %141, %116, %136, %131, %146 in 0 : vector<32x128xf32>, vector<32x128xf32>, vector<32x128xf32>, vector<32x128xf32>, vector<32x128xf32>, vector<32x128xf32>, vector<32x128xf32>, vector<32x128xf32> -> vector<256x128xf32>
    %c0_84 = arith.constant 0 : index
    %c0_85 = arith.constant 0 : index
    %c0_86 = arith.constant 0 : index
    %148 = vector.load %arg5[%c0_84, %c0_85, %c0_86] : memref<8x16x256xf32, #tpu.memory_space<vmem>>, vector<1x16x256xf32>
    %149 = vector.shape_cast %148 : vector<1x16x256xf32> to vector<16x256xf32>
    %cst_87 = arith.constant dense<0.000000e+00> : vector<16x128xf32>
    %150 = tpu.matmul %149, %147, %cst_87 {dimension_numbers = #tpu.dot_dimension_numbers<[1], [0], [0], [1], [0, 0, 1, 1], [], []>} : vector<16x256xf32>, vector<256x128xf32>, vector<16x128xf32> -> vector<16x128xf32>
    %c1_88 = arith.constant 1 : index
    %c0_89 = arith.constant 0 : index
    %c0_90 = arith.constant 0 : index
    %151 = vector.load %arg5[%c1_88, %c0_89, %c0_90] : memref<8x16x256xf32, #tpu.memory_space<vmem>>, vector<1x16x256xf32>
    %152 = vector.shape_cast %151 : vector<1x16x256xf32> to vector<16x256xf32>
    %cst_91 = arith.constant dense<0.000000e+00> : vector<16x128xf32>
    %153 = tpu.matmul %152, %147, %cst_91 {dimension_numbers = #tpu.dot_dimension_numbers<[1], [0], [0], [1], [0, 0, 1, 1], [], []>} : vector<16x256xf32>, vector<256x128xf32>, vector<16x128xf32> -> vector<16x128xf32>
    %c2_92 = arith.constant 2 : index
    %c0_93 = arith.constant 0 : index
    %c0_94 = arith.constant 0 : index
    %154 = vector.load %arg5[%c2_92, %c0_93, %c0_94] : memref<8x16x256xf32, #tpu.memory_space<vmem>>, vector<1x16x256xf32>
    %155 = vector.shape_cast %154 : vector<1x16x256xf32> to vector<16x256xf32>
    %cst_95 = arith.constant dense<0.000000e+00> : vector<16x128xf32>
    %156 = tpu.matmul %155, %147, %cst_95 {dimension_numbers = #tpu.dot_dimension_numbers<[1], [0], [0], [1], [0, 0, 1, 1], [], []>} : vector<16x256xf32>, vector<256x128xf32>, vector<16x128xf32> -> vector<16x128xf32>
    %c3_96 = arith.constant 3 : index
    %c0_97 = arith.constant 0 : index
    %c0_98 = arith.constant 0 : index
    %157 = vector.load %arg5[%c3_96, %c0_97, %c0_98] : memref<8x16x256xf32, #tpu.memory_space<vmem>>, vector<1x16x256xf32>
    %158 = vector.shape_cast %157 : vector<1x16x256xf32> to vector<16x256xf32>
    %cst_99 = arith.constant dense<0.000000e+00> : vector<16x128xf32>
    %159 = tpu.matmul %158, %147, %cst_99 {dimension_numbers = #tpu.dot_dimension_numbers<[1], [0], [0], [1], [0, 0, 1, 1], [], []>} : vector<16x256xf32>, vector<256x128xf32>, vector<16x128xf32> -> vector<16x128xf32>
    %c4_100 = arith.constant 4 : index
    %c0_101 = arith.constant 0 : index
    %c0_102 = arith.constant 0 : index
    %160 = vector.load %arg5[%c4_100, %c0_101, %c0_102] : memref<8x16x256xf32, #tpu.memory_space<vmem>>, vector<1x16x256xf32>
    %161 = vector.shape_cast %160 : vector<1x16x256xf32> to vector<16x256xf32>
    %cst_103 = arith.constant dense<0.000000e+00> : vector<16x128xf32>
    %162 = tpu.matmul %161, %147, %cst_103 {dimension_numbers = #tpu.dot_dimension_numbers<[1], [0], [0], [1], [0, 0, 1, 1], [], []>} : vector<16x256xf32>, vector<256x128xf32>, vector<16x128xf32> -> vector<16x128xf32>
    %c5_104 = arith.constant 5 : index
    %c0_105 = arith.constant 0 : index
    %c0_106 = arith.constant 0 : index
    %163 = vector.load %arg5[%c5_104, %c0_105, %c0_106] : memref<8x16x256xf32, #tpu.memory_space<vmem>>, vector<1x16x256xf32>
    %164 = vector.shape_cast %163 : vector<1x16x256xf32> to vector<16x256xf32>
    %cst_107 = arith.constant dense<0.000000e+00> : vector<16x128xf32>
    %165 = tpu.matmul %164, %147, %cst_107 {dimension_numbers = #tpu.dot_dimension_numbers<[1], [0], [0], [1], [0, 0, 1, 1], [], []>} : vector<16x256xf32>, vector<256x128xf32>, vector<16x128xf32> -> vector<16x128xf32>
    %c6_108 = arith.constant 6 : index
    %c0_109 = arith.constant 0 : index
    %c0_110 = arith.constant 0 : index
    %166 = vector.load %arg5[%c6_108, %c0_109, %c0_110] : memref<8x16x256xf32, #tpu.memory_space<vmem>>, vector<1x16x256xf32>
    %167 = vector.shape_cast %166 : vector<1x16x256xf32> to vector<16x256xf32>
    %cst_111 = arith.constant dense<0.000000e+00> : vector<16x128xf32>
    %168 = tpu.matmul %167, %147, %cst_111 {dimension_numbers = #tpu.dot_dimension_numbers<[1], [0], [0], [1], [0, 0, 1, 1], [], []>} : vector<16x256xf32>, vector<256x128xf32>, vector<16x128xf32> -> vector<16x128xf32>
    %c7_112 = arith.constant 7 : index
    %c0_113 = arith.constant 0 : index
    %c0_114 = arith.constant 0 : index
    %169 = vector.load %arg5[%c7_112, %c0_113, %c0_114] : memref<8x16x256xf32, #tpu.memory_space<vmem>>, vector<1x16x256xf32>
    %170 = vector.shape_cast %169 : vector<1x16x256xf32> to vector<16x256xf32>
    %cst_115 = arith.constant dense<0.000000e+00> : vector<16x128xf32>
    %171 = tpu.matmul %170, %147, %cst_115 {dimension_numbers = #tpu.dot_dimension_numbers<[1], [0], [0], [1], [0, 0, 1, 1], [], []>} : vector<16x256xf32>, vector<256x128xf32>, vector<16x128xf32> -> vector<16x128xf32>
    %172 = tpu.concatenate %150, %153, %156, %159, %162, %165, %168, %171 in 1 : vector<16x128xf32>, vector<16x128xf32>, vector<16x128xf32>, vector<16x128xf32>, vector<16x128xf32>, vector<16x128xf32>, vector<16x128xf32>, vector<16x128xf32> -> vector<16x1024xf32>
    %c0_116 = arith.constant 0 : index
    %c0_117 = arith.constant 0 : index
    %173 = vector.load %arg6[%c0_116, %c0_117] : memref<16x1xf32, #tpu.memory_space<vmem>>, vector<16x1xf32>
    %174 = vector.broadcast %173 : vector<16x1xf32> to vector<16x1024xf32>
    %175 = arith.addf %172, %174 : vector<16x1024xf32>
    %cst_118 = arith.constant 0.000000e+00 : f32
    %176 = vector.broadcast %cst_118 : f32 to vector<16x1024xf32>
    %177 = arith.maximumf %175, %176 : vector<16x1024xf32>
    %c0_119 = arith.constant 0 : index
    %c0_120 = arith.constant 0 : index
    %178 = vector.load %arg10[%c0_119, %c0_120] : memref<9x1024xf32, #tpu.memory_space<vmem>>, vector<1x1024xf32>
    %179 = vector.shape_cast %178 : vector<1x1024xf32> to vector<1x1024xf32>
    %180 = vector.broadcast %179 : vector<1x1024xf32> to vector<16x1024xf32>
    %cst_121 = arith.constant 5.000000e-01 : f32
    %181 = vector.broadcast %cst_121 : f32 to vector<16x1024xf32>
    %182 = arith.cmpf ogt, %180, %181 : vector<16x1024xf32>
    %c1_122 = arith.constant 1 : index
    %c0_123 = arith.constant 0 : index
    %183 = vector.load %arg10[%c1_122, %c0_123] : memref<9x1024xf32, #tpu.memory_space<vmem>>, vector<1x1024xf32>
    %184 = vector.shape_cast %183 : vector<1x1024xf32> to vector<1x1024xf32>
    %185 = vector.broadcast %184 : vector<1x1024xf32> to vector<16x1024xf32>
    %cst_124 = arith.constant 5.000000e-01 : f32
    %186 = vector.broadcast %cst_124 : f32 to vector<16x1024xf32>
    %187 = arith.cmpf ogt, %185, %186 : vector<16x1024xf32>
    %c2_125 = arith.constant 2 : index
    %c0_126 = arith.constant 0 : index
    %188 = vector.load %arg10[%c2_125, %c0_126] : memref<9x1024xf32, #tpu.memory_space<vmem>>, vector<1x1024xf32>
    %189 = vector.shape_cast %188 : vector<1x1024xf32> to vector<1x1024xf32>
    %190 = vector.broadcast %189 : vector<1x1024xf32> to vector<16x1024xf32>
    %cst_127 = arith.constant 5.000000e-01 : f32
    %191 = vector.broadcast %cst_127 : f32 to vector<16x1024xf32>
    %192 = arith.cmpf ogt, %190, %191 : vector<16x1024xf32>
    %c3_128 = arith.constant 3 : index
    %c0_129 = arith.constant 0 : index
    %193 = vector.load %arg10[%c3_128, %c0_129] : memref<9x1024xf32, #tpu.memory_space<vmem>>, vector<1x1024xf32>
    %194 = vector.shape_cast %193 : vector<1x1024xf32> to vector<1x1024xf32>
    %195 = vector.broadcast %194 : vector<1x1024xf32> to vector<16x1024xf32>
    %cst_130 = arith.constant 5.000000e-01 : f32
    %196 = vector.broadcast %cst_130 : f32 to vector<16x1024xf32>
    %197 = arith.cmpf ogt, %195, %196 : vector<16x1024xf32>
    %c4_131 = arith.constant 4 : index
    %c0_132 = arith.constant 0 : index
    %198 = vector.load %arg10[%c4_131, %c0_132] : memref<9x1024xf32, #tpu.memory_space<vmem>>, vector<1x1024xf32>
    %199 = vector.shape_cast %198 : vector<1x1024xf32> to vector<1x1024xf32>
    %200 = vector.broadcast %199 : vector<1x1024xf32> to vector<16x1024xf32>
    %cst_133 = arith.constant 5.000000e-01 : f32
    %201 = vector.broadcast %cst_133 : f32 to vector<16x1024xf32>
    %202 = arith.cmpf ogt, %200, %201 : vector<16x1024xf32>
    %c5_134 = arith.constant 5 : index
    %c0_135 = arith.constant 0 : index
    %203 = vector.load %arg10[%c5_134, %c0_135] : memref<9x1024xf32, #tpu.memory_space<vmem>>, vector<1x1024xf32>
    %204 = vector.shape_cast %203 : vector<1x1024xf32> to vector<1x1024xf32>
    %205 = vector.broadcast %204 : vector<1x1024xf32> to vector<16x1024xf32>
    %cst_136 = arith.constant 5.000000e-01 : f32
    %206 = vector.broadcast %cst_136 : f32 to vector<16x1024xf32>
    %207 = arith.cmpf ogt, %205, %206 : vector<16x1024xf32>
    %c6_137 = arith.constant 6 : index
    %c0_138 = arith.constant 0 : index
    %208 = vector.load %arg10[%c6_137, %c0_138] : memref<9x1024xf32, #tpu.memory_space<vmem>>, vector<1x1024xf32>
    %209 = vector.shape_cast %208 : vector<1x1024xf32> to vector<1x1024xf32>
    %210 = vector.broadcast %209 : vector<1x1024xf32> to vector<16x1024xf32>
    %cst_139 = arith.constant 5.000000e-01 : f32
    %211 = vector.broadcast %cst_139 : f32 to vector<16x1024xf32>
    %212 = arith.cmpf ogt, %210, %211 : vector<16x1024xf32>
    %c7_140 = arith.constant 7 : index
    %c0_141 = arith.constant 0 : index
    %213 = vector.load %arg10[%c7_140, %c0_141] : memref<9x1024xf32, #tpu.memory_space<vmem>>, vector<1x1024xf32>
    %214 = vector.shape_cast %213 : vector<1x1024xf32> to vector<1x1024xf32>
    %215 = vector.broadcast %214 : vector<1x1024xf32> to vector<16x1024xf32>
    %cst_142 = arith.constant 5.000000e-01 : f32
    %216 = vector.broadcast %cst_142 : f32 to vector<16x1024xf32>
    %217 = arith.cmpf ogt, %215, %216 : vector<16x1024xf32>
    %c8 = arith.constant 8 : index
    %c0_143 = arith.constant 0 : index
    %218 = vector.load %arg10[%c8, %c0_143] : memref<9x1024xf32, #tpu.memory_space<vmem>>, vector<1x1024xf32>
    %219 = vector.shape_cast %218 : vector<1x1024xf32> to vector<1x1024xf32>
    %220 = vector.broadcast %219 : vector<1x1024xf32> to vector<16x1024xf32>
    %cst_144 = arith.constant 5.000000e-01 : f32
    %221 = vector.broadcast %cst_144 : f32 to vector<16x1024xf32>
    %222 = arith.cmpf ogt, %220, %221 : vector<16x1024xf32>
    %cst_145 = arith.constant 0.000000e+00 : f32
    %223 = vector.broadcast %cst_145 : f32 to vector<16x1024xf32>
    %c512_i32 = arith.constant 512 : i32
    %224 = tpu.dynamic_rotate %177 by %c512_i32 dim 1 : vector<16x1024xf32>, i32 -> vector<16x1024xf32>
    %225 = arith.select %182, %224, %223 : vector<16x1024xi1>, vector<16x1024xf32>
    %c448_i32 = arith.constant 448 : i32
    %226 = tpu.dynamic_rotate %177 by %c448_i32 dim 1 : vector<16x1024xf32>, i32 -> vector<16x1024xf32>
    %227 = arith.select %187, %226, %225 : vector<16x1024xi1>, vector<16x1024xf32>
    %c572_i32 = arith.constant 572 : i32
    %228 = tpu.dynamic_rotate %177 by %c572_i32 dim 1 : vector<16x1024xf32>, i32 -> vector<16x1024xf32>
    %229 = arith.select %192, %228, %227 : vector<16x1024xi1>, vector<16x1024xf32>
    %cst_146 = arith.constant 0.000000e+00 : f32
    %230 = vector.broadcast %cst_146 : f32 to vector<16x1024xf32>
    %c768_i32 = arith.constant 768 : i32
    %231 = tpu.dynamic_rotate %177 by %c768_i32 dim 1 : vector<16x1024xf32>, i32 -> vector<16x1024xf32>
    %232 = arith.select %197, %231, %230 : vector<16x1024xi1>, vector<16x1024xf32>
    %c224_i32 = arith.constant 224 : i32
    %233 = tpu.dynamic_rotate %177 by %c224_i32 dim 1 : vector<16x1024xf32>, i32 -> vector<16x1024xf32>
    %234 = arith.select %202, %233, %232 : vector<16x1024xi1>, vector<16x1024xf32>
    %c286_i32 = arith.constant 286 : i32
    %235 = tpu.dynamic_rotate %177 by %c286_i32 dim 1 : vector<16x1024xf32>, i32 -> vector<16x1024xf32>
    %236 = arith.select %207, %235, %234 : vector<16x1024xi1>, vector<16x1024xf32>
    %cst_147 = arith.constant 0.000000e+00 : f32
    %237 = vector.broadcast %cst_147 : f32 to vector<16x1024xf32>
    %c896_i32 = arith.constant 896 : i32
    %238 = tpu.dynamic_rotate %177 by %c896_i32 dim 1 : vector<16x1024xf32>, i32 -> vector<16x1024xf32>
    %239 = arith.select %212, %238, %237 : vector<16x1024xi1>, vector<16x1024xf32>
    %c112_i32_148 = arith.constant 112 : i32
    %240 = tpu.dynamic_rotate %177 by %c112_i32_148 dim 1 : vector<16x1024xf32>, i32 -> vector<16x1024xf32>
    %241 = arith.select %217, %240, %239 : vector<16x1024xi1>, vector<16x1024xf32>
    %c143_i32 = arith.constant 143 : i32
    %242 = tpu.dynamic_rotate %177 by %c143_i32 dim 1 : vector<16x1024xf32>, i32 -> vector<16x1024xf32>
    %243 = arith.select %222, %242, %241 : vector<16x1024xi1>, vector<16x1024xf32>
    %cst_149 = arith.constant 0.000000e+00 : f32
    %244 = vector.broadcast %cst_149 : f32 to vector<16x1024xf32>
    %c768_i32_150 = arith.constant 768 : i32
    %245 = tpu.dynamic_rotate %229 by %c768_i32_150 dim 1 : vector<16x1024xf32>, i32 -> vector<16x1024xf32>
    %246 = arith.select %197, %245, %244 : vector<16x1024xi1>, vector<16x1024xf32>
    %c224_i32_151 = arith.constant 224 : i32
    %247 = tpu.dynamic_rotate %229 by %c224_i32_151 dim 1 : vector<16x1024xf32>, i32 -> vector<16x1024xf32>
    %248 = arith.select %202, %247, %246 : vector<16x1024xi1>, vector<16x1024xf32>
    %c286_i32_152 = arith.constant 286 : i32
    %249 = tpu.dynamic_rotate %229 by %c286_i32_152 dim 1 : vector<16x1024xf32>, i32 -> vector<16x1024xf32>
    %250 = arith.select %207, %249, %248 : vector<16x1024xi1>, vector<16x1024xf32>
    %cst_153 = arith.constant 0.000000e+00 : f32
    %251 = vector.broadcast %cst_153 : f32 to vector<16x1024xf32>
    %c896_i32_154 = arith.constant 896 : i32
    %252 = tpu.dynamic_rotate %229 by %c896_i32_154 dim 1 : vector<16x1024xf32>, i32 -> vector<16x1024xf32>
    %253 = arith.select %212, %252, %251 : vector<16x1024xi1>, vector<16x1024xf32>
    %c112_i32_155 = arith.constant 112 : i32
    %254 = tpu.dynamic_rotate %229 by %c112_i32_155 dim 1 : vector<16x1024xf32>, i32 -> vector<16x1024xf32>
    %255 = arith.select %217, %254, %253 : vector<16x1024xi1>, vector<16x1024xf32>
    %c143_i32_156 = arith.constant 143 : i32
    %256 = tpu.dynamic_rotate %229 by %c143_i32_156 dim 1 : vector<16x1024xf32>, i32 -> vector<16x1024xf32>
    %257 = arith.select %222, %256, %255 : vector<16x1024xi1>, vector<16x1024xf32>
    %cst_157 = arith.constant 0.000000e+00 : f32
    %258 = vector.broadcast %cst_157 : f32 to vector<16x1024xf32>
    %c896_i32_158 = arith.constant 896 : i32
    %259 = tpu.dynamic_rotate %236 by %c896_i32_158 dim 1 : vector<16x1024xf32>, i32 -> vector<16x1024xf32>
    %260 = arith.select %212, %259, %258 : vector<16x1024xi1>, vector<16x1024xf32>
    %c112_i32_159 = arith.constant 112 : i32
    %261 = tpu.dynamic_rotate %236 by %c112_i32_159 dim 1 : vector<16x1024xf32>, i32 -> vector<16x1024xf32>
    %262 = arith.select %217, %261, %260 : vector<16x1024xi1>, vector<16x1024xf32>
    %c143_i32_160 = arith.constant 143 : i32
    %263 = tpu.dynamic_rotate %236 by %c143_i32_160 dim 1 : vector<16x1024xf32>, i32 -> vector<16x1024xf32>
    %264 = arith.select %222, %263, %262 : vector<16x1024xi1>, vector<16x1024xf32>
    %cst_161 = arith.constant 0.000000e+00 : f32
    %265 = vector.broadcast %cst_161 : f32 to vector<16x1024xf32>
    %c896_i32_162 = arith.constant 896 : i32
    %266 = tpu.dynamic_rotate %250 by %c896_i32_162 dim 1 : vector<16x1024xf32>, i32 -> vector<16x1024xf32>
    %267 = arith.select %212, %266, %265 : vector<16x1024xi1>, vector<16x1024xf32>
    %c112_i32_163 = arith.constant 112 : i32
    %268 = tpu.dynamic_rotate %250 by %c112_i32_163 dim 1 : vector<16x1024xf32>, i32 -> vector<16x1024xf32>
    %269 = arith.select %217, %268, %267 : vector<16x1024xi1>, vector<16x1024xf32>
    %c143_i32_164 = arith.constant 143 : i32
    %270 = tpu.dynamic_rotate %250 by %c143_i32_164 dim 1 : vector<16x1024xf32>, i32 -> vector<16x1024xf32>
    %271 = arith.select %222, %270, %269 : vector<16x1024xi1>, vector<16x1024xf32>
    %272 = tpu.concatenate %177, %243, %236, %264, %229, %257, %250, %271 in 0 : vector<16x1024xf32>, vector<16x1024xf32>, vector<16x1024xf32>, vector<16x1024xf32>, vector<16x1024xf32>, vector<16x1024xf32>, vector<16x1024xf32>, vector<16x1024xf32> -> vector<128x1024xf32>
    %c0_165 = arith.constant 0 : index
    %c0_166 = arith.constant 0 : index
    %c0_167 = arith.constant 0 : index
    %273 = vector.load %arg8[%c0_165, %c0_166, %c0_167] : memref<8x1x128xf32, #tpu.memory_space<vmem>>, vector<1x1x128xf32>
    %274 = vector.shape_cast %273 : vector<1x1x128xf32> to vector<1x128xf32>
    %cst_168 = arith.constant dense<0.000000e+00> : vector<1x1024xf32>
    %275 = tpu.matmul %274, %272, %cst_168 {dimension_numbers = #tpu.dot_dimension_numbers<[1], [0], [0], [1], [0, 0, 1, 1], [], []>} : vector<1x128xf32>, vector<128x1024xf32>, vector<1x1024xf32> -> vector<1x1024xf32>
    %c1_169 = arith.constant 1 : index
    %c0_170 = arith.constant 0 : index
    %c0_171 = arith.constant 0 : index
    %276 = vector.load %arg8[%c1_169, %c0_170, %c0_171] : memref<8x1x128xf32, #tpu.memory_space<vmem>>, vector<1x1x128xf32>
    %277 = vector.shape_cast %276 : vector<1x1x128xf32> to vector<1x128xf32>
    %cst_172 = arith.constant dense<0.000000e+00> : vector<1x1024xf32>
    %278 = tpu.matmul %277, %272, %cst_172 {dimension_numbers = #tpu.dot_dimension_numbers<[1], [0], [0], [1], [0, 0, 1, 1], [], []>} : vector<1x128xf32>, vector<128x1024xf32>, vector<1x1024xf32> -> vector<1x1024xf32>
    %c2_173 = arith.constant 2 : index
    %c0_174 = arith.constant 0 : index
    %c0_175 = arith.constant 0 : index
    %279 = vector.load %arg8[%c2_173, %c0_174, %c0_175] : memref<8x1x128xf32, #tpu.memory_space<vmem>>, vector<1x1x128xf32>
    %280 = vector.shape_cast %279 : vector<1x1x128xf32> to vector<1x128xf32>
    %cst_176 = arith.constant dense<0.000000e+00> : vector<1x1024xf32>
    %281 = tpu.matmul %280, %272, %cst_176 {dimension_numbers = #tpu.dot_dimension_numbers<[1], [0], [0], [1], [0, 0, 1, 1], [], []>} : vector<1x128xf32>, vector<128x1024xf32>, vector<1x1024xf32> -> vector<1x1024xf32>
    %c3_177 = arith.constant 3 : index
    %c0_178 = arith.constant 0 : index
    %c0_179 = arith.constant 0 : index
    %282 = vector.load %arg8[%c3_177, %c0_178, %c0_179] : memref<8x1x128xf32, #tpu.memory_space<vmem>>, vector<1x1x128xf32>
    %283 = vector.shape_cast %282 : vector<1x1x128xf32> to vector<1x128xf32>
    %cst_180 = arith.constant dense<0.000000e+00> : vector<1x1024xf32>
    %284 = tpu.matmul %283, %272, %cst_180 {dimension_numbers = #tpu.dot_dimension_numbers<[1], [0], [0], [1], [0, 0, 1, 1], [], []>} : vector<1x128xf32>, vector<128x1024xf32>, vector<1x1024xf32> -> vector<1x1024xf32>
    %c4_181 = arith.constant 4 : index
    %c0_182 = arith.constant 0 : index
    %c0_183 = arith.constant 0 : index
    %285 = vector.load %arg8[%c4_181, %c0_182, %c0_183] : memref<8x1x128xf32, #tpu.memory_space<vmem>>, vector<1x1x128xf32>
    %286 = vector.shape_cast %285 : vector<1x1x128xf32> to vector<1x128xf32>
    %cst_184 = arith.constant dense<0.000000e+00> : vector<1x1024xf32>
    %287 = tpu.matmul %286, %272, %cst_184 {dimension_numbers = #tpu.dot_dimension_numbers<[1], [0], [0], [1], [0, 0, 1, 1], [], []>} : vector<1x128xf32>, vector<128x1024xf32>, vector<1x1024xf32> -> vector<1x1024xf32>
    %c5_185 = arith.constant 5 : index
    %c0_186 = arith.constant 0 : index
    %c0_187 = arith.constant 0 : index
    %288 = vector.load %arg8[%c5_185, %c0_186, %c0_187] : memref<8x1x128xf32, #tpu.memory_space<vmem>>, vector<1x1x128xf32>
    %289 = vector.shape_cast %288 : vector<1x1x128xf32> to vector<1x128xf32>
    %cst_188 = arith.constant dense<0.000000e+00> : vector<1x1024xf32>
    %290 = tpu.matmul %289, %272, %cst_188 {dimension_numbers = #tpu.dot_dimension_numbers<[1], [0], [0], [1], [0, 0, 1, 1], [], []>} : vector<1x128xf32>, vector<128x1024xf32>, vector<1x1024xf32> -> vector<1x1024xf32>
    %c6_189 = arith.constant 6 : index
    %c0_190 = arith.constant 0 : index
    %c0_191 = arith.constant 0 : index
    %291 = vector.load %arg8[%c6_189, %c0_190, %c0_191] : memref<8x1x128xf32, #tpu.memory_space<vmem>>, vector<1x1x128xf32>
    %292 = vector.shape_cast %291 : vector<1x1x128xf32> to vector<1x128xf32>
    %cst_192 = arith.constant dense<0.000000e+00> : vector<1x1024xf32>
    %293 = tpu.matmul %292, %272, %cst_192 {dimension_numbers = #tpu.dot_dimension_numbers<[1], [0], [0], [1], [0, 0, 1, 1], [], []>} : vector<1x128xf32>, vector<128x1024xf32>, vector<1x1024xf32> -> vector<1x1024xf32>
    %c7_193 = arith.constant 7 : index
    %c0_194 = arith.constant 0 : index
    %c0_195 = arith.constant 0 : index
    %294 = vector.load %arg8[%c7_193, %c0_194, %c0_195] : memref<8x1x128xf32, #tpu.memory_space<vmem>>, vector<1x1x128xf32>
    %295 = vector.shape_cast %294 : vector<1x1x128xf32> to vector<1x128xf32>
    %cst_196 = arith.constant dense<0.000000e+00> : vector<1x1024xf32>
    %296 = tpu.matmul %295, %272, %cst_196 {dimension_numbers = #tpu.dot_dimension_numbers<[1], [0], [0], [1], [0, 0, 1, 1], [], []>} : vector<1x128xf32>, vector<128x1024xf32>, vector<1x1024xf32> -> vector<1x1024xf32>
    %297 = tpu.concatenate %275, %278, %281, %284, %287, %290, %293, %296 in 1 : vector<1x1024xf32>, vector<1x1024xf32>, vector<1x1024xf32>, vector<1x1024xf32>, vector<1x1024xf32>, vector<1x1024xf32>, vector<1x1024xf32>, vector<1x1024xf32> -> vector<1x8192xf32>
    %c0_197 = arith.constant 0 : index
    %c0_198 = arith.constant 0 : index
    %298 = vector.load %arg9[%c0_197, %c0_198] : memref<1x1xf32, #tpu.memory_space<vmem>>, vector<1x1xf32>
    %299 = vector.broadcast %298 : vector<1x1xf32> to vector<1x8192xf32>
    %300 = arith.addf %297, %299 : vector<1x8192xf32>
    %cst_199 = arith.constant 0.000000e+00 : f32
    %301 = vector.broadcast %cst_199 : f32 to vector<1x8192xf32>
    %302 = arith.subf %301, %300 : vector<1x8192xf32>
    %303 = math.exp %302 : vector<1x8192xf32>
    %cst_200 = arith.constant 1.000000e+00 : f32
    %304 = vector.broadcast %cst_200 : f32 to vector<1x8192xf32>
    %305 = arith.addf %304, %303 : vector<1x8192xf32>
    %306 = tpu.reciprocal %305 : vector<1x8192xf32> -> vector<1x8192xf32>
    %c0_201 = arith.constant 0 : index
    %c0_202 = arith.constant 0 : index
    %307 = vector.load %arg11[%c0_201, %c0_202] : memref<1x8192xf32, #tpu.memory_space<vmem>>, vector<1x8192xf32>
    tpu.vector_store %arg11[%c0_201, %c0_202], %306 {strides = array<i32>} : memref<1x8192xf32, #tpu.memory_space<vmem>>, vector<1x8192xf32>,
    return
  }
  func.func @transform_0(%arg0: i32) -> (i32, i32) {
    %c0_i32 = arith.constant 0 : i32
    %c0_i32_0 = arith.constant 0 : i32
    %c0_i32_1 = arith.constant 0 : i32
    return %c0_i32, %c0_i32_0 : i32, i32
  }
  func.func @transform_1(%arg0: i32) -> (i32, i32, i32) {
    %c0_i32 = arith.constant 0 : i32
    %c0_i32_0 = arith.constant 0 : i32
    %c0_i32_1 = arith.constant 0 : i32
    %c0_i32_2 = arith.constant 0 : i32
    return %c0_i32, %c0_i32_0, %c0_i32_1 : i32, i32, i32
  }
  func.func @transform_2(%arg0: i32) -> (i32, i32) {
    %c0_i32 = arith.constant 0 : i32
    %c0_i32_0 = arith.constant 0 : i32
    %c0_i32_1 = arith.constant 0 : i32
    return %c0_i32, %c0_i32_0 : i32, i32
  }
  func.func @transform_3(%arg0: i32) -> (i32, i32) {
    %c0_i32 = arith.constant 0 : i32
    %c0_i32_0 = arith.constant 0 : i32
    %c0_i32_1 = arith.constant 0 : i32
    return %c0_i32, %c0_i32_0 : i32, i32
  }
  func.func @transform_4(%arg0: i32) -> (i32, i32, i32) {
    %c0_i32 = arith.constant 0 : i32
    %c0_i32_0 = arith.constant 0 : i32
    %c0_i32_1 = arith.constant 0 : i32
    %c0_i32_2 = arith.constant 0 : i32
    return %c0_i32, %c0_i32_0, %c0_i32_1 : i32, i32, i32
  }
  func.func @transform_5(%arg0: i32) -> (i32, i32) {
    %c0_i32 = arith.constant 0 : i32
    %c0_i32_0 = arith.constant 0 : i32
    %c0_i32_1 = arith.constant 0 : i32
    return %c0_i32, %c0_i32_0 : i32, i32
  }
  func.func @transform_6(%arg0: i32) -> (i32, i32) {
    %c0_i32 = arith.constant 0 : i32
    %c0_i32_0 = arith.constant 0 : i32
    %c0_i32_1 = arith.constant 0 : i32
    return %c0_i32, %c0_i32_0 : i32, i32
  }
  func.func @transform_7(%arg0: i32) -> (i32, i32, i32) {
    %c0_i32 = arith.constant 0 : i32
    %c0_i32_0 = arith.constant 0 : i32
    %c0_i32_1 = arith.constant 0 : i32
    %c0_i32_2 = arith.constant 0 : i32
    return %c0_i32, %c0_i32_0, %c0_i32_1 : i32, i32, i32
  }
  func.func @transform_8(%arg0: i32) -> (i32, i32) {
    %c0_i32 = arith.constant 0 : i32
    %c0_i32_0 = arith.constant 0 : i32
    %c0_i32_1 = arith.constant 0 : i32
    return %c0_i32, %c0_i32_0 : i32, i32
  }
  func.func @transform_9(%arg0: i32) -> (i32, i32) {
    %c0_i32 = arith.constant 0 : i32
    %c0_i32_0 = arith.constant 0 : i32
    %c0_i32_1 = arith.constant 0 : i32
    return %c0_i32, %c0_i32_0 : i32, i32
  }
  func.func @transform_10(%arg0: i32) -> (i32, i32) {
    %c0_i32 = arith.constant 0 : i32
    %c0_i32_0 = arith.constant 0 : i32
    %c0_i32_1 = arith.constant 0 : i32
    return %c0_i32, %c0_i32_0 : i32, i32
  }
}

</mosaic_0001>

<bundles_post_ra>
// kernel: decoder_forward.1
= control target key start
LH: loop header
LB: loop body
LE: loop exit
PB: predicated region body
PF: predicated region fallthrough
CT: control target
= control target key end

     0   :  { %s12346_s29 = smov 124   ;;  %s12347_s30 = smov 126   ;;  %vm95_vm0 = vcmask 97280   ;;  %vm136_vm2 = vcmask 113664   ;;  %vm177_vm5 = vcmask 121856   ;;  %vm1985_vm9 = vcmask 130048   ;;  %s18557_s0 = inlined_call_operand.vmem [shape: f32[64,16], index: 0, kind: input, shape index: {}]   ;;  %s18558_s3 = inlined_call_operand.vmem [shape: f32[3,16], index: 3, kind: input, shape index: {}]   ;;  %s18559_s1 = inlined_call_operand.vmem [shape: f32[8,32,512], index: 1, kind: input, shape index: {}]   ;;  %s18560_s2 = inlined_call_operand.vmem [shape: f32[32,1], index: 2, kind: input, shape index: {}]   ;;  %s18561_s6 = inlined_call_operand.vmem [shape: f32[6,128], index: 6, kind: input, shape index: {}]   ;;  %s18562_s5 = inlined_call_operand.vmem [shape: f32[16,1], index: 5, kind: input, shape index: {}]   ;;  %s18563_s4 = inlined_call_operand.vmem [shape: f32[8,16,256], index: 4, kind: input, shape index: {}]   ;;  %s18564_s9 = inlined_call_operand.vmem [shape: f32[9,1024], index: 9, kind: input, shape index: {}]   ;;  %s18565_s8 = inlined_call_operand.<no memory space> [shape: f32[1,1], index: 8, kind: input, shape index: {}]   ;;  %s18566_s7 = inlined_call_operand.vmem [shape: f32[8,1,128], index: 7, kind: input, shape index: {}]   ;;  %s18567_s10 = inlined_call_operand.vmem [shape: f32[1,8192], index: 10, kind: output, shape index: {}]  }
   0x1   :  { %v37_v0 = vld [vmem:[%s18557_s0] sm:$0xff]  ;;  %v38_v1 = vld [vmem:[%s18557_s0 + $0x8] sm:$0xff]  ;;  %v39_v2 = vld [vmem:[%s18557_s0 + $0x10] sm:$0xff]  ;;  %s12350_s13 = smov 16   ;;  %s12352_s14 = smov 48   ;;  %vm1990_vm10 = vcmask 261120  }
   0x2   :  { %v11248_v3 = vpack.i.bf16 %v38_v1, %v37_v0  ;;  %v12426_v4 = vpack.c.bf16 %v38_v1, %v37_v0  ;;  %v40_v5 = vld [vmem:[%s18557_s0 + $0x18] sm:$0xff]  ;;  %v41_v6 = vld [vmem:[%s18557_s0 + $0x20] sm:$0xff]  ;;  %v42_v7 = vld [vmem:[%s18557_s0 + $0x28] sm:$0xff]  ;;  %s12353_s15 = smov 64   ;;  %s12354_s16 = smov 80   ;;  %vm1995_vm11 = vcmask 392192  }
   0x3   :  { %v12437_v8 = vpack.c.bf16 %v40_v5, %v39_v2  ;;  %v11258_v9 = vpack.i.bf16 %v42_v7, %v41_v6  ;;  %v12439_v10 = vpack.c.bf16 %v42_v7, %v41_v6  ;;  %v43_v11 = vld [vmem:[%s18557_s0 + $0x30] sm:$0xff]  ;;  %v44_v12 = vld [vmem:[%s18557_s0 + $0x38] sm:$0xff]  ;;  %v11253_v13 = vpack.i.bf16 %v40_v5, %v39_v2  ;;  %s12348_s0 = smov 127   ;;  %v12463_v16 = vld [vmem:[%s18558_s3] ss:$0 sm:$0xff]  ;;  %s12355_s17 = smov 96  }
   0x4   :  { %11249 = vrot.lane.b32.xlu0 %v11248_v3, %s12346_s29  ;;  %v12447_v14 = vpack.c.bf16 %v44_v12, %v43_v11  ;;  %v12449_v15 = vpack.i.bf16 %v44_v12, %v43_v11  ;;  %vm50_vm1 = vcmp.gt.f32.partialorder %v12463_v16, 0.5  ;;  %v12471_v25 = vld [vmem:[%s18558_s3 + $0x1] ss:$0 sm:$0xff]  ;;  %s12356_s18 = smov 112   ;;  %vm2000_vm12 = vcmask 523264   ;;  %s12358_s19 = smov 30  }
   0x5   :  { %11259 = vrot.lane.b32.xlu1 %v11258_v9, %s12346_s29  ;;  %vm56_vm3 = vcmp.gt.f32.partialorder %v12471_v25, 0.5  ;;  %vm12592_vm6 = vmpackc.low %vm50_vm1, %vm50_vm1  ;;  %vm2005_vm13 = vcmask 654336   ;;  %vm2010_vm14 = vcmask 785408   ;;  %vm2015_vm15 = vcmask 916480   ;;  %s12359_s20 = smov 15  }
   0x6   :  { %vm12511_vm4 = vmpackc.low %vm56_vm3, %vm56_vm3 }
   0x8   :  { %11254 = vrot.lane.b32.xlu0 %v11253_v13, %s12346_s29 }
   0x9   :  { %11264 = vrot.lane.b32.xlu1 %v12449_v15, %s12346_s29 }
   0xc   :  { %11269 = vrot.lane.b32.xlu0 %v11248_v3, %s12347_s30 }
  0x10   :  { %11274 = vrot.lane.b32.xlu0 %v11253_v13, %s12347_s30 }
  0x14   :  { %11279 = vrot.lane.b32.xlu0 %v11258_v9, %s12347_s30 }
  0x18   :  { %11284 = vrot.lane.b32.xlu0 %v12449_v15, %s12347_s30 }
  0x1c   :  { %11309 = vrot.lane.b32.xlu0 %v11248_v3, %s12348_s0 }
  0x20   :  { %11314 = vrot.lane.b32.xlu0 %v11253_v13, %s12348_s0 }
  0x24   :  { %11319 = vrot.lane.b32.xlu0 %v11258_v9, %s12348_s0 }
  0x76   :  { %v11250_v17 = vpop.permute.xlu0 %11249 }
  0x77   :  { %v11252_v18 = vunpack.i.h.bf16 %v11250_v17  ;;  %v11251_v19 = vunpack.i.l.bf16 %v11250_v17  ;;  %v11260_v20 = vpop.permute.xlu1 %11259 }
  0x78   :  { %v11262_v21 = vunpack.i.h.bf16 %v11260_v20  ;;  %v11261_v22 = vunpack.i.l.bf16 %v11260_v20 }
  0x79   :  { %v97_v23 = vsel %vm95_vm0, %v11252_v18, 0.0  ;;  %v96_v24 = vsel %vm95_vm0, %v11251_v19, 0.0 }
  0x7a   :  { %v12473_v26 = vpack.c.bf16 %v97_v23, %v96_v24  ;;  %v11255_v27 = vpop.permute.xlu0 %11254  ;;  %v104_v28 = vsel %vm50_vm1, %v96_v24, 0.0  ;;  %v105_v29 = vsel %vm50_vm1, %v97_v23, 0.0  ;;  %v101_v30 = vsel %vm95_vm0, %v11262_v21, 0.0 }
  0x7b   :  { %v11257_v31 = vunpack.i.h.bf16 %v11255_v27  ;;  %v11256_v32 = vunpack.i.l.bf16 %v11255_v27  ;;  %v12480_v33 = vpack.i.bf16 %v105_v29, %v104_v28  ;;  %v100_v34 = vsel %vm95_vm0, %v11261_v22, 0.0  ;;  %v11265_v35 = vpop.permute.xlu1 %11264 }
  0x7c   :  { %v12484_v36 = vpack.c.bf16 %v101_v30, %v100_v34  ;;  %v11267_v37 = vunpack.i.h.bf16 %v11265_v35  ;;  %v11266_v38 = vunpack.i.l.bf16 %v11265_v35  ;;  %v108_v41 = vsel %vm50_vm1, %v100_v34, 0.0 }
  0x7d   :  { %v99_v39 = vsel %vm95_vm0, %v11257_v31, 0.0  ;;  %v98_v40 = vsel %vm95_vm0, %v11256_v32, 0.0  ;;  %11289 = vrot.lane.b32.xlu1 %v12480_v33, %s12347_s30  ;;  %v109_v42 = vsel %vm50_vm1, %v101_v30, 0.0 }
  0x7e   :  { %v12494_v43 = vpack.c.bf16 %v99_v39, %v98_v40  ;;  %v11270_v44 = vpop.permute.xlu0 %11269  ;;  %v106_v45 = vsel %vm50_vm1, %v98_v40, 0.0  ;;  %v107_v46 = vsel %vm50_vm1, %v99_v39, 0.0  ;;  %v103_v47 = vsel %vm95_vm0, %v11267_v37, 0.0  ;;  %v379_v37 = vld [vmem:[%s18559_s1 + $0x8] sm:$0xff] }
  0x7f   :  { %v11272_v48 = vunpack.i.h.bf16 %v11270_v44  ;;  %v11271_v49 = vunpack.i.l.bf16 %v11270_v44  ;;  %v11293_v50 = vpack.i.bf16 %v107_v46, %v106_v45  ;;  %v102_v51 = vsel %vm95_vm0, %v11266_v38, 0.0  ;;  %458 = vmatprep.mubr.f32.mxu0 %v379_v37 }
  0x80   :  { %v12502_v52 = vpack.c.bf16 %v103_v47, %v102_v51  ;;  %v110_v53 = vsel %vm50_vm1, %v102_v51, 0.0  ;;  %v111_v54 = vsel %vm50_vm1, %v103_v47, 0.0  ;;  %v11298_v58 = vpack.i.bf16 %v109_v42, %v108_v41 }
  0x81   :  { %v138_v56 = vsel %vm136_vm2, %v11272_v48, 0.0  ;;  %v137_v57 = vsel %vm136_vm2, %v11271_v49, 0.0  ;;  %11294 = vrot.lane.b32.xlu1 %v11293_v50, %s12347_s30  ;;  %v12524_v2 = vpack.i.bf16 %v111_v54, %v110_v53 }
  0x82   :  { %v12518_v59 = vpack.c.bf16 %v138_v56, %v137_v57  ;;  %v11275_v60 = vpop.permute.xlu0 %11274  ;;  %v145_v61 = vsel %vm56_vm3, %v137_v57, 0.0  ;;  %v146_v62 = vsel %vm56_vm3, %v138_v56, 0.0 }
  0x83   :  { %v11277_v63 = vunpack.i.h.bf16 %v11275_v60  ;;  %v11276_v0 = vunpack.i.l.bf16 %v11275_v60  ;;  %v11323_v1 = vpack.i.bf16 %v146_v62, %v145_v61 }
  0x84   :  { %9218 = vmatprep.subr.msk.bf16.mxu0 %vm12511_vm4, %v12518_v59 }
  0x85   :  { %v140_v3 = vsel %vm136_vm2, %v11277_v63, 0.0  ;;  %v139_v5 = vsel %vm136_vm2, %v11276_v0, 0.0  ;;  %11324 = vrot.lane.b32.xlu0 %v11323_v1, %s12348_s0  ;;  %11299 = vrot.lane.b32.xlu1 %v11298_v58, %s12347_s30 }
  0x86   :  { %v12533_v6 = vpack.c.bf16 %v140_v3, %v139_v5  ;;  %v11280_v7 = vpop.permute.xlu0 %11279  ;;  %v147_v9 = vsel %vm56_vm3, %v139_v5, 0.0  ;;  %v148_v11 = vsel %vm56_vm3, %v140_v3, 0.0  ;;  %9220 = vmatpush3.bf16.msra.mxu0 %v12426_v4 }
  0x87   :  { %v11282_v12 = vunpack.i.h.bf16 %v11280_v7  ;;  %v11281_v13 = vunpack.i.l.bf16 %v11280_v7  ;;  %v11333_v17 = vpack.i.bf16 %v148_v11, %v147_v9 }
  0x88   :  { %9223 = vmatprep.subr.msk.bf16.mxu0 %vm12511_vm4, %v12533_v6 }
  0x89   :  { %v142_v18 = vsel %vm136_vm2, %v11282_v12, 0.0  ;;  %v141_v19 = vsel %vm136_vm2, %v11281_v13, 0.0  ;;  %11334 = vrot.lane.b32.xlu0 %v11333_v17, %s12348_s0  ;;  %11304 = vrot.lane.b32.xlu1 %v12524_v2, %s12347_s30 }
  0x8a   :  { %v12548_v20 = vpack.c.bf16 %v142_v18, %v141_v19  ;;  %v11285_v21 = vpop.permute.xlu0 %11284  ;;  %v149_v22 = vsel %vm56_vm3, %v141_v19, 0.0  ;;  %v150_v23 = vsel %vm56_vm3, %v142_v18, 0.0  ;;  %9225 = vmatpush3.bf16.msra.mxu0 %v12437_v8 }
  0x8b   :  { %v11287_v24 = vunpack.i.h.bf16 %v11285_v21  ;;  %v11286_v27 = vunpack.i.l.bf16 %v11285_v21  ;;  %v11343_v28 = vpack.i.bf16 %v150_v23, %v149_v22 }
  0x8c   :  { %9228 = vmatprep.subr.msk.bf16.mxu0 %vm12511_vm4, %v12548_v20 }
  0x8d   :  { %v144_v29 = vsel %vm136_vm2, %v11287_v24, 0.0  ;;  %v143_v30 = vsel %vm136_vm2, %v11286_v27, 0.0  ;;  %11344 = vrot.lane.b32.xlu0 %v11343_v28, %s12348_s0  ;;  %11329 = vrot.lane.b32.xlu1 %v12480_v33, %s12348_s0  ;;  %v8085_v24 = vld [vmem:[%s18559_s1 + $0x3b0] sm:$0xff] }
  0x8e   :  { %v12563_v31 = vpack.c.bf16 %v144_v29, %v143_v30  ;;  %v151_v32 = vsel %vm56_vm3, %v143_v30, 0.0  ;;  %v152_v34 = vsel %vm56_vm3, %v144_v29, 0.0  ;;  %9230 = vmatpush3.bf16.msra.mxu0 %v12439_v10  ;;  %v11310_v33 = vpop.permute.xlu0 %11309 }
  0x8f   :  { %v11353_v35 = vpack.i.bf16 %v152_v34, %v151_v32  ;;  %v11312_v39 = vunpack.i.h.bf16 %v11310_v33  ;;  %v11311_v40 = vunpack.i.l.bf16 %v11310_v33 }
  0x90   :  { %9233 = vmatprep.subr.msk.bf16.mxu0 %vm12511_vm4, %v12563_v31 }
  0x91   :  { %11354 = vrot.lane.b32.xlu0 %v11353_v35, %s12348_s0  ;;  %11339 = vrot.lane.b32.xlu1 %v11293_v50, %s12348_s0  ;;  %v179_v46 = vsel %vm177_vm5, %v11312_v39, 0.0  ;;  %v178_v47 = vsel %vm177_vm5, %v11311_v40, 0.0 }
  0x92   :  { %9235 = vmatpush3.bf16.msra.mxu0 %v12447_v14  ;;  %v11315_v38 = vpop.permute.xlu0 %11314  ;;  %v12605_v16 = vpack.c.bf16 %v179_v46, %v178_v47 }
  0x93   :  { %v11317_v51 = vunpack.i.h.bf16 %v11315_v38  ;;  %v11316_v62 = vunpack.i.l.bf16 %v11315_v38 }
  0x95   :  { %11359 = vrot.lane.b32.xlu0 %v12449_v15, %s12348_s0  ;;  %11349 = vrot.lane.b32.xlu1 %v11298_v58, %s12348_s0  ;;  %v7590_v15 = vld [vmem:[%s18558_s3 + $0x2] ss:$0 sm:$0xff]  ;;  %v181_v1 = vsel %vm177_vm5, %v11317_v51, 0.0  ;;  %v180_v19 = vsel %vm177_vm5, %v11316_v62, 0.0  ;;  %s12357_s3 = smov 60  }
  0x96   :  { %v11320_v45 = vpop.permute.xlu0 %11319  ;;  %vm62_vm7 = vcmp.gt.f32.partialorder %v7590_v15, 0.5 }
  0x97   :  { %v11322_v21 = vunpack.i.h.bf16 %v11320_v45  ;;  %v11321_v22 = vunpack.i.l.bf16 %v11320_v45  ;;  %vm12626_vm8 = vmpackc.low %vm62_vm7, %vm62_vm7 }
  0x99   :  { %v183_v45 = vsel %vm177_vm5, %v11322_v21, 0.0  ;;  %v182_v46 = vsel %vm177_vm5, %v11321_v22, 0.0 }
  0xef   :  { %v11290_v41 = vpop.permute.xlu1 %11289 }
  0xf0   :  { %v11292_v42 = vunpack.i.h.bf16 %v11290_v41  ;;  %v11291_v44 = vunpack.i.l.bf16 %v11290_v41 }
  0xf2   :  { %v227_v48 = vsel %vm136_vm2, %v11292_v42, 0.0  ;;  %v226_v49 = vsel %vm136_vm2, %v11291_v44, 0.0  ;;  %v12646_v44 = vpack.c.bf16 %v181_v1, %v180_v19  ;;  %v12684_v1 = vpack.c.bf16 %v183_v45, %v182_v46  ;;  %v7656_v45 = vld [vmem:[%s18559_s1 + $0xc8] sm:$0xff]  ;;  %v7655_v46 = vld [vmem:[%s18559_s1 + $0xc0] sm:$0xff] }
  0xf3   :  { %v12596_v53 = vpack.c.bf16 %v227_v48, %v226_v49  ;;  %v11295_v54 = vpop.permute.xlu1 %11294  ;;  %v234_v56 = vsel %vm56_vm3, %v226_v49, 0.0  ;;  %v235_v57 = vsel %vm56_vm3, %v227_v48, 0.0 }
  0xf4   :  { %v11297_v58 = vunpack.i.h.bf16 %v11295_v54  ;;  %v11296_v60 = vunpack.i.l.bf16 %v11295_v54  ;;  %v11363_v61 = vpack.i.bf16 %v235_v57, %v234_v56 }
  0xf5   :  { %9262 = vmatprep.subr.msk.bf16.mxu1 %vm12511_vm4, %v12596_v53 }
  0xf6   :  { %v229_v63 = vsel %vm136_vm2, %v11297_v58, 0.0  ;;  %v228_v0 = vsel %vm136_vm2, %v11296_v60, 0.0  ;;  %9265 = vmatpush3.bf16.msk.msra.mxu1 %vm12592_vm6, %v12473_v26  ;;  %11364 = vrot.lane.b32.xlu1 %v11363_v61, %s12348_s0 }
  0xf7   :  { %v12614_v3 = vpack.c.bf16 %v229_v63, %v228_v0  ;;  %v11325_v5 = vpop.permute.xlu0 %11324  ;;  %v11300_v7 = vpop.permute.xlu1 %11299  ;;  %v236_v9 = vsel %vm56_vm3, %v228_v0, 0.0  ;;  %v237_v11 = vsel %vm56_vm3, %v229_v63, 0.0  ;;  %v381_v63 = vld [vmem:[%s18559_s1 + $0x18] sm:$0xff] }
  0xf8   :  { %v11327_v12 = vunpack.i.h.bf16 %v11325_v5  ;;  %v11326_v13 = vunpack.i.l.bf16 %v11325_v5  ;;  %v11302_v17 = vunpack.i.h.bf16 %v11300_v7  ;;  %v11301_v18 = vunpack.i.l.bf16 %v11300_v7  ;;  %543 = vmatprep.mubr.f32.mxu1 %v381_v63  ;;  %v7731_v63 = vld [vmem:[%s18559_s1 + $0x160] sm:$0xff] }
  0xf9   :  { %9268 = vmatprep.subr.msk.bf16.mxu1 %vm12511_vm4, %v12614_v3  ;;  %v11368_v23 = vpack.i.bf16 %v237_v11, %v236_v9 }
  0xfa   :  { %v315_v27 = vsel %vm177_vm5, %v11327_v12, 0.0  ;;  %v314_v28 = vsel %vm177_vm5, %v11326_v13, 0.0  ;;  %v231_v29 = vsel %vm136_vm2, %v11302_v17, 0.0  ;;  %v230_v30 = vsel %vm136_vm2, %v11301_v18, 0.0  ;;  %9271 = vmatpush3.bf16.msk.msra.mxu1 %vm12592_vm6, %v12494_v43 }
  0xfb   :  { %v12637_v32 = vpack.c.bf16 %v315_v27, %v314_v28  ;;  %v12639_v34 = vpack.c.bf16 %v231_v29, %v230_v30  ;;  %11369 = vrot.lane.b32.xlu1 %v11368_v23, %s12348_s0  ;;  %v11335_v35 = vpop.permute.xlu0 %11334  ;;  %v11305_v37 = vpop.permute.xlu1 %11304  ;;  %v238_v33 = vsel %vm56_vm3, %v230_v30, 0.0  ;;  %v239_v38 = vsel %vm56_vm3, %v231_v29, 0.0  ;;  %v383_v29 = vld [vmem:[%s18559_s1 + $0x28] sm:$0xff]  ;;  %v382_v30 = vld [vmem:[%s18559_s1 + $0x20] sm:$0xff] }
  0xfc   :  { %v11337_v39 = vunpack.i.h.bf16 %v11335_v35  ;;  %v11336_v40 = vunpack.i.l.bf16 %v11335_v35  ;;  %v11307_v41 = vunpack.i.h.bf16 %v11305_v37  ;;  %v11306_v42 = vunpack.i.l.bf16 %v11305_v37  ;;  %v387_v35 = vld [vmem:[%s18559_s1 + $0x48] sm:$0xff]  ;;  %v386_v37 = vld [vmem:[%s18559_s1 + $0x40] sm:$0xff] }
  0xfd   :  { %9274 = vmatprep.subr.msk.bf16.mxu1 %vm12511_vm4, %v12639_v34  ;;  %v11373_v47 = vpack.i.bf16 %v239_v38, %v238_v33  ;;  %9238 = vmatprep.subr.msk.bf16.mxu0 %vm12626_vm8, %v12637_v32  ;;  %v391_v33 = vld [vmem:[%s18559_s1 + $0x68] sm:$0xff]  ;;  %v390_v38 = vld [vmem:[%s18559_s1 + $0x60] sm:$0xff] }
  0xfe   :  { %v317_v48 = vsel %vm177_vm5, %v11337_v39, 0.0  ;;  %v316_v49 = vsel %vm177_vm5, %v11336_v40, 0.0  ;;  %v233_v15 = vsel %vm136_vm2, %v11307_v41, 0.0  ;;  %v232_v51 = vsel %vm136_vm2, %v11306_v42, 0.0  ;;  %9277 = vmatpush3.bf16.msk.msra.mxu1 %vm12592_vm6, %v12484_v36  ;;  %9241 = vmatpush3.bf16.msk.msra.mxu0 %vm12626_vm8, %v12605_v16  ;;  %v7648_v39 = vld [vmem:[%s18559_s1 + $0x88] sm:$0xff]  ;;  %v7647_v40 = vld [vmem:[%s18559_s1 + $0x80] sm:$0xff] }
  0xff   :  { %v12666_v54 = vpack.c.bf16 %v317_v48, %v316_v49  ;;  %v12668_v56 = vpack.c.bf16 %v233_v15, %v232_v51  ;;  %11374 = vrot.lane.b32.xlu1 %v11373_v47, %s12348_s0  ;;  %v11345_v57 = vpop.permute.xlu0 %11344  ;;  %v240_v58 = vsel %vm56_vm3, %v232_v51, 0.0  ;;  %v241_v60 = vsel %vm56_vm3, %v233_v15, 0.0  ;;  %v7652_v41 = vld [vmem:[%s18559_s1 + $0xa8] sm:$0xff]  ;;  %v7651_v42 = vld [vmem:[%s18559_s1 + $0xa0] sm:$0xff] }
 0x100   :  { %v11347_v61 = vunpack.i.h.bf16 %v11345_v57  ;;  %v11346_v62 = vunpack.i.l.bf16 %v11345_v57  ;;  %v11378_v0 = vpack.i.bf16 %v241_v60, %v240_v58  ;;  %v7660_v47 = vld [vmem:[%s18559_s1 + $0xe8] sm:$0xff]  ;;  %v7659_v48 = vld [vmem:[%s18559_s1 + $0xe0] sm:$0xff] }
 0x101   :  { %9280 = vmatprep.subr.msk.bf16.mxu1 %vm12511_vm4, %v12668_v56  ;;  %9244 = vmatprep.subr.msk.bf16.mxu0 %vm12626_vm8, %v12666_v54  ;;  %v7720_v49 = vld [vmem:[%s18559_s1 + $0x108] sm:$0xff]  ;;  %v7719_v15 = vld [vmem:[%s18559_s1 + $0x100] sm:$0xff] }
 0x102   :  { %v319_v25 = vsel %vm177_vm5, %v11347_v61, 0.0  ;;  %v318_v5 = vsel %vm177_vm5, %v11346_v62, 0.0  ;;  %9283 = vmatpush3.bf16.msk.msra.mxu1 %vm12592_vm6, %v12502_v52  ;;  %9247 = vmatpush3.bf16.msk.msra.mxu0 %vm12626_vm8, %v12646_v44  ;;  %v7724_v51 = vld [vmem:[%s18559_s1 + $0x128] sm:$0xff]  ;;  %v7723_v57 = vld [vmem:[%s18559_s1 + $0x120] sm:$0xff]  ;;  %v11330_v62 = vpop.permute.xlu1 %11329 }
 0x103   :  { %v12694_v7 = vpack.c.bf16 %v319_v25, %v318_v5  ;;  %11379 = vrot.lane.b32.xlu1 %v11378_v0, %s12348_s0  ;;  %v11355_v9 = vpop.permute.xlu0 %11354  ;;  %v7728_v58 = vld [vmem:[%s18559_s1 + $0x148] sm:$0xff]  ;;  %v7727_v60 = vld [vmem:[%s18559_s1 + $0x140] sm:$0xff] }
 0x104   :  { %v11357_v11 = vunpack.i.h.bf16 %v11355_v9  ;;  %v11356_v12 = vunpack.i.l.bf16 %v11355_v9  ;;  %v7732_v61 = vld [vmem:[%s18559_s1 + $0x168] sm:$0xff]  ;;  %v11332_v9 = vunpack.i.h.bf16 %v11330_v62 }
 0x105   :  { %9250 = vmatprep.subr.msk.bf16.mxu0 %vm12626_vm8, %v12694_v7  ;;  %v7792_v0 = vld [vmem:[%s18559_s1 + $0x188] sm:$0xff] }
 0x106   :  { %v321_v13 = vsel %vm177_vm5, %v11357_v11, 0.0  ;;  %v320_v17 = vsel %vm177_vm5, %v11356_v12, 0.0  ;;  %9253 = vmatpush3.bf16.msk.msra.mxu0 %vm12626_vm8, %v12684_v1  ;;  %v11340_v25 = vpop.permute.xlu1 %11339  ;;  %v11331_v11 = vunpack.i.l.bf16 %v11330_v62 }
 0x107   :  { %v12705_v18 = vpack.c.bf16 %v321_v13, %v320_v17  ;;  %11384 = vrot.lane.b32.xlu1 %v12524_v2, %s12348_s0  ;;  %v11360_v19 = vpop.permute.xlu0 %11359  ;;  %v378_v2 = vld [vmem:[%s18559_s1] sm:$0xff] }
 0x108   :  { %v11362_v21 = vunpack.i.h.bf16 %v11360_v19  ;;  %v11361_v22 = vunpack.i.l.bf16 %v11360_v19  ;;  %v267_v19 = vsel %vm177_vm5, %v11332_v9, 0.0  ;;  %v7799_v9 = vld [vmem:[%s18559_s1 + $0x1c0] sm:$0xff] }
 0x109   :  { %9256 = vmatprep.subr.msk.bf16.mxu0 %vm12626_vm8, %v12705_v18 }
 0x10a   :  { %v185_v23 = vsel %vm177_vm5, %v11362_v21, 0.0  ;;  %v184_v27 = vsel %vm177_vm5, %v11361_v22, 0.0  ;;  %v11350_v5 = vpop.permute.xlu1 %11349  ;;  %v266_v21 = vsel %vm177_vm5, %v11331_v11, 0.0  ;;  %v11342_v22 = vunpack.i.h.bf16 %v11340_v25 }
 0x10b   :  { %v12714_v28 = vpack.c.bf16 %v185_v23, %v184_v27  ;;  %v11341_v23 = vunpack.i.l.bf16 %v11340_v25 }
 0x10d   :  { %9259 = vmatpush3.bf16.msk.msra.mxu0 %vm12626_vm8, %v12714_v28 }
 0x10e   :  { %9310 = vmatprep.subr.msk.bf16.mxu0 %vm12511_vm4, %v12518_v59 }
 0x110   :  { %459 = vmatmul.mubr.f32.vlgmr.msra.gmra.mrb[0].mxu0 %v378_v2 }
 0x111   :  { %9312 = vmatpush3.bf16.msra.mxu0 %v12426_v4  ;;  %463 = vmatprep.mubr.f32.mxu0 %v383_v29 }
 0x112   :  { %9315 = vmatprep.subr.msk.bf16.mxu0 %vm12511_vm4, %v12533_v6 }
 0x114   :  { %464 = vmatmul.mubr.f32.gmra.mrb[2].mxu0 %v382_v30  ;;  %v12914_v30 = vpack.c.bf16 %v267_v19, %v266_v21 }
 0x115   :  { %9317 = vmatpush3.bf16.msra.mxu0 %v12437_v8  ;;  %468 = vmatprep.mubr.f32.mxu0 %v387_v35 }
 0x116   :  { %9320 = vmatprep.subr.msk.bf16.mxu0 %vm12511_vm4, %v12548_v20 }
 0x118   :  { %469 = vmatmul.mubr.f32.gmra.mrb[4].mxu0 %v386_v37  ;;  %v7791_v37 = vld [vmem:[%s18559_s1 + $0x180] sm:$0xff] }
 0x119   :  { %9322 = vmatpush3.bf16.msra.mxu0 %v12439_v10  ;;  %473 = vmatprep.mubr.f32.mxu0 %v391_v33 }
 0x11a   :  { %9325 = vmatprep.subr.msk.bf16.mxu0 %vm12511_vm4, %v12563_v31 }
 0x11c   :  { %474 = vmatmul.mubr.f32.gmra.mrb[6].mxu0 %v390_v38 }
 0x11d   :  { %9327 = vmatpush3.bf16.msra.mxu0 %v12447_v14  ;;  %645 = vmatprep.mubr.f32.mxu0 %v7648_v39  ;;  %v7796_v39 = vld [vmem:[%s18559_s1 + $0x1a8] sm:$0xff] }
 0x11e   :  { %9330 = vmatprep.subr.msk.bf16.mxu0 %vm12626_vm8, %v12637_v32 }
 0x121   :  { %9333 = vmatpush3.bf16.msk.msra.mxu0 %vm12626_vm8, %v12605_v16 }
 0x122   :  { %9336 = vmatprep.subr.msk.bf16.mxu0 %vm12626_vm8, %v12666_v54 }
 0x125   :  { %9339 = vmatpush3.bf16.msk.msra.mxu0 %vm12626_vm8, %v12646_v44 }
 0x126   :  { %9342 = vmatprep.subr.msk.bf16.mxu0 %vm12626_vm8, %v12694_v7 }
 0x129   :  { %9345 = vmatpush3.bf16.msk.msra.mxu0 %vm12626_vm8, %v12684_v1 }
 0x12a   :  { %9348 = vmatprep.subr.msk.bf16.mxu0 %vm12626_vm8, %v12705_v18 }
 0x12d   :  { %9351 = vmatpush3.bf16.msk.msra.mxu0 %vm12626_vm8, %v12714_v28 }
 0x12e   :  { %9402 = vmatprep.subr.msk.bf16.mxu0 %vm12511_vm4, %v12518_v59 }
 0x130   :  { %646 = vmatmul.mubr.f32.vlgmr.msra.gmra.mrb[8].mxu0 %v7647_v40  ;;  %v269_v40 = vsel %vm177_vm5, %v11342_v22, 0.0 }
 0x131   :  { %9404 = vmatpush3.bf16.msra.mxu0 %v12426_v4  ;;  %650 = vmatprep.mubr.f32.mxu0 %v7652_v41  ;;  %v268_v41 = vsel %vm177_vm5, %v11341_v23, 0.0 }
 0x132   :  { %9407 = vmatprep.subr.msk.bf16.mxu0 %vm12511_vm4, %v12533_v6 }
 0x134   :  { %651 = vmatmul.mubr.f32.gmra.mrb[10].mxu0 %v7651_v42  ;;  %v11352_v42 = vunpack.i.h.bf16 %v11350_v5 }
 0x135   :  { %9409 = vmatpush3.bf16.msra.mxu0 %v12437_v8  ;;  %655 = vmatprep.mubr.f32.mxu0 %v7656_v45  ;;  %v11351_v45 = vunpack.i.l.bf16 %v11350_v5 }
 0x136   :  { %9412 = vmatprep.subr.msk.bf16.mxu0 %vm12511_vm4, %v12548_v20 }
 0x137   :  { %v270_v62 = vsel %vm177_vm5, %v11351_v45, 0.0  ;;  %v389_v45 = vld [vmem:[%s18559_s1 + $0x58] sm:$0xff] }
 0x138   :  { %656 = vmatmul.mubr.f32.gmra.mrb[12].mxu0 %v7655_v46 }
 0x139   :  { %9414 = vmatpush3.bf16.msra.mxu0 %v12439_v10  ;;  %660 = vmatprep.mubr.f32.mxu0 %v7660_v47 }
 0x13a   :  { %9417 = vmatprep.subr.msk.bf16.mxu0 %vm12511_vm4, %v12563_v31 }
 0x13c   :  { %661 = vmatmul.mubr.f32.gmra.mrb[14].mxu0 %v7659_v48 }
 0x13d   :  { %9419 = vmatpush3.bf16.msra.mxu0 %v12447_v14  ;;  %832 = vmatprep.mubr.f32.mxu0 %v7720_v49 }
 0x13e   :  { %9422 = vmatprep.subr.msk.bf16.mxu0 %vm12626_vm8, %v12637_v32 }
 0x141   :  { %9425 = vmatpush3.bf16.msk.msra.mxu0 %vm12626_vm8, %v12605_v16 }
 0x142   :  { %9428 = vmatprep.subr.msk.bf16.mxu0 %vm12626_vm8, %v12666_v54 }
 0x145   :  { %9431 = vmatpush3.bf16.msk.msra.mxu0 %vm12626_vm8, %v12646_v44 }
 0x146   :  { %9434 = vmatprep.subr.msk.bf16.mxu0 %vm12626_vm8, %v12694_v7 }
 0x149   :  { %9437 = vmatpush3.bf16.msk.msra.mxu0 %vm12626_vm8, %v12684_v1 }
 0x14a   :  { %9440 = vmatprep.subr.msk.bf16.mxu0 %vm12626_vm8, %v12705_v18 }
 0x14d   :  { %9443 = vmatpush3.bf16.msk.msra.mxu0 %vm12626_vm8, %v12714_v28 }
 0x14e   :  { %9494 = vmatprep.subr.msk.bf16.mxu0 %vm12511_vm4, %v12518_v59 }
 0x150   :  { %833 = vmatmul.mubr.f32.vlgmr.msra.gmra.mrb[16].mxu0 %v7719_v15  ;;  %v7795_v15 = vld [vmem:[%s18559_s1 + $0x1a0] sm:$0xff] }
 0x151   :  { %9496 = vmatpush3.bf16.msra.mxu0 %v12426_v4  ;;  %837 = vmatprep.mubr.f32.mxu0 %v7724_v51  ;;  %v12944_v51 = vpack.c.bf16 %v269_v40, %v268_v41  ;;  %v380_v40 = vld [vmem:[%s18559_s1 + $0x10] sm:$0xff]  ;;  %v385_v41 = vld [vmem:[%s18559_s1 + $0x38] sm:$0xff] }
 0x152   :  { %9499 = vmatprep.subr.msk.bf16.mxu0 %vm12511_vm4, %v12533_v6 }
 0x154   :  { %838 = vmatmul.mubr.f32.gmra.mrb[18].mxu0 %v7723_v57 }
 0x155   :  { %9501 = vmatpush3.bf16.msra.mxu0 %v12437_v8  ;;  %842 = vmatprep.mubr.f32.mxu0 %v7728_v58 }
 0x156   :  { %9504 = vmatprep.subr.msk.bf16.mxu0 %vm12511_vm4, %v12548_v20 }
 0x158   :  { %843 = vmatmul.mubr.f32.gmra.mrb[20].mxu0 %v7727_v60  ;;  %v7800_v60 = vld [vmem:[%s18559_s1 + $0x1c8] sm:$0xff] }
 0x159   :  { %9506 = vmatpush3.bf16.msra.mxu0 %v12439_v10  ;;  %847 = vmatprep.mubr.f32.mxu0 %v7732_v61  ;;  %v271_v61 = vsel %vm177_vm5, %v11352_v42, 0.0  ;;  %v384_v42 = vld [vmem:[%s18559_s1 + $0x30] sm:$0xff] }
 0x15a   :  { %9509 = vmatprep.subr.msk.bf16.mxu0 %vm12511_vm4, %v12563_v31  ;;  %v12968_v11 = vpack.c.bf16 %v271_v61, %v270_v62  ;;  %v7872_v61 = vld [vmem:[%s18559_s1 + $0x248] sm:$0xff]  ;;  %v7871_v62 = vld [vmem:[%s18559_s1 + $0x240] sm:$0xff] }
 0x15c   :  { %848 = vmatmul.mubr.f32.gmra.mrb[22].mxu0 %v7731_v63 }
 0x15d   :  { %9511 = vmatpush3.bf16.msra.mxu0 %v12447_v14  ;;  %1019 = vmatprep.mubr.f32.mxu0 %v7792_v0 }
 0x15e   :  { %9514 = vmatprep.subr.msk.bf16.mxu0 %vm12626_vm8, %v12637_v32 }
 0x161   :  { %9517 = vmatpush3.bf16.msk.msra.mxu0 %vm12626_vm8, %v12605_v16 }
 0x162   :  { %9520 = vmatprep.subr.msk.bf16.mxu0 %vm12626_vm8, %v12666_v54 }
 0x165   :  { %9523 = vmatpush3.bf16.msk.msra.mxu0 %vm12626_vm8, %v12646_v44 }
 0x166   :  { %9526 = vmatprep.subr.msk.bf16.mxu0 %vm12626_vm8, %v12694_v7 }
 0x168   :  { %v11365_v12 = vpop.permute.xlu1 %11364 }
 0x169   :  { %v11367_v13 = vunpack.i.h.bf16 %v11365_v12  ;;  %v11366_v17 = vunpack.i.l.bf16 %v11365_v12  ;;  %9529 = vmatpush3.bf16.msk.msra.mxu0 %vm12626_vm8, %v12684_v1 }
 0x16a   :  { %9532 = vmatprep.subr.msk.bf16.mxu0 %vm12626_vm8, %v12705_v18 }
 0x16b   :  { %v363_v27 = vsel %vm177_vm5, %v11367_v13, 0.0  ;;  %v362_v2 = vsel %vm177_vm5, %v11366_v17, 0.0  ;;  %v7804_v17 = vld [vmem:[%s18559_s1 + $0x1e8] sm:$0xff] }
 0x16c   :  { %v12912_v29 = vpack.c.bf16 %v363_v27, %v362_v2  ;;  %v7803_v27 = vld [vmem:[%s18559_s1 + $0x1e0] sm:$0xff] }
 0x16d   :  { %v11370_v35 = vpop.permute.xlu1 %11369  ;;  %9535 = vmatpush3.bf16.msk.msra.mxu0 %vm12626_vm8, %v12714_v28 }
 0x16e   :  { %v11372_v33 = vunpack.i.h.bf16 %v11370_v35  ;;  %v11371_v38 = vunpack.i.l.bf16 %v11370_v35  ;;  %9286 = vmatprep.subr.msk.bf16.mxu1 %vm12626_vm8, %v12912_v29  ;;  %9586 = vmatprep.subr.msk.bf16.mxu0 %vm12511_vm4, %v12518_v59 }
 0x16f   :  { %9289 = vmatpush3.bf16.msk.msra.mxu1 %vm12626_vm8, %v12914_v30 }
 0x170   :  { %v365_v46 = vsel %vm177_vm5, %v11372_v33, 0.0  ;;  %v364_v47 = vsel %vm177_vm5, %v11371_v38, 0.0  ;;  %1020 = vmatmul.mubr.f32.vlgmr.msra.gmra.mrb[24].mxu0 %v7791_v37  ;;  %v7864_v37 = vld [vmem:[%s18559_s1 + $0x208] sm:$0xff] }
 0x171   :  { %v12938_v48 = vpack.c.bf16 %v365_v46, %v364_v47  ;;  %v11375_v49 = vpop.permute.xlu1 %11374  ;;  %9588 = vmatpush3.bf16.msra.mxu0 %v12426_v4  ;;  %1024 = vmatprep.mubr.f32.mxu0 %v7796_v39  ;;  %v388_v46 = vld [vmem:[%s18559_s1 + $0x50] sm:$0xff]  ;;  %v393_v47 = vld [vmem:[%s18559_s1 + $0x78] sm:$0xff] }
 0x172   :  { %v11377_v57 = vunpack.i.h.bf16 %v11375_v49  ;;  %v11376_v58 = vunpack.i.l.bf16 %v11375_v49  ;;  %9591 = vmatprep.subr.msk.bf16.mxu0 %vm12511_vm4, %v12533_v6  ;;  %v392_v49 = vld [vmem:[%s18559_s1 + $0x70] sm:$0xff] }
 0x173   :  { %9292 = vmatprep.subr.msk.bf16.mxu1 %vm12626_vm8, %v12938_v48 }
 0x174   :  { %v367_v63 = vsel %vm177_vm5, %v11377_v57, 0.0  ;;  %v366_v0 = vsel %vm177_vm5, %v11376_v58, 0.0  ;;  %9295 = vmatpush3.bf16.msk.msra.mxu1 %vm12626_vm8, %v12944_v51  ;;  %1025 = vmatmul.mubr.f32.gmra.mrb[26].mxu0 %v7795_v15  ;;  %v7650_v15 = vld [vmem:[%s18559_s1 + $0x98] sm:$0xff]  ;;  %v7863_v57 = vld [vmem:[%s18559_s1 + $0x200] sm:$0xff]  ;;  %v7868_v58 = vld [vmem:[%s18559_s1 + $0x228] sm:$0xff] }
 0x175   :  { %v12962_v25 = vpack.c.bf16 %v367_v63, %v366_v0  ;;  %v11380_v5 = vpop.permute.xlu1 %11379  ;;  %9593 = vmatpush3.bf16.msra.mxu0 %v12437_v8  ;;  %1029 = vmatprep.mubr.f32.mxu0 %v7800_v60  ;;  %v7867_v60 = vld [vmem:[%s18559_s1 + $0x220] sm:$0xff]  ;;  %v7876_v63 = vld [vmem:[%s18559_s1 + $0x268] sm:$0xff] }
 0x176   :  { %v11382_v12 = vunpack.i.h.bf16 %v11380_v5  ;;  %v11381_v13 = vunpack.i.l.bf16 %v11380_v5  ;;  %9596 = vmatprep.subr.msk.bf16.mxu0 %vm12511_vm4, %v12548_v20  ;;  %v7875_v0 = vld [vmem:[%s18559_s1 + $0x260] sm:$0xff]  ;;  %v7936_v5 = vld [vmem:[%s18559_s1 + $0x288] sm:$0xff] }
 0x177   :  { %9298 = vmatprep.subr.msk.bf16.mxu1 %vm12626_vm8, %v12962_v25 }
 0x178   :  { %v369_v19 = vsel %vm177_vm5, %v11382_v12, 0.0  ;;  %v368_v21 = vsel %vm177_vm5, %v11381_v13, 0.0  ;;  %9301 = vmatpush3.bf16.msk.msra.mxu1 %vm12626_vm8, %v12968_v11  ;;  %1030 = vmatmul.mubr.f32.gmra.mrb[28].mxu0 %v7799_v9  ;;  %v7649_v9 = vld [vmem:[%s18559_s1 + $0x90] sm:$0xff]  ;;  %v7654_v12 = vld [vmem:[%s18559_s1 + $0xb8] sm:$0xff] }
 0x179   :  { %v12984_v22 = vpack.c.bf16 %v369_v19, %v368_v21  ;;  %v11385_v23 = vpop.permute.xlu1 %11384  ;;  %9598 = vmatpush3.bf16.msra.mxu0 %v12439_v10  ;;  %1034 = vmatprep.mubr.f32.mxu0 %v7804_v17  ;;  %v7653_v13 = vld [vmem:[%s18559_s1 + $0xb0] sm:$0xff]  ;;  %v7658_v17 = vld [vmem:[%s18559_s1 + $0xd8] sm:$0xff] }
 0x17a   :  { %v11387_v2 = vunpack.i.h.bf16 %v11385_v23  ;;  %v11386_v35 = vunpack.i.l.bf16 %v11385_v23  ;;  %9601 = vmatprep.subr.msk.bf16.mxu0 %vm12511_vm4, %v12563_v31  ;;  %v7657_v19 = vld [vmem:[%s18559_s1 + $0xd0] sm:$0xff]  ;;  %v7662_v21 = vld [vmem:[%s18559_s1 + $0xf8] sm:$0xff] }
 0x17b   :  { %9304 = vmatprep.subr.msk.bf16.mxu1 %vm12626_vm8, %v12984_v22  ;;  %v7661_v23 = vld [vmem:[%s18559_s1 + $0xf0] sm:$0xff] }
 0x17c   :  { %v273_v33 = vsel %vm177_vm5, %v11387_v2, 0.0  ;;  %v272_v38 = vsel %vm177_vm5, %v11386_v35, 0.0  ;;  %1035 = vmatmul.mubr.f32.gmra.mrb[30].mxu0 %v7803_v27  ;;  %v7722_v27 = vld [vmem:[%s18559_s1 + $0x118] sm:$0xff]  ;;  %v7935_v2 = vld [vmem:[%s18559_s1 + $0x280] sm:$0xff]  ;;  %v7940_v35 = vld [vmem:[%s18559_s1 + $0x2a8] sm:$0xff] }
 0x17d   :  { %v13001_v39 = vpack.c.bf16 %v273_v33, %v272_v38  ;;  %9603 = vmatpush3.bf16.msra.mxu0 %v12447_v14  ;;  %1206 = vmatprep.mubr.f32.mxu0 %v7864_v37  ;;  %v7939_v37 = vld [vmem:[%s18559_s1 + $0x2a0] sm:$0xff]  ;;  %v7944_v33 = vld [vmem:[%s18559_s1 + $0x2c8] sm:$0xff] }
 0x17e   :  { %9606 = vmatprep.subr.msk.bf16.mxu0 %vm12626_vm8, %v12637_v32  ;;  %v7943_v38 = vld [vmem:[%s18559_s1 + $0x2c0] sm:$0xff] }
 0x17f   :  { %9307 = vmatpush3.bf16.msk.msra.mxu1 %vm12626_vm8, %v13001_v39 }
 0x180   :  { %9354 = vmatprep.subr.msk.bf16.mxu1 %vm12511_vm4, %v12596_v53 }
 0x181   :  { %9609 = vmatpush3.bf16.msk.msra.mxu0 %vm12626_vm8, %v12605_v16 }
 0x182   :  { %544 = vmatmul.mubr.f32.vlgmr.msra.gmra.mrb[0].mxu1 %v380_v40  ;;  %9612 = vmatprep.subr.msk.bf16.mxu0 %vm12626_vm8, %v12666_v54  ;;  %v7948_v40 = vld [vmem:[%s18559_s1 + $0x2e8] sm:$0xff] }
 0x183   :  { %9357 = vmatpush3.bf16.msk.msra.mxu1 %vm12592_vm6, %v12473_v26  ;;  %548 = vmatprep.mubr.f32.mxu1 %v385_v41  ;;  %v7947_v41 = vld [vmem:[%s18559_s1 + $0x2e0] sm:$0xff] }
 0x184   :  { %9360 = vmatprep.subr.msk.bf16.mxu1 %vm12511_vm4, %v12614_v3 }
 0x185   :  { %9615 = vmatpush3.bf16.msk.msra.mxu0 %vm12626_vm8, %v12646_v44 }
 0x186   :  { %9618 = vmatprep.subr.msk.bf16.mxu0 %vm12626_vm8, %v12694_v7  ;;  %549 = vmatmul.mubr.f32.gmra.mrb[2].mxu1 %v384_v42  ;;  %v8008_v42 = vld [vmem:[%s18559_s1 + $0x308] sm:$0xff] }
 0x187   :  { %9363 = vmatpush3.bf16.msk.msra.mxu1 %vm12592_vm6, %v12494_v43  ;;  %553 = vmatprep.mubr.f32.mxu1 %v389_v45  ;;  %v7721_v45 = vld [vmem:[%s18559_s1 + $0x110] sm:$0xff] }
 0x188   :  { %9366 = vmatprep.subr.msk.bf16.mxu1 %vm12511_vm4, %v12639_v34 }
 0x189   :  { %9621 = vmatpush3.bf16.msk.msra.mxu0 %vm12626_vm8, %v12684_v1 }
 0x18a   :  { %9624 = vmatprep.subr.msk.bf16.mxu0 %vm12626_vm8, %v12705_v18  ;;  %554 = vmatmul.mubr.f32.gmra.mrb[4].mxu1 %v388_v46  ;;  %v7726_v46 = vld [vmem:[%s18559_s1 + $0x138] sm:$0xff] }
 0x18b   :  { %9369 = vmatpush3.bf16.msk.msra.mxu1 %vm12592_vm6, %v12484_v36  ;;  %558 = vmatprep.mubr.f32.mxu1 %v393_v47  ;;  %v7725_v47 = vld [vmem:[%s18559_s1 + $0x130] sm:$0xff] }
 0x18c   :  { %9372 = vmatprep.subr.msk.bf16.mxu1 %vm12511_vm4, %v12668_v56 }
 0x18d   :  { %9627 = vmatpush3.bf16.msk.msra.mxu0 %vm12626_vm8, %v12714_v28 }
 0x18e   :  { %9678 = vmatprep.subr.msk.bf16.mxu0 %vm12511_vm4, %v12518_v59  ;;  %559 = vmatmul.mubr.f32.gmra.mrb[6].mxu1 %v392_v49  ;;  %v7730_v49 = vld [vmem:[%s18559_s1 + $0x158] sm:$0xff] }
 0x18f   :  { %9375 = vmatpush3.bf16.msk.msra.mxu1 %vm12592_vm6, %v12502_v52  ;;  %730 = vmatprep.mubr.f32.mxu1 %v7650_v15  ;;  %v7729_v15 = vld [vmem:[%s18559_s1 + $0x150] sm:$0xff] }
 0x190   :  { %9378 = vmatprep.subr.msk.bf16.mxu1 %vm12626_vm8, %v12912_v29  ;;  %1207 = vmatmul.mubr.f32.vlgmr.msra.gmra.mrb[32].mxu0 %v7863_v57  ;;  %v7734_v57 = vld [vmem:[%s18559_s1 + $0x178] sm:$0xff] }
 0x191   :  { %9680 = vmatpush3.bf16.msra.mxu0 %v12426_v4  ;;  %1211 = vmatprep.mubr.f32.mxu0 %v7868_v58  ;;  %v7733_v58 = vld [vmem:[%s18559_s1 + $0x170] sm:$0xff] }
 0x192   :  { %9683 = vmatprep.subr.msk.bf16.mxu0 %vm12511_vm4, %v12533_v6 }
 0x193   :  { %9381 = vmatpush3.bf16.msk.msra.mxu1 %vm12626_vm8, %v12914_v30 }
 0x194   :  { %9384 = vmatprep.subr.msk.bf16.mxu1 %vm12626_vm8, %v12938_v48  ;;  %1212 = vmatmul.mubr.f32.gmra.mrb[34].mxu0 %v7867_v60  ;;  %v7794_v60 = vld [vmem:[%s18559_s1 + $0x198] sm:$0xff] }
 0x195   :  { %9685 = vmatpush3.bf16.msra.mxu0 %v12437_v8  ;;  %1216 = vmatprep.mubr.f32.mxu0 %v7872_v61  ;;  %v8007_v61 = vld [vmem:[%s18559_s1 + $0x300] sm:$0xff] }
 0x196   :  { %9688 = vmatprep.subr.msk.bf16.mxu0 %vm12511_vm4, %v12548_v20 }
 0x197   :  { %9387 = vmatpush3.bf16.msk.msra.mxu1 %vm12626_vm8, %v12944_v51 }
 0x198   :  { %9390 = vmatprep.subr.msk.bf16.mxu1 %vm12626_vm8, %v12962_v25  ;;  %1217 = vmatmul.mubr.f32.gmra.mrb[36].mxu0 %v7871_v62  ;;  %v8012_v62 = vld [vmem:[%s18559_s1 + $0x328] sm:$0xff] }
 0x199   :  { %9690 = vmatpush3.bf16.msra.mxu0 %v12439_v10  ;;  %1221 = vmatprep.mubr.f32.mxu0 %v7876_v63  ;;  %v8016_v63 = vld [vmem:[%s18559_s1 + $0x348] sm:$0xff] }
 0x19a   :  { %9693 = vmatprep.subr.msk.bf16.mxu0 %vm12511_vm4, %v12563_v31 }
 0x19b   :  { %9393 = vmatpush3.bf16.msk.msra.mxu1 %vm12626_vm8, %v12968_v11 }
 0x19c   :  { %9396 = vmatprep.subr.msk.bf16.mxu1 %vm12626_vm8, %v12984_v22  ;;  %1222 = vmatmul.mubr.f32.gmra.mrb[38].mxu0 %v7875_v0 }
 0x19d   :  { %9695 = vmatpush3.bf16.msra.mxu0 %v12447_v14  ;;  %1393 = vmatprep.mubr.f32.mxu0 %v7936_v5  ;;  %v2020_v5 = vld [vmem:[%s18560_s2] sm:$0xff] }
 0x19e   :  { %9698 = vmatprep.subr.msk.bf16.mxu0 %vm12626_vm8, %v12637_v32 }
 0x19f   :  { %9399 = vmatpush3.bf16.msk.msra.mxu1 %vm12626_vm8, %v13001_v39 }
 0x1a0   :  { %9446 = vmatprep.subr.msk.bf16.mxu1 %vm12511_vm4, %v12596_v53 }
 0x1a1   :  { %9701 = vmatpush3.bf16.msk.msra.mxu0 %vm12626_vm8, %v12605_v16 }
 0x1a2   :  { %731 = vmatmul.mubr.f32.vlgmr.msra.gmra.mrb[8].mxu1 %v7649_v9  ;;  %9704 = vmatprep.subr.msk.bf16.mxu0 %vm12626_vm8, %v12666_v54 }
 0x1a3   :  { %9449 = vmatpush3.bf16.msk.msra.mxu1 %vm12592_vm6, %v12473_v26  ;;  %735 = vmatprep.mubr.f32.mxu1 %v7654_v12  ;;  %v7801_v12 = vld [vmem:[%s18559_s1 + $0x1d0] sm:$0xff] }
 0x1a4   :  { %9452 = vmatprep.subr.msk.bf16.mxu1 %vm12511_vm4, %v12614_v3 }
 0x1a5   :  { %9707 = vmatpush3.bf16.msk.msra.mxu0 %vm12626_vm8, %v12646_v44 }
 0x1a6   :  { %736 = vmatmul.mubr.f32.gmra.mrb[10].mxu1 %v7653_v13  ;;  %9710 = vmatprep.subr.msk.bf16.mxu0 %vm12626_vm8, %v12694_v7 }
 0x1a7   :  { %9455 = vmatpush3.bf16.msk.msra.mxu1 %vm12592_vm6, %v12494_v43  ;;  %740 = vmatprep.mubr.f32.mxu1 %v7658_v17 }
 0x1a8   :  { %9458 = vmatprep.subr.msk.bf16.mxu1 %vm12511_vm4, %v12639_v34 }
 0x1a9   :  { %9713 = vmatpush3.bf16.msk.msra.mxu0 %vm12626_vm8, %v12684_v1 }
 0x1aa   :  { %741 = vmatmul.mubr.f32.gmra.mrb[12].mxu1 %v7657_v19  ;;  %9716 = vmatprep.subr.msk.bf16.mxu0 %vm12626_vm8, %v12705_v18  ;;  %v2021_v19 = vld [vmem:[%s18560_s2 + $0x8] sm:$0xff] }
 0x1ab   :  { %9461 = vmatpush3.bf16.msk.msra.mxu1 %vm12592_vm6, %v12484_v36  ;;  %745 = vmatprep.mubr.f32.mxu1 %v7662_v21 }
 0x1ac   :  { %9464 = vmatprep.subr.msk.bf16.mxu1 %vm12511_vm4, %v12668_v56 }
 0x1ad   :  { %9719 = vmatpush3.bf16.msk.msra.mxu0 %vm12626_vm8, %v12714_v28 }
 0x1ae   :  { %746 = vmatmul.mubr.f32.gmra.mrb[14].mxu1 %v7661_v23  ;;  %9770 = vmatprep.subr.msk.bf16.mxu0 %vm12511_vm4, %v12518_v59 }
 0x1af   :  { %9467 = vmatpush3.bf16.msk.msra.mxu1 %vm12592_vm6, %v12502_v52  ;;  %917 = vmatprep.mubr.f32.mxu1 %v7722_v27  ;;  %v7866_v27 = vld [vmem:[%s18559_s1 + $0x218] sm:$0xff] }
 0x1b0   :  { %9470 = vmatprep.subr.msk.bf16.mxu1 %vm12626_vm8, %v12912_v29  ;;  %1394 = vmatmul.mubr.f32.vlgmr.msra.gmra.mrb[40].mxu0 %v7935_v2  ;;  %v8079_v2 = vld [vmem:[%s18559_s1 + $0x380] sm:$0xff] }
 0x1b1   :  { %9772 = vmatpush3.bf16.msra.mxu0 %v12426_v4  ;;  %1398 = vmatprep.mubr.f32.mxu0 %v7940_v35 }
 0x1b2   :  { %9775 = vmatprep.subr.msk.bf16.mxu0 %vm12511_vm4, %v12533_v6 }
 0x1b3   :  { %9473 = vmatpush3.bf16.msk.msra.mxu1 %vm12626_vm8, %v12914_v30 }
 0x1b4   :  { %9476 = vmatprep.subr.msk.bf16.mxu1 %vm12626_vm8, %v12938_v48  ;;  %1399 = vmatmul.mubr.f32.gmra.mrb[42].mxu0 %v7939_v37  ;;  %v8084_v37 = vld [vmem:[%s18559_s1 + $0x3a8] sm:$0xff] }
 0x1b5   :  { %9777 = vmatpush3.bf16.msra.mxu0 %v12437_v8  ;;  %1403 = vmatprep.mubr.f32.mxu0 %v7944_v33  ;;  %v2022_v33 = vld [vmem:[%s18560_s2 + $0x10] sm:$0xff] }
 0x1b6   :  { %9780 = vmatprep.subr.msk.bf16.mxu0 %vm12511_vm4, %v12548_v20 }
 0x1b7   :  { %9479 = vmatpush3.bf16.msk.msra.mxu1 %vm12626_vm8, %v12944_v51 }
 0x1b8   :  { %9482 = vmatprep.subr.msk.bf16.mxu1 %vm12626_vm8, %v12962_v25  ;;  %1404 = vmatmul.mubr.f32.gmra.mrb[44].mxu0 %v7943_v38 }
 0x1b9   :  { %9782 = vmatpush3.bf16.msra.mxu0 %v12439_v10  ;;  %1408 = vmatprep.mubr.f32.mxu0 %v7948_v40  ;;  %v8083_v40 = vld [vmem:[%s18559_s1 + $0x3a0] sm:$0xff] }
 0x1ba   :  { %9785 = vmatprep.subr.msk.bf16.mxu0 %vm12511_vm4, %v12563_v31 }
 0x1bb   :  { %9485 = vmatpush3.bf16.msk.msra.mxu1 %vm12626_vm8, %v12968_v11 }
 0x1bc   :  { %9488 = vmatprep.subr.msk.bf16.mxu1 %vm12626_vm8, %v12984_v22  ;;  %1409 = vmatmul.mubr.f32.gmra.mrb[46].mxu0 %v7947_v41 }
 0x1bd   :  { %9787 = vmatpush3.bf16.msra.mxu0 %v12447_v14  ;;  %1580 = vmatprep.mubr.f32.mxu0 %v8008_v42  ;;  %v8088_v42 = vld [vmem:[%s18559_s1 + $0x3c8] sm:$0xff] }
 0x1be   :  { %9790 = vmatprep.subr.msk.bf16.mxu0 %vm12626_vm8, %v12637_v32 }
 0x1bf   :  { %9491 = vmatpush3.bf16.msk.msra.mxu1 %vm12626_vm8, %v13001_v39 }
 0x1c0   :  { %9538 = vmatprep.subr.msk.bf16.mxu1 %vm12511_vm4, %v12596_v53 }
 0x1c1   :  { %9793 = vmatpush3.bf16.msk.msra.mxu0 %vm12626_vm8, %v12605_v16 }
 0x1c2   :  { %918 = vmatmul.mubr.f32.vlgmr.msra.gmra.mrb[16].mxu1 %v7721_v45  ;;  %9796 = vmatprep.subr.msk.bf16.mxu0 %vm12626_vm8, %v12666_v54  ;;  %v8087_v45 = vld [vmem:[%s18559_s1 + $0x3c0] sm:$0xff] }
 0x1c3   :  { %9541 = vmatpush3.bf16.msk.msra.mxu1 %vm12592_vm6, %v12473_v26  ;;  %922 = vmatprep.mubr.f32.mxu1 %v7726_v46  ;;  %v8092_v46 = vld [vmem:[%s18559_s1 + $0x3e8] sm:$0xff] }
 0x1c4   :  { %9544 = vmatprep.subr.msk.bf16.mxu1 %vm12511_vm4, %v12614_v3 }
 0x1c5   :  { %9799 = vmatpush3.bf16.msk.msra.mxu0 %vm12626_vm8, %v12646_v44 }
 0x1c6   :  { %923 = vmatmul.mubr.f32.gmra.mrb[18].mxu1 %v7725_v47  ;;  %9802 = vmatprep.subr.msk.bf16.mxu0 %vm12626_vm8, %v12694_v7  ;;  %v8091_v47 = vld [vmem:[%s18559_s1 + $0x3e0] sm:$0xff] }
 0x1c7   :  { %9547 = vmatpush3.bf16.msk.msra.mxu1 %vm12592_vm6, %v12494_v43  ;;  %927 = vmatprep.mubr.f32.mxu1 %v7730_v49  ;;  %v7865_v49 = vld [vmem:[%s18559_s1 + $0x210] sm:$0xff] }
 0x1c8   :  { %9550 = vmatprep.subr.msk.bf16.mxu1 %vm12511_vm4, %v12639_v34 }
 0x1c9   :  { %9805 = vmatpush3.bf16.msk.msra.mxu0 %vm12626_vm8, %v12684_v1 }
 0x1ca   :  { %928 = vmatmul.mubr.f32.gmra.mrb[20].mxu1 %v7729_v15  ;;  %9808 = vmatprep.subr.msk.bf16.mxu0 %vm12626_vm8, %v12705_v18  ;;  %v7870_v15 = vld [vmem:[%s18559_s1 + $0x238] sm:$0xff] }
 0x1cb   :  { %9553 = vmatpush3.bf16.msk.msra.mxu1 %vm12592_vm6, %v12484_v36  ;;  %932 = vmatprep.mubr.f32.mxu1 %v7734_v57  ;;  %v7869_v57 = vld [vmem:[%s18559_s1 + $0x230] sm:$0xff] }
 0x1cc   :  { %9556 = vmatprep.subr.msk.bf16.mxu1 %vm12511_vm4, %v12668_v56 }
 0x1cd   :  { %9811 = vmatpush3.bf16.msk.msra.mxu0 %vm12626_vm8, %v12714_v28 }
 0x1ce   :  { %933 = vmatmul.mubr.f32.gmra.mrb[22].mxu1 %v7733_v58  ;;  %9862 = vmatprep.subr.msk.bf16.mxu0 %vm12511_vm4, %v12518_v59  ;;  %v8011_v59 = vld [vmem:[%s18559_s1 + $0x320] sm:$0xff] }
 0x1cf   :  { %9559 = vmatpush3.bf16.msk.msra.mxu1 %vm12592_vm6, %v12502_v52  ;;  %1104 = vmatprep.mubr.f32.mxu1 %v7794_v60  ;;  %v7874_v60 = vld [vmem:[%s18559_s1 + $0x258] sm:$0xff] }
 0x1d0   :  { %9562 = vmatprep.subr.msk.bf16.mxu1 %vm12626_vm8, %v12912_v29  ;;  %1581 = vmatmul.mubr.f32.vlgmr.msra.gmra.mrb[48].mxu0 %v8007_v61 }
 0x1d1   :  { %9864 = vmatpush3.bf16.msra.mxu0 %v12426_v4  ;;  %1585 = vmatprep.mubr.f32.mxu0 %v8012_v62  ;;  %v8015_v4 = vld [vmem:[%s18559_s1 + $0x340] sm:$0xff] }
 0x1d2   :  { %9867 = vmatprep.subr.msk.bf16.mxu0 %vm12511_vm4, %v12533_v6  ;;  %v8020_v6 = vld [vmem:[%s18559_s1 + $0x368] sm:$0xff] }
 0x1d3   :  { %9565 = vmatpush3.bf16.msk.msra.mxu1 %vm12626_vm8, %v12914_v30 }
 0x1d4   :  { %9568 = vmatprep.subr.msk.bf16.mxu1 %vm12626_vm8, %v12938_v48  ;;  %1586 = vmatmul.mubr.f32.gmra.mrb[50].mxu0 %v8011_v59  ;;  %v7873_v59 = vld [vmem:[%s18559_s1 + $0x250] sm:$0xff] }
 0x1d5   :  { %9869 = vmatpush3.bf16.msra.mxu0 %v12437_v8  ;;  %1590 = vmatprep.mubr.f32.mxu0 %v8016_v63  ;;  %v8019_v8 = vld [vmem:[%s18559_s1 + $0x360] sm:$0xff] }
 0x1d6   :  { %9872 = vmatprep.subr.msk.bf16.mxu0 %vm12511_vm4, %v12548_v20  ;;  %v8080_v20 = vld [vmem:[%s18559_s1 + $0x388] sm:$0xff] }
 0x1d7   :  { %9571 = vmatpush3.bf16.msk.msra.mxu1 %vm12626_vm8, %v12944_v51 }
 0x1d8   :  { %9574 = vmatprep.subr.msk.bf16.mxu1 %vm12626_vm8, %v12962_v25  ;;  %1591 = vmatmul.mubr.f32.gmra.mrb[52].mxu0 %v8015_v4  ;;  %v7878_v4 = vld [vmem:[%s18559_s1 + $0x278] sm:$0xff] }
 0x1d9   :  { %9874 = vmatpush3.bf16.msra.mxu0 %v12439_v10  ;;  %1595 = vmatprep.mubr.f32.mxu0 %v8020_v6  ;;  %v7793_v10 = vld [vmem:[%s18559_s1 + $0x190] sm:$0xff] }
 0x1da   :  { %9877 = vmatprep.subr.msk.bf16.mxu0 %vm12511_vm4, %v12563_v31  ;;  %v7797_v31 = vld [vmem:[%s18559_s1 + $0x1b0] sm:$0xff] }
 0x1db   :  { %9577 = vmatpush3.bf16.msk.msra.mxu1 %vm12626_vm8, %v12968_v11 }
 0x1dc   :  { %9580 = vmatprep.subr.msk.bf16.mxu1 %vm12626_vm8, %v12984_v22  ;;  %1596 = vmatmul.mubr.f32.gmra.mrb[54].mxu0 %v8019_v8 }
 0x1dd   :  { %9879 = vmatpush3.bf16.msra.mxu0 %v12447_v14  ;;  %v7798_v14 = vld [vmem:[%s18559_s1 + $0x1b8] sm:$0xff]  ;;  %1767 = vmatprep.mubr.f32.mxu0 %v8080_v20 }
 0x1de   :  { %9882 = vmatprep.subr.msk.bf16.mxu0 %vm12626_vm8, %v12637_v32 }
 0x1df   :  { %9583 = vmatpush3.bf16.msk.msra.mxu1 %vm12626_vm8, %v13001_v39 }
 0x1e0   :  { %9630 = vmatprep.subr.msk.bf16.mxu1 %vm12511_vm4, %v12596_v53 }
 0x1e1   :  { %9885 = vmatpush3.bf16.msk.msra.mxu0 %vm12626_vm8, %v12605_v16  ;;  %v7802_v16 = vld [vmem:[%s18559_s1 + $0x1d8] sm:$0xff] }
 0x1e2   :  { %1105 = vmatmul.mubr.f32.vlgmr.msra.gmra.mrb[24].mxu1 %v7793_v10  ;;  %9888 = vmatprep.subr.msk.bf16.mxu0 %vm12626_vm8, %v12666_v54  ;;  %v12349_v54 = vmov 0   ;;  %v7877_v10 = vld [vmem:[%s18559_s1 + $0x270] sm:$0xff] }
 0x1e3   :  { %9633 = vmatpush3.bf16.msk.msra.mxu1 %vm12592_vm6, %v12473_v26  ;;  %1109 = vmatprep.mubr.f32.mxu1 %v7798_v14  ;;  %v8240_v32 = vpop.f32.mrb[0].mxu0  ;;  %v7938_v14 = vld [vmem:[%s18559_s1 + $0x298] sm:$0xff] }
 0x1e4   :  { %9636 = vmatprep.subr.msk.bf16.mxu1 %vm12511_vm4, %v12614_v3  ;;  %v8241_v0 = vpop.f32.mrb[1].mxu0  ;;  %11388 = vset.pattern.permute.xlu0 %v12349_v54 }
 0x1e5   :  { %9891 = vmatpush3.bf16.msk.msra.mxu0 %vm12626_vm8, %v12646_v44  ;;  %v13451_v9 = vadd.f32 %v8241_v0, %v8240_v32  ;;  %2026 = vperm.xlu0 %11388, %v2020_v5   ;;  %v2023_v44 = vld [vmem:[%s18560_s2 + $0x18] sm:$0xff]  ;;  %v7937_v5 = vld [vmem:[%s18559_s1 + $0x290] sm:$0xff] }
 0x1e6   :  { %1110 = vmatmul.mubr.f32.gmra.mrb[26].mxu1 %v7797_v31  ;;  %9894 = vmatprep.subr.msk.bf16.mxu0 %vm12626_vm8, %v12694_v7  ;;  %v7806_v7 = vld [vmem:[%s18559_s1 + $0x1f8] sm:$0xff] }
 0x1e7   :  { %9639 = vmatpush3.bf16.msk.msra.mxu1 %vm12592_vm6, %v12494_v43  ;;  %1114 = vmatprep.mubr.f32.mxu1 %v7802_v16  ;;  %v8243_v13 = vpop.f32.mrb[2].mxu0 }
 0x1e8   :  { %9642 = vmatprep.subr.msk.bf16.mxu1 %vm12511_vm4, %v12639_v34  ;;  %11389 = vset.pattern.permute.xlu1 %v12349_v54  ;;  %v8244_v17 = vpop.f32.mrb[3].mxu0 }
 0x1e9   :  { %9897 = vmatpush3.bf16.msk.msra.mxu0 %vm12626_vm8, %v12684_v1  ;;  %2041 = vperm.xlu0 %11388, %v2023_v44   ;;  %v13477_v21 = vadd.f32 %v8244_v17, %v8243_v13  ;;  %v7805_v1 = vld [vmem:[%s18559_s1 + $0x1f0] sm:$0xff] }
 0x1ea   :  { %1115 = vmatmul.mubr.f32.gmra.mrb[28].mxu1 %v7801_v12  ;;  %9900 = vmatprep.subr.msk.bf16.mxu0 %vm12626_vm8, %v12705_v18  ;;  %v7942_v12 = vld [vmem:[%s18559_s1 + $0x2b8] sm:$0xff]  ;;  %v7941_v13 = vld [vmem:[%s18559_s1 + $0x2b0] sm:$0xff] }
 0x1eb   :  { %9645 = vmatpush3.bf16.msk.msra.mxu1 %vm12592_vm6, %v12484_v36  ;;  %1119 = vmatprep.mubr.f32.mxu1 %v7806_v7  ;;  %v8246_v23 = vpop.f32.mrb[4].mxu0  ;;  %v7946_v7 = vld [vmem:[%s18559_s1 + $0x2d8] sm:$0xff] }
 0x1ec   :  { %9648 = vmatprep.subr.msk.bf16.mxu1 %vm12511_vm4, %v12668_v56  ;;  %2031 = vperm.xlu1 %11389, %v2021_v19   ;;  %v8247_v18 = vpop.f32.mrb[5].mxu0 }
 0x1ed   :  { %9903 = vmatpush3.bf16.msk.msra.mxu0 %vm12626_vm8, %v12714_v28  ;;  %v13500_v35 = vadd.f32 %v8247_v18, %v8246_v23 }
 0x1ee   :  { %1120 = vmatmul.mubr.f32.gmra.mrb[30].mxu1 %v7805_v1  ;;  %v7945_v1 = vld [vmem:[%s18559_s1 + $0x2d0] sm:$0xff] }
 0x1ef   :  { %9651 = vmatpush3.bf16.msk.msra.mxu1 %vm12592_vm6, %v12502_v52  ;;  %1291 = vmatprep.mubr.f32.mxu1 %v7866_v27  ;;  %v8249_v28 = vpop.f32.mrb[6].mxu0  ;;  %v7950_v27 = vld [vmem:[%s18559_s1 + $0x2f8] sm:$0xff] }
 0x1f0   :  { %9654 = vmatprep.subr.msk.bf16.mxu1 %vm12626_vm8, %v12912_v29  ;;  %1768 = vmatmul.mubr.f32.vlgmr.msra.gmra.mrb[56].mxu0 %v8079_v2  ;;  %v8250_v38 = vpop.f32.mrb[7].mxu0 }
 0x1f1   :  { %1772 = vmatprep.mubr.f32.mxu0 %v8084_v37  ;;  %2036 = vperm.xlu1 %11389, %v2022_v33   ;;  %v13517_v41 = vadd.f32 %v8250_v38, %v8249_v28  ;;  %v7949_v37 = vld [vmem:[%s18559_s1 + $0x2f0] sm:$0xff]  ;;  %v8010_v28 = vld [vmem:[%s18559_s1 + $0x318] sm:$0xff] }
 0x1f3   :  { %9657 = vmatpush3.bf16.msk.msra.mxu1 %vm12626_vm8, %v12914_v30 }
 0x1f4   :  { %9660 = vmatprep.subr.msk.bf16.mxu1 %vm12626_vm8, %v12938_v48  ;;  %1773 = vmatmul.mubr.f32.gmra.mrb[58].mxu0 %v8083_v40 }
 0x1f5   :  { %1777 = vmatprep.mubr.f32.mxu0 %v8088_v42 }
 0x1f7   :  { %9663 = vmatpush3.bf16.msk.msra.mxu1 %vm12626_vm8, %v12944_v51 }
 0x1f8   :  { %9666 = vmatprep.subr.msk.bf16.mxu1 %vm12626_vm8, %v12962_v25  ;;  %1778 = vmatmul.mubr.f32.gmra.mrb[60].mxu0 %v8087_v45 }
 0x1f9   :  { %1782 = vmatprep.mubr.f32.mxu0 %v8092_v46 }
 0x1fb   :  { %9669 = vmatpush3.bf16.msk.msra.mxu1 %vm12626_vm8, %v12968_v11 }
 0x1fc   :  { %9672 = vmatprep.subr.msk.bf16.mxu1 %vm12626_vm8, %v12984_v22  ;;  %1783 = vmatmul.mubr.f32.gmra.mrb[62].mxu0 %v8091_v47  ;;  %v8009_v47 = vld [vmem:[%s18559_s1 + $0x310] sm:$0xff] }
 0x1ff   :  { %9675 = vmatpush3.bf16.msk.msra.mxu1 %vm12626_vm8, %v13001_v39 }
 0x200   :  { %9722 = vmatprep.subr.msk.bf16.mxu1 %vm12511_vm4, %v12596_v53 }
 0x202   :  { %1292 = vmatmul.mubr.f32.vlgmr.msra.gmra.mrb[32].mxu1 %v7865_v49  ;;  %v8014_v49 = vld [vmem:[%s18559_s1 + $0x338] sm:$0xff] }
 0x203   :  { %9725 = vmatpush3.bf16.msk.msra.mxu1 %vm12592_vm6, %v12473_v26  ;;  %1296 = vmatprep.mubr.f32.mxu1 %v7870_v15  ;;  %v8328_v58 = vpop.f32.mrb[8].mxu0  ;;  %v8013_v15 = vld [vmem:[%s18559_s1 + $0x330] sm:$0xff] }
 0x204   :  { %9728 = vmatprep.subr.msk.bf16.mxu1 %vm12511_vm4, %v12614_v3  ;;  %v8329_v61 = vpop.f32.mrb[9].mxu0 }
 0x205   :  { %v13573_v62 = vadd.f32 %v8329_v61, %v8328_v58 }
 0x206   :  { %1297 = vmatmul.mubr.f32.gmra.mrb[34].mxu1 %v7869_v57 }
 0x207   :  { %9731 = vmatpush3.bf16.msk.msra.mxu1 %vm12592_vm6, %v12494_v43  ;;  %1301 = vmatprep.mubr.f32.mxu1 %v7874_v60  ;;  %v8331_v63 = vpop.f32.mrb[10].mxu0 }
 0x208   :  { %9734 = vmatprep.subr.msk.bf16.mxu1 %vm12511_vm4, %v12639_v34  ;;  %v8332_v6 = vpop.f32.mrb[11].mxu0 }
 0x209   :  { %v13587_v8 = vadd.f32 %v8332_v6, %v8331_v63 }
 0x20a   :  { %1302 = vmatmul.mubr.f32.gmra.mrb[36].mxu1 %v7873_v59 }
 0x20b   :  { %9737 = vmatpush3.bf16.msk.msra.mxu1 %vm12592_vm6, %v12484_v36  ;;  %1306 = vmatprep.mubr.f32.mxu1 %v7878_v4  ;;  %v8334_v20 = vpop.f32.mrb[12].mxu0 }
 0x20c   :  { %9740 = vmatprep.subr.msk.bf16.mxu1 %vm12511_vm4, %v12668_v56  ;;  %v8335_v31 = vpop.f32.mrb[13].mxu0 }
 0x20d   :  { %v13601_v32 = vadd.f32 %v8335_v31, %v8334_v20 }
 0x20e   :  { %1307 = vmatmul.mubr.f32.gmra.mrb[38].mxu1 %v7877_v10 }
 0x20f   :  { %9743 = vmatpush3.bf16.msk.msra.mxu1 %vm12592_vm6, %v12502_v52  ;;  %1478 = vmatprep.mubr.f32.mxu1 %v7938_v14  ;;  %v8337_v16 = vpop.f32.mrb[14].mxu0 }
 0x210   :  { %9746 = vmatprep.subr.msk.bf16.mxu1 %vm12626_vm8, %v12912_v29  ;;  %v8338_v0 = vpop.f32.mrb[15].mxu0 }
 0x211   :  { %v13609_v54 = vadd.f32 %v8338_v0, %v8337_v16 }
 0x213   :  { %9749 = vmatpush3.bf16.msk.msra.mxu1 %vm12626_vm8, %v12914_v30 }
 0x214   :  { %9752 = vmatprep.subr.msk.bf16.mxu1 %vm12626_vm8, %v12938_v48 }
 0x217   :  { %9755 = vmatpush3.bf16.msk.msra.mxu1 %vm12626_vm8, %v12944_v51 }
 0x218   :  { %9758 = vmatprep.subr.msk.bf16.mxu1 %vm12626_vm8, %v12962_v25 }
 0x21b   :  { %9761 = vmatpush3.bf16.msk.msra.mxu1 %vm12626_vm8, %v12968_v11 }
 0x21c   :  { %9764 = vmatprep.subr.msk.bf16.mxu1 %vm12626_vm8, %v12984_v22 }
 0x21f   :  { %9767 = vmatpush3.bf16.msk.msra.mxu1 %vm12626_vm8, %v13001_v39 }
 0x220   :  { %9814 = vmatprep.subr.msk.bf16.mxu1 %vm12511_vm4, %v12596_v53 }
 0x222   :  { %1479 = vmatmul.mubr.f32.vlgmr.msra.gmra.mrb[40].mxu1 %v7937_v5 }
 0x223   :  { %9817 = vmatpush3.bf16.msk.msra.mxu1 %vm12592_vm6, %v12473_v26  ;;  %1483 = vmatprep.mubr.f32.mxu1 %v7942_v12  ;;  %v8416_v44 = vpop.f32.mrb[16].mxu0  ;;  %v8090_v12 = vld [vmem:[%s18559_s1 + $0x3d8] sm:$0xff] }
 0x224   :  { %9820 = vmatprep.subr.msk.bf16.mxu1 %vm12511_vm4, %v12614_v3  ;;  %v8417_v17 = vpop.f32.mrb[17].mxu0 }
 0x225   :  { %v13653_v19 = vadd.f32 %v8417_v17, %v8416_v44 }
 0x226   :  { %1484 = vmatmul.mubr.f32.gmra.mrb[42].mxu1 %v7941_v13 }
 0x227   :  { %9823 = vmatpush3.bf16.msk.msra.mxu1 %vm12592_vm6, %v12494_v43  ;;  %1488 = vmatprep.mubr.f32.mxu1 %v7946_v7  ;;  %v8419_v23 = vpop.f32.mrb[18].mxu0  ;;  %v8089_v7 = vld [vmem:[%s18559_s1 + $0x3d0] sm:$0xff] }
 0x228   :  { %9826 = vmatprep.subr.msk.bf16.mxu1 %vm12511_vm4, %v12639_v34  ;;  %v8420_v18 = vpop.f32.mrb[19].mxu0 }
 0x229   :  { %v13667_v2 = vadd.f32 %v8420_v18, %v8419_v23 }
 0x22a   :  { %1489 = vmatmul.mubr.f32.gmra.mrb[44].mxu1 %v7945_v1  ;;  %v8094_v1 = vld [vmem:[%s18559_s1 + $0x3f8] sm:$0xff] }
 0x22b   :  { %9829 = vmatpush3.bf16.msk.msra.mxu1 %vm12592_vm6, %v12484_v36  ;;  %1493 = vmatprep.mubr.f32.mxu1 %v7950_v27  ;;  %v8422_v33 = vpop.f32.mrb[20].mxu0 }
 0x22c   :  { %9832 = vmatprep.subr.msk.bf16.mxu1 %vm12511_vm4, %v12668_v56  ;;  %v8423_v38 = vpop.f32.mrb[21].mxu0 }
 0x22d   :  { %v13681_v40 = vadd.f32 %v8423_v38, %v8422_v33 }
 0x22e   :  { %1494 = vmatmul.mubr.f32.gmra.mrb[46].mxu1 %v7949_v37 }
 0x22f   :  { %9835 = vmatpush3.bf16.msk.msra.mxu1 %vm12592_vm6, %v12502_v52  ;;  %1665 = vmatprep.mubr.f32.mxu1 %v8010_v28  ;;  %v8425_v42 = vpop.f32.mrb[22].mxu0 }
 0x230   :  { %9838 = vmatprep.subr.msk.bf16.mxu1 %vm12626_vm8, %v12912_v29  ;;  %v8426_v45 = vpop.f32.mrb[23].mxu0 }
 0x231   :  { %v13689_v46 = vadd.f32 %v8426_v45, %v8425_v42 }
 0x233   :  { %9841 = vmatpush3.bf16.msk.msra.mxu1 %vm12626_vm8, %v12914_v30 }
 0x234   :  { %9844 = vmatprep.subr.msk.bf16.mxu1 %vm12626_vm8, %v12938_v48 }
 0x237   :  { %9847 = vmatpush3.bf16.msk.msra.mxu1 %vm12626_vm8, %v12944_v51 }
 0x238   :  { %9850 = vmatprep.subr.msk.bf16.mxu1 %vm12626_vm8, %v12962_v25 }
 0x23b   :  { %9853 = vmatpush3.bf16.msk.msra.mxu1 %vm12626_vm8, %v12968_v11 }
 0x23c   :  { %9856 = vmatprep.subr.msk.bf16.mxu1 %vm12626_vm8, %v12984_v22 }
 0x23f   :  { %9859 = vmatpush3.bf16.msk.msra.mxu1 %vm12626_vm8, %v13001_v39 }
 0x240   :  { %9906 = vmatprep.subr.msk.bf16.mxu1 %vm12511_vm4, %v12596_v53  ;;  %v8018_v53 = vld [vmem:[%s18559_s1 + $0x358] sm:$0xff] }
 0x242   :  { %1666 = vmatmul.mubr.f32.vlgmr.msra.gmra.mrb[48].mxu1 %v8009_v47 }
 0x243   :  { %9909 = vmatpush3.bf16.msk.msra.mxu1 %vm12592_vm6, %v12473_v26  ;;  %1670 = vmatprep.mubr.f32.mxu1 %v8014_v49  ;;  %v8504_v57 = vpop.f32.mrb[24].mxu0  ;;  %v8017_v26 = vld [vmem:[%s18559_s1 + $0x350] sm:$0xff] }
 0x244   :  { %9912 = vmatprep.subr.msk.bf16.mxu1 %vm12511_vm4, %v12614_v3  ;;  %v8505_v58 = vpop.f32.mrb[25].mxu0  ;;  %v8022_v3 = vld [vmem:[%s18559_s1 + $0x378] sm:$0xff] }
 0x245   :  { %v13733_v60 = vadd.f32 %v8505_v58, %v8504_v57 }
 0x246   :  { %1671 = vmatmul.mubr.f32.gmra.mrb[50].mxu1 %v8013_v15 }
 0x247   :  { %9915 = vmatpush3.bf16.msk.msra.mxu1 %vm12592_vm6, %v12494_v43  ;;  %1675 = vmatprep.mubr.f32.mxu1 %v8018_v53  ;;  %v8507_v61 = vpop.f32.mrb[26].mxu0  ;;  %v8021_v43 = vld [vmem:[%s18559_s1 + $0x370] sm:$0xff] }
 0x248   :  { %9918 = vmatprep.subr.msk.bf16.mxu1 %vm12511_vm4, %v12639_v34  ;;  %v8508_v59 = vpop.f32.mrb[27].mxu0  ;;  %v8082_v34 = vld [vmem:[%s18559_s1 + $0x398] sm:$0xff] }
 0x249   :  { %v13747_v63 = vadd.f32 %v8508_v59, %v8507_v61 }
 0x24a   :  { %1676 = vmatmul.mubr.f32.gmra.mrb[52].mxu1 %v8017_v26 }
 0x24b   :  { %9921 = vmatpush3.bf16.msk.msra.mxu1 %vm12592_vm6, %v12484_v36  ;;  %1680 = vmatprep.mubr.f32.mxu1 %v8022_v3  ;;  %v8510_v4 = vpop.f32.mrb[28].mxu0 }
 0x24c   :  { %9924 = vmatprep.subr.msk.bf16.mxu1 %vm12511_vm4, %v12668_v56  ;;  %v8511_v6 = vpop.f32.mrb[29].mxu0 }
 0x24d   :  { %v13761_v10 = vadd.f32 %v8511_v6, %v8510_v4 }
 0x24e   :  { %1681 = vmatmul.mubr.f32.gmra.mrb[54].mxu1 %v8021_v43 }
 0x24f   :  { %9927 = vmatpush3.bf16.msk.msra.mxu1 %vm12592_vm6, %v12502_v52  ;;  %1852 = vmatprep.mubr.f32.mxu1 %v8082_v34  ;;  %v8513_v36 = vpop.f32.mrb[30].mxu0 }
 0x250   :  { %9930 = vmatprep.subr.msk.bf16.mxu1 %vm12626_vm8, %v12912_v29  ;;  %v8514_v55 = vpop.f32.mrb[31].mxu0 }
 0x251   :  { %v13769_v56 = vadd.f32 %v8514_v55, %v8513_v36 }
 0x253   :  { %9933 = vmatpush3.bf16.msk.msra.mxu1 %vm12626_vm8, %v12914_v30 }
 0x254   :  { %9936 = vmatprep.subr.msk.bf16.mxu1 %vm12626_vm8, %v12938_v48 }
 0x255   :  { %v8284_v20 = vpop.f32.mrb[0].mxu1 }
 0x256   :  { %v8285_v50 = vpop.f32.mrb[1].mxu1 }
 0x257   :  { %v8286_v52 = vadd.f32 %v8285_v50, %v8284_v20  ;;  %9939 = vmatpush3.bf16.msk.msra.mxu1 %vm12626_vm8, %v12944_v51 }
 0x258   :  { %9942 = vmatprep.subr.msk.bf16.mxu1 %vm12626_vm8, %v12962_v25  ;;  %v8081_v25 = vld [vmem:[%s18559_s1 + $0x390] sm:$0xff] }
 0x259   :  { %v13784_v29 = vadd.f32 %v8286_v52, %v13451_v9  ;;  %v8287_v14 = vpop.f32.mrb[2].mxu1 }
 0x25a   :  { %v8288_v30 = vpop.f32.mrb[3].mxu1 }
 0x25b   :  { %9945 = vmatpush3.bf16.msk.msra.mxu1 %vm12626_vm8, %v12968_v11  ;;  %v8289_v48 = vadd.f32 %v8288_v30, %v8287_v14  ;;  %v8086_v11 = vld [vmem:[%s18559_s1 + $0x3b8] sm:$0xff] }
 0x25c   :  { %9948 = vmatprep.subr.msk.bf16.mxu1 %vm12626_vm8, %v12984_v22 }
 0x25d   :  { %v13793_v51 = vadd.f32 %v8289_v48, %v13477_v21  ;;  %v8290_v31 = vpop.f32.mrb[4].mxu1 }
 0x25e   :  { %v8291_v16 = vpop.f32.mrb[5].mxu1 }
 0x25f   :  { %9951 = vmatpush3.bf16.msk.msra.mxu1 %vm12626_vm8, %v13001_v39  ;;  %v8292_v9 = vadd.f32 %v8291_v16, %v8290_v31 }
 0x261   :  { %v13805_v22 = vadd.f32 %v8292_v9, %v13500_v35  ;;  %v8293_v21 = vpop.f32.mrb[6].mxu1 }
 0x262   :  { %1853 = vmatmul.mubr.f32.vlgmr.msra.gmra.mrb[56].mxu1 %v8081_v25  ;;  %v8294_v0 = vpop.f32.mrb[7].mxu1 }
 0x263   :  { %1857 = vmatprep.mubr.f32.mxu1 %v8086_v11  ;;  %v8295_v39 = vadd.f32 %v8294_v0, %v8293_v21  ;;  %v8592_v5 = vpop.f32.mrb[32].mxu0 }
 0x264   :  { %v8593_v13 = vpop.f32.mrb[33].mxu0 }
 0x265   :  { %v13814_v44 = vadd.f32 %v8295_v39, %v13517_v41  ;;  %v13816_v35 = vadd.f32 %v8593_v13, %v8592_v5  ;;  %v8093_v41 = vld [vmem:[%s18559_s1 + $0x3f0] sm:$0xff]  ;;  %s12351_s1 = smov 32  }
 0x266   :  { %1858 = vmatmul.mubr.f32.gmra.mrb[58].mxu1 %v8085_v24 }
 0x267   :  { %1862 = vmatprep.mubr.f32.mxu1 %v8090_v12  ;;  %v8595_v17 = vpop.f32.mrb[34].mxu0 }
 0x268   :  { %v8596_v23 = vpop.f32.mrb[35].mxu0 }
 0x269   :  { %v13824_v27 = vadd.f32 %v8596_v23, %v8595_v17 }
 0x26a   :  { %1863 = vmatmul.mubr.f32.gmra.mrb[60].mxu1 %v8089_v7 }
 0x26b   :  { %1867 = vmatprep.mubr.f32.mxu1 %v8094_v1  ;;  %v8598_v18 = vpop.f32.mrb[36].mxu0 }
 0x26c   :  { %v8599_v37 = vpop.f32.mrb[37].mxu0 }
 0x26d   :  { %v13829_v33 = vadd.f32 %v8599_v37, %v8598_v18 }
 0x26e   :  { %1868 = vmatmul.mubr.f32.gmra.mrb[62].mxu1 %v8093_v41 }
 0x26f   :  { %v8601_v28 = vpop.f32.mrb[38].mxu0 }
 0x270   :  { %v8602_v38 = vpop.f32.mrb[39].mxu0 }
 0x271   :  { %v13831_v42 = vadd.f32 %v8602_v38, %v8601_v28 }
 0x275   :  { %v8372_v45 = vpop.f32.mrb[8].mxu1 }
 0x276   :  { %v8373_v47 = vpop.f32.mrb[9].mxu1 }
 0x277   :  { %v8374_v49 = vadd.f32 %v8373_v47, %v8372_v45 }
 0x279   :  { %v733_v15 = vadd.f32 %v8374_v49, %v13573_v62  ;;  %v8375_v57 = vpop.f32.mrb[10].mxu1 }
 0x27a   :  { %v8376_v53 = vpop.f32.mrb[11].mxu1 }
 0x27b   :  { %v8377_v58 = vadd.f32 %v8376_v53, %v8375_v57  ;;  %1877 = vrot.lane.b32.xlu0 %v733_v15, %s12350_s13 }
 0x27d   :  { %v738_v26 = vadd.f32 %v8377_v58, %v13587_v8  ;;  %v8378_v61 = vpop.f32.mrb[12].mxu1 }
 0x27e   :  { %v8379_v3 = vpop.f32.mrb[13].mxu1 }
 0x27f   :  { %v8380_v59 = vadd.f32 %v8379_v3, %v8378_v61  ;;  %1879 = vrot.lane.b32.xlu1 %v738_v26, %s12350_s13 }
 0x281   :  { %v743_v43 = vadd.f32 %v8380_v59, %v13601_v32  ;;  %v8381_v4 = vpop.f32.mrb[14].mxu1 }
 0x282   :  { %v8382_v34 = vpop.f32.mrb[15].mxu1 }
 0x283   :  { %v8383_v6 = vadd.f32 %v8382_v34, %v8381_v4  ;;  %1881 = vrot.lane.b32.xlu1 %v743_v43, %s12350_s13  ;;  %v8680_v36 = vpop.f32.mrb[40].mxu0 }
 0x284   :  { %v8681_v55 = vpop.f32.mrb[41].mxu0 }
 0x285   :  { %v748_v62 = vadd.f32 %v8383_v6, %v13609_v54  ;;  %v13837_v20 = vadd.f32 %v8681_v55, %v8680_v36 }
 0x287   :  { %1883 = vrot.lane.b32.xlu0 %v748_v62, %s12350_s13  ;;  %v8683_v50 = vpop.f32.mrb[42].mxu0 }
 0x288   :  { %v8684_v52 = vpop.f32.mrb[43].mxu0 }
 0x289   :  { %v13839_v8 = vadd.f32 %v8684_v52, %v8683_v50 }
 0x28b   :  { %v8686_v14 = vpop.f32.mrb[44].mxu0 }
 0x28c   :  { %v8687_v30 = vpop.f32.mrb[45].mxu0 }
 0x28d   :  { %v13841_v48 = vadd.f32 %v8687_v30, %v8686_v14 }
 0x28f   :  { %v8689_v32 = vpop.f32.mrb[46].mxu0 }
 0x290   :  { %v8690_v31 = vpop.f32.mrb[47].mxu0 }
 0x291   :  { %v13843_v16 = vadd.f32 %v8690_v31, %v8689_v32 }
 0x295   :  { %v8460_v25 = vpop.f32.mrb[16].mxu1 }
 0x296   :  { %v8461_v9 = vpop.f32.mrb[17].mxu1 }
 0x297   :  { %v8462_v11 = vadd.f32 %v8461_v9, %v8460_v25 }
 0x299   :  { %v920_v54 = vadd.f32 %v8462_v11, %v13653_v19  ;;  %v8463_v21 = vpop.f32.mrb[18].mxu1 }
 0x29a   :  { %v8464_v0 = vpop.f32.mrb[19].mxu1 }
 0x29b   :  { %v8465_v24 = vadd.f32 %v8464_v0, %v8463_v21  ;;  %1893 = vrot.lane.b32.xlu1 %v920_v54, %s12351_s1 }
 0x29d   :  { %v925_v39 = vadd.f32 %v8465_v24, %v13667_v2  ;;  %v8466_v5 = vpop.f32.mrb[20].mxu1 }
 0x29e   :  { %v8467_v12 = vpop.f32.mrb[21].mxu1 }
 0x29f   :  { %v8468_v13 = vadd.f32 %v8467_v12, %v8466_v5  ;;  %1895 = vrot.lane.b32.xlu0 %v925_v39, %s12351_s1 }
 0x2a1   :  { %v930_v7 = vadd.f32 %v8468_v13, %v13681_v40  ;;  %v8469_v17 = vpop.f32.mrb[22].mxu1 }
 0x2a2   :  { %v8470_v1 = vpop.f32.mrb[23].mxu1 }
 0x2a3   :  { %v8471_v23 = vadd.f32 %v8470_v1, %v8469_v17  ;;  %1897 = vrot.lane.b32.xlu1 %v930_v7, %s12351_s1  ;;  %v8768_v41 = vpop.f32.mrb[48].mxu0 }
 0x2a4   :  { %v8769_v18 = vpop.f32.mrb[49].mxu0 }
 0x2a5   :  { %v935_v19 = vadd.f32 %v8471_v23, %v13689_v46  ;;  %v13849_v37 = vadd.f32 %v8769_v18, %v8768_v41 }
 0x2a7   :  { %1899 = vrot.lane.b32.xlu0 %v935_v19, %s12351_s1  ;;  %v8771_v28 = vpop.f32.mrb[50].mxu0 }
 0x2a8   :  { %v8772_v38 = vpop.f32.mrb[51].mxu0 }
 0x2a9   :  { %v13851_v2 = vadd.f32 %v8772_v38, %v8771_v28 }
 0x2ab   :  { %v8774_v45 = vpop.f32.mrb[52].mxu0 }
 0x2ac   :  { %v8775_v47 = vpop.f32.mrb[53].mxu0 }
 0x2ad   :  { %v13853_v49 = vadd.f32 %v8775_v47, %v8774_v45 }
 0x2af   :  { %v8777_v40 = vpop.f32.mrb[54].mxu0 }
 0x2b0   :  { %v8778_v15 = vpop.f32.mrb[55].mxu0 }
 0x2b1   :  { %v13855_v57 = vadd.f32 %v8778_v15, %v8777_v40 }
 0x2b5   :  { %v8548_v53 = vpop.f32.mrb[24].mxu1 }
 0x2b6   :  { %v8549_v58 = vpop.f32.mrb[25].mxu1 }
 0x2b7   :  { %v8550_v26 = vadd.f32 %v8549_v58, %v8548_v53 }
 0x2b9   :  { %v1107_v46 = vadd.f32 %v8550_v26, %v13733_v60  ;;  %v8551_v61 = vpop.f32.mrb[26].mxu1 }
 0x2ba   :  { %v8552_v3 = vpop.f32.mrb[27].mxu1 }
 0x2bb   :  { %v8553_v59 = vadd.f32 %v8552_v3, %v8551_v61  ;;  %1909 = vrot.lane.b32.xlu1 %v1107_v46, %s12352_s14 }
 0x2bd   :  { %v1112_v43 = vadd.f32 %v8553_v59, %v13747_v63  ;;  %v8554_v4 = vpop.f32.mrb[28].mxu1 }
 0x2be   :  { %v8555_v34 = vpop.f32.mrb[29].mxu1 }
 0x2bf   :  { %v8556_v6 = vadd.f32 %v8555_v34, %v8554_v4  ;;  %1911 = vrot.lane.b32.xlu0 %v1112_v43, %s12352_s14 }
 0x2c1   :  { %v1117_v36 = vadd.f32 %v8556_v6, %v13761_v10  ;;  %v8557_v55 = vpop.f32.mrb[30].mxu1 }
 0x2c2   :  { %v8558_v62 = vpop.f32.mrb[31].mxu1 }
 0x2c3   :  { %v8559_v50 = vadd.f32 %v8558_v62, %v8557_v55  ;;  %1913 = vrot.lane.b32.xlu1 %v1117_v36, %s12352_s14  ;;  %v8856_v52 = vpop.f32.mrb[56].mxu0 }
 0x2c4   :  { %v8857_v14 = vpop.f32.mrb[57].mxu0 }
 0x2c5   :  { %v1122_v60 = vadd.f32 %v8559_v50, %v13769_v56  ;;  %v13861_v30 = vadd.f32 %v8857_v14, %v8856_v52 }
 0x2c7   :  { %1915 = vrot.lane.b32.xlu0 %v1122_v60, %s12352_s14  ;;  %v8859_v32 = vpop.f32.mrb[58].mxu0 }
 0x2c8   :  { %v8860_v31 = vpop.f32.mrb[59].mxu0 }
 0x2c9   :  { %v13863_v63 = vadd.f32 %v8860_v31, %v8859_v32 }
 0x2cb   :  { %v8862_v25 = vpop.f32.mrb[60].mxu0 }
 0x2cc   :  { %v8863_v9 = vpop.f32.mrb[61].mxu0 }
 0x2cd   :  { %v13865_v11 = vadd.f32 %v8863_v9, %v8862_v25 }
 0x2cf   :  { %v8865_v10 = vpop.f32.mrb[62].mxu0 }
 0x2d0   :  { %v8866_v54 = vpop.f32.mrb[63].mxu0 }
 0x2d1   :  { %v13867_v21 = vadd.f32 %v8866_v54, %v8865_v10 }
 0x2d5   :  { %v8636_v0 = vpop.f32.mrb[32].mxu1 }
 0x2d6   :  { %v8637_v24 = vpop.f32.mrb[33].mxu1 }
 0x2d7   :  { %v8638_v39 = vadd.f32 %v8637_v24, %v8636_v0 }
 0x2d9   :  { %v1294_v56 = vadd.f32 %v8638_v39, %v13816_v35  ;;  %v8639_v5 = vpop.f32.mrb[34].mxu1 }
 0x2da   :  { %v8640_v12 = vpop.f32.mrb[35].mxu1 }
 0x2db   :  { %v8641_v13 = vadd.f32 %v8640_v12, %v8639_v5  ;;  %1925 = vrot.lane.b32.xlu1 %v1294_v56, %s12353_s15 }
 0x2dd   :  { %v1299_v7 = vadd.f32 %v8641_v13, %v13824_v27  ;;  %v8642_v17 = vpop.f32.mrb[36].mxu1 }
 0x2de   :  { %v8643_v1 = vpop.f32.mrb[37].mxu1 }
 0x2df   :  { %v8644_v23 = vadd.f32 %v8643_v1, %v8642_v17  ;;  %1927 = vrot.lane.b32.xlu0 %v1299_v7, %s12353_s15  ;;  %v2032_v7 = vpop.permute.xlu1 %2031  ;;  %v2027_v17 = vpop.permute.xlu0 %2026 }
 0x2e1   :  { %v1304_v41 = vadd.f32 %v8644_v23, %v13829_v33  ;;  %v8645_v18 = vpop.f32.mrb[38].mxu1 }
 0x2e2   :  { %v8646_v19 = vpop.f32.mrb[39].mxu1 }
 0x2e3   :  { %v8647_v28 = vadd.f32 %v8646_v19, %v8645_v18  ;;  %1929 = vrot.lane.b32.xlu1 %v1304_v41, %s12353_s15  ;;  %v13897_v1 = vpop.permute.xlu1 %2036 }
 0x2e5   :  { %v1309_v35 = vadd.f32 %v8647_v28, %v13831_v42 }
 0x2e7   :  { %1931 = vrot.lane.b32.xlu0 %v1309_v35, %s12353_s15 }
 0x2f1   :  { %v1880_v23 = vpop.permute.xlu1 %1879 }
 0x2f5   :  { %v8724_v38 = vpop.f32.mrb[40].mxu1  ;;  %v1882_v18 = vpop.permute.xlu1 %1881 }
 0x2f6   :  { %v8725_v45 = vpop.f32.mrb[41].mxu1 }
 0x2f7   :  { %v8726_v47 = vadd.f32 %v8725_v45, %v8724_v38 }
 0x2f9   :  { %v1481_v27 = vadd.f32 %v8726_v47, %v13837_v20  ;;  %v8727_v40 = vpop.f32.mrb[42].mxu1 }
 0x2fa   :  { %v8728_v15 = vpop.f32.mrb[43].mxu1 }
 0x2fb   :  { %v8729_v53 = vadd.f32 %v8728_v15, %v8727_v40  ;;  %1941 = vrot.lane.b32.xlu1 %v1481_v27, %s12354_s16 }
 0x2fd   :  { %v1486_v33 = vadd.f32 %v8729_v53, %v13839_v8  ;;  %v8730_v58 = vpop.f32.mrb[44].mxu1 }
 0x2fe   :  { %v8731_v26 = vpop.f32.mrb[45].mxu1 }
 0x2ff   :  { %v8732_v46 = vadd.f32 %v8731_v26, %v8730_v58  ;;  %1943 = vrot.lane.b32.xlu0 %v1486_v33, %s12354_s16 }
 0x301   :  { %v1491_v42 = vadd.f32 %v8732_v46, %v13841_v48  ;;  %v8733_v61 = vpop.f32.mrb[46].mxu1 }
 0x302   :  { %v8734_v3 = vpop.f32.mrb[47].mxu1 }
 0x303   :  { %v8735_v59 = vadd.f32 %v8734_v3, %v8733_v61  ;;  %1945 = vrot.lane.b32.xlu1 %v1491_v42, %s12354_s16 }
 0x305   :  { %v1496_v43 = vadd.f32 %v8735_v59, %v13843_v16 }
 0x307   :  { %1947 = vrot.lane.b32.xlu0 %v1496_v43, %s12354_s16 }
 0x315   :  { %v8812_v20 = vpop.f32.mrb[48].mxu1 }
 0x316   :  { %v8813_v4 = vpop.f32.mrb[49].mxu1 }
 0x317   :  { %v8814_v34 = vadd.f32 %v8813_v4, %v8812_v20 }
 0x319   :  { %v1668_v6 = vadd.f32 %v8814_v34, %v13849_v37  ;;  %v8815_v36 = vpop.f32.mrb[50].mxu1 }
 0x31a   :  { %v8816_v8 = vpop.f32.mrb[51].mxu1 }
 0x31b   :  { %v8817_v55 = vadd.f32 %v8816_v8, %v8815_v36  ;;  %1957 = vrot.lane.b32.xlu1 %v1668_v6, %s12355_s17  ;;  %v1987_v6 = vsel %vm1985_vm9, %v13793_v51, %v1880_v23 }
 0x31d   :  { %v1673_v48 = vadd.f32 %v8817_v55, %v13851_v2  ;;  %v8818_v62 = vpop.f32.mrb[52].mxu1 }
 0x31e   :  { %v8819_v50 = vpop.f32.mrb[53].mxu1 }
 0x31f   :  { %v8820_v52 = vadd.f32 %v8819_v50, %v8818_v62  ;;  %1959 = vrot.lane.b32.xlu0 %v1673_v48, %s12355_s17 }
 0x321   :  { %v1678_v16 = vadd.f32 %v8820_v52, %v13853_v49  ;;  %v8821_v14 = vpop.f32.mrb[54].mxu1 }
 0x322   :  { %v8822_v60 = vpop.f32.mrb[55].mxu1 }
 0x323   :  { %v8823_v32 = vadd.f32 %v8822_v60, %v8821_v14  ;;  %1961 = vrot.lane.b32.xlu1 %v1678_v16, %s12355_s17  ;;  %v1988_v16 = vsel %vm1985_vm9, %v13805_v22, %v1882_v18 }
 0x325   :  { %v1683_v37 = vadd.f32 %v8823_v32, %v13855_v57 }
 0x327   :  { %1963 = vrot.lane.b32.xlu0 %v1683_v37, %s12355_s17 }
 0x335   :  { %v8900_v31 = vpop.f32.mrb[56].mxu1 }
 0x336   :  { %v8901_v25 = vpop.f32.mrb[57].mxu1 }
 0x337   :  { %v8902_v9 = vadd.f32 %v8901_v25, %v8900_v31 }
 0x339   :  { %v1855_v2 = vadd.f32 %v8902_v9, %v13861_v30  ;;  %v8903_v10 = vpop.f32.mrb[58].mxu1 }
 0x33a   :  { %v8904_v54 = vpop.f32.mrb[59].mxu1 }
 0x33b   :  { %v8905_v0 = vadd.f32 %v8904_v54, %v8903_v10  ;;  %1973 = vrot.lane.b32.xlu1 %v1855_v2, %s12356_s18 }
 0x33d   :  { %v1860_v49 = vadd.f32 %v8905_v0, %v13863_v63  ;;  %v8906_v24 = vpop.f32.mrb[60].mxu1  ;;  %v13899_v63 = vpop.permute.xlu0 %2041 }
 0x33e   :  { %v8907_v39 = vpop.f32.mrb[61].mxu1 }
 0x33f   :  { %v8908_v56 = vadd.f32 %v8907_v39, %v8906_v24  ;;  %1975 = vrot.lane.b32.xlu0 %v1860_v49, %s12356_s18 }
 0x341   :  { %v1865_v57 = vadd.f32 %v8908_v56, %v13865_v11  ;;  %v8909_v5 = vpop.f32.mrb[62].mxu1  ;;  %v1878_v41 = vpop.permute.xlu0 %1877 }
 0x342   :  { %v8910_v12 = vpop.f32.mrb[63].mxu1  ;;  %v1894_v11 = vpop.permute.xlu1 %1893  ;;  %v1986_v3 = vsel %vm1985_vm9, %v13784_v29, %v1878_v41 }
 0x343   :  { %v8911_v13 = vadd.f32 %v8910_v12, %v8909_v5  ;;  %1977 = vrot.lane.b32.xlu1 %v1865_v57, %s12356_s18  ;;  %v1991_v59 = vsel %vm1990_vm10, %v1986_v3, %v1894_v11 }
 0x345   :  { %v1870_v30 = vadd.f32 %v8911_v13, %v13867_v21  ;;  %v1884_v19 = vpop.permute.xlu0 %1883 }
 0x346   :  { %v1898_v35 = vpop.permute.xlu1 %1897  ;;  %v1989_v9 = vsel %vm1985_vm9, %v13814_v44, %v1884_v19 }
 0x347   :  { %1979 = vrot.lane.b32.xlu0 %v1870_v30, %s12356_s18  ;;  %v1993_v51 = vsel %vm1990_vm10, %v1988_v16, %v1898_v35 }
 0x349   :  { %v1896_v28 = vpop.permute.xlu0 %1895 }
 0x34a   :  { %v1910_v45 = vpop.permute.xlu1 %1909  ;;  %v1992_v8 = vsel %vm1990_vm10, %v1987_v6, %v1896_v28 }
 0x34b   :  { %v1996_v4 = vsel %vm1995_vm11, %v1991_v59, %v1910_v45 }
 0x34d   :  { %v1900_v38 = vpop.permute.xlu0 %1899 }
 0x34e   :  { %v1914_v27 = vpop.permute.xlu1 %1913  ;;  %v1994_v22 = vsel %vm1990_vm10, %v1989_v9, %v1900_v38 }
 0x34f   :  { %v1998_v31 = vsel %vm1995_vm11, %v1993_v51, %v1914_v27 }
 0x351   :  { %v1912_v47 = vpop.permute.xlu0 %1911 }
 0x352   :  { %v1926_v40 = vpop.permute.xlu1 %1925  ;;  %v1997_v62 = vsel %vm1995_vm11, %v1992_v8, %v1912_v47 }
 0x353   :  { %v2001_v34 = vsel %vm2000_vm12, %v1996_v4, %v1926_v40 }
 0x355   :  { %v1916_v21 = vpop.permute.xlu0 %1915 }
 0x356   :  { %v1930_v53 = vpop.permute.xlu1 %1929  ;;  %v1999_v0 = vsel %vm1995_vm11, %v1994_v22, %v1916_v21 }
 0x357   :  { %v2003_v2 = vsel %vm2000_vm12, %v1998_v31, %v1930_v53 }
 0x359   :  { %v1928_v15 = vpop.permute.xlu0 %1927 }
 0x35a   :  { %v2002_v52 = vsel %vm2000_vm12, %v1997_v62, %v1928_v15 }
 0x35d   :  { %v1932_v33 = vpop.permute.xlu0 %1931 }
 0x35e   :  { %v2004_v57 = vsel %vm2000_vm12, %v1999_v0, %v1932_v33 }
 0x36d   :  { %v1942_v58 = vpop.permute.xlu1 %1941 }
 0x36e   :  { %v2006_v36 = vsel %vm2005_vm13, %v2001_v34, %v1942_v58 }
 0x371   :  { %v1944_v26 = vpop.permute.xlu0 %1943 }
 0x372   :  { %v2007_v14 = vsel %vm2005_vm13, %v2002_v52, %v1944_v26 }
 0x375   :  { %v1946_v46 = vpop.permute.xlu1 %1945 }
 0x376   :  { %v2008_v54 = vsel %vm2005_vm13, %v2003_v2, %v1946_v46 }
 0x379   :  { %v1948_v42 = vpop.permute.xlu0 %1947 }
 0x37a   :  { %v2009_v44 = vsel %vm2005_vm13, %v2004_v57, %v1948_v42 }
 0x38d   :  { %v1958_v61 = vpop.permute.xlu1 %1957 }
 0x38e   :  { %v2011_v29 = vsel %vm2010_vm14, %v2006_v36, %v1958_v61  ;;  %v13976_v36 = vld [vmem:[%s18561_s6 + $0x2] ss:$0 sm:$0xff] }
 0x38f   :  { %vm2069_vm2 = vcmp.gt.f32.partialorder %v13976_v36, 0.5 }
 0x391   :  { %v1960_v43 = vpop.permute.xlu0 %1959 }
 0x392   :  { %v2012_v60 = vsel %vm2010_vm14, %v2007_v14, %v1960_v43 }
 0x395   :  { %v1962_v20 = vpop.permute.xlu1 %1961 }
 0x396   :  { %v2013_v49 = vsel %vm2010_vm14, %v2008_v54, %v1962_v20 }
 0x399   :  { %v1964_v55 = vpop.permute.xlu0 %1963 }
 0x39a   :  { %v2014_v30 = vsel %vm2010_vm14, %v2009_v44, %v1964_v55  ;;  %v2896_v44 = vld [vmem:[%s18562_s5 + $0x8] sm:$0xff] }
 0x3ad   :  { %v1974_v48 = vpop.permute.xlu1 %1973 }
 0x3ae   :  { %v2016_v50 = vsel %vm2015_vm15, %v2011_v29, %v1974_v48  ;;  %v13983_v48 = vld [vmem:[%s18561_s6 + $0x3] ss:$0 sm:$0xff] }
 0x3af   :  { %v2044_v32 = vadd.f32 %v2027_v17, %v2016_v50  ;;  %vm2075_vm3 = vcmp.gt.f32.partialorder %v13983_v48, 0.5 }
 0x3b1   :  { %v1976_v37 = vpop.permute.xlu0 %1975  ;;  %v2048_v24 = vmax.f32 %v2044_v32, 0.0 }
 0x3b2   :  { %v2017_v25 = vsel %vm2015_vm15, %v2012_v60, %v1976_v37 }
 0x3b3   :  { %v2045_v10 = vadd.f32 %v2032_v7, %v2017_v25 }
 0x3b5   :  { %v2049_v39 = vmax.f32 %v2045_v10, 0.0  ;;  %v1978_v56 = vpop.permute.xlu1 %1977 }
 0x3b6   :  { %v2018_v5 = vsel %vm2015_vm15, %v2013_v49, %v1978_v56 }
 0x3b7   :  { %v13931_v12 = vpack.c.bf16 %v2049_v39, %v2048_v24  ;;  %v11395_v13 = vpack.i.bf16 %v2049_v39, %v2048_v24  ;;  %v2046_v7 = vadd.f32 %v13897_v1, %v2018_v5  ;;  %v8151_v1 = vld [vmem:[%s18561_s6] ss:$0 sm:$0xff] }
 0x3b8   :  { %vm2057_vm0 = vcmp.gt.f32.partialorder %v8151_v1, 0.5 }
 0x3b9   :  { %v1980_v17 = vpop.permute.xlu0 %1979  ;;  %11396 = vrot.lane.b32.xlu0 %v11395_v13, %s12357_s3  ;;  %11391 = vrot.lane.b32.xlu1 %v11395_v13, %s12353_s15  ;;  %v2050_v18 = vmax.f32 %v2046_v7, 0.0 }
 0x3ba   :  { %v2019_v23 = vsel %vm2015_vm15, %v2014_v30, %v1980_v17 }
 0x3bb   :  { %v2047_v41 = vadd.f32 %v13899_v63, %v2019_v23  ;;  %v8152_v63 = vld [vmem:[%s18561_s6 + $0x1] ss:$0 sm:$0xff] }
 0x3bc   :  { %vm2063_vm1 = vcmp.gt.f32.partialorder %v8152_v63, 0.5 }
 0x3bd   :  { %v2051_v19 = vmax.f32 %v2047_v41, 0.0 }
 0x3bf   :  { %v13939_v11 = vpack.c.bf16 %v2051_v19, %v2050_v18  ;;  %v11405_v28 = vpack.i.bf16 %v2051_v19, %v2050_v18 }
 0x3c1   :  { %11406 = vrot.lane.b32.xlu0 %v11405_v28, %s12357_s3  ;;  %11401 = vrot.lane.b32.xlu1 %v11405_v28, %s12353_s15 }
 0x3c5   :  { %11411 = vrot.lane.b32.xlu0 %v11395_v13, %s12355_s17 }
 0x3c9   :  { %11416 = vrot.lane.b32.xlu0 %v11395_v13, %s12358_s19 }
 0x3cd   :  { %11421 = vrot.lane.b32.xlu0 %v11405_v28, %s12355_s17 }
 0x3d1   :  { %11446 = vrot.lane.b32.xlu0 %v11405_v28, %s12358_s19 }
 0x3d5   :  { %11456 = vrot.lane.b32.xlu0 %v11395_v13, %s12356_s18 }
 0x3d9   :  { %11466 = vrot.lane.b32.xlu0 %v11395_v13, %s12359_s20 }
 0x3dd   :  { %11471 = vrot.lane.b32.xlu0 %v11405_v28, %s12356_s18 }
 0x3e1   :  { %11476 = vrot.lane.b32.xlu0 %v11405_v28, %s12359_s20 }
 0x42b   :  { %v11397_v35 = vpop.permute.xlu0 %11396  ;;  %v11392_v38 = vpop.permute.xlu1 %11391 }
 0x42c   :  { %v11399_v45 = vunpack.i.h.bf16 %v11397_v35  ;;  %v11398_v47 = vunpack.i.l.bf16 %v11397_v35  ;;  %v11394_v27 = vunpack.i.h.bf16 %v11392_v38  ;;  %v11393_v21 = vunpack.i.l.bf16 %v11392_v38 }
 0x42e   :  { %v2097_v40 = vsel %vm2057_vm0, %v11394_v27, 0.0  ;;  %v2096_v15 = vsel %vm2057_vm0, %v11393_v21, 0.0 }
 0x42f   :  { %v2109_v53 = vsel %vm2063_vm1, %v11399_v45, %v2097_v40  ;;  %v2108_v33 = vsel %vm2063_vm1, %v11398_v47, %v2096_v15 }
 0x430   :  { %v13961_v58 = vpack.c.bf16 %v2109_v53, %v2108_v33  ;;  %v11425_v26 = vpack.i.bf16 %v2109_v53, %v2108_v33  ;;  %v14042_v53 = vld [vmem:[%s18561_s6 + $0x4] ss:$0 sm:$0xff] }
 0x431   :  { %vm2081_vm4 = vcmp.gt.f32.partialorder %v14042_v53, 0.5  ;;  %v2256_v53 = vld [vmem:[%s18563_s4] sm:$0xff] }
 0x432   :  { %11426 = vrot.lane.b32.xlu1 %v11425_v26, %s12355_s17  ;;  %9953 = vmatprep.subr.bf16.mxu0 %v13961_v58 }
 0x433   :  { %9985 = vmatprep.subr.bf16.mxu1 %v13961_v58  ;;  %v11407_v46 = vpop.permute.xlu0 %11406  ;;  %v11402_v42 = vpop.permute.xlu1 %11401  ;;  %9955 = vmatpush3.bf16.msra.mxu0 %v13931_v12 }
 0x434   :  { %v11409_v61 = vunpack.i.h.bf16 %v11407_v46  ;;  %v11408_v3 = vunpack.i.l.bf16 %v11407_v46  ;;  %v11404_v59 = vunpack.i.h.bf16 %v11402_v42  ;;  %v11403_v43 = vunpack.i.l.bf16 %v11402_v42  ;;  %9987 = vmatpush3.bf16.msra.mxu1 %v13931_v12 }
 0x436   :  { %v2099_v20 = vsel %vm2057_vm0, %v11404_v59, 0.0  ;;  %v2098_v4 = vsel %vm2057_vm0, %v11403_v43, 0.0  ;;  %11431 = vrot.lane.b32.xlu1 %v11425_v26, %s12358_s19 }
 0x437   :  { %v2111_v34 = vsel %vm2063_vm1, %v11409_v61, %v2099_v20  ;;  %v2110_v6 = vsel %vm2063_vm1, %v11408_v3, %v2098_v4  ;;  %v11412_v8 = vpop.permute.xlu0 %11411  ;;  %v14060_v61 = vld [vmem:[%s18561_s6 + $0x5] ss:$0 sm:$0xff] }
 0x438   :  { %v13978_v29 = vpack.c.bf16 %v2111_v34, %v2110_v6  ;;  %v11435_v55 = vpack.i.bf16 %v2111_v34, %v2110_v6  ;;  %v11414_v62 = vunpack.i.h.bf16 %v11412_v8  ;;  %v11413_v50 = vunpack.i.l.bf16 %v11412_v8  ;;  %v2257_v34 = vld [vmem:[%s18563_s4 + $0x8] sm:$0xff] }
 0x439   :  { %v8158_v6 = vld [vmem:[%s18563_s4 + $0x28] sm:$0xff]  ;;  %2324 = vmatprep.mubr.f32.mxu0 %v2257_v34  ;;  %vm2087_vm5 = vcmp.gt.f32.partialorder %v14060_v61, 0.5  ;;  %v8157_v61 = vld [vmem:[%s18563_s4 + $0x20] sm:$0xff] }
 0x43a   :  { %11436 = vrot.lane.b32.xlu1 %v11435_v55, %s12355_s17  ;;  %9957 = vmatprep.subr.bf16.mxu0 %v13978_v29  ;;  %v2121_v51 = vsel %vm2069_vm2, %v11414_v62, 0.0  ;;  %v2120_v60 = vsel %vm2069_vm2, %v11413_v50, 0.0 }
 0x43b   :  { %9989 = vmatprep.subr.bf16.mxu1 %v13978_v29  ;;  %v11417_v52 = vpop.permute.xlu0 %11416  ;;  %9959 = vmatpush3.bf16.msra.mxu0 %v13939_v11 }
 0x43c   :  { %v11419_v16 = vunpack.i.h.bf16 %v11417_v52  ;;  %v11418_v14 = vunpack.i.l.bf16 %v11417_v52  ;;  %9991 = vmatpush3.bf16.msra.mxu1 %v13939_v11  ;;  %2404 = vmatprep.mubr.f32.mxu1 %v8158_v6 }
 0x43e   :  { %11441 = vrot.lane.b32.xlu1 %v11435_v55, %s12358_s19  ;;  %v2132_v32 = vsel %vm2075_vm3, %v11418_v14, %v2120_v60  ;;  %v2133_v37 = vsel %vm2075_vm3, %v11419_v16, %v2121_v51 }
 0x43f   :  { %v11422_v31 = vpop.permute.xlu0 %11421  ;;  %v11480_v25 = vpack.i.bf16 %v2133_v37, %v2132_v32  ;;  %v14001_v9 = vpack.c.bf16 %v2133_v37, %v2132_v32 }
 0x440   :  { %v11424_v2 = vunpack.i.h.bf16 %v11422_v31  ;;  %v11423_v10 = vunpack.i.l.bf16 %v11422_v31 }
 0x441   :  { %11481 = vrot.lane.b32.xlu0 %v11480_v25, %s12356_s18 }
 0x442   :  { %11451 = vrot.lane.b32.xlu1 %v11425_v26, %s12356_s18  ;;  %v2123_v49 = vsel %vm2069_vm2, %v11424_v2, 0.0  ;;  %v2122_v24 = vsel %vm2069_vm2, %v11423_v10, 0.0  ;;  %v2895_v10 = vld [vmem:[%s18562_s5] sm:$0xff] }
 0x443   :  { %v11447_v22 = vpop.permute.xlu0 %11446 }
 0x444   :  { %v11449_v54 = vunpack.i.h.bf16 %v11447_v22  ;;  %v11448_v0 = vunpack.i.l.bf16 %v11447_v22 }
 0x445   :  { %11486 = vrot.lane.b32.xlu0 %v11480_v25, %s12359_s20 }
 0x446   :  { %11461 = vrot.lane.b32.xlu1 %v11425_v26, %s12359_s20  ;;  %v2134_v39 = vsel %vm2075_vm3, %v11448_v0, %v2122_v24  ;;  %v2135_v56 = vsel %vm2075_vm3, %v11449_v54, %v2123_v49 }
 0x447   :  { %v11500_v57 = vpack.i.bf16 %v2135_v56, %v2134_v39  ;;  %v14015_v5 = vpack.c.bf16 %v2135_v56, %v2134_v39  ;;  %v11457_v23 = vpop.permute.xlu0 %11456 }
 0x448   :  { %v11459_v43 = vunpack.i.h.bf16 %v11457_v23  ;;  %v11458_v20 = vunpack.i.l.bf16 %v11457_v23 }
 0x449   :  { %11501 = vrot.lane.b32.xlu0 %v11500_v57, %s12356_s18 }
 0x44a   :  { %11491 = vrot.lane.b32.xlu1 %v11435_v55, %s12356_s18  ;;  %v2145_v50 = vsel %vm2081_vm4, %v11459_v43, 0.0  ;;  %v2144_v52 = vsel %vm2081_vm4, %v11458_v20, 0.0 }
 0x44b   :  { %v11467_v27 = vpop.permute.xlu0 %11466 }
 0x44c   :  { %v11469_v36 = vunpack.i.h.bf16 %v11467_v27  ;;  %v11468_v8 = vunpack.i.l.bf16 %v11467_v27 }
 0x44d   :  { %11526 = vrot.lane.b32.xlu0 %v11500_v57, %s12359_s20 }
 0x44e   :  { %11496 = vrot.lane.b32.xlu1 %v11435_v55, %s12359_s20  ;;  %v2156_v51 = vsel %vm2087_vm5, %v11468_v8, %v2144_v52  ;;  %v2157_v60 = vsel %vm2087_vm5, %v11469_v36, %v2145_v50 }
 0x44f   :  { %v11472_v4 = vpop.permute.xlu0 %11471  ;;  %v14095_v0 = vpack.c.bf16 %v2157_v60, %v2156_v51 }
 0x450   :  { %v11474_v49 = vunpack.i.h.bf16 %v11472_v4  ;;  %v11473_v24 = vunpack.i.l.bf16 %v11472_v4 }
 0x451   :  { %2904 = vperm.xlu0 %11388, %v2896_v44  }
 0x453   :  { %v11477_v31 = vpop.permute.xlu0 %11476 }
 0x454   :  { %v11479_v39 = vunpack.i.h.bf16 %v11477_v31  ;;  %v11478_v56 = vunpack.i.l.bf16 %v11477_v31 }
 0x4a4   :  { %v11427_v13 = vpop.permute.xlu1 %11426 }
 0x4a5   :  { %v11429_v30 = vunpack.i.h.bf16 %v11427_v13  ;;  %v11428_v7 = vunpack.i.l.bf16 %v11427_v13 }
 0x4a7   :  { %v2169_v19 = vsel %vm2069_vm2, %v11429_v30, 0.0  ;;  %v2168_v28 = vsel %vm2069_vm2, %v11428_v7, 0.0  ;;  %v2147_v30 = vsel %vm2081_vm4, %v11474_v49, 0.0  ;;  %v2146_v7 = vsel %vm2081_vm4, %v11473_v24, 0.0 }
 0x4a8   :  { %v11432_v17 = vpop.permute.xlu1 %11431 }
 0x4a9   :  { %v11434_v41 = vunpack.i.h.bf16 %v11432_v17  ;;  %v11433_v18 = vunpack.i.l.bf16 %v11432_v17 }
 0x4ab   :  { %v14030_v1 = vsel %vm2075_vm3, %v11433_v18, %v2168_v28  ;;  %v14034_v63 = vsel %vm2075_vm3, %v11434_v41, %v2169_v19  ;;  %v2158_v41 = vsel %vm2087_vm5, %v11478_v56, %v2146_v7  ;;  %v2159_v18 = vsel %vm2087_vm5, %v11479_v39, %v2147_v30 }
 0x4ac   :  { %v11437_v35 = vpop.permute.xlu1 %11436  ;;  %v11505_v38 = vpack.i.bf16 %v14034_v63, %v14030_v1  ;;  %v14123_v27 = vpack.c.bf16 %v14034_v63, %v14030_v1 }
 0x4ad   :  { %v11439_v45 = vunpack.i.h.bf16 %v11437_v35  ;;  %v11438_v47 = vunpack.i.l.bf16 %v11437_v35 }
 0x4ae   :  { %11506 = vrot.lane.b32.xlu1 %v11505_v38, %s12356_s18 }
 0x4af   :  { %v2171_v33 = vsel %vm2069_vm2, %v11439_v45, 0.0  ;;  %v2170_v26 = vsel %vm2069_vm2, %v11438_v47, 0.0  ;;  %v14119_v47 = vpack.c.bf16 %v2159_v18, %v2158_v41  ;;  %v2259_v41 = vld [vmem:[%s18563_s4 + $0x18] sm:$0xff] }
 0x4b0   :  { %v11442_v21 = vpop.permute.xlu1 %11441  ;;  %v8160_v18 = vld [vmem:[%s18563_s4 + $0x38] sm:$0xff] }
 0x4b1   :  { %v11444_v40 = vunpack.i.h.bf16 %v11442_v21  ;;  %v11443_v15 = vunpack.i.l.bf16 %v11442_v21 }
 0x4b2   :  { %11511 = vrot.lane.b32.xlu1 %v11505_v38, %s12359_s20 }
 0x4b3   :  { %v14051_v46 = vsel %vm2075_vm3, %v11443_v15, %v2170_v26  ;;  %v14055_v42 = vsel %vm2075_vm3, %v11444_v40, %v2171_v33  ;;  %v11482_v1 = vpop.permute.xlu0 %11481 }
 0x4b4   :  { %v11452_v3 = vpop.permute.xlu1 %11451  ;;  %v11515_v59 = vpack.i.bf16 %v14055_v42, %v14051_v46  ;;  %v14133_v21 = vpack.c.bf16 %v14055_v42, %v14051_v46  ;;  %v11484_v15 = vunpack.i.h.bf16 %v11482_v1  ;;  %v11483_v33 = vunpack.i.l.bf16 %v11482_v1  ;;  %v8161_v1 = vld [vmem:[%s18563_s4 + $0x40] sm:$0xff] }
 0x4b5   :  { %v11454_v55 = vunpack.i.h.bf16 %v11452_v3  ;;  %v11453_v48 = vunpack.i.l.bf16 %v11452_v3 }
 0x4b6   :  { %11516 = vrot.lane.b32.xlu1 %v11515_v59, %s12356_s18  ;;  %v2217_v20 = vsel %vm2081_vm4, %v11484_v15, 0.0  ;;  %v2216_v4 = vsel %vm2081_vm4, %v11483_v33, 0.0  ;;  %v8168_v15 = vld [vmem:[%s18563_s4 + $0x78] sm:$0xff]  ;;  %v8163_v33 = vld [vmem:[%s18563_s4 + $0x50] sm:$0xff] }
 0x4b7   :  { %v2193_v32 = vsel %vm2081_vm4, %v11454_v55, 0.0  ;;  %v2192_v37 = vsel %vm2081_vm4, %v11453_v48, 0.0  ;;  %v11487_v63 = vpop.permute.xlu0 %11486 }
 0x4b8   :  { %v11462_v62 = vpop.permute.xlu1 %11461  ;;  %v11489_v46 = vunpack.i.h.bf16 %v11487_v63  ;;  %v11488_v42 = vunpack.i.l.bf16 %v11487_v63  ;;  %v8165_v63 = vld [vmem:[%s18563_s4 + $0x60] sm:$0xff] }
 0x4b9   :  { %v11464_v16 = vunpack.i.h.bf16 %v11462_v62  ;;  %v11463_v14 = vunpack.i.l.bf16 %v11462_v62 }
 0x4ba   :  { %11521 = vrot.lane.b32.xlu1 %v11515_v59, %s12359_s20  ;;  %v2228_v36 = vsel %vm2087_vm5, %v11488_v42, %v2216_v4  ;;  %v2229_v8 = vsel %vm2087_vm5, %v11489_v46, %v2217_v20  ;;  %v8170_v46 = vld [vmem:[%s18563_s4 + $0x88] sm:$0xff]  ;;  %v8176_v20 = vld [vmem:[%s18563_s4 + $0xb8] sm:$0xff]  ;;  %v8171_v4 = vld [vmem:[%s18563_s4 + $0x90] sm:$0xff] }
 0x4bb   :  { %v2204_v25 = vsel %vm2087_vm5, %v11463_v14, %v2192_v37  ;;  %v2205_v2 = vsel %vm2087_vm5, %v11464_v16, %v2193_v32  ;;  %v11502_v26 = vpop.permute.xlu0 %11501  ;;  %v14159_v51 = vpack.c.bf16 %v2229_v8, %v2228_v36  ;;  %v8174_v42 = vld [vmem:[%s18563_s4 + $0xa8] sm:$0xff] }
 0x4bc   :  { %v14093_v22 = vpack.c.bf16 %v2205_v2, %v2204_v25  ;;  %v11492_v54 = vpop.permute.xlu1 %11491  ;;  %v11504_v60 = vunpack.i.h.bf16 %v11502_v26  ;;  %v11503_v32 = vunpack.i.l.bf16 %v11502_v26  ;;  %v8167_v26 = vld [vmem:[%s18563_s4 + $0x70] sm:$0xff] }
 0x4bd   :  { %v11494_v57 = vunpack.i.h.bf16 %v11492_v54  ;;  %v11493_v44 = vunpack.i.l.bf16 %v11492_v54 }
 0x4be   :  { %2899 = vperm.xlu1 %11389, %v2895_v10   ;;  %9961 = vmatprep.subr.bf16.mxu0 %v14093_v22  ;;  %v2219_v54 = vsel %vm2081_vm4, %v11504_v60, 0.0  ;;  %v2218_v49 = vsel %vm2081_vm4, %v11503_v32, 0.0 }
 0x4bf   :  { %9993 = vmatprep.subr.bf16.mxu1 %v14093_v22  ;;  %9963 = vmatpush3.bf16.msra.mxu0 %v14095_v0  ;;  %v2195_v19 = vsel %vm2081_vm4, %v11494_v57, 0.0  ;;  %v2194_v28 = vsel %vm2081_vm4, %v11493_v44, 0.0  ;;  %v11527_v62 = vpop.permute.xlu0 %11526 }
 0x4c0   :  { %9995 = vmatpush3.bf16.msra.mxu1 %v14095_v0  ;;  %v11497_v13 = vpop.permute.xlu1 %11496  ;;  %v11529_v37 = vunpack.i.h.bf16 %v11527_v62  ;;  %v11528_v31 = vunpack.i.l.bf16 %v11527_v62 }
 0x4c1   :  { %v11499_v17 = vunpack.i.h.bf16 %v11497_v13  ;;  %v11498_v23 = vunpack.i.l.bf16 %v11497_v13 }
 0x4c2   :  { %v2230_v56 = vsel %vm2087_vm5, %v11528_v31, %v2218_v49  ;;  %v2231_v57 = vsel %vm2087_vm5, %v11529_v37, %v2219_v54 }
 0x4c3   :  { %v2206_v35 = vsel %vm2087_vm5, %v11498_v23, %v2194_v28  ;;  %v2207_v38 = vsel %vm2087_vm5, %v11499_v17, %v2195_v19  ;;  %v14183_v23 = vpack.c.bf16 %v2231_v57, %v2230_v56  ;;  %v2258_v19 = vld [vmem:[%s18563_s4 + $0x10] sm:$0xff] }
 0x4c4   :  { %v14117_v45 = vpack.c.bf16 %v2207_v38, %v2206_v35  ;;  %v8159_v28 = vld [vmem:[%s18563_s4 + $0x30] sm:$0xff]  ;;  %v8162_v35 = vld [vmem:[%s18563_s4 + $0x48] sm:$0xff] }
 0x4c5   :  { %v8166_v38 = vld [vmem:[%s18563_s4 + $0x68] sm:$0xff] }
 0x4c6   :  { %9965 = vmatprep.subr.bf16.mxu0 %v14117_v45  ;;  %9997 = vmatprep.subr.bf16.mxu1 %v14117_v45 }
 0x4c7   :  { %9967 = vmatpush3.bf16.msra.mxu0 %v14119_v47  ;;  %9999 = vmatpush3.bf16.msra.mxu1 %v14119_v47 }
 0x4c8   :  { %9969 = vmatprep.subr.bf16.mxu0 %v14123_v27  ;;  %10001 = vmatprep.subr.bf16.mxu1 %v14123_v27 }
 0x4cb   :  { %9971 = vmatpush3.bf16.msra.mxu0 %v14001_v9  ;;  %10003 = vmatpush3.bf16.msra.mxu1 %v14001_v9 }
 0x4cc   :  { %9973 = vmatprep.subr.bf16.mxu0 %v14133_v21  ;;  %10005 = vmatprep.subr.bf16.mxu1 %v14133_v21 }
 0x4cf   :  { %9975 = vmatpush3.bf16.msra.mxu0 %v14015_v5  ;;  %10007 = vmatpush3.bf16.msra.mxu1 %v14015_v5 }
 0x4d0   :  { %v14379_v60 = vpop.permute.xlu0 %2904 }
 0x520   :  { %v11507_v40 = vpop.permute.xlu1 %11506 }
 0x521   :  { %v11509_v3 = vunpack.i.h.bf16 %v11507_v40  ;;  %v11508_v59 = vunpack.i.l.bf16 %v11507_v40  ;;  %v8164_v40 = vld [vmem:[%s18563_s4 + $0x58] sm:$0xff] }
 0x523   :  { %v2241_v55 = vsel %vm2081_vm4, %v11509_v3, 0.0  ;;  %v2240_v48 = vsel %vm2081_vm4, %v11508_v59, 0.0  ;;  %v8169_v3 = vld [vmem:[%s18563_s4 + $0x80] sm:$0xff] }
 0x524   :  { %v11512_v43 = vpop.permute.xlu1 %11511  ;;  %v8173_v59 = vld [vmem:[%s18563_s4 + $0xa0] sm:$0xff] }
 0x525   :  { %v11514_v34 = vunpack.i.h.bf16 %v11512_v43  ;;  %v11513_v6 = vunpack.i.l.bf16 %v11512_v43  ;;  %v8172_v43 = vld [vmem:[%s18563_s4 + $0x98] sm:$0xff] }
 0x527   :  { %v2252_v50 = vsel %vm2087_vm5, %v11513_v6, %v2240_v48  ;;  %v2253_v52 = vsel %vm2087_vm5, %v11514_v34, %v2241_v55  ;;  %v8182_v34 = vld [vmem:[%s18563_s4 + $0xe8] sm:$0xff] }
 0x528   :  { %v14157_v16 = vpack.c.bf16 %v2253_v52, %v2252_v50  ;;  %v11517_v14 = vpop.permute.xlu1 %11516 }
 0x529   :  { %v11519_v25 = vunpack.i.h.bf16 %v11517_v14  ;;  %v11518_v2 = vunpack.i.l.bf16 %v11517_v14 }
 0x52a   :  { %9977 = vmatprep.subr.bf16.mxu0 %v14157_v16  ;;  %10009 = vmatprep.subr.bf16.mxu1 %v14157_v16 }
 0x52b   :  { %9979 = vmatpush3.bf16.msra.mxu0 %v14159_v51  ;;  %10011 = vmatpush3.bf16.msra.mxu1 %v14159_v51  ;;  %v2243_v44 = vsel %vm2081_vm4, %v11519_v25, 0.0  ;;  %v2242_v13 = vsel %vm2081_vm4, %v11518_v2, 0.0 }
 0x52c   :  { %v11522_v10 = vpop.permute.xlu1 %11521 }
 0x52d   :  { %v11524_v24 = vunpack.i.h.bf16 %v11522_v10  ;;  %v11523_v39 = vunpack.i.l.bf16 %v11522_v10 }
 0x52f   :  { %v2254_v30 = vsel %vm2087_vm5, %v11523_v39, %v2242_v13  ;;  %v2255_v7 = vsel %vm2087_vm5, %v11524_v24, %v2243_v44 }
 0x530   :  { %v14181_v17 = vpack.c.bf16 %v2255_v7, %v2254_v30 }
 0x532   :  { %9981 = vmatprep.subr.bf16.mxu0 %v14181_v17  ;;  %10013 = vmatprep.subr.bf16.mxu1 %v14181_v17 }
 0x533   :  { %9983 = vmatpush3.bf16.msra.mxu0 %v14183_v23  ;;  %10015 = vmatpush3.bf16.msra.mxu1 %v14183_v23 }
 0x534   :  { %10017 = vmatprep.subr.bf16.mxu0 %v13961_v58  ;;  %10049 = vmatprep.subr.bf16.mxu1 %v13961_v58 }
 0x536   :  { %2325 = vmatmul.mubr.f32.vlgmr.msra.gmra.mrb[64].mxu0 %v2256_v53  ;;  %2405 = vmatmul.mubr.f32.vlgmr.msra.gmra.mrb[64].mxu1 %v8157_v61 }
 0x537   :  { %10019 = vmatpush3.bf16.msra.mxu0 %v13931_v12  ;;  %10051 = vmatpush3.bf16.msra.mxu1 %v13931_v12 }
 0x538   :  { %10021 = vmatprep.subr.bf16.mxu0 %v13978_v29  ;;  %10053 = vmatprep.subr.bf16.mxu1 %v13978_v29 }
 0x539   :  { %2329 = vmatprep.mubr.f32.mxu0 %v2259_v41  ;;  %2409 = vmatprep.mubr.f32.mxu1 %v8160_v18 }
 0x53a   :  { %2330 = vmatmul.mubr.f32.gmra.mrb[66].mxu0 %v2258_v19  ;;  %2410 = vmatmul.mubr.f32.gmra.mrb[66].mxu1 %v8159_v28 }
 0x53b   :  { %10023 = vmatpush3.bf16.msra.mxu0 %v13939_v11  ;;  %10055 = vmatpush3.bf16.msra.mxu1 %v13939_v11 }
 0x53c   :  { %10025 = vmatprep.subr.bf16.mxu0 %v14093_v22  ;;  %10057 = vmatprep.subr.bf16.mxu1 %v14093_v22 }
 0x53d   :  { %2484 = vmatprep.mubr.f32.mxu0 %v8162_v35  ;;  %2564 = vmatprep.mubr.f32.mxu1 %v8166_v38  ;;  %v14375_v8 = vpop.permute.xlu1 %2899 }
 0x53f   :  { %10027 = vmatpush3.bf16.msra.mxu0 %v14095_v0  ;;  %10059 = vmatpush3.bf16.msra.mxu1 %v14095_v0 }
 0x540   :  { %10029 = vmatprep.subr.bf16.mxu0 %v14117_v45  ;;  %10061 = vmatprep.subr.bf16.mxu1 %v14117_v45 }
 0x543   :  { %10031 = vmatpush3.bf16.msra.mxu0 %v14119_v47  ;;  %10063 = vmatpush3.bf16.msra.mxu1 %v14119_v47 }
 0x544   :  { %10033 = vmatprep.subr.bf16.mxu0 %v14123_v27  ;;  %10065 = vmatprep.subr.bf16.mxu1 %v14123_v27 }
 0x547   :  { %10035 = vmatpush3.bf16.msra.mxu0 %v14001_v9  ;;  %10067 = vmatpush3.bf16.msra.mxu1 %v14001_v9 }
 0x548   :  { %10037 = vmatprep.subr.bf16.mxu0 %v14133_v21  ;;  %10069 = vmatprep.subr.bf16.mxu1 %v14133_v21 }
 0x54b   :  { %10039 = vmatpush3.bf16.msra.mxu0 %v14015_v5  ;;  %10071 = vmatpush3.bf16.msra.mxu1 %v14015_v5 }
 0x54c   :  { %10041 = vmatprep.subr.bf16.mxu0 %v14157_v16  ;;  %10073 = vmatprep.subr.bf16.mxu1 %v14157_v16 }
 0x54f   :  { %10043 = vmatpush3.bf16.msra.mxu0 %v14159_v51  ;;  %10075 = vmatpush3.bf16.msra.mxu1 %v14159_v51 }
 0x550   :  { %10045 = vmatprep.subr.bf16.mxu0 %v14181_v17  ;;  %10077 = vmatprep.subr.bf16.mxu1 %v14181_v17 }
 0x553   :  { %10047 = vmatpush3.bf16.msra.mxu0 %v14183_v23  ;;  %10079 = vmatpush3.bf16.msra.mxu1 %v14183_v23 }
 0x554   :  { %10081 = vmatprep.subr.bf16.mxu0 %v13961_v58  ;;  %10113 = vmatprep.subr.bf16.mxu1 %v13961_v58 }
 0x556   :  { %2485 = vmatmul.mubr.f32.vlgmr.msra.gmra.mrb[68].mxu0 %v8161_v1  ;;  %2565 = vmatmul.mubr.f32.vlgmr.msra.gmra.mrb[68].mxu1 %v8165_v63 }
 0x557   :  { %10083 = vmatpush3.bf16.msra.mxu0 %v13931_v12  ;;  %10115 = vmatpush3.bf16.msra.mxu1 %v13931_v12 }
 0x558   :  { %10085 = vmatprep.subr.bf16.mxu0 %v13978_v29  ;;  %10117 = vmatprep.subr.bf16.mxu1 %v13978_v29 }
 0x559   :  { %2489 = vmatprep.mubr.f32.mxu0 %v8164_v40  ;;  %2569 = vmatprep.mubr.f32.mxu1 %v8168_v15 }
 0x55a   :  { %2490 = vmatmul.mubr.f32.gmra.mrb[70].mxu0 %v8163_v33  ;;  %2570 = vmatmul.mubr.f32.gmra.mrb[70].mxu1 %v8167_v26 }
 0x55b   :  { %10087 = vmatpush3.bf16.msra.mxu0 %v13939_v11  ;;  %10119 = vmatpush3.bf16.msra.mxu1 %v13939_v11 }
 0x55c   :  { %10089 = vmatprep.subr.bf16.mxu0 %v14093_v22  ;;  %10121 = vmatprep.subr.bf16.mxu1 %v14093_v22 }
 0x55d   :  { %2644 = vmatprep.mubr.f32.mxu0 %v8170_v46  ;;  %2724 = vmatprep.mubr.f32.mxu1 %v8174_v42 }
 0x55f   :  { %10091 = vmatpush3.bf16.msra.mxu0 %v14095_v0  ;;  %10123 = vmatpush3.bf16.msra.mxu1 %v14095_v0 }
 0x560   :  { %10093 = vmatprep.subr.bf16.mxu0 %v14117_v45  ;;  %10125 = vmatprep.subr.bf16.mxu1 %v14117_v45 }
 0x563   :  { %10095 = vmatpush3.bf16.msra.mxu0 %v14119_v47  ;;  %10127 = vmatpush3.bf16.msra.mxu1 %v14119_v47 }
 0x564   :  { %10097 = vmatprep.subr.bf16.mxu0 %v14123_v27  ;;  %10129 = vmatprep.subr.bf16.mxu1 %v14123_v27 }
 0x567   :  { %10099 = vmatpush3.bf16.msra.mxu0 %v14001_v9  ;;  %10131 = vmatpush3.bf16.msra.mxu1 %v14001_v9 }
 0x568   :  { %10101 = vmatprep.subr.bf16.mxu0 %v14133_v21  ;;  %10133 = vmatprep.subr.bf16.mxu1 %v14133_v21 }
 0x56b   :  { %10103 = vmatpush3.bf16.msra.mxu0 %v14015_v5  ;;  %10135 = vmatpush3.bf16.msra.mxu1 %v14015_v5 }
 0x56c   :  { %10105 = vmatprep.subr.bf16.mxu0 %v14157_v16  ;;  %10137 = vmatprep.subr.bf16.mxu1 %v14157_v16 }
 0x56f   :  { %10107 = vmatpush3.bf16.msra.mxu0 %v14159_v51  ;;  %10139 = vmatpush3.bf16.msra.mxu1 %v14159_v51 }
 0x570   :  { %10109 = vmatprep.subr.bf16.mxu0 %v14181_v17  ;;  %10141 = vmatprep.subr.bf16.mxu1 %v14181_v17 }
 0x573   :  { %10111 = vmatpush3.bf16.msra.mxu0 %v14183_v23  ;;  %10143 = vmatpush3.bf16.msra.mxu1 %v14183_v23 }
 0x574   :  { %10145 = vmatprep.subr.bf16.mxu0 %v13961_v58  ;;  %10177 = vmatprep.subr.bf16.mxu1 %v13961_v58  ;;  %v8175_v58 = vld [vmem:[%s18563_s4 + $0xb0] sm:$0xff] }
 0x576   :  { %2645 = vmatmul.mubr.f32.vlgmr.msra.gmra.mrb[72].mxu0 %v8169_v3  ;;  %2725 = vmatmul.mubr.f32.vlgmr.msra.gmra.mrb[72].mxu1 %v8173_v59 }
 0x577   :  { %10147 = vmatpush3.bf16.msra.mxu0 %v13931_v12  ;;  %10179 = vmatpush3.bf16.msra.mxu1 %v13931_v12  ;;  %v8178_v12 = vld [vmem:[%s18563_s4 + $0xc8] sm:$0xff] }
 0x578   :  { %10149 = vmatprep.subr.bf16.mxu0 %v13978_v29  ;;  %10181 = vmatprep.subr.bf16.mxu1 %v13978_v29  ;;  %v8181_v29 = vld [vmem:[%s18563_s4 + $0xe0] sm:$0xff] }
 0x579   :  { %2649 = vmatprep.mubr.f32.mxu0 %v8172_v43  ;;  %2729 = vmatprep.mubr.f32.mxu1 %v8176_v20 }
 0x57a   :  { %2650 = vmatmul.mubr.f32.gmra.mrb[74].mxu0 %v8171_v4  ;;  %2730 = vmatmul.mubr.f32.gmra.mrb[74].mxu1 %v8175_v58 }
 0x57b   :  { %10151 = vmatpush3.bf16.msra.mxu0 %v13939_v11  ;;  %10183 = vmatpush3.bf16.msra.mxu1 %v13939_v11  ;;  %v8177_v11 = vld [vmem:[%s18563_s4 + $0xc0] sm:$0xff] }
 0x57c   :  { %10153 = vmatprep.subr.bf16.mxu0 %v14093_v22  ;;  %10185 = vmatprep.subr.bf16.mxu1 %v14093_v22  ;;  %v8179_v22 = vld [vmem:[%s18563_s4 + $0xd0] sm:$0xff] }
 0x57d   :  { %2804 = vmatprep.mubr.f32.mxu0 %v8178_v12  ;;  %2884 = vmatprep.mubr.f32.mxu1 %v8182_v34 }
 0x57f   :  { %10155 = vmatpush3.bf16.msra.mxu0 %v14095_v0  ;;  %10187 = vmatpush3.bf16.msra.mxu1 %v14095_v0  ;;  %v8183_v0 = vld [vmem:[%s18563_s4 + $0xf0] sm:$0xff] }
 0x580   :  { %10157 = vmatprep.subr.bf16.mxu0 %v14117_v45  ;;  %10189 = vmatprep.subr.bf16.mxu1 %v14117_v45 }
 0x583   :  { %10159 = vmatpush3.bf16.msra.mxu0 %v14119_v47  ;;  %10191 = vmatpush3.bf16.msra.mxu1 %v14119_v47 }
 0x584   :  { %10161 = vmatprep.subr.bf16.mxu0 %v14123_v27  ;;  %10193 = vmatprep.subr.bf16.mxu1 %v14123_v27 }
 0x587   :  { %10163 = vmatpush3.bf16.msra.mxu0 %v14001_v9  ;;  %10195 = vmatpush3.bf16.msra.mxu1 %v14001_v9  ;;  %v8180_v9 = vld [vmem:[%s18563_s4 + $0xd8] sm:$0xff] }
 0x588   :  { %10165 = vmatprep.subr.bf16.mxu0 %v14133_v21  ;;  %10197 = vmatprep.subr.bf16.mxu1 %v14133_v21 }
 0x58b   :  { %10167 = vmatpush3.bf16.msra.mxu0 %v14015_v5  ;;  %10199 = vmatpush3.bf16.msra.mxu1 %v14015_v5  ;;  %v8184_v5 = vld [vmem:[%s18563_s4 + $0xf8] sm:$0xff] }
 0x58c   :  { %10169 = vmatprep.subr.bf16.mxu0 %v14157_v16  ;;  %10201 = vmatprep.subr.bf16.mxu1 %v14157_v16 }
 0x58f   :  { %10171 = vmatpush3.bf16.msra.mxu0 %v14159_v51  ;;  %10203 = vmatpush3.bf16.msra.mxu1 %v14159_v51 }
 0x590   :  { %10173 = vmatprep.subr.bf16.mxu0 %v14181_v17  ;;  %10205 = vmatprep.subr.bf16.mxu1 %v14181_v17 }
 0x593   :  { %10175 = vmatpush3.bf16.msra.mxu0 %v14183_v23  ;;  %10207 = vmatpush3.bf16.msra.mxu1 %v14183_v23 }
 0x596   :  { %2805 = vmatmul.mubr.f32.vlgmr.msra.gmra.mrb[76].mxu0 %v8177_v11  ;;  %2885 = vmatmul.mubr.f32.vlgmr.msra.gmra.mrb[76].mxu1 %v8181_v29 }
 0x597   :  { %2809 = vmatprep.mubr.f32.mxu0 %v8180_v9  ;;  %2889 = vmatprep.mubr.f32.mxu1 %v8184_v5 }
 0x59a   :  { %2810 = vmatmul.mubr.f32.gmra.mrb[78].mxu0 %v8179_v22  ;;  %2890 = vmatmul.mubr.f32.gmra.mrb[78].mxu1 %v8183_v0 }
 0x609   :  { %v8944_v45 = vpop.f32.mrb[64].mxu0  ;;  %v8982_v47 = vpop.f32.mrb[64].mxu1 }
 0x60a   :  { %v8945_v27 = vpop.f32.mrb[65].mxu0  ;;  %v8983_v21 = vpop.f32.mrb[65].mxu1 }
 0x60b   :  { %v8946_v6 = vadd.f32 %v8945_v27, %v8944_v45  ;;  %v8984_v36 = vadd.f32 %v8983_v21, %v8982_v47 }
 0x60d   :  { %v8947_v55 = vpop.f32.mrb[66].mxu0  ;;  %v8985_v48 = vpop.f32.mrb[66].mxu1  ;;  %v2907_v52 = vadd.f32 %v8946_v6, %v14375_v8  ;;  %v2908_v16 = vadd.f32 %v8984_v36, %v14375_v8 }
 0x60e   :  { %v8948_v62 = vpop.f32.mrb[67].mxu0  ;;  %v8986_v50 = vpop.f32.mrb[67].mxu1 }
 0x60f   :  { %v8949_v14 = vadd.f32 %v8948_v62, %v8947_v55  ;;  %v8987_v51 = vadd.f32 %v8986_v50, %v8985_v48  ;;  %v14383_v31 = vmax.f32 %v2907_v52, 0.0  ;;  %v14385_v25 = vmax.f32 %v2908_v16, 0.0 }
 0x611   :  { %v2915_v32 = vadd.f32 %v8949_v14, %v14379_v60  ;;  %v2916_v37 = vadd.f32 %v8987_v51, %v14379_v60  ;;  %19050 = vst [vmem:[#allocation3_spill] sm:$0xff] %v14383_v31  ;;  %19051 = vst [vmem:[#allocation4_spill] sm:$0xff] %v14385_v25 }
 0x613   :  { %v14387_v2 = vmax.f32 %v2915_v32, 0.0  ;;  %v14389_v10 = vmax.f32 %v2916_v37, 0.0 }
 0x615   :  { %19052 = vst [vmem:[#allocation5_spill] sm:$0xff] %v14387_v2  ;;  %19053 = vst [vmem:[#allocation6_spill] sm:$0xff] %v14389_v10  ;;  %v11535_v54 = vpack.i.bf16 %v14389_v10, %v14385_v25  ;;  %v14395_v49 = vpack.c.bf16 %v14389_v10, %v14385_v25  ;;  %v14399_v24 = vpack.c.bf16 %v14387_v2, %v14383_v31 }
 0x616   :  { %v11545_v39 = vpack.i.bf16 %v14387_v2, %v14383_v31 }
 0x617   :  { %19054 = vst [vmem:[#allocation7_spill] sm:$0xff] %v14395_v49  ;;  %19055 = vst [vmem:[#allocation8_spill] sm:$0xff] %v14399_v24  ;;  %11536 = vrot.lane.b32.xlu0 %v11535_v54, %s12357_s3  ;;  %11531 = vrot.lane.b32.xlu1 %v11535_v54, %s12353_s15 }
 0x618   :  { %10209 = vmatprep.subr.bf16.mxu0 %v14395_v49 }
 0x619   :  { %10211 = vmatpush1.bf16.msra.mxu0 %v14399_v24 }
 0x61b   :  { %11546 = vrot.lane.b32.xlu1 %v11545_v39, %s12357_s3  ;;  %11541 = vrot.lane.b32.xlu0 %v11545_v39, %s12353_s15 }
 0x61f   :  { %11551 = vrot.lane.b32.xlu1 %v11545_v39, %s12355_s17  ;;  %11556 = vrot.lane.b32.xlu0 %v11535_v54, %s12355_s17 }
 0x623   :  { %11561 = vrot.lane.b32.xlu1 %v11545_v39, %s12358_s19  ;;  %11566 = vrot.lane.b32.xlu0 %v11535_v54, %s12358_s19 }
 0x627   :  { %11571 = vrot.lane.b32.xlu1 %v11545_v39, %s12356_s18  ;;  %11576 = vrot.lane.b32.xlu0 %v11535_v54, %s12356_s18 }
 0x629   :  { %v9020_v56 = vpop.f32.mrb[68].mxu0  ;;  %v9058_v57 = vpop.f32.mrb[68].mxu1 }
 0x62a   :  { %v9021_v44 = vpop.f32.mrb[69].mxu0  ;;  %v9059_v13 = vpop.f32.mrb[69].mxu1 }
 0x62b   :  { %v9022_v30 = vadd.f32 %v9021_v44, %v9020_v56  ;;  %v9060_v7 = vadd.f32 %v9059_v13, %v9058_v57  ;;  %11586 = vrot.lane.b32.xlu1 %v11535_v54, %s12359_s20  ;;  %11581 = vrot.lane.b32.xlu0 %v11545_v39, %s12359_s20 }
 0x62d   :  { %v9023_v17 = vpop.f32.mrb[70].mxu0  ;;  %v9061_v23 = vpop.f32.mrb[70].mxu1  ;;  %v2909_v41 = vadd.f32 %v9022_v30, %v14375_v8  ;;  %v2910_v18 = vadd.f32 %v9060_v7, %v14375_v8 }
 0x62e   :  { %v9024_v53 = vpop.f32.mrb[71].mxu0  ;;  %v9062_v61 = vpop.f32.mrb[71].mxu1 }
 0x62f   :  { %v9025_v19 = vadd.f32 %v9024_v53, %v9023_v17  ;;  %v9063_v28 = vadd.f32 %v9062_v61, %v9061_v23  ;;  %v14421_v1 = vmax.f32 %v2909_v41, 0.0  ;;  %v14423_v63 = vmax.f32 %v2910_v18, 0.0 }
 0x631   :  { %v2917_v35 = vadd.f32 %v9025_v19, %v14379_v60  ;;  %v2918_v38 = vadd.f32 %v9063_v28, %v14379_v60  ;;  %19056 = vst [vmem:[#allocation9_spill] sm:$0xff] %v14421_v1 }
 0x633   :  { %v14425_v40 = vmax.f32 %v2917_v35, 0.0  ;;  %v14427_v15 = vmax.f32 %v2918_v38, 0.0 }
 0x635   :  { %19057 = vst [vmem:[#allocation10_spill] sm:$0xff] %v14425_v40  ;;  %v14431_v33 = vpack.c.bf16 %v14427_v15, %v14423_v63  ;;  %v11590_v26 = vpack.i.bf16 %v14425_v40, %v14421_v1  ;;  %v14437_v46 = vpack.i.bf16 %v14427_v15, %v14423_v63  ;;  %v14441_v42 = vpack.c.bf16 %v14425_v40, %v14421_v1 }
 0x637   :  { %19058 = vst [vmem:[#allocation11_spill] sm:$0xff] %v14431_v33  ;;  %19059 = vst [vmem:[#allocation12_spill] sm:$0xff] %v14437_v46  ;;  %10241 = vmatprep.subr.bf16.mxu1 %v14431_v33  ;;  %11591 = vrot.lane.b32.xlu1 %v11590_v26, %s12353_s15 }
 0x638   :  { %19060 = vst [vmem:[#allocation13_spill] sm:$0xff] %v14441_v42  ;;  %11596 = vrot.lane.b32.xlu0 %v14437_v46, %s12353_s15  ;;  %10243 = vmatpush1.bf16.msra.mxu1 %v14441_v42 }
 0x63b   :  { %11601 = vrot.lane.b32.xlu1 %v11590_v26, %s12357_s3 }
 0x63c   :  { %11606 = vrot.lane.b32.xlu0 %v14437_v46, %s12357_s3 }
 0x63f   :  { %11611 = vrot.lane.b32.xlu1 %v11590_v26, %s12355_s17 }
 0x640   :  { %11616 = vrot.lane.b32.xlu0 %v14437_v46, %s12358_s19 }
 0x643   :  { %11621 = vrot.lane.b32.xlu1 %v14437_v46, %s12355_s17 }
 0x644   :  { %11626 = vrot.lane.b32.xlu0 %v11590_v26, %s12358_s19 }
 0x647   :  { %11631 = vrot.lane.b32.xlu1 %v11590_v26, %s12356_s18 }
 0x648   :  { %11636 = vrot.lane.b32.xlu0 %v14437_v46, %s12356_s18 }
 0x649   :  { %v9096_v3 = vpop.f32.mrb[72].mxu0  ;;  %v9134_v59 = vpop.f32.mrb[72].mxu1 }
 0x64a   :  { %v9097_v43 = vpop.f32.mrb[73].mxu0  ;;  %v9135_v20 = vpop.f32.mrb[73].mxu1 }
 0x64b   :  { %v9098_v4 = vadd.f32 %v9097_v43, %v9096_v3  ;;  %v9136_v58 = vadd.f32 %v9135_v20, %v9134_v59  ;;  %v2940_v3 = vld [vmem:[%s18564_s9] ss:$8 sm:$0xf0]  ;;  %v8185_v59 = vld [vmem:[%s18564_s9 + $0x1] ss:$8 sm:$0xf] }
 0x64c   :  { %11641 = vrot.lane.b32.xlu0 %v11590_v26, %s12359_s20  ;;  %v2939_v26 = vld [vmem:[%s18564_s9] ss:$8 sm:$0xf]  ;;  %v8186_v43 = vld [vmem:[%s18564_s9 + $0x1] ss:$8 sm:$0xf0] }
 0x64d   :  { %v9099_v12 = vpop.f32.mrb[74].mxu0  ;;  %v9137_v34 = vpop.f32.mrb[74].mxu1  ;;  %v2911_v9 = vadd.f32 %v9098_v4, %v14375_v8  ;;  %v2912_v5 = vadd.f32 %v9136_v58, %v14375_v8  ;;  %v14557_v20 = vor.u32 %v2940_v3, %v2939_v26  ;;  %v14562_v58 = vor.u32 %v8186_v43, %v8185_v59 }
 0x64e   :  { %v9100_v11 = vpop.f32.mrb[75].mxu0  ;;  %v9138_v29 = vpop.f32.mrb[75].mxu1 }
 0x64f   :  { %v9101_v22 = vadd.f32 %v9100_v11, %v9099_v12  ;;  %v9139_v0 = vadd.f32 %v9138_v29, %v9137_v34  ;;  %v14465_v27 = vmax.f32 %v2911_v9, 0.0  ;;  %v14467_v21 = vmax.f32 %v2912_v5, 0.0 }
 0x651   :  { %v2919_v45 = vadd.f32 %v9101_v22, %v14379_v60  ;;  %v2920_v47 = vadd.f32 %v9139_v0, %v14379_v60  ;;  %v8189_v0 = vld [vmem:[%s18564_s9 + $0x3] ss:$8 sm:$0xf] }
 0x653   :  { %v14469_v6 = vmax.f32 %v2919_v45, 0.0  ;;  %v14471_v36 = vmax.f32 %v2920_v47, 0.0 }
 0x655   :  { %19061 = vst [vmem:[#allocation14_spill] sm:$0xff] %v14471_v36  ;;  %v14475_v55 = vpack.i.bf16 %v14469_v6, %v14465_v27  ;;  %v14479_v48 = vpack.i.bf16 %v14471_v36, %v14467_v21  ;;  %v14491_v62 = vpack.c.bf16 %v14471_v36, %v14467_v21  ;;  %v14495_v50 = vpack.c.bf16 %v14469_v6, %v14465_v27 }
 0x657   :  { %19062 = vst [vmem:[#allocation15_spill] sm:$0xff] %v14475_v55  ;;  %19063 = vst [vmem:[#allocation16_spill] sm:$0xff] %v14479_v48  ;;  %11646 = vrot.lane.b32.xlu1 %v14475_v55, %s12353_s15  ;;  %11651 = vrot.lane.b32.xlu0 %v14479_v48, %s12353_s15 }
 0x658   :  { %19064 = vst [vmem:[#allocation17_spill] sm:$0xff] %v14491_v62  ;;  %19065 = vst [vmem:[#allocation18_spill] sm:$0xff] %v14495_v50  ;;  %v8199_v50 = vld [vmem:[%s18564_s9 + $0x40] ss:$8 sm:$0xf] }
 0x659   :  { %v8200_v62 = vld [vmem:[%s18564_s9 + $0x40] ss:$8 sm:$0xf0] }
 0x65b   :  { %11656 = vrot.lane.b32.xlu1 %v14475_v55, %s12357_s3  ;;  %11661 = vrot.lane.b32.xlu0 %v14479_v48, %s12357_s3 }
 0x65f   :  { %11671 = vrot.lane.b32.xlu1 %v14479_v48, %s12358_s19  ;;  %11666 = vrot.lane.b32.xlu0 %v14479_v48, %s12355_s17  ;;  %v19105_v48 = vmov 0 }
 0x663   :  { %11681 = vrot.lane.b32.xlu1 %v14475_v55, %s12358_s19  ;;  %11676 = vrot.lane.b32.xlu0 %v14475_v55, %s12355_s17 }
 0x669   :  { %v9172_v52 = vpop.f32.mrb[76].mxu0  ;;  %v9210_v16 = vpop.f32.mrb[76].mxu1 }
 0x66a   :  { %v9173_v14 = vpop.f32.mrb[77].mxu0  ;;  %v9211_v51 = vpop.f32.mrb[77].mxu1 }
 0x66b   :  { %v9174_v32 = vadd.f32 %v9173_v14, %v9172_v52  ;;  %v9212_v37 = vadd.f32 %v9211_v51, %v9210_v16  ;;  %v8197_v51 = vld [vmem:[%s18564_s9 + $0x7] ss:$8 sm:$0xf] }
 0x66d   :  { %v9175_v54 = vpop.f32.mrb[78].mxu0  ;;  %v9213_v39 = vpop.f32.mrb[78].mxu1  ;;  %v2913_v44 = vadd.f32 %v9174_v32, %v14375_v8  ;;  %v2914_v13 = vadd.f32 %v9212_v37, %v14375_v8  ;;  %v8198_v32 = vld [vmem:[%s18564_s9 + $0x7] ss:$8 sm:$0xf0] }
 0x66e   :  { %v9176_v56 = vpop.f32.mrb[79].mxu0  ;;  %v9214_v57 = vpop.f32.mrb[79].mxu1  ;;  %v8195_v37 = vld [vmem:[%s18564_s9 + $0x6] ss:$8 sm:$0xf] }
 0x66f   :  { %v9177_v30 = vadd.f32 %v9176_v56, %v9175_v54  ;;  %v9215_v7 = vadd.f32 %v9214_v57, %v9213_v39  ;;  %v14509_v53 = vmax.f32 %v2913_v44, 0.0  ;;  %v14511_v61 = vmax.f32 %v2914_v13, 0.0  ;;  %v8196_v44 = vld [vmem:[%s18564_s9 + $0x6] ss:$8 sm:$0xf0] }
 0x671   :  { %v2921_v17 = vadd.f32 %v9177_v30, %v14379_v60  ;;  %v2922_v23 = vadd.f32 %v9215_v7, %v14379_v60  ;;  %19066 = vst [vmem:[#allocation19_spill] sm:$0xff] %v14509_v53  ;;  %19067 = vst [vmem:[#allocation20_spill] sm:$0xff] %v14511_v61  ;;  %v2943_v60 = vlaneseq }
 0x673   :  { %v14513_v41 = vmax.f32 %v2921_v17, 0.0  ;;  %v14515_v18 = vmax.f32 %v2922_v23, 0.0  ;;  %v14540_v38 = vshrl.u32 %v2943_v60, 7  ;;  %v14571_v11 = vand.u32 127, %v2943_v60 }
 0x674   :  { %v14642_v60 = vor.u32 %v8196_v44, %v8195_v37  ;;  %v8187_v37 = vld [vmem:[%s18564_s9 + $0x2] ss:$8 sm:$0xf]  ;;  %v19089_v44 = vmov 0 }
 0x675   :  { %19068 = vst [vmem:[#allocation21_spill] sm:$0xff] %v14513_v41  ;;  %19069 = vst [vmem:[#allocation22_spill] sm:$0xff] %v14515_v18  ;;  %v14519_v19 = vpack.i.bf16 %v14513_v41, %v14509_v53  ;;  %v11690_v8 = vpack.i.bf16 %v14515_v18, %v14511_v61  ;;  %v14531_v28 = vpack.c.bf16 %v14515_v18, %v14511_v61  ;;  %v14560_v4 = vsub.s32 4, %v14540_v38 }
 0x676   :  { %v14535_v35 = vpack.c.bf16 %v14513_v41, %v14509_v53  ;;  %19073 = vst [vmem:[#allocation26_spill] sm:$0xff] %v14540_v38  ;;  %vm18628_vm8 = vcmp.lt.s32.totalorder %v14571_v11, 64  ;;  %v14638_v23 = vsub.s32 1, %v14540_v38  ;;  %19084 = vst [vmem:[#allocation33_spill] sm:$0xff] %v14642_v60  ;;  %v14645_v26 = vsub.s32 2, %v14540_v38 }
 0x677   :  { %19070 = vst [vmem:[#allocation23_spill] sm:$0xff] %v14519_v19  ;;  %11686 = vrot.lane.b32.xlu1 %v14519_v19, %s12353_s15  ;;  %11691 = vrot.lane.b32.xlu0 %v11690_v8, %s12353_s15  ;;  %19071 = vst [vmem:[#allocation24_spill] sm:$0xff] %v14531_v28  ;;  %v2962_v29 = vrot.slane %v14557_v20, %v14560_v4  ;;  %v3015_v9 = vrot.slane %v14562_v58, %v14560_v4  ;;  %v14648_v3 = vsub.s32 5, %v14540_v38 }
 0x678   :  { %19072 = vst [vmem:[#allocation25_spill] sm:$0xff] %v14535_v35  ;;  %19074 = vst [vmem:[#allocation27_spill] sm:$0xff] %v14560_v4  ;;  %v14659_v22 = vsub.s32 6, %v14540_v38  ;;  %vm18620_vm9 = vcmp.lt.s32.totalorder %v14571_v11, 112  ;;  %vm18625_vm15 = vcmp.lt.s32.totalorder %v14571_v11, 60  ;;  %vm18656_vm2 = vcmp.lt.s32.totalorder %v14571_v11, 30 }
 0x679   :  { %vm14580_vm6 = vcmp.gt.f32.partialorder %v2962_v29, 0.5  ;;  %vm14584_vm7 = vcmp.gt.f32.partialorder %v3015_v9, 0.5  ;;  %19085 = vst [vmem:[#allocation34_spill] sm:$0xff] %v14648_v3  ;;  %v3268_v29 = vrot.slane %v14642_v60, %v14638_v23 }
 0x67a   :  { %v3427_v54 = vsel %vm14580_vm6, %v14387_v2, 0.0  ;;  %v3419_v56 = vsel %vm14580_vm6, %v14383_v31, 0.0  ;;  %19087 = vst [vmem:[#allocation36_spill] sm:$0xff] %v14659_v22  ;;  %v3023_v46 = vrot.slane %v14562_v58, %v14659_v22 }
 0x67b   :  { %11696 = vrot.lane.b32.xlu1 %v14519_v19, %s12357_s3  ;;  %11701 = vrot.lane.b32.xlu0 %v11690_v8, %s12357_s3  ;;  %vm14682_vm10 = vcmp.gt.f32.partialorder %v3268_v29, 0.5 }
 0x67c   :  { %v19090_v44 = vsel %vm14682_vm10, 4294967295, %v19089_v44  ;;  %v3718_v35 = vsel %vm14682_vm10, %v14425_v40, 0.0  ;;  %vm14825_vm5 = vcmp.gt.f32.partialorder %v3023_v46, 0.5 }
 0x67d   :  { %19091 = vst [vmem:[#allocation38_spill] sm:$0xff] %v19090_v44 }
 0x67f   :  { %11711 = vrot.lane.b32.xlu1 %v11690_v8, %s12355_s17  ;;  %11706 = vrot.lane.b32.xlu0 %v14519_v19, %s12355_s17 }
 0x683   :  { %11721 = vrot.lane.b32.xlu1 %v11690_v8, %s12358_s19  ;;  %11716 = vrot.lane.b32.xlu0 %v14519_v19, %s12358_s19 }
 0x687   :  { %11726 = vrot.lane.b32.xlu1 %v11690_v8, %s12356_s18  ;;  %11736 = vrot.lane.b32.xlu0 %v14519_v19, %s12359_s20  ;;  %v19108_v19 = vmov 0 }
 0x689   :  { %v14567_v12 = vpop.permute.xlu0 %11536  ;;  %v14569_v34 = vpop.permute.xlu1 %11531 }
 0x68a   :  { %v18571_v47 = vunpack.i.h.bf16 %v14569_v34  ;;  %v18570_v52 = vunpack.i.l.bf16 %v14569_v34  ;;  %v19129_v31 = vunpack.i.h.bf16 %v14569_v34 }
 0x68b   :  { %11731 = vrot.lane.b32.xlu1 %v11690_v8, %s12359_s20  ;;  %v14640_v8 = vor.u32 %v8198_v32, %v8197_v51  ;;  %v8190_v51 = vld [vmem:[%s18564_s9 + $0x3] ss:$8 sm:$0xf0]  ;;  %v2966_v32 = vrot.slane %v14557_v20, %v14648_v3 }
 0x68c   :  { %v14699_v24 = vor.u32 %v8190_v51, %v8189_v0 }
 0x68d   :  { %v14578_v5 = vpop.permute.xlu1 %11546  ;;  %v14589_v45 = vpop.permute.xlu0 %11541  ;;  %v3321_v9 = vrot.slane %v14640_v8, %v14638_v23  ;;  %vm14729_vm12 = vcmp.gt.f32.partialorder %v2966_v32, 0.5  ;;  %v8191_v32 = vld [vmem:[%s18564_s9 + $0x4] ss:$8 sm:$0xf] }
 0x68e   :  { %19075 = vst [vmem:[#allocation28_spill] sm:$0xff] %v14578_v5  ;;  %19080 = vst [vmem:[#allocation29_spill] sm:$0xff] %v14589_v45  ;;  %v18568_v16 = vunpack.i.h.bf16 %v14589_v45  ;;  %v18569_v14 = vunpack.i.l.bf16 %v14589_v45  ;;  %v11539_v45 = vunpack.i.h.bf16 %v14567_v12 }
 0x68f   :  { %vm14686_vm11 = vcmp.gt.f32.partialorder %v3321_v9, 0.5  ;;  %v3710_v9 = vsel %vm14682_vm10, %v14421_v1, 0.0  ;;  %vm19277_vm10 = vcmp.lt.s32.totalorder %v14571_v11, 30 }
 0x690   :  { %v3479_v39 = vsel %vm18628_vm8, %v18568_v16, %v18571_v47  ;;  %v3478_v57 = vsel %vm18628_vm8, %v18569_v14, %v18570_v52  ;;  %v19092_v16 = vmov 0  ;;  %v14693_v52 = vsub.s32 3, %v14540_v38 }
 0x691   :  { %v14627_v13 = vsel %vm14584_vm7, %v3479_v39, %v3427_v54  ;;  %v14631_v30 = vsel %vm14584_vm7, %v3478_v57, %v3419_v56  ;;  %v14633_v7 = vpop.permute.xlu1 %11551  ;;  %v14635_v17 = vpop.permute.xlu0 %11556  ;;  %v8188_v54 = vld [vmem:[%s18564_s9 + $0x2] ss:$8 sm:$0xf0]  ;;  %v2970_v39 = vrot.slane %v14557_v20, %v14659_v22  ;;  %v3272_v56 = vrot.slane %v14642_v60, %v14645_v26 }
 0x692   :  { %19081 = vst [vmem:[#allocation30_spill] sm:$0xff] %v14627_v13  ;;  %19082 = vst [vmem:[#allocation31_spill] sm:$0xff] %v14631_v30  ;;  %v19093_v16 = vsel %vm14686_vm11, 4294967295, %v19092_v16  ;;  %v14701_v49 = vor.u32 %v8188_v54, %v8187_v37  ;;  %v11538_v13 = vunpack.i.l.bf16 %v14567_v12  ;;  %vm18640_vm7 = vcmp.lt.s32.totalorder %v14571_v11, 15 }
 0x693   :  { %19083 = vst [vmem:[#allocation32_spill] sm:$0xff] %v14633_v7  ;;  %19094 = vst [vmem:[#allocation39_spill] sm:$0xff] %v19093_v16  ;;  %vm14736_vm13 = vcmp.gt.f32.partialorder %v2970_v39, 0.5  ;;  %vm14744_vm14 = vcmp.gt.f32.partialorder %v3272_v56, 0.5  ;;  %v3420_v16 = vsel %vm14729_vm12, %v14385_v25, 0.0  ;;  %v19121_v7 = vunpack.i.h.bf16 %v14578_v5 }
 0x694   :  { %v8192_v39 = vld [vmem:[%s18564_s9 + $0x4] ss:$8 sm:$0xf0]  ;;  %v8193_v56 = vld [vmem:[%s18564_s9 + $0x5] ss:$8 sm:$0xf]  ;;  %v3076_v44 = vrot.slane %v14701_v49, %v14659_v22  ;;  %v19130_v12 = vunpack.i.l.bf16 %v14569_v34 }
 0x695   :  { %v14650_v59 = vpop.permute.xlu1 %11561  ;;  %v14652_v43 = vpop.permute.xlu0 %11566  ;;  %v14785_v55 = vor.u32 %v8192_v39, %v8191_v32  ;;  %v3428_v32 = vsel %vm14729_vm12, %v14389_v10, 0.0  ;;  %v14806_v39 = vor.u32 %v8200_v62, %v8199_v50  ;;  %v3325_v50 = vrot.slane %v14640_v8, %v14645_v26 }
 0x696   :  { %19086 = vst [vmem:[#allocation35_spill] sm:$0xff] %v14650_v59  ;;  %vm14834_vm6 = vcmp.gt.f32.partialorder %v3076_v44, 0.5  ;;  %v3544_v10 = vsel %vm18625_vm15, %v19121_v7, %v11539_v45  ;;  %v19123_v62 = vmov 0 }
 0x697   :  { %v3378_v44 = vrot.slane %v14806_v39, %v14645_v26 }
 0x699   :  { %v14680_v57 = vpop.permute.xlu1 %11571  ;;  %v14690_v14 = vpop.permute.xlu0 %11576 }
 0x69a   :  { %19088 = vst [vmem:[#allocation37_spill] sm:$0xff] %v14680_v57  ;;  %v18582_v47 = vunpack.i.h.bf16 %v14680_v57  ;;  %v18583_v33 = vunpack.i.h.bf16 %v14690_v14  ;;  %v18584_v29 = vunpack.i.l.bf16 %v14690_v14  ;;  %v19095_v0 = vunpack.i.l.bf16 %v14680_v57 }
 0x69c   :  { %v3771_v42 = vsel %vm18620_vm9, %v18582_v47, %v18583_v33  ;;  %v3770_v51 = vsel %vm18620_vm9, %v19095_v0, %v18584_v29  ;;  %v14734_v47 = vsub.s32 7, %v14540_v38  ;;  %v3117_v0 = vrot.slane %v14699_v24, %v14693_v52  ;;  %v8194_v29 = vld [vmem:[%s18564_s9 + $0x5] ss:$8 sm:$0xf0] }
 0x69d   :  { %v14723_v37 = vsel %vm14686_vm11, %v3771_v42, %v3718_v35  ;;  %v14727_v54 = vsel %vm14686_vm11, %v3770_v51, %v3710_v9  ;;  %v3121_v42 = vrot.slane %v14699_v24, %v14560_v4  ;;  %v19102_v35 = vmov 0 }
 0x69e   :  { %19096 = vst [vmem:[#allocation40_spill] sm:$0xff] %v14723_v37  ;;  %19097 = vst [vmem:[#allocation41_spill] sm:$0xff] %v14727_v54  ;;  %v19103_v35 = vsel %vm14744_vm14, 4294967295, %v19102_v35  ;;  %v3019_v9 = vrot.slane %v14562_v58, %v14648_v3  ;;  %v3072_v51 = vrot.slane %v14701_v49, %v14648_v3  ;;  %vm14777_vm0 = vcmp.gt.f32.partialorder %v3117_v0, 0.5  ;;  %v14808_v54 = vpop.permute.xlu1 %11586 }
 0x69f   :  { %19104 = vst [vmem:[#allocation42_spill] sm:$0xff] %v19103_v35  ;;  %v19106_v48 = vsel %vm14777_vm0, 4294967295, %v19105_v48  ;;  %vm14781_vm1 = vcmp.gt.f32.partialorder %v3121_v42, 0.5  ;;  %v14792_v37 = vor.u32 %v8194_v29, %v8193_v56  ;;  %v3421_v29 = vsel %vm14736_vm13, %v14421_v1, 0.0  ;;  %v14823_v56 = vpop.permute.xlu0 %11581 }
 0x6a0   :  { %19107 = vst [vmem:[#allocation43_spill] sm:$0xff] %v19106_v48  ;;  %v19109_v19 = vsel %vm14781_vm1, 4294967295, %v19108_v19  ;;  %vm14795_vm3 = vcmp.gt.f32.partialorder %v3019_v9, 0.5  ;;  %vm14799_vm4 = vcmp.gt.f32.partialorder %v3072_v51, 0.5  ;;  %v3429_v9 = vsel %vm14736_vm13, %v14425_v40, 0.0  ;;  %19116 = vst [vmem:[#allocation46_spill] sm:$0xff] %v14823_v56 }
 0x6a1   :  { %19110 = vst [vmem:[#allocation44_spill] sm:$0xff] %v19109_v19  ;;  %19111 = vst [vmem:[#allocation45_spill] sm:$0xff] %v14792_v37  ;;  %v3170_v51 = vrot.slane %v14785_v55, %v14693_v52  ;;  %v3174_v33 = vrot.slane %v14785_v55, %v14560_v4  ;;  %v3223_v28 = vrot.slane %v14792_v37, %v14693_v52  ;;  %vm18655_vm13 = vcmp.lt.s32.totalorder %v14571_v11, 96 }
 0x6a2   :  { %v3227_v46 = vrot.slane %v14792_v37, %v14560_v4  ;;  %v19122_v4 = vunpack.i.l.bf16 %v14578_v5  ;;  %v19135_v0 = vmov 0 }
 0x6a3   :  { %vm14875_vm12 = vcmp.gt.f32.partialorder %v3170_v51, 0.5  ;;  %vm14884_vm9 = vcmp.gt.f32.partialorder %v3223_v28, 0.5  ;;  %v18629_v28 = vunpack.i.l.bf16 %v14652_v43 }
 0x6a4   :  { %v3543_v1 = vsel %vm18625_vm15, %v19122_v4, %v11538_v13  ;;  %v19124_v62 = vsel %vm14875_vm12, 4294967295, %v19123_v62  ;;  %v19126_v4 = vmov 0 }
 0x6a5   :  { %19125 = vst [vmem:[#allocation47_spill] sm:$0xff] %v19124_v62  ;;  %v19127_v4 = vsel %vm14884_vm9, 4294967295, %v19126_v4 }
 0x6a6   :  { %19128 = vst [vmem:[#allocation48_spill] sm:$0xff] %v19127_v4 }
 0x6a9   :  { %v11592_v40 = vpop.permute.xlu1 %11591 }
 0x6aa   :  { %v11594_v25 = vunpack.i.h.bf16 %v11592_v40  ;;  %v11593_v18 = vunpack.i.l.bf16 %v11592_v40  ;;  %v14873_v61 = vpop.permute.xlu0 %11596 }
 0x6ac   :  { %v3477_v37 = vsel %vm18628_vm8, %v19129_v31, %v11594_v25  ;;  %v3476_v2 = vsel %vm18628_vm8, %v19130_v12, %v11593_v18  ;;  %v19133_v12 = vunpack.i.h.bf16 %v14873_v61 }
 0x6ad   :  { %v3495_v7 = vsel %vm14795_vm3, %v3477_v37, %v3428_v32  ;;  %v3487_v51 = vsel %vm14795_vm3, %v3476_v2, %v3420_v16  ;;  %v14904_v40 = vpop.permute.xlu1 %11601  ;;  %v19134_v37 = vunpack.i.l.bf16 %v14873_v61  ;;  %vm14924_vm3 = vcmp.gt.f32.partialorder %v3174_v33, 0.5 }
 0x6ae   :  { %v14908_v31 = vsel %vm14799_vm4, %v3543_v1, %v3487_v51  ;;  %v14912_v34 = vsel %vm14799_vm4, %v3544_v10, %v3495_v7  ;;  %v3475_v5 = vsel %vm18628_vm8, %v11594_v25, %v19133_v12  ;;  %v14922_v16 = vpop.permute.xlu0 %11606  ;;  %v19136_v0 = vsel %vm14924_vm3, 4294967295, %v19135_v0 }
 0x6af   :  { %19131 = vst [vmem:[#allocation49_spill] sm:$0xff] %v14908_v31  ;;  %19132 = vst [vmem:[#allocation50_spill] sm:$0xff] %v14912_v34  ;;  %v3474_v2 = vsel %vm18628_vm8, %v11593_v18, %v19134_v37  ;;  %v19138_v1 = vunpack.i.h.bf16 %v14652_v43  ;;  %v19139_v10 = vunpack.i.h.bf16 %v14650_v59  ;;  %v14936_v25 = vpack.c.bf16 %v14912_v34, %v14908_v31 }
 0x6b0   :  { %19137 = vst [vmem:[#allocation51_spill] sm:$0xff] %v19136_v0  ;;  %v18627_v32 = vunpack.i.h.bf16 %v14904_v40  ;;  %v18626_v18 = vunpack.i.l.bf16 %v14904_v40  ;;  %v14944_v51 = vpack.i.bf16 %v14912_v34, %v14908_v31  ;;  %vm14946_vm4 = vcmp.gt.f32.partialorder %v3227_v46, 0.5 }
 0x6b1   :  { %v3690_v42 = vsel %vm18656_vm2, %v19139_v10, %v19138_v1  ;;  %19140 = vst [vmem:[#allocation52_spill] sm:$0xff] %v14936_v25  ;;  %v19142_v12 = vmov 0  ;;  %v3496_v37 = vsel %vm14825_vm5, %v3475_v5, %v3429_v9  ;;  %v3488_v1 = vsel %vm14825_vm5, %v3474_v2, %v3421_v29  ;;  %v11612_v46 = vpop.permute.xlu1 %11611 }
 0x6b2   :  { %19141 = vst [vmem:[#allocation53_spill] sm:$0xff] %v14944_v51  ;;  %v19143_v12 = vsel %vm14946_vm4, 4294967295, %v19142_v12  ;;  %v3542_v10 = vsel %vm18625_vm15, %v11539_v45, %v18627_v32  ;;  %v3541_v7 = vsel %vm18625_vm15, %v11538_v13, %v18626_v18  ;;  %v19145_v33 = vunpack.i.l.bf16 %v14650_v59  ;;  %11751 = vrot.lane.b32.xlu1 %v14944_v51, %s12358_s19  ;;  %v14978_v13 = vpop.permute.xlu0 %11616 }
 0x6b3   :  { %19144 = vst [vmem:[#allocation54_spill] sm:$0xff] %v19143_v12  ;;  %v14970_v57 = vsel %vm14834_vm6, %v3541_v7, %v3488_v1  ;;  %v14974_v45 = vsel %vm14834_vm6, %v3542_v10, %v3496_v37  ;;  %v11614_v29 = vunpack.i.h.bf16 %v11612_v46  ;;  %vm14980_vm5 = vcmp.gt.f32.partialorder %v3325_v50, 0.5 }
 0x6b4   :  { %v3689_v5 = vsel %vm18656_vm2, %v19145_v33, %v18629_v28  ;;  %19146 = vst [vmem:[#allocation55_spill] sm:$0xff] %v14970_v57  ;;  %19147 = vst [vmem:[#allocation56_spill] sm:$0xff] %v14974_v45  ;;  %v19148_v9 = vmov 0  ;;  %v14988_v7 = vpack.c.bf16 %v14974_v45, %v14970_v57  ;;  %v11613_v30 = vunpack.i.l.bf16 %v11612_v46 }
 0x6b5   :  { %v19149_v9 = vsel %vm14980_vm5, 4294967295, %v19148_v9  ;;  %vm14990_vm6 = vcmp.gt.f32.partialorder %v3378_v44, 0.5  ;;  %v19152_v37 = vmov 0  ;;  %v19155_v1 = vrot.slane %v14642_v60, %v14693_v52 }
 0x6b6   :  { %19150 = vst [vmem:[#allocation57_spill] sm:$0xff] %v19149_v9  ;;  %19151 = vst [vmem:[#allocation58_spill] sm:$0xff] %v14988_v7  ;;  %v19153_v37 = vsel %vm14990_vm6, 4294967295, %v19152_v37  ;;  %v19156_v50 = vmov 0  ;;  %v19159_v10 = vunpack.i.h.bf16 %v14635_v17  ;;  %v15007_v32 = vpack.i.bf16 %v14974_v45, %v14970_v57  ;;  %v15033_v45 = vpop.permute.xlu1 %11621  ;;  %v11627_v25 = vpop.permute.xlu0 %11626 }
 0x6b7   :  { %19154 = vst [vmem:[#allocation59_spill] sm:$0xff] %v19153_v37  ;;  %vm14997_vm15 = vcmp.gt.f32.partialorder %v19155_v1, 0.5  ;;  %v19161_v44 = vrot.slane %v14640_v8, %v14693_v52  ;;  %v19162_v46 = vmov 0  ;;  %v19165_v1 = vunpack.i.h.bf16 %v14808_v54 }
 0x6b8   :  { %v19157_v50 = vsel %vm14997_vm15, 4294967295, %v19156_v50  ;;  %v3623_v18 = vsel %vm18655_vm13, %v19159_v10, %v11614_v29  ;;  %19160 = vst [vmem:[#allocation61_spill] sm:$0xff] %v15007_v32  ;;  %v19166_v33 = vunpack.i.h.bf16 %v14823_v56  ;;  %v19167_v10 = vunpack.i.l.bf16 %v14635_v17  ;;  %11741 = vrot.lane.b32.xlu0 %v15007_v32, %s12355_s17 }
 0x6b9   :  { %19158 = vst [vmem:[#allocation60_spill] sm:$0xff] %v19157_v50  ;;  %vm15012_vm8 = vcmp.gt.f32.partialorder %v19161_v44, 0.5  ;;  %v19168_v7 = vsel %vm14777_vm0, %v14471_v36, 0.0  ;;  %v11629_v62 = vunpack.i.h.bf16 %v11627_v25  ;;  %v19181_v4 = vunpack.i.h.bf16 %v14978_v13 }
 0x6ba   :  { %v19163_v46 = vsel %vm15012_vm8, 4294967295, %v19162_v46  ;;  %v3836_v2 = vsel %vm18640_vm7, %v19166_v33, %v19165_v1  ;;  %v3622_v28 = vsel %vm18655_vm13, %v19167_v10, %v11613_v30  ;;  %v3639_v44 = vsel %vm14875_vm12, %v3623_v18, %v19168_v7  ;;  %v15111_v19 = vpop.permute.xlu0 %11636 }
 0x6bb   :  { %19164 = vst [vmem:[#allocation62_spill] sm:$0xff] %v19163_v46  ;;  %v19169_v33 = vsel %vm14777_vm0, %v14467_v21, 0.0  ;;  %v15043_v10 = vsel %vm14884_vm9, %v3690_v42, %v3639_v44  ;;  %v18642_v18 = vunpack.i.h.bf16 %v15033_v45  ;;  %v18641_v7 = vunpack.i.l.bf16 %v15033_v45  ;;  %19184 = vst [vmem:[#allocation68_spill] sm:$0xff] %v15111_v19 }
 0x6bc   :  { %v3631_v1 = vsel %vm14875_vm12, %v3622_v28, %v19169_v33  ;;  %19170 = vst [vmem:[#allocation63_spill] sm:$0xff] %v15043_v10  ;;  %v11628_v28 = vunpack.i.l.bf16 %v11627_v25  ;;  %v19172_v42 = vrot.slane %v14806_v39, %v14693_v52  ;;  %v19173_v44 = vmov 0  ;;  %11746 = vrot.lane.b32.xlu0 %v14944_v51, %s12355_s17 }
 0x6bd   :  { %v15051_v57 = vsel %vm14884_vm9, %v3689_v5, %v3631_v1  ;;  %v3620_v5 = vsel %vm18655_vm13, %v11613_v30, %v18641_v7  ;;  %v3621_v25 = vsel %vm18655_vm13, %v11614_v29, %v18642_v18  ;;  %v19179_v30 = vsel %vm14781_vm1, %v14513_v41, 0.0 }
 0x6be   :  { %19171 = vst [vmem:[#allocation64_spill] sm:$0xff] %v15051_v57  ;;  %vm15057_vm7 = vcmp.gt.f32.partialorder %v19172_v42, 0.5  ;;  %v15063_v33 = vpack.c.bf16 %v15043_v10, %v15051_v57  ;;  %v15075_v1 = vpack.i.bf16 %v15043_v10, %v15051_v57  ;;  %v19178_v42 = vsel %vm14781_vm1, %v14509_v53, 0.0 }
 0x6bf   :  { %v19174_v44 = vsel %vm15057_vm7, 4294967295, %v19173_v44  ;;  %v3632_v34 = vsel %vm14924_vm3, %v3620_v5, %v19178_v42  ;;  %v3640_v7 = vsel %vm14924_vm3, %v3621_v25, %v19179_v30  ;;  %v19180_v29 = vunpack.i.l.bf16 %v14978_v13  ;;  %v11632_v5 = vpop.permute.xlu1 %11631 }
 0x6c0   :  { %19175 = vst [vmem:[#allocation65_spill] sm:$0xff] %v19174_v44  ;;  %19176 = vst [vmem:[#allocation66_spill] sm:$0xff] %v15063_v33  ;;  %v15099_v57 = vsel %vm18656_vm2, %v11629_v62, %v19181_v4  ;;  %v19182_v42 = vunpack.i.l.bf16 %v14652_v43  ;;  %v19183_v25 = vunpack.i.h.bf16 %v14652_v43  ;;  %v11633_v0 = vunpack.i.l.bf16 %v11632_v5  ;;  %11756 = vrot.lane.b32.xlu0 %v15007_v32, %s12358_s19 }
 0x6c1   :  { %19177 = vst [vmem:[#allocation67_spill] sm:$0xff] %v15075_v1  ;;  %v15093_v18 = vsel %vm18656_vm2, %v11628_v28, %v19180_v29  ;;  %v11634_v29 = vunpack.i.h.bf16 %v11632_v5  ;;  %vm19189_vm13 = vcmp.lt.s32.totalorder %v14571_v11, 15  ;;  %v11609_v51 = vunpack.i.h.bf16 %v14922_v16 }
 0x6c2   :  { %v3687_v10 = vsel %vm18656_vm2, %v19182_v42, %v11628_v28  ;;  %v3688_v30 = vsel %vm18656_vm2, %v19183_v25, %v11629_v62  ;;  %v19187_v62 = vunpack.i.l.bf16 %v14808_v54  ;;  %v19188_v42 = vunpack.i.l.bf16 %v14823_v56 }
 0x6c3   :  { %v15115_v4 = vsel %vm14946_vm4, %v3687_v10, %v3632_v34  ;;  %v15119_v48 = vsel %vm14946_vm4, %v3688_v30, %v3640_v7  ;;  %v19191_v34 = vunpack.i.l.bf16 %v14690_v14  ;;  %vm19192_vm2 = vcmp.lt.s32.totalorder %v14571_v11, 112 }
 0x6c4   :  { %19185 = vst [vmem:[#allocation69_spill] sm:$0xff] %v15115_v4  ;;  %19186 = vst [vmem:[#allocation70_spill] sm:$0xff] %v15119_v48  ;;  %v3835_v5 = vsel %vm19189_vm13, %v19188_v42, %v19187_v62  ;;  %v15131_v25 = vpack.c.bf16 %v15119_v48, %v15115_v4  ;;  %v19193_v7 = vunpack.i.h.bf16 %v14690_v14  ;;  %v19195_v28 = vsel %vm14744_vm14, %v14423_v63, 0.0  ;;  %11761 = vrot.lane.b32.xlu0 %v15075_v1, %s12356_s18 }
 0x6c5   :  { %v3768_v10 = vsel %vm19192_vm2, %v19191_v34, %v11633_v0  ;;  %vm19194_vm11 = vmmov %vm19192_vm2  ;;  %v19196_v42 = vsel %vm14744_vm14, %v14427_v15, 0.0  ;;  %v19197_v34 = vunpack.i.h.bf16 %v15111_v19  ;;  %v11608_v37 = vunpack.i.l.bf16 %v14922_v16 }
 0x6c6   :  { %19190 = vst [vmem:[#allocation71_spill] sm:$0xff] %v15131_v25  ;;  %v3769_v30 = vsel %vm19194_vm11, %v19193_v7, %v11634_v29  ;;  %v3776_v62 = vsel %vm14980_vm5, %v3768_v10, %v19195_v28  ;;  %v19198_v7 = vunpack.i.l.bf16 %v15111_v19  ;;  %vm19199_vm11 = vmmov %vm19192_vm2  ;;  %v19217_v44 = vmov 0 }
 0x6c7   :  { %v3784_v43 = vsel %vm14980_vm5, %v3769_v30, %v19196_v42  ;;  %v3767_v14 = vsel %vm19192_vm2, %v11634_v29, %v19197_v34  ;;  %v3841_v28 = vsel %vm14990_vm6, %v3835_v5, %v3776_v62  ;;  %v3712_v30 = vsel %vm14997_vm15, %v14465_v27, 0.0  ;;  %v15173_v29 = vpop.permute.xlu0 %11641  ;;  %vm19205_vm2 = vmmov %vm19189_vm13 }
 0x6c8   :  { %v3766_v25 = vsel %vm19199_vm11, %v11633_v0, %v19198_v7  ;;  %v3849_v10 = vsel %vm14990_vm6, %v3836_v2, %v3784_v43  ;;  %v3720_v42 = vsel %vm14997_vm15, %v14469_v6, 0.0  ;;  %19200 = vst [vmem:[#allocation72_spill] sm:$0xff] %v15173_v29  ;;  %v18661_v2 = vunpack.i.h.bf16 %v15173_v29  ;;  %11766 = vrot.lane.b32.xlu0 %v15007_v32, %s12359_s20 }
 0x6c9   :  { %v15175_v0 = vpack.c.bf16 %v3849_v10, %v3841_v28  ;;  %v3785_v5 = vsel %vm15012_vm8, %v3767_v14, %v3720_v42  ;;  %v18660_v43 = vunpack.i.l.bf16 %v15173_v29  ;;  %v3777_v62 = vsel %vm15012_vm8, %v3766_v25, %v3712_v30 }
 0x6ca   :  { %v15185_v34 = vpack.i.bf16 %v15119_v48, %v15115_v4  ;;  %v19203_v7 = vunpack.i.h.bf16 %v14808_v54  ;;  %v19204_v14 = vunpack.i.l.bf16 %v14808_v54  ;;  %v15206_v42 = vsub.s32 0, %v14540_v38 }
 0x6cb   :  { %19201 = vst [vmem:[#allocation73_spill] sm:$0xff] %v15175_v0  ;;  %vm19225_vm4 = vcmp.lt.s32.totalorder %v14571_v11, 64  ;;  %v19226_v16 = vunpack.i.h.bf16 %v14873_v61  ;;  %v19232_v19 = vunpack.i.h.bf16 %v14904_v40  ;;  %vm19233_vm9 = vcmp.lt.s32.totalorder %v14571_v11, 60 }
 0x6cc   :  { %19202 = vst [vmem:[#allocation74_spill] sm:$0xff] %v15185_v34  ;;  %v3834_v28 = vsel %vm19189_vm13, %v19203_v7, %v18661_v2  ;;  %v3833_v10 = vsel %vm19205_vm2, %v19204_v14, %v18660_v43  ;;  %19206 = vst [vmem:[#allocation75_spill] sm:$0xff] %v15206_v42  ;;  %v2946_v54 = vrot.slane %v14557_v20, %v15206_v42  ;;  %vm19284_vm14 = vcmp.lt.s32.totalorder %v14571_v11, 96 }
 0x6cd   :  { %v3842_v25 = vsel %vm15057_vm7, %v3833_v10, %v3777_v62  ;;  %v3850_v30 = vsel %vm15057_vm7, %v3834_v28, %v3785_v5  ;;  %v3129_v14 = vrot.slane %v14699_v24, %v14659_v22  ;;  %v19208_v62 = vrot.slane %v14557_v20, %v14734_v47  ;;  %v11647_v5 = vpop.permute.xlu1 %11646  ;;  %vm19227_vm3 = vmmov %vm19225_vm4 }
 0x6ce   :  { %v15208_v7 = vpack.c.bf16 %v3850_v30, %v3842_v25  ;;  %v3027_v28 = vrot.slane %v14562_v58, %v14734_v47  ;;  %v3080_v10 = vrot.slane %v14701_v49, %v14734_v47  ;;  %v3133_v25 = vrot.slane %v14699_v24, %v14734_v47  ;;  %vm19229_vm8 = vmmov %vm19227_vm3 }
 0x6cf   :  { %vm15218_vm11 = vcmp.gt.f32.partialorder %v19208_v62, 0.5  ;;  %v3264_v43 = vrot.slane %v14642_v60, %v15206_v42  ;;  %v2999_v38 = vrot.slane %v14562_v58, %v15206_v42  ;;  %vm15252_vm13 = vcmp.gt.f32.partialorder %v2946_v54, 0.5  ;;  %v15268_v54 = vpop.permute.xlu0 %11651 }
 0x6d0   :  { %19207 = vst [vmem:[#allocation76_spill] sm:$0xff] %v15208_v7  ;;  %10245 = vmatprep.subr.bf16.mxu1 %v15208_v7  ;;  %v3422_v62 = vsel %vm15218_vm11, %v14423_v63, 0.0  ;;  %v3430_v7 = vsel %vm15218_vm11, %v14427_v15, 0.0  ;;  %vm15260_vm2 = vcmp.gt.f32.partialorder %v3027_v28, 0.5  ;;  %vm15264_vm6 = vcmp.gt.f32.partialorder %v3080_v10, 0.5 }
 0x6d1   :  { %10247 = vmatpush1.bf16.msra.mxu1 %v15175_v0  ;;  %v3052_v0 = vrot.slane %v14701_v49, %v15206_v42  ;;  %vm15270_vm11 = vcmp.gt.f32.partialorder %v3129_v14, 0.5  ;;  %v11649_v1 = vunpack.i.h.bf16 %v11647_v5  ;;  %v11648_v12 = vunpack.i.l.bf16 %v11647_v5 }
 0x6d2   :  { %10249 = vmatprep.subr.bf16.mxu1 %v15063_v33  ;;  %v3125_v33 = vrot.slane %v14699_v24, %v14648_v3  ;;  %v19218_v44 = vsel %vm15270_vm11, 4294967295, %v19217_v44  ;;  %vm15276_vm5 = vcmp.gt.f32.partialorder %v2999_v38, 0.5  ;;  %v3415_v10 = vsel %vm15252_vm13, %v14465_v27, 0.0 }
 0x6d3   :  { %19219 = vst [vmem:[#allocation77_spill] sm:$0xff] %v19218_v44  ;;  %v3423_v14 = vsel %vm15252_vm13, %v14469_v6, 0.0  ;;  %vm15286_vm7 = vcmp.gt.f32.partialorder %v3052_v0, 0.5  ;;  %v19224_v5 = vunpack.i.l.bf16 %v14873_v61  ;;  %v3473_v32 = vsel %vm19227_vm3, %v19226_v16, %v11649_v1  ;;  %vm19231_vm13 = vmmov %vm19227_vm3  ;;  %v15320_v35 = vpop.permute.xlu0 %11661 }
 0x6d4   :  { %v19228_v46 = vunpack.i.h.bf16 %v15268_v54  ;;  %v19230_v0 = vunpack.i.l.bf16 %v15268_v54  ;;  %v19234_v61 = vunpack.i.l.bf16 %v14904_v40  ;;  %v2954_v29 = vrot.slane %v14557_v20, %v14645_v26 }
 0x6d5   :  { %v3472_v38 = vsel %vm19225_vm4, %v19224_v5, %v11648_v12  ;;  %v3540_v5 = vsel %vm19233_vm9, %v19232_v19, %v11609_v51  ;;  %vm19235_vm4 = vmmov %vm19233_vm9  ;;  %vm15388_vm3 = vcmp.gt.f32.partialorder %v3264_v43, 0.5  ;;  %v19253_v43 = vmov 0 }
 0x6d6   :  { %v3471_v2 = vsel %vm19229_vm8, %v11649_v1, %v19228_v46  ;;  %v3470_v34 = vsel %vm19231_vm13, %v11648_v12, %v19230_v0  ;;  %v3539_v16 = vsel %vm19235_vm4, %v19234_v61, %v11608_v37  ;;  %v3489_v48 = vsel %vm15260_vm2, %v3472_v38, %v3422_v62  ;;  %v15318_v1 = vpop.permute.xlu1 %11656  ;;  %vm19239_vm8 = vmmov %vm19235_vm4 }
 0x6d7   :  { %v3497_v46 = vsel %vm15260_vm2, %v3473_v32, %v3430_v7  ;;  %v15324_v12 = vsel %vm15264_vm6, %v3539_v16, %v3489_v48  ;;  %v18707_v40 = vunpack.i.h.bf16 %v15318_v1  ;;  %v18706_v0 = vunpack.i.l.bf16 %v15318_v1  ;;  %vm19240_vm9 = vmmov %vm19235_vm4 }
 0x6d8   :  { %19236 = vst [vmem:[#allocation78_spill] sm:$0xff] %v15324_v12  ;;  %v15328_v19 = vsel %vm15264_vm6, %v3540_v5, %v3497_v46  ;;  %v3490_v32 = vsel %vm15276_vm5, %v3471_v2, %v3423_v14  ;;  %v3482_v7 = vsel %vm15276_vm5, %v3470_v34, %v3415_v10  ;;  %v15362_v10 = vpop.permute.xlu0 %11666  ;;  %v3182_v38 = vrot.slane %v14785_v55, %v14659_v22  ;;  %v19244_v2 = vld [vmem:[#allocation45_spill] sm:$0xff] }
 0x6d9   :  { %19237 = vst [vmem:[#allocation79_spill] sm:$0xff] %v15328_v19  ;;  %v15334_v30 = vpack.c.bf16 %v15328_v19, %v15324_v12  ;;  %v15342_v48 = vpack.i.bf16 %v15328_v19, %v15324_v12  ;;  %v3537_v9 = vsel %vm19239_vm8, %v11608_v37, %v18706_v0  ;;  %v3538_v62 = vsel %vm19240_vm9, %v11609_v51, %v18707_v40 }
 0x6da   :  { %v15354_v14 = vsel %vm15286_vm7, %v3537_v9, %v3482_v7  ;;  %v15358_v34 = vsel %vm15286_vm7, %v3538_v62, %v3490_v32  ;;  %v15360_v28 = vpop.permute.xlu1 %11671  ;;  %v3178_v37 = vrot.slane %v14785_v55, %v14648_v3  ;;  %v3231_v5 = vrot.slane %v19244_v2, %v14648_v3  ;;  %v19252_v62 = vld [vmem:[#allocation3_spill] sm:$0xff] }
 0x6db   :  { %19238 = vst [vmem:[#allocation80_spill] sm:$0xff] %v15334_v30  ;;  %19241 = vst [vmem:[#allocation81_spill] sm:$0xff] %v15354_v14  ;;  %v15370_v51 = vpack.c.bf16 %v15358_v34, %v15354_v14  ;;  %v2958_v61 = vrot.slane %v14557_v20, %v14693_v52  ;;  %v15380_v16 = vpack.i.bf16 %v15358_v34, %v15354_v14  ;;  %vm15384_vm7 = vcmp.gt.f32.partialorder %v3133_v25, 0.5  ;;  %v19259_v30 = vld [vmem:[#allocation5_spill] sm:$0xff] }
 0x6dc   :  { %19242 = vst [vmem:[#allocation82_spill] sm:$0xff] %v15358_v34  ;;  %v3235_v46 = vrot.slane %v19244_v2, %v14659_v22  ;;  %vm15392_vm5 = vcmp.gt.f32.partialorder %v3125_v33, 0.5  ;;  %v19249_v9 = vmov 0  ;;  %v3569_v0 = vsel %vm15270_vm11, %v19252_v62, 0.0  ;;  %v11677_v19 = vpop.permute.xlu0 %11676  ;;  %v19282_v22 = vld [vmem:[#allocation22_spill] sm:$0xff] }
 0x6dd   :  { %19243 = vst [vmem:[#allocation83_spill] sm:$0xff] %v15370_v51  ;;  %v19250_v9 = vsel %vm15392_vm5, 4294967295, %v19249_v9  ;;  %v3166_v40 = vrot.slane %v14785_v55, %v14645_v26  ;;  %11771 = vrot.lane.b32.xlu1 %v15380_v16, %s12355_s17  ;;  %vm15405_vm6 = vcmp.gt.f32.partialorder %v3178_v37, 0.5  ;;  %vm15409_vm2 = vcmp.gt.f32.partialorder %v3182_v38, 0.5 }
 0x6de   :  { %19251 = vst [vmem:[#allocation45_spill] sm:$0xff] %v19250_v9  ;;  %v15403_v25 = vpop.permute.xlu1 %11681  ;;  %v19254_v43 = vsel %vm15405_vm6, 4294967295, %v19253_v43  ;;  %v19256_v33 = vmov 0  ;;  %v3577_v51 = vsel %vm15270_vm11, %v19259_v30, 0.0  ;;  %v19260_v12 = vrot.slane %v14699_v24, %v14638_v23  ;;  %vm19280_vm11 = vmmov %vm19277_vm10 }
 0x6df   :  { %19255 = vst [vmem:[#allocation84_spill] sm:$0xff] %v19254_v43  ;;  %v19257_v33 = vsel %vm15409_vm2, 4294967295, %v19256_v33  ;;  %v19263_v37 = vrot.slane %v14699_v24, %v15206_v42  ;;  %v19266_v14 = vrot.slane %v14699_v24, %v14645_v26  ;;  %v19267_v44 = vmov 0 }
 0x6e0   :  { %19258 = vst [vmem:[#allocation85_spill] sm:$0xff] %v19257_v33  ;;  %vm15419_vm13 = vcmp.gt.f32.partialorder %v19260_v12, 0.5  ;;  %v18740_v12 = vunpack.i.l.bf16 %v15403_v25  ;;  %v11679_v4 = vunpack.i.h.bf16 %v11677_v19  ;;  %v11678_v31 = vunpack.i.l.bf16 %v11677_v19 }
 0x6e1   :  { %vm15426_vm4 = vcmp.gt.f32.partialorder %v19263_v37, 0.5  ;;  %vm15433_vm8 = vcmp.gt.f32.partialorder %v19266_v14, 0.5  ;;  %vm15441_vm9 = vcmp.gt.f32.partialorder %v3231_v5, 0.5  ;;  %v19270_v62 = vmov 0  ;;  %v19281_v37 = vld [vmem:[#allocation20_spill] sm:$0xff]  ;;  %11776 = vrot.lane.b32.xlu1 %v15342_v48, %s12355_s17 }
 0x6e2   :  { %v19268_v44 = vsel %vm15433_vm8, 4294967295, %v19267_v44  ;;  %v19271_v62 = vsel %vm15441_vm9, 4294967295, %v19270_v62  ;;  %vm15445_vm12 = vcmp.gt.f32.partialorder %v3235_v46, 0.5  ;;  %v19273_v24 = vmov 0 }
 0x6e3   :  { %19269 = vst [vmem:[#allocation86_spill] sm:$0xff] %v19268_v44  ;;  %19272 = vst [vmem:[#allocation87_spill] sm:$0xff] %v19271_v62  ;;  %v19274_v24 = vsel %vm15445_vm12, 4294967295, %v19273_v24  ;;  %v19276_v14 = vunpack.i.l.bf16 %v14978_v13  ;;  %v19278_v19 = vunpack.i.h.bf16 %v15403_v25  ;;  %v19279_v30 = vunpack.i.h.bf16 %v14978_v13 }
 0x6e4   :  { %19275 = vst [vmem:[#allocation88_spill] sm:$0xff] %v19274_v24  ;;  %v3568_v46 = vsel %vm15392_vm5, %v19281_v37, 0.0  ;;  %v3576_v3 = vsel %vm15392_vm5, %v19282_v22, 0.0  ;;  %v19283_v60 = vunpack.i.h.bf16 %v15033_v45  ;;  %v19289_v56 = vunpack.i.l.bf16 %v15033_v45 }
 0x6e5   :  { %v3683_v50 = vsel %vm19277_vm10, %v19276_v14, %v18740_v12  ;;  %v3684_v5 = vsel %vm19280_vm11, %v19279_v30, %v19278_v19  ;;  %v19285_v12 = vunpack.i.l.bf16 %v15362_v10  ;;  %vm19286_vm10 = vmmov %vm19284_vm14  ;;  %v19287_v30 = vunpack.i.h.bf16 %v15362_v10  ;;  %11781 = vrot.lane.b32.xlu1 %v15380_v16, %s12358_s19 }
 0x6e6   :  { %v3619_v14 = vsel %vm19284_vm14, %v19283_v60, %v11679_v4  ;;  %vm19288_vm11 = vmmov %vm19286_vm10  ;;  %v19323_v62 = vunpack.i.h.bf16 %v14635_v17  ;;  %v11664_v24 = vunpack.i.h.bf16 %v15320_v35  ;;  %v11663_v33 = vunpack.i.l.bf16 %v15320_v35 }
 0x6e7   :  { %v3616_v13 = vsel %vm19286_vm10, %v11678_v31, %v19285_v12  ;;  %v3617_v19 = vsel %vm19288_vm11, %v11679_v4, %v19287_v30  ;;  %vm19290_vm15 = vmmov %vm19286_vm10  ;;  %v3641_v60 = vsel %vm15405_vm6, %v3619_v14, %v3576_v3  ;;  %vm15542_vm10 = vcmp.gt.f32.partialorder %v2958_v61, 0.5  ;;  %v19307_v14 = vld [vmem:[#allocation6_spill] sm:$0xff] }
 0x6e8   :  { %v3618_v9 = vsel %vm19290_vm15, %v19289_v56, %v11678_v31  ;;  %v3634_v12 = vsel %vm15409_vm2, %v3616_v13, %v3569_v0  ;;  %v3642_v4 = vsel %vm15409_vm2, %v3617_v19, %v3577_v51  ;;  %v15505_v3 = vsel %vm15441_vm9, %v15099_v57, %v3641_v60  ;;  %v19313_v13 = vld [vmem:[#allocation32_spill] sm:$0xff] }
 0x6e9   :  { %v3633_v59 = vsel %vm15405_vm6, %v3618_v9, %v3568_v46  ;;  %v15500_v56 = vsel %vm15445_vm12, %v3683_v50, %v3634_v12  ;;  %19293 = vst [vmem:[#allocation91_spill] sm:$0xff] %v15505_v3  ;;  %v15509_v31 = vsel %vm15445_vm12, %v3684_v5, %v3642_v4  ;;  %v19298_v57 = vrot.slane %v14557_v20, %v14638_v23  ;;  %v19306_v20 = vld [vmem:[#allocation4_spill] sm:$0xff]  ;;  %v11687_v35 = vpop.permute.xlu1 %11686 }
 0x6ea   :  { %v15496_v45 = vsel %vm15441_vm9, %v15093_v18, %v3633_v59  ;;  %19292 = vst [vmem:[#allocation90_spill] sm:$0xff] %v15500_v56  ;;  %19294 = vst [vmem:[#allocation92_spill] sm:$0xff] %v15509_v31  ;;  %v15517_v59 = vpack.c.bf16 %v15509_v31, %v15500_v56  ;;  %v15521_v50 = vpack.i.bf16 %v15509_v31, %v15500_v56  ;;  %vm15532_vm15 = vcmp.gt.f32.partialorder %v2954_v29, 0.5 }
 0x6eb   :  { %19291 = vst [vmem:[#allocation89_spill] sm:$0xff] %v15496_v45  ;;  %v15513_v0 = vpack.c.bf16 %v15505_v3, %v15496_v45  ;;  %vm15528_vm14 = vcmp.gt.f32.partialorder %v19298_v57, 0.5  ;;  %v15538_v9 = vpack.i.bf16 %v15505_v3, %v15496_v45  ;;  %vm15555_vm11 = vcmp.gt.f32.partialorder %v3166_v40, 0.5  ;;  %v19311_v40 = vld [vmem:[#allocation9_spill] sm:$0xff]  ;;  %11786 = vrot.lane.b32.xlu1 %v15342_v48, %s12358_s19  ;;  %v19312_v57 = vld [vmem:[#allocation10_spill] sm:$0xff] }
 0x6ec   :  { %19296 = vst [vmem:[#allocation94_spill] sm:$0xff] %v15517_v59  ;;  %19297 = vst [vmem:[#allocation95_spill] sm:$0xff] %v15521_v50  ;;  %11791 = vrot.lane.b32.xlu0 %v15521_v50, %s12359_s20  ;;  %v19308_v30 = vmov 0  ;;  %v3003_v61 = vrot.slane %v14562_v58, %v14638_v23  ;;  %v3056_v19 = vrot.slane %v14701_v49, %v14638_v23  ;;  %v3007_v60 = vrot.slane %v14562_v58, %v14645_v26 }
 0x6ed   :  { %19295 = vst [vmem:[#allocation93_spill] sm:$0xff] %v15513_v0  ;;  %19303 = vst [vmem:[#allocation96_spill] sm:$0xff] %v15538_v9  ;;  %v19309_v30 = vsel %vm15555_vm11, 4294967295, %v19308_v30  ;;  %v3011_v12 = vrot.slane %v14562_v58, %v14693_v52  ;;  %v3565_v29 = vsel %vm15433_vm8, %v14465_v27, 0.0  ;;  %v3416_v58 = vsel %vm15528_vm14, %v14467_v21, 0.0 }
 0x6ee   :  { %19310 = vst [vmem:[#allocation4_spill] sm:$0xff] %v19309_v30  ;;  %v3573_v27 = vsel %vm15433_vm8, %v14469_v6, 0.0  ;;  %v3424_v31 = vsel %vm15528_vm14, %v14471_v36, 0.0  ;;  %vm15600_vm9 = vcmp.gt.f32.partialorder %v3003_v61, 0.5  ;;  %vm15604_vm6 = vcmp.gt.f32.partialorder %v3056_v19, 0.5 }
 0x6ef   :  { %vm15608_vm12 = vcmp.gt.f32.partialorder %v3007_v60, 0.5  ;;  %v3060_v6 = vrot.slane %v14701_v49, %v14645_v26  ;;  %vm15614_vm2 = vcmp.gt.f32.partialorder %v3011_v12, 0.5  ;;  %v3417_v18 = vsel %vm15532_vm15, %v14509_v53, 0.0  ;;  %v19322_v60 = vld [vmem:[#allocation27_spill] sm:$0xff]  ;;  %11796 = vrot.lane.b32.xlu1 %v15380_v16, %s12356_s18 }
 0x6f0   :  { %11806 = vrot.lane.b32.xlu0 %v15380_v16, %s12359_s20  ;;  %v3418_v61 = vsel %vm15542_vm10, %v19281_v37, 0.0  ;;  %v3064_v19 = vrot.slane %v14701_v49, %v14693_v52  ;;  %v3068_v56 = vrot.slane %v14701_v49, %v19322_v60  ;;  %v3425_v12 = vsel %vm15532_vm15, %v14513_v41, 0.0 }
 0x6f1   :  { %v3426_v3 = vsel %vm15542_vm10, %v19282_v22, 0.0  ;;  %v3162_v45 = vrot.slane %v14785_v55, %v14638_v23  ;;  %v3158_v52 = vrot.slane %v14785_v55, %v15206_v42  ;;  %v19324_v49 = vunpack.i.h.bf16 %v19313_v13 }
 0x6f2   :  { %vm19325_vm14 = vcmp.lt.s32.totalorder %v14571_v11, 96  ;;  %v19326_v51 = vunpack.i.l.bf16 %v14635_v17  ;;  %v19327_v43 = vunpack.i.l.bf16 %v19313_v13  ;;  %v3186_v9 = vrot.slane %v14785_v55, %v14734_v47 }
 0x6f3   :  { %v3625_v16 = vsel %vm19325_vm14, %v19324_v49, %v19323_v62  ;;  %vm19328_vm15 = vmmov %vm19325_vm14  ;;  %v3239_v50 = vrot.slane %v19244_v2, %v14734_v47  ;;  %vm15658_vm10 = vcmp.gt.f32.partialorder %v3060_v6, 0.5  ;;  %v3219_v17 = vrot.slane %v19244_v2, %v14645_v26  ;;  %11801 = vrot.lane.b32.xlu1 %v15342_v48, %s12356_s18  ;;  %v11692_v6 = vpop.permute.xlu0 %11691 }
 0x6f4   :  { %v3624_v5 = vsel %vm19328_vm15, %v19327_v43, %v19326_v51  ;;  %vm15666_vm14 = vcmp.gt.f32.partialorder %v3064_v19, 0.5  ;;  %v15680_v26 = vsel %vm15555_vm11, %v3625_v16, %v3573_v27  ;;  %vm15690_vm15 = vcmp.gt.f32.partialorder %v3068_v56, 0.5 }
 0x6f5   :  { %v15684_v19 = vsel %vm15555_vm11, %v3624_v5, %v3565_v29  ;;  %v11689_v49 = vunpack.i.h.bf16 %v11687_v35  ;;  %v11688_v27 = vunpack.i.l.bf16 %v11687_v35  ;;  %v11694_v16 = vunpack.i.h.bf16 %v11692_v6 }
 0x6f6   :  { %v11693_v22 = vunpack.i.l.bf16 %v11692_v6  ;;  %v19335_v29 = vunpack.i.h.bf16 %v15318_v1  ;;  %vm19336_vm11 = vcmp.lt.s32.totalorder %v14571_v11, 60  ;;  %v19337_v51 = vunpack.i.l.bf16 %v15318_v1 }
 0x6f7   :  { %vm19338_vm5 = vmmov %vm19336_vm11  ;;  %v19339_v30 = vunpack.i.l.bf16 %v15360_v28  ;;  %v19340_v56 = vunpack.i.l.bf16 %v15403_v25  ;;  %vm19341_vm8 = vcmp.lt.s32.totalorder %v14571_v11, 30  ;;  %v19342_v35 = vunpack.i.h.bf16 %v15360_v28  ;;  %11811 = vrot.lane.b32.xlu1 %v15342_v48, %s12359_s20  ;;  %v11702_v36 = vpop.permute.xlu0 %11701 }
 0x6f8   :  { %v3536_v5 = vsel %vm19336_vm11, %v19335_v29, %v11664_v24  ;;  %v3535_v55 = vsel %vm19338_vm5, %v19337_v51, %v11663_v33  ;;  %v19343_v6 = vunpack.i.h.bf16 %v15403_v25  ;;  %vm19344_vm1 = vmmov %vm19341_vm8  ;;  %v19345_v1 = vunpack.i.l.bf16 %v15268_v54 }
 0x6f9   :  { %v15708_v41 = vsel %vm19341_vm8, %v19340_v56, %v19339_v30  ;;  %vm19346_vm5 = vcmp.lt.s32.totalorder %v14571_v11, 64  ;;  %v19347_v37 = vunpack.i.h.bf16 %v15268_v54  ;;  %v19388_v43 = vrot.slane %v19244_v2, %v14638_v23 }
 0x6fa   :  { %v15716_v29 = vsel %vm19344_vm1, %v19343_v6, %v19342_v35  ;;  %v3468_v51 = vsel %vm19346_vm5, %v19345_v1, %v11688_v27  ;;  %vm19348_vm11 = vmmov %vm19346_vm5  ;;  %v19351_v1 = vld [vmem:[#allocation29_spill] sm:$0xff]  ;;  %v15_v32 = vstv %s18565_s8 }
 0x6fb   :  { %v3469_v53 = vsel %vm19348_vm11, %v19347_v37, %v11689_v49  ;;  %vm19349_vm8 = vmmov %vm19346_vm5  ;;  %v3483_v56 = vsel %vm15600_vm9, %v3468_v51, %v3416_v58  ;;  %v19352_v54 = vunpack.i.l.bf16 %v19351_v1  ;;  %v19356_v46 = vunpack.i.h.bf16 %v19351_v1  ;;  %16 = vst [vmem:[#allocation2] sm:$0x1] %v15_v32 }
 0x6fc   :  { %v3467_v30 = vsel %vm19349_vm8, %v11689_v49, %v11694_v16  ;;  %vm19350_vm0 = vmmov %vm19346_vm5  ;;  %v3491_v35 = vsel %vm15600_vm9, %v3469_v53, %v3424_v31  ;;  %v11697_v49 = vpop.permute.xlu1 %11696  ;;  %v15748_v53 = vsel %vm15604_vm6, %v3535_v55, %v3483_v56  ;;  %vm15760_vm5 = vcmp.gt.f32.partialorder %v3158_v52, 0.5 }
 0x6fd   :  { %v3466_v25 = vsel %vm19350_vm0, %v11688_v27, %v11693_v22  ;;  %v3492_v6 = vsel %vm15608_vm12, %v3467_v30, %v3425_v12  ;;  %vm19353_vm1 = vmmov %vm19350_vm0  ;;  %vm15742_vm0 = vcmp.gt.f32.partialorder %v3162_v45, 0.5  ;;  %v15752_v31 = vsel %vm15604_vm6, %v3536_v5, %v3491_v35  ;;  %v19371_v30 = vld [vmem:[#allocation28_spill] sm:$0xff] }
 0x6fe   :  { %v3480_v37 = vsel %vm19353_vm1, %v11693_v22, %v19352_v54  ;;  %vm19357_vm9 = vmmov %vm19353_vm1  ;;  %v3484_v48 = vsel %vm15608_vm12, %v3466_v25, %v3417_v18  ;;  %v15766_v58 = vpack.c.bf16 %v15752_v31, %v15748_v53  ;;  %v11699_v55 = vunpack.i.h.bf16 %v11697_v49 }
 0x6ff   :  { %v3481_v22 = vsel %vm19357_vm9, %v11694_v16, %v19356_v46  ;;  %v3485_v4 = vsel %vm15614_vm2, %v3480_v37, %v3418_v61  ;;  %vm15772_vm6 = vcmp.gt.f32.partialorder %v3186_v9, 0.5  ;;  %v11698_v0 = vunpack.i.l.bf16 %v11697_v49  ;;  %v11707_v61 = vpop.permute.xlu0 %11706  ;;  %v19381_v37 = vld [vmem:[#allocation31_spill] sm:$0xff]  ;;  %v19383_v46 = vld [vmem:[#allocation30_spill] sm:$0xff] }
 0x700   :  { %19360 = vst [vmem:[#allocation6_spill] sm:$0xff] %v15766_v58  ;;  %v3493_v12 = vsel %vm15614_vm2, %v3481_v22, %v3426_v3  ;;  %v11704_v18 = vunpack.i.h.bf16 %v11702_v36  ;;  %v11703_v52 = vunpack.i.l.bf16 %v11702_v36  ;;  %vm15776_vm12 = vcmp.gt.f32.partialorder %v3239_v50, 0.5  ;;  %v11712_v9 = vpop.permute.xlu1 %11711  ;;  %v19543_v58 = vld [vmem:[#allocation70_spill] sm:$0xff] }
 0x701   :  { %v19363_v5 = vmov 0  ;;  %vm15780_vm11 = vcmp.gt.f32.partialorder %v3219_v17, 0.5  ;;  %v19365_v51 = vmov 0  ;;  %v15786_v59 = vpack.i.bf16 %v15752_v31, %v15748_v53 }
 0x702   :  { %v19364_v5 = vsel %vm15776_vm12, 4294967295, %v19363_v5  ;;  %v19366_v51 = vsel %vm15780_vm11, 4294967295, %v19365_v51  ;;  %vm19367_vm2 = vcmp.lt.s32.totalorder %v14571_v11, 60  ;;  %v19372_v25 = vunpack.i.h.bf16 %v19371_v30 }
 0x703   :  { %v3534_v3 = vsel %vm19367_vm2, %v11664_v24, %v11699_v55  ;;  %vm19368_vm8 = vmmov %vm19367_vm2 }
 0x704   :  { %v3533_v36 = vsel %vm19368_vm8, %v11663_v33, %v11698_v0  ;;  %v15794_v50 = vsel %vm15658_vm10, %v3534_v3, %v3492_v6  ;;  %vm19370_vm1 = vmmov %vm19367_vm2  ;;  %v19376_v33 = vunpack.i.l.bf16 %v19371_v30  ;;  %v11717_v3 = vpop.permute.xlu0 %11716  ;;  %v19394_v30 = vrot.slane %v14640_v8, %v15206_v42 }
 0x705   :  { %19369 = vst [vmem:[#allocation9_spill] sm:$0xff] %v15794_v50  ;;  %v3532_v17 = vsel %vm19370_vm1, %v11699_v55, %v11704_v18  ;;  %vm19373_vm9 = vmmov %vm19370_vm1  ;;  %v15804_v24 = vsel %vm15658_vm10, %v3533_v36, %v3484_v48  ;;  %v19385_v48 = vrot.slane %v19244_v2, %v15206_v42  ;;  %v11709_v36 = vunpack.i.h.bf16 %v11707_v61 }
 0x706   :  { %v3546_v56 = vsel %vm19373_vm9, %v11704_v18, %v19372_v25  ;;  %19374 = vst [vmem:[#allocation10_spill] sm:$0xff] %v15804_v24  ;;  %vm19375_vm2 = vmmov %vm19370_vm1  ;;  %v15814_v1 = vsel %vm15666_vm14, %v3532_v17, %v3493_v12  ;;  %v15818_v54 = vpack.c.bf16 %v15794_v50, %v15804_v24  ;;  %v11713_v18 = vunpack.i.l.bf16 %v11712_v9 }
 0x707   :  { %v3531_v35 = vsel %vm19375_vm2, %v11698_v0, %v11703_v52  ;;  %vm19377_vm8 = vmmov %vm19370_vm1  ;;  %19378 = vst [vmem:[#allocation32_spill] sm:$0xff] %v15814_v1  ;;  %v15832_v22 = vsel %vm15690_vm15, %v3546_v56, %v19383_v46  ;;  %vm15837_vm10 = vcmp.gt.f32.partialorder %v19385_v48, 0.5  ;;  %v11714_v0 = vunpack.i.h.bf16 %v11712_v9 }
 0x708   :  { %v3545_v6 = vsel %vm19377_vm8, %v11703_v52, %v19376_v33  ;;  %19379 = vst [vmem:[#allocation27_spill] sm:$0xff] %v15818_v54  ;;  %v15822_v44 = vsel %vm15666_vm14, %v3531_v35, %v3485_v4  ;;  %19384 = vst [vmem:[#allocation31_spill] sm:$0xff] %v15832_v22  ;;  %vm15844_vm14 = vcmp.gt.f32.partialorder %v19388_v43, 0.5  ;;  %v11722_v52 = vpop.permute.xlu1 %11721  ;;  %v11708_v17 = vunpack.i.l.bf16 %v11707_v61  ;;  %v19533_v54 = vld [vmem:[#allocation60_spill] sm:$0xff] }
 0x709   :  { %19380 = vst [vmem:[#allocation29_spill] sm:$0xff] %v15822_v44  ;;  %v15827_v49 = vsel %vm15690_vm15, %v3545_v6, %v19381_v37  ;;  %v15850_v55 = vpack.c.bf16 %v15814_v1, %v15822_v44  ;;  %vm15863_vm15 = vcmp.gt.f32.partialorder %v19394_v30, 0.5  ;;  %v19395_v25 = vmov 0 }
 0x70a   :  { %19382 = vst [vmem:[#allocation28_spill] sm:$0xff] %v15827_v49  ;;  %v15854_v62 = vpack.c.bf16 %v15832_v22, %v15827_v49  ;;  %v15858_v2 = vpack.i.bf16 %v15832_v22, %v15827_v49  ;;  %v19396_v25 = vsel %vm15863_vm15, 4294967295, %v19395_v25  ;;  %v19398_v56 = vunpack.i.l.bf16 %v19313_v13 }
 0x70b   :  { %19391 = vst [vmem:[#allocation30_spill] sm:$0xff] %v15850_v55  ;;  %19397 = vst [vmem:[#allocation99_spill] sm:$0xff] %v19396_v25  ;;  %vm19399_vm1 = vcmp.lt.s32.totalorder %v14571_v11, 96  ;;  %v19400_v35 = vunpack.i.h.bf16 %v19313_v13  ;;  %v11724_v33 = vunpack.i.h.bf16 %v11722_v52  ;;  %v11723_v6 = vunpack.i.l.bf16 %v11722_v52 }
 0x70c   :  { %19392 = vst [vmem:[#allocation97_spill] sm:$0xff] %v15854_v62  ;;  %19393 = vst [vmem:[#allocation98_spill] sm:$0xff] %v15858_v2  ;;  %v3626_v9 = vsel %vm19399_vm1, %v11713_v18, %v19398_v56  ;;  %v19402_v37 = vsel %vm15419_vm13, %v14423_v63, 0.0  ;;  %v19403_v48 = vsel %vm15419_vm13, %v14427_v15, 0.0  ;;  %11821 = vrot.lane.b32.xlu1 %v15858_v2, %s12358_s19  ;;  %v19406_v63 = vsel %vm15426_vm4, %v19312_v57, 0.0  ;;  %11816 = vrot.lane.b32.xlu0 %v15858_v2, %s12355_s17  ;;  %v19460_v62 = vld [vmem:[#allocation41_spill] sm:$0xff] }
 0x70d   :  { %vm19401_vm9 = vmmov %vm19399_vm1  ;;  %v3629_v46 = vsel %vm15742_vm0, %v3626_v9, %v19402_v37  ;;  %v19407_v15 = vunpack.i.l.bf16 %v15362_v10  ;;  %v19410_v9 = vsel %vm15426_vm4, %v19311_v40, 0.0 }
 0x70e   :  { %v3627_v61 = vsel %vm19401_vm9, %v11714_v0, %v19400_v35  ;;  %vm19404_vm2 = vmmov %vm19399_vm1  ;;  %v15915_v35 = vpop.permute.xlu1 %11726 }
 0x70f   :  { %v3637_v43 = vsel %vm15742_vm0, %v3627_v61, %v19403_v48  ;;  %v3613_v13 = vsel %vm19404_vm2, %v11709_v36, %v11714_v0  ;;  %vm19405_vm8 = vmmov %vm19399_vm1  ;;  %v3614_v56 = vsel %vm19399_vm1, %v19407_v15, %v11708_v17  ;;  %v19408_v0 = vunpack.i.h.bf16 %v15362_v10  ;;  %v19413_v61 = vld [vmem:[#allocation35_spill] sm:$0xff] }
 0x710   :  { %v3612_v52 = vsel %vm19405_vm8, %v11708_v17, %v11713_v18  ;;  %v3636_v30 = vsel %vm15760_vm5, %v3613_v13, %v19406_v63  ;;  %vm19409_vm9 = vmmov %vm19399_vm1  ;;  %v19411_v17 = vsel %vm15384_vm7, %v19306_v20, 0.0  ;;  %v19414_v37 = vunpack.i.l.bf16 %v19413_v61  ;;  %v15937_v63 = vpop.permute.xlu0 %11736 }
 0x711   :  { %v3615_v18 = vsel %vm19409_vm9, %v19408_v0, %v11709_v36  ;;  %v3628_v57 = vsel %vm15760_vm5, %v3612_v52, %v19410_v9  ;;  %v3635_v10 = vsel %vm15772_vm6, %v3614_v56, %v19411_v17  ;;  %v19412_v36 = vsel %vm15384_vm7, %v19307_v14, 0.0  ;;  %19418 = vst [vmem:[#allocation35_spill] sm:$0xff] %v15937_v63 }
 0x712   :  { %v3643_v40 = vsel %vm15772_vm6, %v3615_v18, %v19412_v36  ;;  %vm19415_vm2 = vcmp.lt.s32.totalorder %v14571_v11, 30  ;;  %v19416_v13 = vunpack.i.h.bf16 %v19413_v61  ;;  %v19419_v15 = vrot.slane %v14806_v39, %v15206_v42 }
 0x713   :  { %v3691_v48 = vsel %vm19415_vm2, %v11723_v6, %v19414_v37  ;;  %vm19417_vm8 = vmmov %vm19415_vm2  ;;  %v19420_v56 = vmov 0  ;;  %v19423_v0 = vrot.slane %v14806_v39, %v14638_v23  ;;  %v19424_v18 = vmov 0 }
 0x714   :  { %v3692_v52 = vsel %vm19417_vm8, %v11724_v33, %v19416_v13  ;;  %vm15942_vm1 = vcmp.gt.f32.partialorder %v19419_v15, 0.5  ;;  %v15956_v9 = vsel %vm15776_vm12, %v15708_v41, %v3635_v10  ;;  %v15961_v17 = vsel %vm15776_vm12, %v15716_v29, %v3643_v40  ;;  %vm19434_vm8 = vmmov %vm19415_vm2 }
 0x715   :  { %v19421_v56 = vsel %vm15942_vm1, 4294967295, %v19420_v56  ;;  %vm15949_vm9 = vcmp.gt.f32.partialorder %v19423_v0, 0.5  ;;  %19427 = vst [vmem:[#allocation102_spill] sm:$0xff] %v15956_v9  ;;  %19428 = vst [vmem:[#allocation103_spill] sm:$0xff] %v15961_v17  ;;  %v15966_v36 = vsel %vm15780_vm11, %v3691_v48, %v15684_v19  ;;  %v15971_v23 = vsel %vm15780_vm11, %v3692_v52, %v15680_v26 }
 0x716   :  { %19422 = vst [vmem:[#allocation100_spill] sm:$0xff] %v19421_v56  ;;  %v19425_v18 = vsel %vm15949_vm9, 4294967295, %v19424_v18  ;;  %19429 = vst [vmem:[#allocation104_spill] sm:$0xff] %v15966_v36  ;;  %v15975_v61 = vpack.c.bf16 %v15961_v17, %v15956_v9  ;;  %v15979_v41 = vpack.c.bf16 %v15971_v23, %v15966_v36  ;;  %v11719_v29 = vunpack.i.h.bf16 %v11717_v3 }
 0x717   :  { %19426 = vst [vmem:[#allocation101_spill] sm:$0xff] %v19425_v18  ;;  %19430 = vst [vmem:[#allocation105_spill] sm:$0xff] %v15971_v23  ;;  %v11718_v10 = vunpack.i.l.bf16 %v11717_v3  ;;  %v18800_v40 = vunpack.i.h.bf16 %v15915_v35  ;;  %v18799_v19 = vunpack.i.l.bf16 %v15915_v35  ;;  %v18806_v48 = vunpack.i.l.bf16 %v15937_v63  ;;  %v19542_v18 = vld [vmem:[#allocation82_spill] sm:$0xff] }
 0x718   :  { %19431 = vst [vmem:[#allocation106_spill] sm:$0xff] %v15975_v61  ;;  %19432 = vst [vmem:[#allocation107_spill] sm:$0xff] %v15979_v41  ;;  %v3678_v26 = vsel %vm19415_vm2, %v11719_v29, %v11724_v33  ;;  %v19433_v13 = vunpack.i.h.bf16 %v15360_v28  ;;  %v19436_v3 = vunpack.i.l.bf16 %v15360_v28  ;;  %10251 = vmatpush1.bf16.msra.mxu1 %v15979_v41 }
 0x719   :  { %vm19435_vm11 = vmmov %vm19415_vm2  ;;  %v16000_v37 = vsel %vm15844_vm14, %v3678_v26, %v3637_v43  ;;  %v19444_v26 = vld [vmem:[#allocation37_spill] sm:$0xff] }
 0x71a   :  { %v3680_v52 = vsel %vm19434_vm8, %v19433_v13, %v11719_v29  ;;  %v3677_v15 = vsel %vm19435_vm11, %v11718_v10, %v11723_v6  ;;  %vm19437_vm12 = vmmov %vm19415_vm2  ;;  %19438 = vst [vmem:[#allocation108_spill] sm:$0xff] %v16000_v37  ;;  %v11732_v6 = vpop.permute.xlu1 %11731  ;;  %v19447_v13 = vunpack.i.h.bf16 %v19444_v26  ;;  %vm19452_vm2 = vcmp.lt.s32.totalorder %v14571_v11, 15 }
 0x71b   :  { %v3679_v0 = vsel %vm19437_vm12, %v19436_v3, %v11718_v10  ;;  %v16008_v29 = vsel %vm15844_vm14, %v3677_v15, %v3629_v46  ;;  %v16012_v28 = vsel %vm15837_vm10, %v3680_v52, %v3636_v30  ;;  %vm19446_vm12 = vcmp.lt.s32.totalorder %v14571_v11, 112  ;;  %vm19454_vm8 = vmmov %vm19452_vm2 }
 0x71c   :  { %v16004_v33 = vsel %vm15837_vm10, %v3679_v0, %v3628_v57  ;;  %19440 = vst [vmem:[#allocation110_spill] sm:$0xff] %v16008_v29  ;;  %19441 = vst [vmem:[#allocation111_spill] sm:$0xff] %v16012_v28  ;;  %v16016_v10 = vpack.c.bf16 %v16000_v37, %v16008_v29  ;;  %v19445_v57 = vunpack.i.l.bf16 %v19444_v26  ;;  %v19449_v52 = vsel %vm15388_vm3, %v19306_v20, 0.0 }
 0x71d   :  { %19439 = vst [vmem:[#allocation109_spill] sm:$0xff] %v16004_v33  ;;  %v16020_v43 = vpack.c.bf16 %v16012_v28, %v16004_v33  ;;  %vm19448_vm11 = vmmov %vm19446_vm12  ;;  %v19450_v3 = vsel %vm15388_vm3, %v19307_v14, 0.0  ;;  %v11825_v26 = vpack.i.bf16 %v15971_v23, %v15966_v36  ;;  %v16052_v20 = vpack.i.bf16 %v15814_v1, %v15822_v44 }
 0x71e   :  { %19442 = vst [vmem:[#allocation112_spill] sm:$0xff] %v16016_v10  ;;  %v3772_v46 = vsel %vm19446_vm12, %v18799_v19, %v19445_v57  ;;  %v3773_v30 = vsel %vm19448_vm11, %v18800_v40, %v19447_v13  ;;  %v11734_v57 = vunpack.i.h.bf16 %v11732_v6  ;;  %v11733_v19 = vunpack.i.l.bf16 %v11732_v6  ;;  %vm19457_vm12 = vmmov %vm19452_vm2 }
 0x71f   :  { %19443 = vst [vmem:[#allocation113_spill] sm:$0xff] %v16020_v43  ;;  %v3774_v15 = vsel %vm15863_vm15, %v3772_v46, %v19449_v52  ;;  %v3782_v0 = vsel %vm15863_vm15, %v3773_v30, %v19450_v3  ;;  %v11840_v13 = vpack.i.bf16 %v15794_v50, %v15804_v24  ;;  %19451 = vst [vmem:[#allocation37_spill] sm:$0xff] %v16052_v20  ;;  %11826 = vrot.lane.b32.xlu1 %v11825_v26, %s12356_s18  ;;  %v19455_v3 = vld [vmem:[#allocation46_spill] sm:$0xff] }
 0x720   :  { %11831 = vrot.lane.b32.xlu0 %v11825_v26, %s12359_s20  ;;  %v11895_v14 = vpack.i.bf16 %v16012_v28, %v16004_v33  ;;  %v11905_v46 = vpack.i.bf16 %v15961_v17, %v15956_v9  ;;  %v3823_v6 = vsel %vm19452_vm2, %v18806_v48, %v11733_v19  ;;  %v19453_v30 = vunpack.i.h.bf16 %v15937_v63  ;;  %vm19459_vm11 = vmmov %vm19452_vm2  ;;  %v19461_v17 = vld [vmem:[#allocation40_spill] sm:$0xff]  ;;  %v19548_v63 = vld [vmem:[#allocation45_spill] sm:$0xff] }
 0x721   :  { %v19456_v40 = vunpack.i.l.bf16 %v19455_v3  ;;  %v19458_v42 = vunpack.i.h.bf16 %v19455_v3  ;;  %v3839_v61 = vsel %vm15942_vm1, %v3823_v6, %v3774_v15  ;;  %vm19468_vm2 = vcmp.lt.s32.totalorder %v14571_v11, 96 }
 0x722   :  { %v3824_v52 = vsel %vm19454_vm8, %v19453_v30, %v11734_v57  ;;  %vm19469_vm8 = vmmov %vm19468_vm2 }
 0x723   :  { %v3837_v26 = vsel %vm19457_vm12, %v11733_v19, %v19456_v40  ;;  %v3838_v41 = vsel %vm19459_vm11, %v11734_v57, %v19458_v42  ;;  %v3847_v30 = vsel %vm15942_vm1, %v3824_v52, %v3782_v0  ;;  %v11915_v42 = vpack.i.bf16 %v16000_v37, %v16008_v29  ;;  %11841 = vrot.lane.b32.xlu1 %v11840_v13, %s12355_s17 }
 0x724   :  { %v3840_v48 = vsel %vm15949_vm9, %v3837_v26, %v19460_v62  ;;  %v3848_v9 = vsel %vm15949_vm9, %v3838_v41, %v19461_v17  ;;  %v16088_v19 = vpack.c.bf16 %v3847_v30, %v3839_v61  ;;  %11836 = vrot.lane.b32.xlu0 %v15786_v59, %s12355_s17  ;;  %v19464_v62 = vld [vmem:[#allocation15_spill] sm:$0xff]  ;;  %v19466_v17 = vld [vmem:[#allocation16_spill] sm:$0xff]  ;;  %v16161_v30 = vpop.permute.xlu1 %11751  ;;  %vm19472_vm12 = vcmp.lt.s32.totalorder %v14571_v11, 30 }
 0x725   :  { %v16086_v40 = vpack.c.bf16 %v3848_v9, %v3840_v48  ;;  %v19465_v9 = vld [vmem:[#allocation23_spill] sm:$0xff]  ;;  %v19467_v61 = vld [vmem:[#allocation12_spill] sm:$0xff]  ;;  %v18811_v16 = vunpack.i.h.bf16 %v16161_v30  ;;  %vm19473_vm11 = vmmov %vm19472_vm12  ;;  %v19515_v33 = vunpack.i.l.bf16 %v16161_v30  ;;  %v19553_v37 = vmov 0 }
 0x726   :  { %19463 = vst [vmem:[#allocation41_spill] sm:$0xff] %v16088_v19  ;;  %v19562_v29 = vmov 0 }
 0x727   :  { %19462 = vst [vmem:[#allocation46_spill] sm:$0xff] %v16086_v40  ;;  %10213 = vmatprep.subr.bf16.mxu0 %v16086_v40  ;;  %11846 = vrot.lane.b32.xlu1 %v19464_v62, %s12356_s18  ;;  %v19495_v40 = vld [vmem:[#allocation36_spill] sm:$0xff] }
 0x728   :  { %10215 = vmatpush1.bf16.msra.mxu0 %v16088_v19  ;;  %11851 = vrot.lane.b32.xlu0 %v15786_v59, %s12358_s19  ;;  %v3341_v25 = vrot.slane %v14640_v8, %v19495_v40 }
 0x729   :  { %10217 = vmatprep.subr.bf16.mxu0 %v16016_v10 }
 0x72a   :  { %v11742_v41 = vpop.permute.xlu0 %11741 }
 0x72b   :  { %11866 = vrot.lane.b32.xlu1 %v19465_v9, %s12356_s18  ;;  %v11744_v15 = vunpack.i.h.bf16 %v11742_v41  ;;  %v11743_v0 = vunpack.i.l.bf16 %v11742_v41 }
 0x72c   :  { %10219 = vmatpush1.bf16.msra.mxu0 %v16020_v43  ;;  %11856 = vrot.lane.b32.xlu0 %v16052_v20, %s12358_s19 }
 0x72e   :  { %v16127_v48 = vpop.permute.xlu0 %11746 }
 0x72f   :  { %11876 = vrot.lane.b32.xlu1 %v19464_v62, %s12359_s20  ;;  %v18810_v57 = vunpack.i.h.bf16 %v16127_v48  ;;  %v18809_v6 = vunpack.i.l.bf16 %v16127_v48 }
 0x730   :  { %11861 = vrot.lane.b32.xlu0 %v19466_v17, %s12356_s18 }
 0x731   :  { %v3905_v52 = vsel %vm19468_vm2, %v18809_v6, %v11743_v0 }
 0x732   :  { %v11757_v62 = vpop.permute.xlu0 %11756 }
 0x733   :  { %11886 = vrot.lane.b32.xlu1 %v16052_v20, %s12355_s17  ;;  %v11759_v9 = vunpack.i.h.bf16 %v11757_v62 }
 0x734   :  { %11871 = vrot.lane.b32.xlu0 %v19467_v61, %s12359_s20 }
 0x737   :  { %11896 = vrot.lane.b32.xlu1 %v11895_v14, %s12356_s18 }
 0x738   :  { %11881 = vrot.lane.b32.xlu0 %v19466_v17, %s12359_s20  ;;  %v11758_v17 = vunpack.i.l.bf16 %v11757_v62  ;;  %v3970_v62 = vsel %vm19472_vm12, %v18811_v16, %v11759_v9 }
 0x73b   :  { %11906 = vrot.lane.b32.xlu1 %v11905_v46, %s12356_s18 }
 0x73c   :  { %11891 = vrot.lane.b32.xlu0 %v11840_v13, %s12358_s19 }
 0x73f   :  { %11916 = vrot.lane.b32.xlu1 %v11915_v42, %s12359_s20 }
 0x740   :  { %11901 = vrot.lane.b32.xlu0 %v11915_v42, %s12356_s18 }
 0x743   :  { %11921 = vrot.lane.b32.xlu1 %v11905_v46, %s12359_s20  ;;  %v3870_v46 = vsel %vm15384_vm7, %v15752_v31, 0.0 }
 0x744   :  { %11911 = vrot.lane.b32.xlu0 %v11895_v14, %s12359_s20  ;;  %v3862_v14 = vsel %vm15384_vm7, %v15748_v53, 0.0  ;;  %vm19470_vm7 = vmmov %vm19468_vm2 }
 0x745   :  { %v16151_v3 = vsel %vm15772_vm6, %v3905_v52, %v3862_v14  ;;  %v3855_v52 = vsel %vm15426_vm4, %v15804_v24, 0.0 }
 0x747   :  { %11931 = vrot.lane.b32.xlu1 %v11840_v13, %s12356_s18 }
 0x748   :  { %11926 = vrot.lane.b32.xlu0 %v15786_v59, %s12356_s18 }
 0x74b   :  { %11941 = vrot.lane.b32.xlu1 %v15786_v59, %s12359_s20  ;;  %v3906_v59 = vsel %vm19469_vm8, %v18810_v57, %v11744_v15 }
 0x74c   :  { %11936 = vrot.lane.b32.xlu0 %v16052_v20, %s12356_s18  ;;  %v16155_v26 = vsel %vm15772_vm6, %v3906_v59, %v3870_v46  ;;  %v18812_v46 = vunpack.i.l.bf16 %v16161_v30  ;;  %vm19471_vm6 = vmmov %vm19468_vm2 }
 0x74f   :  { %v16163_v42 = vpop.permute.xlu1 %11771 }
 0x750   :  { %11946 = vrot.lane.b32.xlu0 %v11840_v13, %s12359_s20  ;;  %v3863_v13 = vsel %vm15426_vm4, %v15794_v50, 0.0  ;;  %v18814_v16 = vunpack.i.h.bf16 %v16163_v42  ;;  %vm19477_vm4 = vmmov %vm19468_vm2 }
 0x753   :  { %v11777_v61 = vpop.permute.xlu1 %11776 }
 0x754   :  { %v11779_v41 = vunpack.i.h.bf16 %v11777_v61  ;;  %v11778_v14 = vunpack.i.l.bf16 %v11777_v61  ;;  %v3969_v61 = vsel %vm19473_vm11, %v18812_v46, %v11758_v17  ;;  %v18813_v46 = vunpack.i.l.bf16 %v16163_v42 }
 0x756   :  { %v3904_v59 = vsel %vm19470_vm7, %v11744_v15, %v11779_v41  ;;  %v3903_v32 = vsel %vm19471_vm6, %v11743_v0, %v11778_v14 }
 0x757   :  { %v3927_v38 = vsel %vm15760_vm5, %v3904_v59, %v3863_v13  ;;  %v3919_v6 = vsel %vm15760_vm5, %v3903_v32, %v3855_v52  ;;  %v16189_v15 = vpop.permute.xlu1 %11781  ;;  %v3918_v52 = vsel %vm19477_vm4, %v11779_v41, %v18814_v16  ;;  %vm19478_vm5 = vmmov %vm19468_vm2  ;;  %v3864_v41 = vsel %vm15419_vm13, %v15814_v1, 0.0  ;;  %v16238_v16 = vpop.permute.xlu0 %11761 }
 0x758   :  { %v16193_v0 = vsel %vm15837_vm10, %v3970_v62, %v3927_v38  ;;  %v16197_v57 = vsel %vm15837_vm10, %v3969_v61, %v3919_v6  ;;  %v3917_v12 = vsel %vm19478_vm5, %v11778_v14, %v18813_v46  ;;  %v3856_v62 = vsel %vm15419_vm13, %v15822_v44, 0.0  ;;  %vm19479_vm10 = vmmov %vm19473_vm11  ;;  %19481 = vst [vmem:[#allocation16_spill] sm:$0xff] %v16238_v16 }
 0x759   :  { %19474 = vst [vmem:[#allocation40_spill] sm:$0xff] %v16193_v0  ;;  %19475 = vst [vmem:[#allocation15_spill] sm:$0xff] %v16197_v57  ;;  %v16203_v13 = vpack.c.bf16 %v16193_v0, %v16197_v57  ;;  %v11950_v45 = vpack.i.bf16 %v16193_v0, %v16197_v57  ;;  %v3920_v61 = vsel %vm15742_vm0, %v3917_v12, %v3856_v62  ;;  %vm19488_vm13 = vcmp.lt.s32.totalorder %v14571_v11, 112  ;;  %v19511_v57 = vld [vmem:[#allocation19_spill] sm:$0xff] }
 0x75a   :  { %v3928_v14 = vsel %vm15742_vm0, %v3918_v52, %v3864_v41  ;;  %vm19480_vm2 = vmmov %vm19479_vm10  ;;  %v11784_v2 = vunpack.i.h.bf16 %v16189_v15  ;;  %v11783_v44 = vunpack.i.l.bf16 %v16189_v15  ;;  %v19569_v15 = vld [vmem:[#allocation85_spill] sm:$0xff] }
 0x75b   :  { %19476 = vst [vmem:[#allocation23_spill] sm:$0xff] %v16203_v13  ;;  %11951 = vrot.lane.b32.xlu1 %v11950_v45, %s12356_s18  ;;  %vm19489_vm0 = vmmov %vm19488_vm13 }
 0x75c   :  { %vm19514_vm4 = vmmov %vm19480_vm2 }
 0x75d   :  { %v16215_v6 = vpop.permute.xlu1 %11786  ;;  %vm19517_vm5 = vmmov %vm19480_vm2 }
 0x75e   :  { %v18815_v59 = vunpack.i.h.bf16 %v16215_v6  ;;  %v18816_v32 = vunpack.i.l.bf16 %v16215_v6  ;;  %v19567_v1 = vunpack.i.h.bf16 %v16215_v6 }
 0x760   :  { %v3968_v38 = vsel %vm19479_vm10, %v11759_v9, %v18815_v59  ;;  %v3967_v46 = vsel %vm19480_vm2, %v11758_v17, %v18816_v32  ;;  %vm19520_vm10 = vnez %v19364_v5 }
 0x761   :  { %v16242_v34 = vsel %vm15844_vm14, %v3967_v46, %v3920_v61  ;;  %v16246_v27 = vsel %vm15844_vm14, %v3968_v38, %v3928_v14  ;;  %v16248_v52 = vpop.permute.xlu1 %11796  ;;  %v16264_v61 = vpop.permute.xlu0 %11766  ;;  %v3999_v14 = vsel %vm15388_vm3, %v15748_v53, 0.0  ;;  %v4007_v38 = vsel %vm15388_vm3, %v15752_v31, 0.0 }
 0x762   :  { %19482 = vst [vmem:[#allocation12_spill] sm:$0xff] %v16242_v34  ;;  %19483 = vst [vmem:[#allocation114_spill] sm:$0xff] %v16246_v27  ;;  %v16252_v9 = vpack.c.bf16 %v16246_v27, %v16242_v34  ;;  %v11965_v12 = vpack.i.bf16 %v16246_v27, %v16242_v34  ;;  %v18824_v46 = vunpack.i.h.bf16 %v16248_v52  ;;  %v18820_v4 = vunpack.i.l.bf16 %v16248_v52  ;;  %v19518_v27 = vld [vmem:[#allocation20_spill] sm:$0xff]  ;;  %v19519_v34 = vld [vmem:[#allocation21_spill] sm:$0xff] }
 0x763   :  { %19484 = vst [vmem:[#allocation115_spill] sm:$0xff] %v16248_v52  ;;  %19487 = vst [vmem:[#allocation118_spill] sm:$0xff] %v16264_v61  ;;  %v18831_v43 = vunpack.i.h.bf16 %v16264_v61  ;;  %vm19490_vm14 = vcmp.lt.s32.totalorder %v14571_v11, 15  ;;  %v19540_v52 = vld [vmem:[#allocation77_spill] sm:$0xff] }
 0x764   :  { %19485 = vst [vmem:[#allocation116_spill] sm:$0xff] %v16252_v9  ;;  %11966 = vrot.lane.b32.xlu1 %v11965_v12, %s12359_s20  ;;  %11956 = vrot.lane.b32.xlu0 %v11965_v12, %s12356_s18  ;;  %vm19491_vm8 = vmmov %vm19490_vm14 }
 0x765   :  { %v16258_v17 = vpop.permute.xlu1 %11801 }
 0x766   :  { %19486 = vst [vmem:[#allocation117_spill] sm:$0xff] %v16258_v17  ;;  %v18823_v62 = vunpack.i.h.bf16 %v16258_v17  ;;  %v18819_v41 = vunpack.i.l.bf16 %v16258_v17 }
 0x768   :  { %v4061_v12 = vsel %vm19488_vm13, %v18819_v41, %v18820_v4  ;;  %v4062_v59 = vsel %vm19489_vm0, %v18823_v62, %v18824_v46  ;;  %11961 = vrot.lane.b32.xlu0 %v11950_v45, %s12359_s20  ;;  %v18825_v41 = vunpack.i.l.bf16 %v16264_v61  ;;  %v19493_v62 = vld [vmem:[#allocation33_spill] sm:$0xff]  ;;  %v19509_v61 = vld [vmem:[#allocation14_spill] sm:$0xff]  ;;  %vm19534_vm0 = vnez %v19533_v54 }
 0x769   :  { %v4063_v53 = vsel %vm15863_vm15, %v4061_v12, %v3999_v14  ;;  %v4071_v31 = vsel %vm15863_vm15, %v4062_v59, %v4007_v38  ;;  %v16289_v32 = vpop.permute.xlu1 %11811  ;;  %v3292_v46 = vrot.slane %v19493_v62, %v14734_v47 }
 0x76a   :  { %v18832_v4 = vunpack.i.h.bf16 %v16289_v32  ;;  %v18826_v10 = vunpack.i.l.bf16 %v16289_v32 }
 0x76b   :  { %vm16323_vm7 = vcmp.gt.f32.partialorder %v3292_v46, 0.5 }
 0x76c   :  { %v4111_v14 = vsel %vm19490_vm14, %v18825_v41, %v18826_v10  ;;  %v4112_v45 = vsel %vm19491_vm8, %v18831_v43, %v18832_v4  ;;  %v3280_v41 = vrot.slane %v19493_v62, %v19322_v60  ;;  %v19494_v10 = vld [vmem:[#allocation34_spill] sm:$0xff]  ;;  %v3288_v43 = vrot.slane %v19493_v62, %v19495_v40  ;;  %v16321_v4 = vpop.permute.xlu0 %11791 }
 0x76d   :  { %v4127_v59 = vsel %vm15942_vm1, %v4111_v14, %v4063_v53  ;;  %v4135_v38 = vsel %vm15942_vm1, %v4112_v45, %v4071_v31  ;;  %v3284_v19 = vrot.slane %v19493_v62, %v19494_v10  ;;  %19496 = vst [vmem:[#allocation33_spill] sm:$0xff] %v16321_v4  ;;  %v19497_v53 = vmov 0 }
 0x76e   :  { %v16311_v12 = vpack.c.bf16 %v4135_v38, %v4127_v59  ;;  %v19498_v53 = vsel %vm16323_vm7, 4294967295, %v19497_v53  ;;  %vm16327_vm6 = vcmp.gt.f32.partialorder %v3280_v41, 0.5  ;;  %v19500_v31 = vmov 0  ;;  %v19508_v38 = vld [vmem:[#allocation3_spill] sm:$0xff] }
 0x76f   :  { %19499 = vst [vmem:[#allocation34_spill] sm:$0xff] %v19498_v53  ;;  %v19501_v31 = vsel %vm16327_vm6, 4294967295, %v19500_v31  ;;  %vm16331_vm12 = vcmp.gt.f32.partialorder %v3284_v19, 0.5  ;;  %vm16337_vm11 = vcmp.gt.f32.partialorder %v3288_v43, 0.5  ;;  %v19505_v59 = vmov 0  ;;  %v19510_v43 = vld [vmem:[#allocation5_spill] sm:$0xff] }
 0x770   :  { %19492 = vst [vmem:[#allocation119_spill] sm:$0xff] %v16311_v12  ;;  %19502 = vst [vmem:[#allocation36_spill] sm:$0xff] %v19501_v31  ;;  %v19506_v59 = vsel %vm16337_vm11, 4294967295, %v19505_v59  ;;  %v16358_v62 = vpop.permute.xlu0 %11806  ;;  %v19512_v41 = vunpack.i.h.bf16 %v16161_v30  ;;  %v19523_v30 = vld [vmem:[#allocation49_spill] sm:$0xff]  ;;  %vm19541_vm8 = vnez %v19540_v52  ;;  %v3333_v52 = vrot.slane %v14640_v8, %v19322_v60 }
 0x771   :  { %19507 = vst [vmem:[#allocation120_spill] sm:$0xff] %v19506_v59  ;;  %v3869_v12 = vsel %vm19541_vm8, %v19542_v18, 0.0  ;;  %v19547_v18 = vld [vmem:[#allocation78_spill] sm:$0xff]  ;;  %vm19570_vm14 = vnez %v19569_v15  ;;  %v19579_v15 = vld [vmem:[#allocation47_spill] sm:$0xff] }
 0x77e   :  { %v16335_v45 = vpop.permute.xlu1 %11821  ;;  %v16421_v56 = vpop.permute.xlu0 %11816 }
 0x77f   :  { %v19513_v28 = vunpack.i.h.bf16 %v16335_v45  ;;  %v19516_v0 = vunpack.i.l.bf16 %v16335_v45  ;;  %v19557_v24 = vunpack.i.h.bf16 %v16421_v56 }
 0x781   :  { %v3972_v19 = vsel %vm19514_vm4, %v19513_v28, %v19512_v41  ;;  %v3971_v17 = vsel %vm19517_vm5, %v19516_v0, %v19515_v33  ;;  %v19524_v33 = vld [vmem:[#allocation43_spill] sm:$0xff]  ;;  %v19526_v41 = vld [vmem:[#allocation22_spill] sm:$0xff]  ;;  %v19532_v0 = vld [vmem:[#allocation69_spill] sm:$0xff]  ;;  %vm19549_vm5 = vnez %v19548_v63 }
 0x782   :  { %v16381_v9 = vsel %vm19520_vm10, %v3972_v19, %v16155_v26  ;;  %v16386_v28 = vsel %vm19520_vm10, %v3971_v17, %v16151_v3  ;;  %vm19525_vm2 = vnez %v19524_v33  ;;  %v19528_v19 = vld [vmem:[#allocation50_spill] sm:$0xff]  ;;  %v19530_v17 = vld [vmem:[#allocation44_spill] sm:$0xff]  ;;  %v19556_v3 = vunpack.i.h.bf16 %v16127_v48 }
 0x783   :  { %19521 = vst [vmem:[#allocation3_spill] sm:$0xff] %v16381_v9  ;;  %19522 = vst [vmem:[#allocation14_spill] sm:$0xff] %v16386_v28  ;;  %v16396_v13 = vpack.c.bf16 %v16381_v9, %v16386_v28  ;;  %v11970_v26 = vpack.i.bf16 %v16381_v9, %v16386_v28  ;;  %vm19531_vm13 = vnez %v19530_v17  ;;  %v19539_v28 = vld [vmem:[#allocation81_spill] sm:$0xff]  ;;  %v3345_v9 = vrot.slane %v14640_v8, %v14734_v47 }
 0x784   :  { %v3861_v5 = vsel %vm19541_vm8, %v19539_v28, 0.0  ;;  %vm16473_vm8 = vcmp.gt.f32.partialorder %v3333_v52, 0.5  ;;  %v19559_v52 = vunpack.i.l.bf16 %v16127_v48  ;;  %vm19571_vm10 = vcmp.lt.s32.totalorder %v14571_v11, 96 }
 0x785   :  { %19527 = vst [vmem:[#allocation5_spill] sm:$0xff] %v16396_v13  ;;  %11971 = vrot.lane.b32.xlu1 %v11970_v26, %s12356_s18  ;;  %v19545_v13 = vld [vmem:[#allocation86_spill] sm:$0xff]  ;;  %v19554_v37 = vsel %vm16473_vm8, 4294967295, %v19553_v37 }
 0x786   :  { %vm19546_vm4 = vnez %v19545_v13  ;;  %19555 = vst [vmem:[#allocation19_spill] sm:$0xff] %v19554_v37 }
 0x787   :  { %v3865_v28 = vsel %vm19546_vm4, %v15832_v22, 0.0  ;;  %v3857_v55 = vsel %vm19546_vm4, %v15827_v49, 0.0  ;;  %v3337_v22 = vrot.slane %v14640_v8, %v19494_v10  ;;  %vm19558_vm4 = vcmp.lt.s32.totalorder %v14571_v11, 96 }
 0x788   :  { %v3908_v13 = vsel %vm19558_vm4, %v19557_v24, %v19556_v3  ;;  %v19560_v8 = vunpack.i.l.bf16 %v16421_v56  ;;  %vm19561_vm9 = vmmov %vm19558_vm4  ;;  %vm16517_vm4 = vcmp.gt.f32.partialorder %v3345_v9, 0.5 }
 0x789   :  { %11976 = vrot.lane.b32.xlu1 %v11970_v26, %s12359_s20  ;;  %v19563_v29 = vsel %vm16517_vm4, 4294967295, %v19562_v29  ;;  %v3933_v50 = vsel %vm19570_vm14, %v3908_v13, %v3869_v12  ;;  %v19576_v13 = vld [vmem:[#allocation4_spill] sm:$0xff] }
 0x78a   :  { %v3907_v36 = vsel %vm19561_vm9, %v19560_v8, %v19559_v52  ;;  %19564 = vst [vmem:[#allocation20_spill] sm:$0xff] %v19563_v29  ;;  %v19565_v8 = vunpack.i.l.bf16 %v16215_v6  ;;  %vm19566_vm9 = vcmp.lt.s32.totalorder %v14571_v11, 30  ;;  %vm19577_vm15 = vnez %v19576_v13  ;;  %v19592_v13 = vld [vmem:[#allocation68_spill] sm:$0xff] }
 0x78b   :  { %vm19568_vm1 = vmmov %vm19566_vm9  ;;  %v19614_v29 = vmov 0 }
 0x78c   :  { %v3981_v52 = vsel %vm19566_vm9, %v19565_v8, %v11783_v44  ;;  %v3982_v26 = vsel %vm19568_vm1, %v19567_v1, %v11784_v2  ;;  %v19572_v8 = vunpack.i.h.bf16 %v16163_v42  ;;  %vm19573_vm9 = vmmov %vm19571_vm10  ;;  %v19574_v1 = vunpack.i.l.bf16 %v16163_v42 }
 0x78d   :  { %vm19575_vm1 = vmmov %vm19573_vm9 }
 0x791   :  { %v16458_v49 = vpop.permute.xlu1 %11826 }
 0x792   :  { %v16460_v46 = vpop.permute.xlu0 %11831 }
 0x795   :  { %v16513_v20 = vpop.permute.xlu1 %11841 }
 0x796   :  { %v11837_v23 = vpop.permute.xlu0 %11836  ;;  %v18890_v24 = vunpack.i.h.bf16 %v16513_v20  ;;  %v19581_v9 = vunpack.i.l.bf16 %v16513_v20 }
 0x797   :  { %v11839_v3 = vunpack.i.h.bf16 %v11837_v23  ;;  %v11838_v17 = vunpack.i.l.bf16 %v11837_v23  ;;  %v3925_v23 = vsel %vm19570_vm14, %v3907_v36, %v3861_v5  ;;  %v19578_v5 = vsel %vm19525_vm2, %v19528_v19, 0.0 }
 0x798   :  { %vm19580_vm14 = vnez %v19579_v15  ;;  %v19598_v15 = vsel %vm16327_vm6, %v14467_v21, 0.0  ;;  %v19601_v21 = vld [vmem:[#allocation48_spill] sm:$0xff] }
 0x799   :  { %v3914_v48 = vsel %vm19571_vm10, %v11839_v3, %v18890_v24  ;;  %v3916_v6 = vsel %vm19573_vm9, %v19572_v8, %v11839_v3  ;;  %v3915_v12 = vsel %vm19575_vm1, %v19574_v1, %v11838_v17  ;;  %vm19582_vm10 = vmmov %vm19575_vm1  ;;  %v11847_v8 = vpop.permute.xlu1 %11846  ;;  %vm19583_vm9 = vnez %v19366_v51 }
 0x79a   :  { %v3929_v36 = vsel %vm19577_vm15, %v3916_v6, %v3865_v28  ;;  %v3930_v24 = vsel %vm19580_vm14, %v3914_v48, %v19578_v5  ;;  %v3913_v3 = vsel %vm19582_vm10, %v11838_v17, %v19581_v9  ;;  %v3921_v42 = vsel %vm19577_vm15, %v3915_v12, %v3857_v55  ;;  %v16560_v1 = vpop.permute.xlu0 %11851 }
 0x79b   :  { %v16564_v28 = vsel %vm19583_vm9, %v3982_v26, %v3929_v36  ;;  %v16568_v6 = vsel %vm19583_vm9, %v3981_v52, %v3921_v42  ;;  %v11849_v48 = vunpack.i.h.bf16 %v11847_v8  ;;  %v11848_v5 = vunpack.i.l.bf16 %v11847_v8 }
 0x79c   :  { %v16572_v19 = vpack.c.bf16 %v16564_v28, %v16568_v6  ;;  %v18892_v17 = vunpack.i.h.bf16 %v16560_v1  ;;  %v18893_v55 = vunpack.i.l.bf16 %v16560_v1  ;;  %v16578_v9 = vpack.i.bf16 %v16564_v28, %v16568_v6 }
 0x79d   :  { %vm16580_vm15 = vcmp.gt.f32.partialorder %v3337_v22, 0.5  ;;  %v19585_v26 = vmov 0  ;;  %vm16584_vm1 = vcmp.gt.f32.partialorder %v3341_v25, 0.5  ;;  %v19588_v51 = vmov 0 }
 0x79e   :  { %19584 = vst [vmem:[#allocation21_spill] sm:$0xff] %v16572_v19  ;;  %v19586_v26 = vsel %vm16580_vm15, 4294967295, %v19585_v26  ;;  %v19589_v51 = vsel %vm16584_vm1, 4294967295, %v19588_v51  ;;  %v19591_v52 = vsel %vm19525_vm2, %v19523_v30, 0.0  ;;  %v19593_v36 = vunpack.i.h.bf16 %v19592_v13  ;;  %11986 = vrot.lane.b32.xlu1 %v16578_v9, %s12356_s18 }
 0x79f   :  { %19587 = vst [vmem:[#allocation49_spill] sm:$0xff] %v19586_v26  ;;  %19590 = vst [vmem:[#allocation43_spill] sm:$0xff] %v19589_v51  ;;  %v3922_v12 = vsel %vm19580_vm14, %v3913_v3, %v19591_v52  ;;  %vm19594_vm10 = vcmp.lt.s32.totalorder %v14571_v11, 112  ;;  %v19595_v22 = vunpack.i.l.bf16 %v19592_v13  ;;  %v19597_v8 = vsel %vm16327_vm6, %v19509_v61, 0.0  ;;  %v11867_v13 = vpop.permute.xlu1 %11866 }
 0x7a0   :  { %v3765_v42 = vsel %vm19594_vm10, %v19593_v36, %v11849_v48  ;;  %vm19596_vm9 = vmmov %vm19594_vm10  ;;  %vm19599_vm2 = vcmp.lt.s32.totalorder %v14571_v11, 30  ;;  %v16626_v36 = vpop.permute.xlu0 %11856  ;;  %vm19602_vm10 = vnez %v19601_v21  ;;  %v19607_v21 = vsel %vm16323_vm7, %v19510_v43, 0.0 }
 0x7a1   :  { %v3764_v25 = vsel %vm19596_vm9, %v19595_v22, %v11848_v5  ;;  %v16608_v33 = vsel %vm16473_vm8, %v3765_v42, %v19597_v8  ;;  %v3980_v52 = vsel %vm19599_vm2, %v11784_v2, %v18892_v17  ;;  %vm19600_vm14 = vmmov %vm19599_vm2  ;;  %v11869_v2 = vunpack.i.h.bf16 %v11867_v13 }
 0x7a2   :  { %v16616_v3 = vsel %vm16473_vm8, %v3764_v25, %v19598_v15  ;;  %v3979_v61 = vsel %vm19600_vm14, %v11783_v44, %v18893_v55  ;;  %v16636_v22 = vsel %vm19602_vm10, %v3980_v52, %v3930_v24  ;;  %v11868_v25 = vunpack.i.l.bf16 %v11867_v13  ;;  %vm19606_vm2 = vmmov %vm19596_vm9 }
 0x7a3   :  { %v16632_v42 = vsel %vm19602_vm10, %v3979_v61, %v3922_v12  ;;  %v18896_v44 = vunpack.i.h.bf16 %v16626_v36  ;;  %v18897_v15 = vunpack.i.l.bf16 %v16626_v36  ;;  %v19604_v61 = vunpack.i.h.bf16 %v15915_v35  ;;  %vm19611_vm10 = vmmov %vm19600_vm14 }
 0x7a4   :  { %v16640_v8 = vpack.c.bf16 %v16636_v22, %v16632_v42  ;;  %v16646_v17 = vpack.i.bf16 %v16636_v22, %v16632_v42  ;;  %v19605_v52 = vunpack.i.l.bf16 %v15915_v35  ;;  %v19608_v12 = vsel %vm16323_vm7, %v19508_v38, 0.0  ;;  %v11862_v38 = vpop.permute.xlu0 %11861 }
 0x7a5   :  { %v3759_v24 = vsel %vm19596_vm9, %v11869_v2, %v19604_v61  ;;  %v19609_v35 = vunpack.i.h.bf16 %v16335_v45  ;;  %v19610_v43 = vunpack.i.l.bf16 %v16335_v45  ;;  %v19616_v45 = vrot.slane %v14806_v39, %v19494_v10  ;;  %v19626_v10 = vld [vmem:[#allocation88_spill] sm:$0xff] }
 0x7a6   :  { %19603 = vst [vmem:[#allocation22_spill] sm:$0xff] %v16640_v8  ;;  %v3758_v13 = vsel %vm19606_vm2, %v11868_v25, %v19605_v52  ;;  %v16663_v55 = vsel %vm16517_vm4, %v3759_v24, %v19607_v21  ;;  %v16685_v21 = vpop.permute.xlu1 %11876  ;;  %v11863_v31 = vunpack.i.l.bf16 %v11862_v38  ;;  %v19672_v26 = vsel %vm19549_vm5, %v19547_v18, 0.0 }
 0x7a7   :  { %v16671_v61 = vsel %vm16517_vm4, %v3758_v13, %v19608_v12  ;;  %v3974_v52 = vsel %vm19600_vm14, %v18896_v44, %v19609_v35  ;;  %v3973_v24 = vsel %vm19611_vm10, %v18897_v15, %v19610_v43  ;;  %v19612_v12 = vld [vmem:[#allocation74_spill] sm:$0xff]  ;;  %v19613_v13 = vrot.slane %v14806_v39, %v19322_v60 }
 0x7a8   :  { %11991 = vrot.lane.b32.xlu1 %v19612_v12, %s12356_s18  ;;  %vm16699_vm2 = vcmp.gt.f32.partialorder %v19616_v45, 0.5  ;;  %v19617_v35 = vmov 0  ;;  %v19620_v43 = vunpack.i.l.bf16 %v16358_v62  ;;  %v19621_v44 = vunpack.i.l.bf16 %v16289_v32 }
 0x7a9   :  { %vm16692_vm9 = vcmp.gt.f32.partialorder %v19613_v13, 0.5  ;;  %v19618_v35 = vsel %vm16699_vm2, 4294967295, %v19617_v35  ;;  %vm19622_vm14 = vcmp.lt.s32.totalorder %v14571_v11, 15  ;;  %v19623_v60 = vunpack.i.h.bf16 %v16358_v62 }
 0x7aa   :  { %v19615_v29 = vsel %vm16692_vm9, 4294967295, %v19614_v29  ;;  %19619 = vst [vmem:[#allocation69_spill] sm:$0xff] %v19618_v35  ;;  %v16709_v15 = vsel %vm19622_vm14, %v19621_v44, %v19620_v43  ;;  %v19624_v13 = vunpack.i.h.bf16 %v16289_v32  ;;  %vm19625_vm10 = vmmov %vm19622_vm14  ;;  %vm19627_vm4 = vnez %v19626_v10 }
 0x7ab   :  { %v16721_v45 = vsel %vm19627_vm4, %v3973_v24, %v3925_v23  ;;  %v16725_v53 = vsel %vm19627_vm4, %v3974_v52, %v3933_v50  ;;  %v11864_v43 = vunpack.i.h.bf16 %v11862_v38  ;;  %vm19633_vm14 = vcmp.lt.s32.totalorder %v14571_v11, 112 }
 0x7ac   :  { %v16717_v37 = vsel %vm19625_vm10, %v19624_v13, %v19623_v60  ;;  %19628 = vst [vmem:[#allocation60_spill] sm:$0xff] %v16721_v45  ;;  %19629 = vst [vmem:[#allocation77_spill] sm:$0xff] %v16725_v53  ;;  %v16729_v44 = vpack.c.bf16 %v16725_v53, %v16721_v45  ;;  %v16733_v32 = vpack.i.bf16 %v16725_v53, %v16721_v45  ;;  %v19631_v60 = vunpack.i.h.bf16 %v16238_v16  ;;  %v19668_v45 = vld [vmem:[#allocation55_spill] sm:$0xff] }
 0x7ad   :  { %v19632_v13 = vunpack.i.h.bf16 %v16458_v49  ;;  %v19634_v50 = vunpack.i.l.bf16 %v16238_v16  ;;  %v19635_v52 = vunpack.i.l.bf16 %v16458_v49  ;;  %vm19636_vm4 = vmmov %vm19633_vm14 }
 0x7ae   :  { %19630 = vst [vmem:[#allocation70_spill] sm:$0xff] %v16729_v44  ;;  %vm19637_vm10 = vmmov %vm19636_vm4  ;;  %11981 = vrot.lane.b32.xlu0 %v16733_v32, %s12359_s20 }
 0x7af   :  { %v4200_v23 = vsel %vm19633_vm14, %v19632_v13, %v19631_v60  ;;  %v4199_v24 = vsel %vm19636_vm4, %v19635_v52, %v19634_v50  ;;  %v3761_v38 = vsel %vm19637_vm10, %v11864_v43, %v11869_v2  ;;  %vm19638_vm8 = vmmov %vm19636_vm4  ;;  %v11887_v60 = vpop.permute.xlu1 %11886  ;;  %v11872_v13 = vpop.permute.xlu0 %11871  ;;  %v19641_v50 = vsel %vm16331_vm12, %v19519_v34, 0.0 }
 0x7b0   :  { %v3763_v10 = vsel %vm19638_vm8, %v11849_v48, %v11864_v43  ;;  %vm19639_vm7 = vmmov %vm19636_vm4  ;;  %v19642_v48 = vsel %vm16337_vm11, %v19526_v41, 0.0  ;;  %v19644_v34 = vsel %vm16337_vm11, %v19518_v27, 0.0  ;;  %v19645_v41 = vld [vmem:[#allocation95_spill] sm:$0xff]  ;;  %v19646_v52 = vrot.slane %v14806_v39, %v19495_v40 }
 0x7b1   :  { %v3760_v44 = vsel %vm19639_vm7, %v11863_v31, %v11868_v25  ;;  %vm19640_vm6 = vmmov %vm19636_vm4  ;;  %v3787_v2 = vsel %vm16580_vm15, %v3763_v10, %v19641_v50  ;;  %v16769_v25 = vsel %vm16584_vm1, %v3761_v38, %v19642_v48  ;;  %12001 = vrot.lane.b32.xlu1 %v19645_v41, %s12356_s18  ;;  %v19647_v38 = vmov 0 }
 0x7b2   :  { %v3762_v53 = vsel %vm19640_vm6, %v11848_v5, %v11863_v31  ;;  %v19643_v31 = vsel %vm16331_vm12, %v19511_v57, 0.0  ;;  %v16783_v43 = vsel %vm16584_vm1, %v3760_v44, %v19644_v34  ;;  %vm16790_vm7 = vcmp.gt.f32.partialorder %v19646_v52, 0.5 }
 0x7b3   :  { %v3779_v5 = vsel %vm16580_vm15, %v3762_v53, %v19643_v31  ;;  %v19648_v38 = vsel %vm16790_vm7, 4294967295, %v19647_v38  ;;  %v19650_v57 = vrot.slane %v14806_v39, %v14734_v47  ;;  %v19651_v53 = vmov 0  ;;  %v19655_v31 = vld [vmem:[#allocation62_spill] sm:$0xff] }
 0x7b4   :  { %19649 = vst [vmem:[#allocation86_spill] sm:$0xff] %v19648_v38  ;;  %v11889_v27 = vunpack.i.h.bf16 %v11887_v60  ;;  %v11888_v44 = vunpack.i.l.bf16 %v11887_v60  ;;  %v11874_v10 = vunpack.i.h.bf16 %v11872_v13  ;;  %v11873_v50 = vunpack.i.l.bf16 %v11872_v13  ;;  %v19742_v38 = vld [vmem:[#allocation57_spill] sm:$0xff] }
 0x7b5   :  { %vm16797_vm6 = vcmp.gt.f32.partialorder %v19650_v57, 0.5  ;;  %v18915_v48 = vmov 0.0   ;;  %v19654_v40 = vsel %vm19534_vm0, %v19543_v58, 0.0  ;;  %vm19656_vm8 = vnez %v19655_v31  ;;  %12021 = vrot.lane.b32.xlu1 %v19612_v12, %s12359_s20 }
 0x7b6   :  { %v19652_v53 = vsel %vm16797_vm6, 4294967295, %v19651_v53  ;;  %4496 = vmatprep.mubr.f32.mxu0 %v18915_v48  ;;  %4567 = vmatprep.mubr.f32.mxu1 %v18915_v48  ;;  %v16809_v47 = vsel %vm19656_vm8, %v4200_v23, %v19654_v40  ;;  %v19657_v39 = vsel %vm19534_vm0, %v19532_v0, 0.0  ;;  %v11879_v41 = vunpack.i.h.bf16 %v16685_v21  ;;  %v16833_v40 = vpop.permute.xlu1 %11896 }
 0x7b7   :  { %19653 = vst [vmem:[#allocation78_spill] sm:$0xff] %v19652_v53  ;;  %v16817_v60 = vsel %vm19656_vm8, %v4199_v24, %v19657_v39  ;;  %v11878_v58 = vunpack.i.l.bf16 %v16685_v21  ;;  %v19658_v52 = vunpack.i.l.bf16 %v16421_v56  ;;  %vm19659_vm14 = vcmp.lt.s32.totalorder %v14571_v11, 96  ;;  %v19662_v24 = vld [vmem:[#allocation96_spill] sm:$0xff]  ;;  %v11882_v39 = vpop.permute.xlu0 %11881 }
 0x7b8   :  { %v19660_v57 = vunpack.i.l.bf16 %v16513_v20  ;;  %vm19661_vm4 = vmmov %vm19659_vm14  ;;  %11996 = vrot.lane.b32.xlu0 %v19662_v24, %s12356_s18  ;;  %v19663_v48 = vunpack.i.h.bf16 %v16421_v56  ;;  %v19665_v34 = vunpack.i.h.bf16 %v16513_v20  ;;  %v19673_v56 = vld [vmem:[#allocation84_spill] sm:$0xff] }
 0x7b9   :  { %v3909_v23 = vsel %vm19659_vm14, %v11888_v44, %v19658_v52  ;;  %vm19664_vm10 = vmmov %vm19661_vm4  ;;  %vm19674_vm1 = vnez %v19673_v56  ;;  %v11898_v56 = vunpack.i.l.bf16 %v16833_v40 }
 0x7ba   :  { %v3911_v0 = vsel %vm19661_vm4, %v19660_v57, %v11888_v44  ;;  %v3910_v21 = vsel %vm19664_vm10, %v11889_v27, %v19663_v48  ;;  %vm19666_vm14 = vmmov %vm19661_vm4  ;;  %v19669_v44 = vsel %vm19531_vm13, %v19668_v45, 0.0  ;;  %v19670_v57 = vld [vmem:[#allocation51_spill] sm:$0xff]  ;;  %v3924_v16 = vsel %vm19674_vm1, %v3909_v23, %v19672_v26 }
 0x7bb   :  { %v3912_v52 = vsel %vm19666_vm14, %v19665_v34, %v11889_v27  ;;  %vm19671_vm4 = vnez %v19670_v57  ;;  %vm19675_vm10 = vcmp.lt.s32.totalorder %v14571_v11, 15  ;;  %v19676_v27 = vld [vmem:[#allocation72_spill] sm:$0xff]  ;;  %v11892_v13 = vpop.permute.xlu0 %11891  ;;  %v11883_v57 = vunpack.i.l.bf16 %v11882_v39 }
 0x7bc   :  { %v3923_v51 = vsel %vm19671_vm4, %v3911_v0, %v19669_v44  ;;  %v3830_v20 = vsel %vm19675_vm10, %v11874_v10, %v11879_v41  ;;  %v19677_v48 = vunpack.i.h.bf16 %v19676_v27  ;;  %vm19678_vm14 = vmmov %vm19675_vm10  ;;  %v19680_v44 = vunpack.i.l.bf16 %v19676_v27  ;;  %v19682_v27 = vld [vmem:[#allocation56_spill] sm:$0xff]  ;;  %12006 = vrot.lane.b32.xlu0 %v16646_v17, %s12356_s18 }
 0x7bd   :  { %vm19679_vm15 = vmmov %vm19675_vm10 }
 0x7be   :  { %v3832_v34 = vsel %vm19678_vm14, %v19677_v48, %v11874_v10  ;;  %v3829_v0 = vsel %vm19679_vm15, %v11873_v50, %v11878_v58  ;;  %vm19681_vm11 = vmmov %vm19675_vm10  ;;  %v3852_v10 = vsel %vm16699_vm2, %v3830_v20, %v3787_v2  ;;  %v19683_v48 = vsel %vm19531_vm13, %v19682_v27, 0.0  ;;  %v16897_v2 = vpop.permute.xlu1 %11906 }
 0x7bf   :  { %v3831_v59 = vsel %vm19681_vm11, %v19680_v44, %v11873_v50  ;;  %v3851_v26 = vsel %vm16692_vm9, %v3832_v34, %v16608_v33  ;;  %v3844_v23 = vsel %vm16699_vm2, %v3829_v0, %v3779_v5  ;;  %v3931_v50 = vsel %vm19671_vm4, %v3912_v52, %v19683_v48  ;;  %v19684_v33 = vld [vmem:[#allocation79_spill] sm:$0xff]  ;;  %v19688_v0 = vld [vmem:[#allocation98_spill] sm:$0xff]  ;;  %vm19691_vm11 = vmmov %vm19675_vm10 }
 0x7c0   :  { %v3843_v12 = vsel %vm16692_vm9, %v3831_v59, %v16616_v3  ;;  %v19685_v34 = vsel %vm19549_vm5, %v19684_v33, 0.0  ;;  %v16891_v3 = vpack.c.bf16 %v3852_v10, %v3844_v23  ;;  %v11884_v20 = vunpack.i.h.bf16 %v11882_v39  ;;  %12031 = vrot.lane.b32.xlu1 %v19688_v0, %s12356_s18  ;;  %vm19692_vm13 = vmmov %vm19675_vm10  ;;  %12011 = vrot.lane.b32.xlu0 %v16578_v9, %s12359_s20  ;;  %v19702_v9 = vld [vmem:[#allocation110_spill] sm:$0xff] }
 0x7c1   :  { %v3932_v59 = vsel %vm19674_vm1, %v3910_v21, %v19685_v34  ;;  %v16893_v5 = vpack.c.bf16 %v3851_v26, %v3843_v12  ;;  %v18933_v63 = vunpack.i.l.bf16 %v16897_v2  ;;  %v11899_v21 = vunpack.i.h.bf16 %v16833_v40  ;;  %v19689_v12 = vld [vmem:[#allocation35_spill] sm:$0xff]  ;;  %vm19694_vm5 = vmmov %vm19675_vm10 }
 0x7c2   :  { %19686 = vst [vmem:[#allocation45_spill] sm:$0xff] %v16891_v3  ;;  %v11894_v44 = vunpack.i.h.bf16 %v11892_v13  ;;  %v11893_v26 = vunpack.i.l.bf16 %v11892_v13  ;;  %v19690_v23 = vunpack.i.h.bf16 %v19689_v12  ;;  %v3828_v39 = vsel %vm19692_vm13, %v11879_v41, %v11884_v20  ;;  %vm19695_vm15 = vmmov %vm19694_vm5 }
 0x7c3   :  { %19687 = vst [vmem:[#allocation85_spill] sm:$0xff] %v16893_v5  ;;  %v19693_v48 = vunpack.i.l.bf16 %v19689_v12  ;;  %v3827_v52 = vsel %vm19695_vm15, %v11878_v58, %v11883_v57  ;;  %v16931_v58 = vpop.permute.xlu1 %11916  ;;  %vm19698_vm1 = vcmp.lt.s32.totalorder %v14571_v11, 112  ;;  %vm19709_vm14 = vcmp.lt.s32.totalorder %v14571_v11, 30 }
 0x7c4   :  { %v3826_v10 = vsel %vm19691_vm11, %v11884_v20, %v19690_v23  ;;  %v3845_v13 = vsel %vm16790_vm7, %v3827_v52, %v16783_v43  ;;  %v3853_v20 = vsel %vm16790_vm7, %v3828_v39, %v16769_v25  ;;  %v4205_v43 = vsel %vm19698_vm1, %v18933_v63, %v11898_v56  ;;  %vm19700_vm4 = vmmov %vm19698_vm1  ;;  %v19701_v52 = vld [vmem:[#allocation61_spill] sm:$0xff] }
 0x7c5   :  { %v3825_v34 = vsel %vm19694_vm5, %v11883_v57, %v19693_v48  ;;  %v3854_v40 = vsel %vm16797_vm6, %v3826_v10, %v16663_v55  ;;  %v11902_v57 = vpop.permute.xlu0 %11901  ;;  %v16935_v55 = vpack.c.bf16 %v3853_v20, %v3845_v13  ;;  %12041 = vrot.lane.b32.xlu1 %v19701_v52, %s12356_s18  ;;  %v19703_v23 = vsel %vm15388_vm3, %v19702_v9, 0.0  ;;  %v19704_v10 = vld [vmem:[#allocation99_spill] sm:$0xff]  ;;  %v19706_v48 = vld [vmem:[#allocation108_spill] sm:$0xff]  ;;  %vm19711_vm11 = vmmov %vm19709_vm14 }
 0x7c6   :  { %v3846_v41 = vsel %vm16797_vm6, %v3825_v34, %v16671_v61  ;;  %v19699_v61 = vunpack.i.h.bf16 %v16897_v2  ;;  %vm19705_vm10 = vnez %v19704_v10  ;;  %v19707_v34 = vsel %vm15388_vm3, %v19706_v48, 0.0  ;;  %vm19713_vm13 = vmmov %vm19711_vm11  ;;  %v19817_v10 = vld [vmem:[#allocation36_spill] sm:$0xff] }
 0x7c7   :  { %v16933_v12 = vpack.c.bf16 %v3854_v40, %v3846_v41  ;;  %19697 = vst [vmem:[#allocation47_spill] sm:$0xff] %v16935_v55  ;;  %v4207_v39 = vsel %vm19705_vm10, %v4205_v43, %v19703_v23  ;;  %v19708_v13 = vunpack.i.l.bf16 %v16626_v36  ;;  %v19710_v20 = vunpack.i.h.bf16 %v16626_v36  ;;  %vm19715_vm5 = vmmov %vm19711_vm11  ;;  %v19716_v23 = vld [vmem:[#allocation87_spill] sm:$0xff] }
 0x7c8   :  { %v4206_v25 = vsel %vm19700_vm4, %v19699_v61, %v11899_v21  ;;  %v19712_v52 = vunpack.i.l.bf16 %v16560_v1  ;;  %v19714_v9 = vunpack.i.h.bf16 %v16560_v1  ;;  %vm19717_vm15 = vnez %v19716_v23  ;;  %v19736_v55 = vld [vmem:[#allocation39_spill] sm:$0xff] }
 0x7c9   :  { %19696 = vst [vmem:[#allocation4_spill] sm:$0xff] %v16933_v12  ;;  %v4215_v40 = vsel %vm19705_vm10, %v4206_v25, %v19707_v34  ;;  %v3975_v41 = vsel %vm19709_vm14, %v11893_v26, %v19708_v13  ;;  %v3976_v61 = vsel %vm19711_vm11, %v11894_v44, %v19710_v20  ;;  %v19718_v34 = vld [vmem:[#allocation54_spill] sm:$0xff]  ;;  %12051 = vrot.lane.b32.xlu1 %v19688_v0, %s12359_s20  ;;  %vm19724_vm4 = vcmp.lt.s32.totalorder %v14571_v11, 15 }
 0x7ca   :  { %v3977_v43 = vsel %vm19713_vm13, %v19712_v52, %v11893_v26  ;;  %v3978_v25 = vsel %vm19715_vm5, %v19714_v9, %v11894_v44  ;;  %v16977_v48 = vsel %vm19717_vm15, %v3975_v41, %v3924_v16  ;;  %v16981_v36 = vsel %vm19717_vm15, %v3976_v61, %v3932_v59  ;;  %v19721_v16 = vld [vmem:[#allocation67_spill] sm:$0xff]  ;;  %v11922_v41 = vpop.permute.xlu1 %11921  ;;  %v11912_v59 = vpop.permute.xlu0 %11911  ;;  %vm19726_vm14 = vmmov %vm19724_vm4 }
 0x7cb   :  { %vm19719_vm1 = vnez %v19718_v34  ;;  %v16993_v1 = vpack.c.bf16 %v16981_v36, %v16977_v48  ;;  %v11919_v44 = vunpack.i.h.bf16 %v16931_v58  ;;  %12016 = vrot.lane.b32.xlu0 %v19721_v16, %s12359_s20  ;;  %v11904_v61 = vunpack.i.h.bf16 %v11902_v57 }
 0x7cc   :  { %v16985_v13 = vsel %vm19719_vm1, %v3977_v43, %v3923_v51  ;;  %v16989_v26 = vsel %vm19719_vm1, %v3978_v25, %v3931_v50  ;;  %v11918_v51 = vunpack.i.l.bf16 %v16931_v58  ;;  %v11903_v50 = vunpack.i.l.bf16 %v11902_v57  ;;  %v19727_v58 = vld [vmem:[#allocation65_spill] sm:$0xff] }
 0x7cd   :  { %19720 = vst [vmem:[#allocation68_spill] sm:$0xff] %v16993_v1  ;;  %v17000_v20 = vpack.c.bf16 %v16989_v26, %v16985_v13  ;;  %v19723_v52 = vunpack.i.h.bf16 %v16460_v46  ;;  %v11924_v9 = vunpack.i.h.bf16 %v11922_v41  ;;  %v11923_v25 = vunpack.i.l.bf16 %v11922_v41  ;;  %v19734_v1 = vld [vmem:[#allocation105_spill] sm:$0xff]  ;;  %12061 = vrot.lane.b32.xlu1 %v16733_v32, %s12356_s18 }
 0x7ce   :  { %v11914_v23 = vunpack.i.h.bf16 %v11912_v59  ;;  %v19725_v34 = vunpack.i.l.bf16 %v16460_v46  ;;  %vm19728_vm11 = vnez %v19727_v58  ;;  %v19729_v63 = vunpack.i.h.bf16 %v16458_v49 }
 0x7cf   :  { %19722 = vst [vmem:[#allocation48_spill] sm:$0xff] %v17000_v20  ;;  %v4266_v43 = vsel %vm19724_vm4, %v11919_v44, %v19723_v52  ;;  %vm19730_vm13 = vcmp.lt.s32.totalorder %v14571_v11, 112  ;;  %v19732_v20 = vld [vmem:[#allocation38_spill] sm:$0xff]  ;;  %vm19737_vm1 = vnez %v19736_v55  ;;  %12026 = vrot.lane.b32.xlu0 %v19662_v24, %s12359_s20  ;;  %v19751_v24 = vld [vmem:[#allocation104_spill] sm:$0xff]  ;;  %vm19768_vm9 = vcmp.lt.s32.totalorder %v14571_v11, 112 }
 0x7d0   :  { %v4265_v16 = vsel %vm19726_vm14, %v11918_v51, %v19725_v34  ;;  %v4282_v57 = vsel %vm19728_vm11, %v4266_v43, %v16809_v47  ;;  %v4202_v0 = vsel %vm19730_vm13, %v11904_v61, %v19729_v63  ;;  %vm19731_vm5 = vmmov %vm19730_vm13  ;;  %vm19733_vm15 = vnez %v19732_v20  ;;  %v19738_v47 = vld [vmem:[#allocation42_spill] sm:$0xff]  ;;  %v19740_v43 = vld [vmem:[#allocation63_spill] sm:$0xff] }
 0x7d1   :  { %v4204_v52 = vsel %vm19731_vm5, %v11899_v21, %v11904_v61  ;;  %v4274_v41 = vsel %vm19728_vm11, %v4265_v16, %v16817_v60  ;;  %v19735_v34 = vsel %vm19733_vm15, %v19734_v1, 0.0  ;;  %vm19739_vm4 = vnez %v19738_v47  ;;  %vm19745_vm13 = vmmov %vm19731_vm5  ;;  %v11932_v60 = vpop.permute.xlu1 %11931  ;;  %v11927_v1 = vpop.permute.xlu0 %11926 }
 0x7d2   :  { %v4216_v12 = vsel %vm19737_vm1, %v4204_v52, %v19735_v34  ;;  %v19741_v53 = vsel %vm19739_vm4, %v19740_v43, 0.0  ;;  %vm19743_vm14 = vnez %v19742_v38  ;;  %v19744_v21 = vunpack.i.l.bf16 %v16458_v49  ;;  %v19747_v34 = vld [vmem:[#allocation64_spill] sm:$0xff] }
 0x7d3   :  { %v4217_v63 = vsel %vm19743_vm14, %v4202_v0, %v19741_v53  ;;  %v17043_v16 = vpack.c.bf16 %v4282_v57, %v4274_v41  ;;  %v4203_v52 = vsel %vm19731_vm5, %v11898_v56, %v11903_v50  ;;  %v19748_v43 = vsel %vm19739_vm4, %v19747_v34, 0.0 }
 0x7d4   :  { %v4201_v61 = vsel %vm19745_vm13, %v11903_v50, %v19744_v21  ;;  %v19749_v53 = vunpack.i.h.bf16 %v16321_v4  ;;  %vm19750_vm13 = vcmp.lt.s32.totalorder %v14571_v11, 15  ;;  %v19752_v57 = vsel %vm19733_vm15, %v19751_v24, 0.0  ;;  %v19755_v21 = vld [vmem:[#allocation100_spill] sm:$0xff]  ;;  %v19759_v24 = vld [vmem:[#allocation59_spill] sm:$0xff] }
 0x7d5   :  { %19746 = vst [vmem:[#allocation74_spill] sm:$0xff] %v17043_v16  ;;  %v4209_v49 = vsel %vm19743_vm14, %v4201_v61, %v19748_v43  ;;  %v4208_v56 = vsel %vm19737_vm1, %v4203_v52, %v19752_v57  ;;  %v19753_v50 = vunpack.i.l.bf16 %v16321_v4  ;;  %vm19754_vm5 = vmmov %vm19750_vm13  ;;  %vm19756_vm6 = vnez %v19755_v21  ;;  %10253 = vmatprep.subr.bf16.mxu1 %v17043_v16  ;;  %v19769_v16 = vld [vmem:[#allocation115_spill] sm:$0xff] }
 0x7d6   :  { %v4256_v0 = vsel %vm19750_vm13, %v19749_v53, %v11924_v9  ;;  %vm19757_vm13 = vmmov %vm19754_vm5  ;;  %v11913_v53 = vunpack.i.l.bf16 %v11912_v59  ;;  %vm19760_vm2 = vnez %v19759_v24  ;;  %v11933_v4 = vunpack.i.l.bf16 %v11932_v60  ;;  %v19828_v21 = vld [vmem:[#allocation91_spill] sm:$0xff] }
 0x7d7   :  { %v4255_v41 = vsel %vm19754_vm5, %v19753_v50, %v11923_v25  ;;  %v4279_v61 = vsel %vm19756_vm6, %v4256_v0, %v4215_v40  ;;  %v4268_v34 = vsel %vm19757_vm13, %v11914_v23, %v11919_v44  ;;  %vm19758_vm7 = vmmov %vm19754_vm5  ;;  %v19762_v50 = vld [vmem:[#allocation101_spill] sm:$0xff]  ;;  %v11934_v0 = vunpack.i.h.bf16 %v11932_v60 }
 0x7d8   :  { %v4271_v32 = vsel %vm19756_vm6, %v4255_v41, %v4207_v39  ;;  %v4270_v43 = vsel %vm19758_vm7, %v11924_v9, %v11914_v23  ;;  %v4281_v52 = vsel %vm19760_vm2, %v4268_v34, %v4217_v63  ;;  %vm19763_vm5 = vnez %v19762_v50  ;;  %v19764_v44 = vld [vmem:[#allocation53_spill] sm:$0xff]  ;;  %v11942_v39 = vpop.permute.xlu1 %11941  ;;  %v17086_v41 = vpop.permute.xlu0 %11936  ;;  %vm19765_vm13 = vmmov %vm19758_vm7 }
 0x7d9   :  { %v17080_v57 = vpack.c.bf16 %v4279_v61, %v4271_v32  ;;  %v4280_v40 = vsel %vm19763_vm5, %v4270_v43, %v4216_v12  ;;  %12036 = vrot.lane.b32.xlu0 %v19764_v44, %s12356_s18  ;;  %v4267_v59 = vsel %vm19758_vm7, %v11913_v53, %v11918_v51  ;;  %v4269_v9 = vsel %vm19765_vm13, %v11923_v25, %v11913_v53  ;;  %vm19771_vm7 = vmmov %vm19768_vm9  ;;  %v19774_v53 = vld [vmem:[#allocation32_spill] sm:$0xff] }
 0x7da   :  { %v11929_v23 = vunpack.i.h.bf16 %v11927_v1  ;;  %v11928_v63 = vunpack.i.l.bf16 %v11927_v1  ;;  %v4272_v61 = vsel %vm19763_vm5, %v4269_v9, %v4208_v56  ;;  %v4273_v12 = vsel %vm19760_vm2, %v4267_v59, %v4209_v49  ;;  %v19772_v1 = vld [vmem:[#allocation9_spill] sm:$0xff]  ;;  %vm19778_vm13 = vmmov %vm19771_vm7 }
 0x7db   :  { %19761 = vst [vmem:[#allocation88_spill] sm:$0xff] %v17080_v57  ;;  %v11944_v60 = vunpack.i.h.bf16 %v11942_v39  ;;  %v11943_v34 = vunpack.i.l.bf16 %v11942_v39  ;;  %v17096_v32 = vpack.c.bf16 %v4280_v40, %v4272_v61  ;;  %v17098_v43 = vpack.c.bf16 %v4281_v52, %v4273_v12  ;;  %v19779_v9 = vld [vmem:[#allocation37_spill] sm:$0xff]  ;;  %v19780_v61 = vld [vmem:[#allocation10_spill] sm:$0xff] }
 0x7dc   :  { %v4058_v51 = vsel %vm19768_vm9, %v11929_v23, %v11934_v0  ;;  %v19770_v35 = vunpack.i.h.bf16 %v19769_v16  ;;  %v19773_v56 = vsel %vm19733_vm15, %v19772_v1, 0.0  ;;  %v19775_v52 = vsel %vm19739_vm4, %v19774_v53, 0.0  ;;  %vm19776_vm9 = vmmov %vm19771_vm7 }
 0x7dd   :  { %19766 = vst [vmem:[#allocation95_spill] sm:$0xff] %v17096_v32  ;;  %19767 = vst [vmem:[#allocation62_spill] sm:$0xff] %v17098_v43  ;;  %v4073_v40 = vsel %vm19743_vm14, %v4058_v51, %v19775_v52  ;;  %v4057_v39 = vsel %vm19776_vm9, %v11928_v63, %v11933_v4  ;;  %v19777_v59 = vunpack.i.l.bf16 %v19769_v16  ;;  %12046 = vrot.lane.b32.xlu0 %v19779_v9, %s12359_s20  ;;  %v19781_v12 = vsel %vm19733_vm15, %v19780_v61, 0.0  ;;  %v19782_v16 = vld [vmem:[#allocation29_spill] sm:$0xff] }
 0x7de   :  { %v4060_v25 = vsel %vm19771_vm7, %v19770_v35, %v11929_v23  ;;  %10221 = vmatprep.subr.bf16.mxu0 %v17096_v32  ;;  %10255 = vmatpush1.bf16.msra.mxu1 %v17098_v43  ;;  %vm19785_vm7 = vcmp.lt.s32.totalorder %v14571_v11, 15  ;;  %v19786_v53 = vunpack.i.l.bf16 %v16358_v62  ;;  %v4297_v50 = vsel %vm19739_vm4, %v16636_v22, 0.0 }
 0x7df   :  { %v4072_v49 = vsel %vm19737_vm1, %v4060_v25, %v19773_v56  ;;  %v4059_v35 = vsel %vm19778_vm13, %v19777_v59, %v11928_v63  ;;  %v19783_v25 = vsel %vm19739_vm4, %v19782_v16, 0.0  ;;  %v19784_v56 = vunpack.i.h.bf16 %v16358_v62  ;;  %vm19787_vm9 = vmmov %vm19785_vm7  ;;  %10223 = vmatpush1.bf16.msra.mxu0 %v17080_v57  ;;  %v19788_v59 = vld [vmem:[#allocation30_spill] sm:$0xff] }
 0x7e0   :  { %v4136_v23 = vsel %vm19763_vm5, %v16717_v37, %v4072_v49  ;;  %v4064_v51 = vsel %vm19737_vm1, %v4059_v35, %v19781_v12  ;;  %v4065_v63 = vsel %vm19743_vm14, %v4057_v39, %v19783_v25  ;;  %v18959_v37 = vunpack.i.h.bf16 %v17086_v41  ;;  %10257 = vmatprep.subr.bf16.mxu1 %v19788_v59  ;;  %v17158_v35 = vpop.permute.xlu0 %11946  ;;  %v19790_v62 = vld [vmem:[#allocation6_spill] sm:$0xff] }
 0x7e1   :  { %v4128_v1 = vsel %vm19763_vm5, %v16709_v15, %v4064_v51  ;;  %v4124_v49 = vsel %vm19785_vm7, %v19784_v56, %v11944_v60  ;;  %v4123_v52 = vsel %vm19787_vm9, %v19786_v53, %v11943_v34  ;;  %v18958_v39 = vunpack.i.l.bf16 %v17086_v41  ;;  %10225 = vmatprep.subr.bf16.mxu0 %v19790_v62  ;;  %vm19792_vm7 = vmmov %vm19778_vm13  ;;  %12056 = vrot.lane.b32.xlu0 %v19764_v44, %s12359_s20  ;;  %v19795_v56 = vld [vmem:[#allocation28_spill] sm:$0xff] }
 0x7e2   :  { %v17160_v9 = vpack.c.bf16 %v4136_v23, %v4128_v1  ;;  %v4129_v15 = vsel %vm19760_vm2, %v4123_v52, %v4065_v63  ;;  %v4137_v61 = vsel %vm19760_vm2, %v4124_v49, %v4073_v40  ;;  %v4056_v51 = vsel %vm19778_vm13, %v11934_v0, %v18959_v37  ;;  %v19793_v40 = vld [vmem:[#allocation27_spill] sm:$0xff]  ;;  %vm19797_vm13 = vmmov %vm19787_vm9 }
 0x7e3   :  { %v17167_v12 = vpack.c.bf16 %v4137_v61, %v4129_v15  ;;  %v4055_v23 = vsel %vm19792_vm7, %v11933_v4, %v18958_v39  ;;  %v12065_v16 = vpack.i.bf16 %v16989_v26, %v16985_v13  ;;  %10259 = vmatpush1.bf16.msra.mxu1 %v19793_v40  ;;  %v18957_v25 = vunpack.i.h.bf16 %v17158_v35  ;;  %v19794_v1 = vld [vmem:[#allocation31_spill] sm:$0xff] }
 0x7e4   :  { %19789 = vst [vmem:[#allocation96_spill] sm:$0xff] %v17160_v9  ;;  %v18956_v63 = vunpack.i.l.bf16 %v17158_v35  ;;  %v4010_v0 = vsel %vm19534_vm0, %v19794_v1, 0.0  ;;  %v4002_v4 = vsel %vm19534_vm0, %v19795_v56, 0.0  ;;  %v19796_v49 = vld [vmem:[#allocation83_spill] sm:$0xff]  ;;  %v12070_v44 = vpack.i.bf16 %v16981_v36, %v16977_v48  ;;  %v19800_v56 = vld [vmem:[#allocation116_spill] sm:$0xff] }
 0x7e5   :  { %19791 = vst [vmem:[#allocation44_spill] sm:$0xff] %v17167_v12  ;;  %12066 = vrot.lane.b32.xlu1 %v12065_v16, %s12356_s18  ;;  %10227 = vmatpush1.bf16.msra.mxu0 %v19796_v49  ;;  %v4074_v53 = vsel %vm19656_vm8, %v4056_v51, %v4010_v0  ;;  %v4066_v52 = vsel %vm19656_vm8, %v4055_v23, %v4002_v4  ;;  %v6718_v0 = vld [vmem:[#allocation2] sm:$0x1]  ;;  %v19845_v43 = vmov 0.0   ;;  %v19846_v49 = vld [vmem:[#allocation19_spill] sm:$0xff] }
 0x7e6   :  { %v4122_v15 = vsel %vm19787_vm9, %v11944_v60, %v18957_v25  ;;  %v4121_v61 = vsel %vm19797_vm13, %v11943_v34, %v18956_v63  ;;  %10229 = vmatprep.subr.bf16.mxu0 %v17160_v9  ;;  %12071 = vrot.lane.b32.xlu0 %v12070_v44, %s12356_s18  ;;  %v19799_v60 = vld [vmem:[#allocation119_spill] sm:$0xff]  ;;  %vm19802_vm9 = vmmov %vm19792_vm7 }
 0x7e7   :  { %v4130_v1 = vsel %vm19728_vm11, %v4121_v61, %v4066_v52  ;;  %v4138_v51 = vsel %vm19728_vm11, %v4122_v15, %v4074_v53  ;;  %v19801_v34 = vld [vmem:[#allocation23_spill] sm:$0xff]  ;;  %v11957_v53 = vpop.permute.xlu0 %11956 }
 0x7e8   :  { %v17212_v23 = vpack.c.bf16 %v4138_v51, %v4130_v1  ;;  %v11959_v52 = vunpack.i.h.bf16 %v11957_v53  ;;  %v11958_v15 = vunpack.i.l.bf16 %v11957_v53  ;;  %v4288_v53 = vsel %vm19733_vm15, %v16568_v6, 0.0  ;;  %v19844_v9 = vld [vmem:[#allocation15_spill] sm:$0xff] }
 0x7e9   :  { %12081 = vrot.lane.b32.xlu1 %v12065_v16, %s12359_s20  ;;  %10231 = vmatpush1.bf16.msra.mxu0 %v19799_v60  ;;  %v11952_v16 = vpop.permute.xlu1 %11951  ;;  %v19839_v60 = vld [vmem:[#allocation102_spill] sm:$0xff] }
 0x7ea   :  { %19798 = vst [vmem:[#allocation55_spill] sm:$0xff] %v17212_v23  ;;  %10233 = vmatprep.subr.bf16.mxu0 %v19800_v56  ;;  %10261 = vmatprep.subr.bf16.mxu1 %v17212_v23  ;;  %v11954_v1 = vunpack.i.h.bf16 %v11952_v16  ;;  %v11953_v51 = vunpack.i.l.bf16 %v11952_v16  ;;  %v4296_v16 = vsel %vm19733_vm15, %v16564_v28, 0.0  ;;  %v19842_v56 = vld [vmem:[#allocation103_spill] sm:$0xff] }
 0x7eb   :  { %10263 = vmatpush1.bf16.msra.mxu1 %v17167_v12  ;;  %12076 = vrot.lane.b32.xlu0 %v16646_v17, %s12359_s20  ;;  %v11962_v17 = vpop.permute.xlu0 %11961 }
 0x7ec   :  { %10265 = vmatprep.subr.bf16.mxu1 %v16640_v8  ;;  %v4347_v63 = vsel %vm19802_vm9, %v11953_v51, %v11958_v15  ;;  %v11964_v39 = vunpack.i.h.bf16 %v11962_v17 }
 0x7ed   :  { %6721 = vperm.xlu1 %11389, %v6718_v0   ;;  %10235 = vmatpush1.bf16.msra.mxu0 %v19801_v34  ;;  %v17225_v4 = vpop.permute.xlu1 %11966  ;;  %v4348_v0 = vsel %vm19792_vm7, %v11954_v1, %v11959_v52  ;;  %v4352_v8 = vsel %vm19737_vm1, %v4347_v63, %v4288_v53  ;;  %vm19803_vm7 = vmmov %vm19797_vm13 }
 0x7ee   :  { %v4360_v12 = vsel %vm19737_vm1, %v4348_v0, %v4296_v16  ;;  %v18971_v55 = vunpack.i.h.bf16 %v17225_v4  ;;  %v18970_v63 = vunpack.i.l.bf16 %v17225_v4  ;;  %vm19805_vm15 = vmmov %vm19803_vm7 }
 0x7ef   :  { %10267 = vmatpush1.bf16.msra.mxu1 %v16572_v19  ;;  %12086 = vrot.lane.b32.xlu0 %v12070_v44, %s12359_s20  ;;  %v11963_v44 = vunpack.i.l.bf16 %v11962_v17  ;;  %vm19806_vm1 = vmmov %vm19803_vm7 }
 0x7f7   :  { %v17227_v61 = vpop.permute.xlu1 %11971 }
 0x7f8   :  { %v18969_v22 = vunpack.i.h.bf16 %v17227_v61  ;;  %v18968_v47 = vunpack.i.l.bf16 %v17227_v61 }
 0x7fb   :  { %v11977_v25 = vpop.permute.xlu1 %11976 }
 0x7fc   :  { %v11979_v37 = vunpack.i.h.bf16 %v11977_v25  ;;  %v11978_v19 = vunpack.i.l.bf16 %v11977_v25 }
 0x7fe   :  { %v4413_v34 = vsel %vm19797_vm13, %v11978_v19, %v11963_v44  ;;  %v4414_v25 = vsel %vm19803_vm7, %v11979_v37, %v11964_v39 }
 0x7ff   :  { %v4416_v17 = vsel %vm19763_vm5, %v4413_v34, %v4352_v8  ;;  %v4424_v6 = vsel %vm19763_vm5, %v4414_v25, %v4360_v12  ;;  %v4289_v8 = vsel %vm19739_vm4, %v16632_v42, 0.0  ;;  %v4412_v12 = vsel %vm19805_vm15, %v11964_v39, %v18971_v55  ;;  %vm19807_vm5 = vmmov %vm19802_vm9  ;;  %v19832_v55 = vld [vmem:[#allocation92_spill] sm:$0xff] }
 0x800   :  { %v17251_v20 = vpack.c.bf16 %v4424_v6, %v4416_v17  ;;  %v4411_v34 = vsel %vm19806_vm1, %v11963_v44, %v18970_v63  ;;  %vm19808_vm9 = vmmov %vm19807_vm5 }
 0x801   :  { %vm19810_vm4 = vmmov %vm19807_vm5 }
 0x802   :  { %19804 = vst [vmem:[#allocation51_spill] sm:$0xff] %v17251_v20  ;;  %10237 = vmatprep.subr.bf16.mxu0 %v17251_v20  ;;  %vm19811_vm13 = vmmov %vm19810_vm4 }
 0x803   :  { %v4349_v38 = vsel %vm19811_vm13, %v18968_v47, %v11953_v51  ;;  %v19827_v47 = vld [vmem:[#allocation89_spill] sm:$0xff]  ;;  %vm19836_vm7 = vmmov %vm19810_vm4 }
 0x804   :  { %vm19838_vm15 = vmmov %vm19810_vm4 }
 0x810   :  { %v17254_v28 = vpop.permute.xlu1 %11986 }
 0x811   :  { %v18972_v0 = vunpack.i.h.bf16 %v17254_v28  ;;  %v18973_v53 = vunpack.i.l.bf16 %v17254_v28  ;;  %v19849_v57 = vunpack.i.l.bf16 %v17254_v28 }
 0x813   :  { %v4346_v16 = vsel %vm19807_vm5, %v11959_v52, %v18972_v0  ;;  %v4345_v42 = vsel %vm19808_vm9, %v11958_v15, %v18973_v53  ;;  %v4350_v15 = vsel %vm19810_vm4, %v18969_v22, %v11954_v1  ;;  %v4156_v0 = vsel %vm16331_vm12, %v19832_v55, 0.0 }
 0x814   :  { %v4361_v39 = vsel %vm19743_vm14, %v4346_v16, %v4297_v50  ;;  %v4353_v44 = vsel %vm19743_vm14, %v4345_v42, %v4289_v8  ;;  %v19814_v42 = vld [vmem:[#allocation114_spill] sm:$0xff]  ;;  %vm19816_vm14 = vmmov %vm19806_vm1  ;;  %vm19847_vm5 = vnez %v19846_v49 }
 0x815   :  { %v4425_v52 = vsel %vm19760_vm2, %v4412_v12, %v4361_v39  ;;  %v4417_v17 = vsel %vm19760_vm2, %v4411_v34, %v4353_v44  ;;  %v19813_v34 = vld [vmem:[#allocation12_spill] sm:$0xff]  ;;  %v4295_v1 = vsel %vm15388_vm3, %v19814_v42, 0.0  ;;  %vm19815_vm2 = vmmov %vm19806_vm1 }
 0x816   :  { %v17294_v6 = vpack.c.bf16 %v4425_v52, %v4417_v17  ;;  %v4287_v16 = vsel %vm15388_vm3, %v19813_v34, 0.0  ;;  %v4359_v39 = vsel %vm19705_vm10, %v4350_v15, %v4295_v1  ;;  %vm19818_vm3 = vnez %v19817_v10  ;;  %v19819_v34 = vld [vmem:[#allocation50_spill] sm:$0xff]  ;;  %vm19841_vm1 = vmmov %vm19810_vm4 }
 0x817   :  { %v4351_v51 = vsel %vm19705_vm10, %v4349_v38, %v4287_v16  ;;  %v4147_v22 = vsel %vm19818_vm3, %v19827_v47, 0.0  ;;  %v19830_v38 = vld [vmem:[#allocation111_spill] sm:$0xff]  ;;  %vm19850_vm9 = vmmov %vm19841_vm1 }
 0x818   :  { %19809 = vst [vmem:[#allocation84_spill] sm:$0xff] %v17294_v6  ;;  %vm19853_vm4 = vmmov %vm19841_vm1 }
 0x81a   :  { %v17288_v25 = vpop.permute.xlu1 %11991 }
 0x81b   :  { %v11994_v16 = vunpack.i.h.bf16 %v17288_v25 }
 0x820   :  { %v17304_v8 = vpop.permute.xlu0 %11981 }
 0x821   :  { %19812 = vst [vmem:[#allocation72_spill] sm:$0xff] %v17304_v8  ;;  %v18967_v50 = vunpack.i.h.bf16 %v17304_v8  ;;  %v18966_v12 = vunpack.i.l.bf16 %v17304_v8 }
 0x823   :  { %v17308_v24 = vpop.permute.xlu1 %12001  ;;  %v4400_v44 = vsel %vm19815_vm2, %v18967_v50, %v11979_v37  ;;  %v4399_v52 = vsel %vm19816_vm14, %v18966_v12, %v11978_v19  ;;  %v19824_v12 = vld [vmem:[#allocation82_spill] sm:$0xff]  ;;  %v19834_v50 = vld [vmem:[#allocation16_spill] sm:$0xff] }
 0x824   :  { %v4423_v7 = vsel %vm19756_vm6, %v4400_v44, %v4359_v39  ;;  %v4415_v17 = vsel %vm19756_vm6, %v4399_v52, %v4351_v51  ;;  %v11993_v39 = vunpack.i.l.bf16 %v17288_v25  ;;  %v19821_v51 = vld [vmem:[#allocation81_spill] sm:$0xff]  ;;  %v19822_v44 = vld [vmem:[#allocation34_spill] sm:$0xff]  ;;  %v4155_v25 = vsel %vm19818_vm3, %v19828_v21, 0.0 }
 0x825   :  { %v17341_v42 = vpack.c.bf16 %v4423_v7, %v4415_v17  ;;  %vm19823_vm6 = vnez %v19822_v44  ;;  %v19825_v17 = vld [vmem:[#allocation120_spill] sm:$0xff]  ;;  %v12004_v1 = vunpack.i.h.bf16 %v17308_v24  ;;  %v17372_v7 = vld [vmem:[%s18566_s7] sm:$0x1]  ;;  %v19829_v52 = vld [vmem:[#allocation109_spill] sm:$0xff]  ;;  %v19835_v20 = vunpack.i.h.bf16 %v19834_v50 }
 0x826   :  { %vm19826_vm10 = vnez %v19825_v17  ;;  %v4150_v47 = vsel %vm19823_vm6, %v19829_v52, 0.0  ;;  %v4158_v21 = vsel %vm19823_vm6, %v19830_v38, 0.0  ;;  %v19831_v37 = vld [vmem:[#allocation90_spill] sm:$0xff]  ;;  %v12003_v23 = vunpack.i.l.bf16 %v17308_v24  ;;  %v19974_v44 = vld [vmem:[#allocation5_spill] sm:$0xff] }
 0x827   :  { %19820 = vst [vmem:[#allocation56_spill] sm:$0xff] %v17341_v42  ;;  %v17343_v19 = vpop.permute.xlu1 %12021  ;;  %10239 = vmatpush1.bf16.msra.mxu0 %v17341_v42  ;;  %v4148_v63 = vsel %vm16331_vm12, %v19831_v37, 0.0  ;;  %v19833_v42 = vld [vmem:[#allocation17_spill] sm:$0xff]  ;;  %v4198_v52 = vsel %vm19836_vm7, %v19835_v20, %v11994_v16  ;;  %v19837_v40 = vunpack.i.l.bf16 %v19834_v50  ;;  %v19840_v24 = vunpack.i.h.bf16 %v16897_v2 }
 0x828   :  { %10273 = vmatprep.subr.bf16.mxu0 %v19833_v42  ;;  %v4149_v42 = vsel %vm19826_vm10, %v19839_v60, 0.0  ;;  %v4157_v50 = vsel %vm19826_vm10, %v19842_v56, 0.0  ;;  %v19843_v60 = vld [vmem:[#allocation18_spill] sm:$0xff]  ;;  %v4219_v62 = vsel %vm19847_vm5, %v4198_v52, %v4155_v25 }
 0x829   :  { %v4197_v55 = vsel %vm19838_vm15, %v19837_v40, %v11993_v39  ;;  %v4192_v38 = vsel %vm19841_vm1, %v12004_v1, %v19840_v24  ;;  %v4290_v40 = vsel %vm19534_vm0, %v16985_v13, 0.0  ;;  %v4298_v24 = vsel %vm19534_vm0, %v16989_v26, 0.0  ;;  %vm19855_vm0 = vmmov %vm19841_vm1 }
 0x82a   :  { %v17332_v15 = vpop.permute.xlu0 %11996  ;;  %4497 = vmatmul.mubr.f32.vlgmr.msra.gmra.mrb[80].mxu0 %v17372_v7  ;;  %v4211_v54 = vsel %vm19847_vm5, %v4197_v55, %v4147_v22  ;;  %v19854_v26 = vunpack.i.l.bf16 %v16897_v2  ;;  %vm19858_vm2 = vmmov %vm19855_vm0  ;;  %vm19862_vm15 = vcmp.lt.s32.totalorder %v14571_v11, 15 }
 0x82b   :  { %v11999_v59 = vunpack.i.h.bf16 %v17332_v15  ;;  %v11998_v20 = vunpack.i.l.bf16 %v17332_v15  ;;  %10275 = vmatpush1.bf16.msra.mxu0 %v19843_v60  ;;  %4638 = vmatprep.mubr.f32.mxu0 %v19845_v43  ;;  %v19852_v15 = vunpack.i.h.bf16 %v17254_v28  ;;  %v19856_v28 = vld [vmem:[#allocation20_spill] sm:$0xff]  ;;  %vm19859_vm14 = vmmov %vm19855_vm0 }
 0x82c   :  { %10277 = vmatprep.subr.bf16.mxu0 %v16891_v3  ;;  %v4191_v25 = vsel %vm19855_vm0, %v12003_v23, %v19854_v26  ;;  %vm19857_vm13 = vnez %v19856_v28  ;;  %vm19860_vm7 = vmmov %vm19855_vm0  ;;  %v19861_v26 = vunpack.i.h.bf16 %v17225_v4 }
 0x82d   :  { %v4196_v22 = vsel %vm19860_vm7, %v11994_v16, %v11999_v59  ;;  %vm19864_vm1 = vmmov %vm19862_vm15  ;;  %v4214_v31 = vsel %vm19857_vm13, %v4191_v25, %v4150_v47  ;;  %v19868_v47 = vld [vmem:[#allocation49_spill] sm:$0xff]  ;;  %vm19879_vm7 = vnez %v19615_v29  ;;  %v19971_v29 = vsel %vm19823_vm6, %v19844_v9, 0.0  ;;  %v19975_v9 = vld [vmem:[#allocation72_spill] sm:$0xff] }
 0x82e   :  { %v17389_v53 = vpop.permute.xlu0 %12006 }
 0x82f   :  { %v19848_v56 = vunpack.i.l.bf16 %v17389_v53  ;;  %v19851_v60 = vunpack.i.h.bf16 %v17389_v53  ;;  %10279 = vmatpush1.bf16.msra.mxu0 %v16893_v5 }
 0x831   :  { %v4343_v13 = vsel %vm19850_vm9, %v19849_v57, %v19848_v56  ;;  %v4344_v32 = vsel %vm19853_vm4, %v19852_v15, %v19851_v60  ;;  %v4222_v56 = vsel %vm19857_vm13, %v4192_v38, %v4158_v21  ;;  %v4194_v60 = vsel %vm19858_vm2, %v11999_v59, %v12004_v1 }
 0x832   :  { %v17399_v37 = vpop.permute.xlu1 %12031  ;;  %v17443_v8 = vpop.permute.xlu0 %12011  ;;  %v4195_v15 = vsel %vm19859_vm14, %v11993_v39, %v11998_v20  ;;  %v4354_v2 = vsel %vm19656_vm8, %v4343_v13, %v4290_v40  ;;  %v4362_v55 = vsel %vm19656_vm8, %v4344_v32, %v4298_v24  ;;  %v19863_v1 = vunpack.i.l.bf16 %v17225_v4  ;;  %vm19865_vm8 = vmmov %vm19855_vm0  ;;  %v19866_v40 = vld [vmem:[#allocation93_spill] sm:$0xff] }
 0x833   :  { %v18990_v57 = vunpack.i.h.bf16 %v17443_v8  ;;  %v18991_v52 = vunpack.i.l.bf16 %v17443_v8  ;;  %v4193_v32 = vsel %vm19865_vm8, %v11998_v20, %v12003_v23  ;;  %10281 = vmatprep.subr.bf16.mxu0 %v19866_v40  ;;  %v12024_v24 = vunpack.i.h.bf16 %v17343_v19  ;;  %v19870_v20 = vld [vmem:[#allocation43_spill] sm:$0xff]  ;;  %vm19874_vm0 = vmmov %vm19864_vm1 }
 0x834   :  { %v12023_v13 = vunpack.i.l.bf16 %v17343_v19  ;;  %vm19869_vm9 = vnez %v19868_v47  ;;  %vm19871_vm4 = vnez %v19870_v20  ;;  %v19872_v19 = vunpack.i.h.bf16 %v16460_v46  ;;  %vm19876_vm2 = vmmov %vm19874_vm0  ;;  %v19920_v40 = vld [vmem:[#allocation47_spill] sm:$0xff] }
 0x835   :  { %v4410_v21 = vsel %vm19862_vm15, %v19861_v26, %v18990_v57  ;;  %v4409_v59 = vsel %vm19864_vm1, %v19863_v1, %v18991_v52  ;;  %v4212_v25 = vsel %vm19869_vm9, %v4195_v15, %v4148_v63  ;;  %v4220_v23 = vsel %vm19869_vm9, %v4196_v22, %v4156_v0  ;;  %v19875_v0 = vld [vmem:[#allocation71_spill] sm:$0xff]  ;;  %vm19878_vm14 = vmmov %vm19874_vm0  ;;  %v19880_v22 = vld [vmem:[#allocation69_spill] sm:$0xff] }
 0x836   :  { %v4418_v39 = vsel %vm19728_vm11, %v4409_v59, %v4354_v2  ;;  %v4426_v38 = vsel %vm19728_vm11, %v4410_v21, %v4362_v55  ;;  %v4221_v58 = vsel %vm19871_vm4, %v4194_v60, %v4157_v50  ;;  %v4213_v55 = vsel %vm19871_vm4, %v4193_v32, %v4149_v42  ;;  %vm19873_vm11 = vmmov %vm19864_vm1  ;;  %10283 = vmatpush1.bf16.msra.mxu0 %v19875_v0 }
 0x837   :  { %v17478_v16 = vpop.permute.xlu1 %12041  ;;  %v17492_v26 = vpack.c.bf16 %v4426_v38, %v4418_v39  ;;  %v12034_v21 = vunpack.i.h.bf16 %v17399_v37  ;;  %v19877_v60 = vunpack.i.l.bf16 %v16460_v46  ;;  %vm19881_vm15 = vnez %v19880_v22  ;;  %vm19887_vm1 = vmmov %vm19874_vm0 }
 0x838   :  { %vm19889_vm8 = vmmov %vm19874_vm0  ;;  %v19915_v0 = vsel %vm19818_vm3, %v19523_v30, 0.0  ;;  %v19968_v14 = vunpack.i.h.bf16 %v17443_v8 }
 0x839   :  { %19867 = vst [vmem:[#allocation79_spill] sm:$0xff] %v17492_v26  ;;  %10269 = vmatprep.subr.bf16.mxu1 %v17492_v26 }
 0x83a   :  { %10271 = vmatpush1.bf16.msra.mxu1 %v17294_v6 }
 0x83d   :  { %v12017_v4 = vpop.permute.xlu0 %12016  ;;  %4568 = vmatmul.mubr.f32.vlgmr.msra.gmra.mrb[80].mxu1 %v17372_v7 }
 0x83e   :  { %v12019_v1 = vunpack.i.h.bf16 %v12017_v4  ;;  %v12018_v2 = vunpack.i.l.bf16 %v12017_v4  ;;  %4709 = vmatprep.mubr.f32.mxu1 %v19845_v43 }
 0x840   :  { %v4264_v59 = vsel %vm19873_vm11, %v19872_v19, %v12019_v1  ;;  %v4262_v63 = vsel %vm19874_vm0, %v12019_v1, %v12024_v24  ;;  %v4261_v50 = vsel %vm19876_vm2, %v12018_v2, %v12023_v13  ;;  %v4263_v42 = vsel %vm19878_vm14, %v19877_v60, %v12018_v2  ;;  %v17526_v1 = vpop.permute.xlu1 %12051  ;;  %v19882_v2 = vld [vmem:[#allocation24_spill] sm:$0xff]  ;;  %v19885_v60 = vld [vmem:[#allocation33_spill] sm:$0xff]  ;;  %vm19890_vm11 = vmmov %vm19874_vm0 }
 0x841   :  { %v4283_v15 = vsel %vm19879_vm7, %v4264_v59, %v4219_v62  ;;  %v4284_v32 = vsel %vm19881_vm15, %v4262_v63, %v4220_v23  ;;  %v12027_v39 = vpop.permute.xlu0 %12026  ;;  %v4275_v38 = vsel %vm19879_vm7, %v4263_v42, %v4211_v54  ;;  %v4276_v4 = vsel %vm19881_vm15, %v4261_v50, %v4212_v25  ;;  %10305 = vmatprep.subr.bf16.mxu1 %v19882_v2 }
 0x842   :  { %v12029_v46 = vunpack.i.h.bf16 %v12027_v39  ;;  %v12028_v19 = vunpack.i.l.bf16 %v12027_v39  ;;  %v12033_v62 = vunpack.i.l.bf16 %v17399_v37  ;;  %v12043_v59 = vunpack.i.l.bf16 %v17478_v16  ;;  %v19893_v39 = vld [vmem:[#allocation78_spill] sm:$0xff] }
 0x843   :  { %v17531_v23 = vpack.c.bf16 %v4284_v32, %v4276_v4  ;;  %v17533_v63 = vpack.c.bf16 %v4283_v15, %v4275_v38  ;;  %v19886_v57 = vunpack.i.h.bf16 %v19885_v60  ;;  %v19888_v25 = vunpack.i.l.bf16 %v19885_v60  ;;  %v19891_v15 = vld [vmem:[#allocation86_spill] sm:$0xff] }
 0x844   :  { %v4259_v42 = vsel %vm19890_vm11, %v12023_v13, %v12028_v19  ;;  %v4260_v37 = vsel %vm19874_vm0, %v12024_v24, %v12029_v46  ;;  %vm19892_vm2 = vnez %v19891_v15  ;;  %vm19894_vm14 = vnez %v19893_v39  ;;  %v19985_v15 = vld [vmem:[#allocation46_spill] sm:$0xff]  ;;  %v19986_v39 = vld [vmem:[#allocation11_spill] sm:$0xff] }
 0x845   :  { %19883 = vst [vmem:[#allocation98_spill] sm:$0xff] %v17531_v23  ;;  %19884 = vst [vmem:[#allocation35_spill] sm:$0xff] %v17533_v63  ;;  %v4258_v54 = vsel %vm19887_vm1, %v12029_v46, %v19886_v57  ;;  %v4257_v50 = vsel %vm19889_vm8, %v12028_v19, %v19888_v25  ;;  %v4277_v32 = vsel %vm19892_vm2, %v4259_v42, %v4213_v55  ;;  %10285 = vmatprep.subr.bf16.mxu0 %v17531_v23  ;;  %v19914_v23 = vld [vmem:[#allocation77_spill] sm:$0xff] }
 0x846   :  { %v4278_v38 = vsel %vm19894_vm14, %v4257_v50, %v4214_v31  ;;  %v4285_v57 = vsel %vm19892_vm2, %v4260_v37, %v4221_v58  ;;  %v4286_v4 = vsel %vm19894_vm14, %v4258_v54, %v4222_v56  ;;  %v19895_v19 = vunpack.i.h.bf16 %v17086_v41  ;;  %10287 = vmatpush1.bf16.msra.mxu0 %v17533_v63  ;;  %v19901_v58 = vld [vmem:[#allocation117_spill] sm:$0xff] }
 0x847   :  { %vm19896_vm1 = vcmp.lt.s32.totalorder %v14571_v11, 112  ;;  %v12044_v46 = vunpack.i.h.bf16 %v17478_v16  ;;  %v17562_v55 = vpack.c.bf16 %v4286_v4, %v4278_v38  ;;  %v17564_v60 = vpack.c.bf16 %v4285_v57, %v4277_v32  ;;  %v19904_v37 = vld [vmem:[#allocation25_spill] sm:$0xff]  ;;  %v19905_v16 = vld [vmem:[#allocation52_spill] sm:$0xff]  ;;  %v17580_v57 = vpop.permute.xlu1 %12061 }
 0x848   :  { %v4054_v24 = vsel %vm19896_vm1, %v19895_v19, %v12034_v21  ;;  %v19899_v31 = vunpack.i.l.bf16 %v17086_v41  ;;  %vm19900_vm8 = vmmov %vm19896_vm1  ;;  %v19902_v54 = vunpack.i.l.bf16 %v19901_v58  ;;  %10307 = vmatpush1.bf16.msra.mxu1 %v19904_v37  ;;  %10289 = vmatprep.subr.bf16.mxu0 %v19905_v16  ;;  %v19906_v32 = vld [vmem:[#allocation40_spill] sm:$0xff]  ;;  %v19911_v38 = vsel %vm19818_vm3, %v19819_v34, 0.0 }
 0x849   :  { %19897 = vst [vmem:[#allocation61_spill] sm:$0xff] %v17562_v55  ;;  %19898 = vst [vmem:[#allocation110_spill] sm:$0xff] %v17564_v60  ;;  %v19907_v41 = vld [vmem:[#allocation4_spill] sm:$0xff]  ;;  %v4075_v16 = vsel %vm19847_vm5, %v4054_v24, %v19911_v38  ;;  %v19916_v24 = vunpack.i.h.bf16 %v19901_v58  ;;  %v12054_v52 = vunpack.i.h.bf16 %v17526_v1  ;;  %v12053_v30 = vunpack.i.l.bf16 %v17526_v1 }
 0x84a   :  { %v4053_v56 = vsel %vm19900_vm8, %v19899_v31, %v12033_v62  ;;  %vm19903_vm11 = vmmov %vm19896_vm1  ;;  %10309 = vmatprep.subr.bf16.mxu1 %v19907_v41  ;;  %v19908_v4 = vld [vmem:[#allocation60_spill] sm:$0xff]  ;;  %v19909_v31 = vld [vmem:[#allocation14_spill] sm:$0xff]  ;;  %v19923_v1 = vsel %vm16331_vm12, %v19682_v27, 0.0 }
 0x84b   :  { %v12037_v13 = vpop.permute.xlu0 %12036  ;;  %v4047_v25 = vsel %vm19903_vm11, %v12043_v59, %v19902_v54  ;;  %v19910_v54 = vld [vmem:[#allocation3_spill] sm:$0xff]  ;;  %vm19912_vm0 = vmmov %vm19896_vm1  ;;  %v4067_v34 = vsel %vm19847_vm5, %v4053_v56, %v19915_v0  ;;  %v19919_v41 = vld [vmem:[#allocation97_spill] sm:$0xff] }
 0x84c   :  { %v12039_v50 = vunpack.i.h.bf16 %v12037_v13  ;;  %v12038_v42 = vunpack.i.l.bf16 %v12037_v13  ;;  %vm19913_vm1 = vmmov %vm19912_vm0  ;;  %10291 = vmatpush1.bf16.msra.mxu0 %v19919_v41  ;;  %10311 = vmatpush1.bf16.msra.mxu1 %v19920_v40  ;;  %v19924_v0 = vld [vmem:[#allocation106_spill] sm:$0xff] }
 0x84d   :  { %vm19917_vm8 = vmmov %vm19912_vm0  ;;  %10313 = vmatprep.subr.bf16.mxu1 %v19924_v0 }
 0x84e   :  { %v4051_v19 = vsel %vm19912_vm0, %v12033_v62, %v12038_v42  ;;  %v4052_v63 = vsel %vm19913_vm1, %v12034_v21, %v12039_v50  ;;  %v4048_v62 = vsel %vm19917_vm8, %v12044_v46, %v19916_v24  ;;  %v19918_v21 = vsel %vm19823_vm6, %v19821_v51, 0.0  ;;  %vm19921_vm11 = vmmov %vm19912_vm0 }
 0x84f   :  { %v12047_v13 = vpop.permute.xlu0 %12046  ;;  %v4070_v38 = vsel %vm19857_vm13, %v4047_v25, %v19918_v21  ;;  %v4049_v24 = vsel %vm19921_vm11, %v12038_v42, %v12043_v59  ;;  %v4050_v51 = vsel %vm19912_vm0, %v12039_v50, %v12044_v46  ;;  %v19922_v25 = vsel %vm16331_vm12, %v19668_v45, 0.0 }
 0x850   :  { %v12049_v56 = vunpack.i.h.bf16 %v12047_v13  ;;  %v12048_v58 = vunpack.i.l.bf16 %v12047_v13  ;;  %v4068_v21 = vsel %vm19869_vm9, %v4051_v19, %v19922_v25  ;;  %v4076_v13 = vsel %vm19869_vm9, %v4052_v63, %v19923_v1 }
 0x851   :  { %v19925_v59 = vunpack.i.h.bf16 %v17158_v35  ;;  %vm19926_vm1 = vcmp.lt.s32.totalorder %v14571_v11, 15  ;;  %v19929_v42 = vunpack.i.l.bf16 %v17158_v35 }
 0x852   :  { %vm19927_vm8 = vmmov %vm19926_vm1 }
 0x853   :  { %v4120_v46 = vsel %vm19926_vm1, %v19925_v59, %v12049_v56  ;;  %v4117_v45 = vsel %vm19927_vm8, %v12048_v58, %v12053_v30  ;;  %vm19928_vm11 = vmmov %vm19926_vm1  ;;  %v12057_v19 = vpop.permute.xlu0 %12056 }
 0x854   :  { %v4118_v50 = vsel %vm19928_vm11, %v12049_v56, %v12054_v52  ;;  %vm19930_vm0 = vmmov %vm19926_vm1  ;;  %v4132_v25 = vsel %vm19881_vm15, %v4117_v45, %v4068_v21  ;;  %v4139_v1 = vsel %vm19879_vm7, %v4120_v46, %v4075_v16  ;;  %v12059_v0 = vunpack.i.h.bf16 %v12057_v19  ;;  %v19935_v45 = vld [vmem:[#allocation118_spill] sm:$0xff] }
 0x855   :  { %v4119_v27 = vsel %vm19930_vm0, %v19929_v42, %v12048_v58  ;;  %v4140_v59 = vsel %vm19881_vm15, %v4118_v50, %v4076_v13  ;;  %v12058_v58 = vunpack.i.l.bf16 %v12057_v19  ;;  %v19933_v42 = vld [vmem:[#allocation94_spill] sm:$0xff]  ;;  %v19934_v21 = vsel %vm19826_vm10, %v19547_v18, 0.0  ;;  %vm19937_vm1 = vmmov %vm19930_vm0 }
 0x856   :  { %v4131_v63 = vsel %vm19879_vm7, %v4119_v27, %v4067_v34  ;;  %v17664_v56 = vpack.c.bf16 %v4140_v59, %v4132_v25  ;;  %10315 = vmatpush1.bf16.msra.mxu1 %v19933_v42  ;;  %v12063_v34 = vunpack.i.l.bf16 %v17580_v57  ;;  %v4069_v16 = vsel %vm19871_vm4, %v4049_v24, %v19934_v21  ;;  %vm19939_vm8 = vmmov %vm19930_vm0 }
 0x857   :  { %v12067_v41 = vpop.permute.xlu1 %12066  ;;  %v17666_v35 = vpack.c.bf16 %v4139_v1, %v4131_v63  ;;  %10317 = vmatprep.subr.bf16.mxu1 %v17562_v55  ;;  %v19936_v50 = vunpack.i.h.bf16 %v19935_v45  ;;  %v19938_v19 = vunpack.i.l.bf16 %v19935_v45  ;;  %vm19940_vm11 = vmmov %vm19930_vm0  ;;  %v4116_v24 = vsel %vm19930_vm0, %v12054_v52, %v12059_v0 }
 0x858   :  { %19931 = vst [vmem:[#allocation99_spill] sm:$0xff] %v17664_v56  ;;  %v12069_v46 = vunpack.i.h.bf16 %v12067_v41  ;;  %v12068_v13 = vunpack.i.l.bf16 %v12067_v41  ;;  %v4115_v18 = vsel %vm19940_vm11, %v12053_v30, %v12058_v58  ;;  %10293 = vmatprep.subr.bf16.mxu0 %v17664_v56  ;;  %v12072_v41 = vpop.permute.xlu0 %12071  ;;  %v19941_v25 = vsel %vm19823_vm6, %v19824_v12, 0.0 }
 0x859   :  { %19932 = vst [vmem:[#allocation108_spill] sm:$0xff] %v17666_v35  ;;  %v4114_v27 = vsel %vm19937_vm1, %v12059_v0, %v19936_v50  ;;  %v4113_v63 = vsel %vm19939_vm8, %v12058_v58, %v19938_v19  ;;  %v4078_v1 = vsel %vm19857_vm13, %v4048_v62, %v19941_v25  ;;  %v19942_v59 = vsel %vm19826_vm10, %v19684_v33, 0.0  ;;  %10295 = vmatpush1.bf16.msra.mxu0 %v17666_v35  ;;  %v19948_v19 = vld [vmem:[#allocation68_spill] sm:$0xff] }
 0x85a   :  { %v4077_v30 = vsel %vm19871_vm4, %v4050_v51, %v19942_v59  ;;  %v4133_v52 = vsel %vm19892_vm2, %v4115_v18, %v4069_v16  ;;  %v4134_v0 = vsel %vm19894_vm14, %v4113_v63, %v4070_v38  ;;  %v19943_v12 = vunpack.i.h.bf16 %v17389_v53  ;;  %10319 = vmatpush1.bf16.msra.mxu1 %v17564_v60  ;;  %10297 = vmatprep.subr.bf16.mxu0 %v19948_v19  ;;  %v19949_v63 = vld [vmem:[#allocation80_spill] sm:$0xff] }
 0x85b   :  { %vm19944_vm1 = vcmp.lt.s32.totalorder %v14571_v11, 112  ;;  %v19945_v58 = vunpack.i.l.bf16 %v17389_v53  ;;  %v4141_v51 = vsel %vm19892_vm2, %v4116_v24, %v4077_v30  ;;  %v4142_v21 = vsel %vm19894_vm14, %v4114_v27, %v4078_v1  ;;  %v12082_v53 = vpop.permute.xlu1 %12081  ;;  %10321 = vmatprep.subr.bf16.mxu1 %v19949_v63 }
 0x85c   :  { %v4342_v62 = vsel %vm19944_vm1, %v19943_v12, %v12069_v46  ;;  %vm19946_vm8 = vmmov %vm19944_vm1  ;;  %v4291_v38 = vsel %vm19818_vm3, %v16977_v48, 0.0  ;;  %v4299_v16 = vsel %vm19818_vm3, %v16981_v36, 0.0  ;;  %v17726_v45 = vpack.c.bf16 %v4142_v21, %v4134_v0  ;;  %v19955_v12 = vld [vmem:[#allocation48_spill] sm:$0xff] }
 0x85d   :  { %v4341_v33 = vsel %vm19946_vm8, %v19945_v58, %v12068_v13  ;;  %v17728_v50 = vpack.c.bf16 %v4141_v51, %v4133_v52  ;;  %v19950_v27 = vunpack.i.h.bf16 %v17227_v61  ;;  %v19951_v18 = vunpack.i.h.bf16 %v17580_v57  ;;  %vm19952_vm11 = vmmov %vm19944_vm1  ;;  %v12077_v1 = vpop.permute.xlu0 %12076  ;;  %10299 = vmatpush1.bf16.msra.mxu0 %v19955_v12 }
 0x85e   :  { %19947 = vst [vmem:[#allocation87_spill] sm:$0xff] %v17726_v45  ;;  %v19953_v24 = vunpack.i.l.bf16 %v17227_v61  ;;  %vm19954_vm3 = vmmov %vm19944_vm1  ;;  %v12074_v10 = vunpack.i.h.bf16 %v12072_v41  ;;  %v12073_v25 = vunpack.i.l.bf16 %v12072_v41  ;;  %v4363_v59 = vsel %vm19847_vm5, %v4342_v62, %v4299_v16  ;;  %v19958_v41 = vld [vmem:[#allocation58_spill] sm:$0xff] }
 0x85f   :  { %v4336_v48 = vsel %vm19952_vm11, %v19951_v18, %v19950_v27  ;;  %v4355_v30 = vsel %vm19847_vm5, %v4341_v33, %v4291_v38  ;;  %v12079_v52 = vunpack.i.h.bf16 %v12077_v1  ;;  %v12078_v0 = vunpack.i.l.bf16 %v12077_v1  ;;  %vm19956_vm0 = vmmov %vm19944_vm1  ;;  %10323 = vmatpush1.bf16.msra.mxu1 %v19958_v41 }
 0x860   :  { %v4335_v36 = vsel %vm19954_vm3, %v12063_v34, %v19953_v24  ;;  %v12084_v58 = vunpack.i.h.bf16 %v12082_v53  ;;  %v12083_v51 = vunpack.i.l.bf16 %v12082_v53  ;;  %v4339_v61 = vsel %vm19956_vm0, %v12068_v13, %v12073_v25  ;;  %vm19957_vm1 = vmmov %vm19956_vm0  ;;  %10325 = vmatprep.subr.bf16.mxu1 %v17726_v45 }
 0x861   :  { %v4340_v21 = vsel %vm19957_vm1, %v12069_v46, %v12074_v10  ;;  %vm19959_vm8 = vmmov %vm19956_vm0  ;;  %v19960_v49 = vmov %v19951_v18  ;;  %v19962_v38 = vsel %vm16331_vm12, %v19908_v4, 0.0  ;;  %v19963_v46 = vsel %vm16331_vm12, %v19914_v23, 0.0  ;;  %v12087_v47 = vpop.permute.xlu0 %12086 }
 0x862   :  { %v4337_v62 = vsel %vm19959_vm8, %v12073_v25, %v12063_v34  ;;  %vm19961_vm5 = vmmov %vm19956_vm0  ;;  %v4356_v13 = vsel %vm19869_vm9, %v4339_v61, %v19962_v38  ;;  %v4364_v16 = vsel %vm19869_vm9, %v4340_v21, %v19963_v46  ;;  %vm19964_vm11 = vcmp.lt.s32.totalorder %v14571_v11, 15  ;;  %v19983_v38 = vld [vmem:[#allocation7_spill] sm:$0xff]  ;;  %v19987_v46 = vld [vmem:[#allocation41_spill] sm:$0xff] }
 0x863   :  { %v4338_v33 = vsel %vm19961_vm5, %v12074_v10, %v19960_v49  ;;  %v4405_v57 = vsel %vm19964_vm11, %v12078_v0, %v12083_v51  ;;  %vm19965_vm3 = vmmov %vm19964_vm11  ;;  %v19966_v4 = vunpack.i.l.bf16 %v17443_v8  ;;  %v12089_v8 = vunpack.i.h.bf16 %v12087_v47  ;;  %10327 = vmatpush1.bf16.msra.mxu1 %v17728_v50 }
 0x864   :  { %v4406_v34 = vsel %vm19965_vm3, %v12079_v52, %v12084_v58  ;;  %vm19967_vm0 = vmmov %vm19965_vm3  ;;  %v4420_v18 = vsel %vm19881_vm15, %v4405_v57, %v4356_v13  ;;  %v4358_v22 = vsel %vm19857_vm13, %v4335_v36, %v19971_v29  ;;  %10329 = vmatprep.subr.bf16.mxu1 %v19974_v44  ;;  %v19976_v21 = vunpack.i.h.bf16 %v19975_v9  ;;  %v19984_v13 = vld [vmem:[#allocation8_spill] sm:$0xff] }
 0x865   :  { %v4407_v53 = vsel %vm19967_vm0, %v19966_v4, %v12078_v0  ;;  %vm19969_vm12 = vmmov %vm19967_vm0  ;;  %v4428_v10 = vsel %vm19881_vm15, %v4406_v34, %v4364_v16  ;;  %v12088_v0 = vunpack.i.l.bf16 %v12087_v47  ;;  %v19978_v36 = vunpack.i.l.bf16 %v19975_v9  ;;  %v19988_v16 = vld [vmem:[#allocation13_spill] sm:$0xff]  ;;  %v19989_v57 = vld [vmem:[#allocation112_spill] sm:$0xff] }
 0x866   :  { %v4408_v23 = vsel %vm19969_vm12, %v19968_v14, %v12079_v52  ;;  %v4419_v27 = vsel %vm19879_vm7, %v4407_v53, %v4355_v30  ;;  %v17791_v25 = vpack.c.bf16 %v4428_v10, %v4420_v18  ;;  %v19970_v30 = vsel %vm19823_vm6, %v19906_v32, 0.0  ;;  %vm19977_vm6 = vmmov %vm19967_vm0  ;;  %v19990_v34 = vld [vmem:[#allocation76_spill] sm:$0xff]  ;;  %v19991_v4 = vld [vmem:[#allocation113_spill] sm:$0xff] }
 0x867   :  { %v4427_v24 = vsel %vm19879_vm7, %v4408_v23, %v4363_v59  ;;  %v4366_v52 = vsel %vm19857_vm13, %v4336_v48, %v19970_v30  ;;  %v19972_v59 = vsel %vm19826_vm10, %v19909_v31, 0.0  ;;  %v19973_v32 = vsel %vm19826_vm10, %v19910_v54, 0.0  ;;  %vm19979_vm13 = vmmov %vm19967_vm0  ;;  %v19992_v53 = vld [vmem:[#allocation73_spill] sm:$0xff]  ;;  %v19993_v14 = vld [vmem:[#allocation95_spill] sm:$0xff] }
 0x868   :  { %v17793_v1 = vpack.c.bf16 %v4427_v24, %v4419_v27  ;;  %v4357_v61 = vsel %vm19871_vm4, %v4337_v62, %v19972_v59  ;;  %v4365_v48 = vsel %vm19871_vm4, %v4338_v33, %v19973_v32  ;;  %v4402_v28 = vsel %vm19977_vm6, %v12089_v8, %v19976_v21  ;;  %vm19980_vm9 = vmmov %vm19967_vm0  ;;  %10301 = vmatprep.subr.bf16.mxu0 %v17791_v25  ;;  %v19994_v23 = vld [vmem:[#allocation66_spill] sm:$0xff]  ;;  %v19995_v47 = vld [vmem:[#allocation88_spill] sm:$0xff] }
 0x869   :  { %v4401_v31 = vsel %vm19979_vm13, %v12088_v0, %v19978_v36  ;;  %v4403_v17 = vsel %vm19980_vm9, %v12083_v51, %v12088_v0  ;;  %vm19981_vm10 = vmmov %vm19967_vm0  ;;  %v4430_v33 = vsel %vm19894_vm14, %v4402_v28, %v4366_v52  ;;  %v19997_v27 = vld [vmem:[#allocation6_spill] sm:$0xff]  ;;  %v19999_v24 = vld [vmem:[#allocation83_spill] sm:$0xff] }
 0x86a   :  { %v4404_v54 = vsel %vm19981_vm10, %v12084_v58, %v12089_v8  ;;  %v4421_v20 = vsel %vm19892_vm2, %v4403_v17, %v4357_v61  ;;  %v4422_v62 = vsel %vm19894_vm14, %v4401_v31, %v4358_v22  ;;  %10303 = vmatpush1.bf16.msra.mxu0 %v17793_v1  ;;  %v19982_v58 = vld [vmem:[#allocation70_spill] sm:$0xff]  ;;  %v20001_v8 = vld [vmem:[#allocation96_spill] sm:$0xff]  ;;  %v20003_v30 = vld [vmem:[#allocation119_spill] sm:$0xff] }
 0x86b   :  { %v4429_v49 = vsel %vm19892_vm2, %v4404_v54, %v4365_v48  ;;  %v17843_v51 = vpack.c.bf16 %v4430_v33, %v4422_v62  ;;  %10331 = vmatpush1.bf16.msra.mxu1 %v19982_v58  ;;  %10337 = vmatprep.subr.bf16.mxu0 %v19983_v38  ;;  %v19998_v18 = vld [vmem:[#allocation74_spill] sm:$0xff]  ;;  %v20004_v52 = vld [vmem:[#allocation27_spill] sm:$0xff]  ;;  %v20005_v29 = vld [vmem:[#allocation116_spill] sm:$0xff] }
 0x86c   :  { %v17845_v11 = vpack.c.bf16 %v4429_v49, %v4421_v20  ;;  %v20000_v10 = vld [vmem:[#allocation62_spill] sm:$0xff]  ;;  %v20006_v22 = vld [vmem:[#allocation55_spill] sm:$0xff]  ;;  %v20008_v61 = vld [vmem:[#allocation44_spill] sm:$0xff] }
 0x86d   :  { %4639 = vmatmul.mubr.f32.vlgmr.msra.gmra.mrb[82].mxu0 %v17372_v7  ;;  %10333 = vmatprep.subr.bf16.mxu1 %v17843_v51  ;;  %v20002_v0 = vld [vmem:[#allocation30_spill] sm:$0xff]  ;;  %v20007_v59 = vld [vmem:[#allocation23_spill] sm:$0xff]  ;;  %v20011_v9 = vld [vmem:[#allocation56_spill] sm:$0xff] }
 0x86e   :  { %10339 = vmatpush1.bf16.msra.mxu0 %v19984_v13  ;;  %4782 = vmatprep.mubr.f32.mxu0 %v19845_v43  ;;  %v20009_v32 = vld [vmem:[#allocation51_spill] sm:$0xff]  ;;  %v20010_v48 = vld [vmem:[#allocation22_spill] sm:$0xff]  ;;  %v20012_v28 = vld [vmem:[#allocation21_spill] sm:$0xff] }
 0x86f   :  { %10335 = vmatpush1.bf16.msra.mxu1 %v17845_v11  ;;  %10341 = vmatprep.subr.bf16.mxu0 %v19985_v15  ;;  %v8201_v21 = vld [vmem:[%s18566_s7 + $0x1] sm:$0x1]  ;;  %v20013_v36 = vld [vmem:[#allocation17_spill] sm:$0xff]  ;;  %v20014_v31 = vld [vmem:[#allocation18_spill] sm:$0xff] }
 0x870   :  { %10369 = vmatprep.subr.bf16.mxu1 %v19986_v39  ;;  %v20015_v17 = vld [vmem:[#allocation93_spill] sm:$0xff]  ;;  %v20016_v54 = vld [vmem:[#allocation4_spill] sm:$0xff]  ;;  %v20017_v20 = vld [vmem:[#allocation71_spill] sm:$0xff] }
 0x871   :  { %v20018_v62 = vld [vmem:[#allocation98_spill] sm:$0xff]  ;;  %v20020_v33 = vld [vmem:[#allocation35_spill] sm:$0xff] }
 0x872   :  { %4710 = vmatmul.mubr.f32.vlgmr.msra.gmra.mrb[82].mxu1 %v17372_v7  ;;  %10343 = vmatpush1.bf16.msra.mxu0 %v19987_v46  ;;  %v19996_v7 = vld [vmem:[#allocation107_spill] sm:$0xff]  ;;  %v20019_v49 = vld [vmem:[#allocation106_spill] sm:$0xff] }
 0x873   :  { %10371 = vmatpush1.bf16.msra.mxu1 %v19988_v16  ;;  %10345 = vmatprep.subr.bf16.mxu0 %v19989_v57 }
 0x874   :  { %10373 = vmatprep.subr.bf16.mxu1 %v19990_v34  ;;  %4853 = vmatprep.mubr.f32.mxu1 %v19845_v43 }
 0x876   :  { %10347 = vmatpush1.bf16.msra.mxu0 %v19991_v4 }
 0x877   :  { %10375 = vmatpush1.bf16.msra.mxu1 %v19992_v53  ;;  %10349 = vmatprep.subr.bf16.mxu0 %v19993_v14 }
 0x878   :  { %10377 = vmatprep.subr.bf16.mxu1 %v19994_v23 }
 0x87a   :  { %10351 = vmatpush1.bf16.msra.mxu0 %v19995_v47 }
 0x87b   :  { %10379 = vmatpush1.bf16.msra.mxu1 %v19996_v7  ;;  %10353 = vmatprep.subr.bf16.mxu0 %v19997_v27 }
 0x87c   :  { %10381 = vmatprep.subr.bf16.mxu1 %v19998_v18 }
 0x87e   :  { %10355 = vmatpush1.bf16.msra.mxu0 %v19999_v24 }
 0x87f   :  { %10383 = vmatpush1.bf16.msra.mxu1 %v20000_v10  ;;  %10357 = vmatprep.subr.bf16.mxu0 %v20001_v8 }
 0x880   :  { %10385 = vmatprep.subr.bf16.mxu1 %v20002_v0 }
 0x882   :  { %10359 = vmatpush1.bf16.msra.mxu0 %v20003_v30 }
 0x883   :  { %10387 = vmatpush1.bf16.msra.mxu1 %v20004_v52  ;;  %10361 = vmatprep.subr.bf16.mxu0 %v20005_v29 }
 0x884   :  { %10389 = vmatprep.subr.bf16.mxu1 %v20006_v22 }
 0x886   :  { %10363 = vmatpush1.bf16.msra.mxu0 %v20007_v59 }
 0x887   :  { %10391 = vmatpush1.bf16.msra.mxu1 %v20008_v61  ;;  %10365 = vmatprep.subr.bf16.mxu0 %v20009_v32 }
 0x888   :  { %10393 = vmatprep.subr.bf16.mxu1 %v20010_v48 }
 0x88a   :  { %10367 = vmatpush1.bf16.msra.mxu0 %v20011_v9 }
 0x88b   :  { %10395 = vmatpush1.bf16.msra.mxu1 %v20012_v28  ;;  %10401 = vmatprep.subr.bf16.mxu0 %v20013_v36 }
 0x88c   :  { %10397 = vmatprep.subr.bf16.mxu1 %v17492_v26 }
 0x88d   :  { %4783 = vmatmul.mubr.f32.vlgmr.msra.gmra.mrb[84].mxu0 %v8201_v21 }
 0x88e   :  { %10403 = vmatpush1.bf16.msra.mxu0 %v20014_v31  ;;  %4924 = vmatprep.mubr.f32.mxu0 %v19845_v43 }
 0x88f   :  { %10399 = vmatpush1.bf16.msra.mxu1 %v17294_v6  ;;  %10405 = vmatprep.subr.bf16.mxu0 %v16891_v3 }
 0x890   :  { %10433 = vmatprep.subr.bf16.mxu1 %v19882_v2 }
 0x892   :  { %4854 = vmatmul.mubr.f32.vlgmr.msra.gmra.mrb[84].mxu1 %v8201_v21  ;;  %10407 = vmatpush1.bf16.msra.mxu0 %v16893_v5  ;;  %v20021_v5 = vld [vmem:[#allocation52_spill] sm:$0xff] }
 0x893   :  { %10435 = vmatpush1.bf16.msra.mxu1 %v19904_v37  ;;  %10409 = vmatprep.subr.bf16.mxu0 %v20015_v17  ;;  %v20022_v17 = vld [vmem:[#allocation97_spill] sm:$0xff] }
 0x894   :  { %10437 = vmatprep.subr.bf16.mxu1 %v20016_v54  ;;  %4995 = vmatprep.mubr.f32.mxu1 %v19845_v43 }
 0x896   :  { %10411 = vmatpush1.bf16.msra.mxu0 %v20017_v20 }
 0x897   :  { %10439 = vmatpush1.bf16.msra.mxu1 %v19920_v40  ;;  %10413 = vmatprep.subr.bf16.mxu0 %v20018_v62 }
 0x898   :  { %10441 = vmatprep.subr.bf16.mxu1 %v20019_v49 }
 0x89a   :  { %10415 = vmatpush1.bf16.msra.mxu0 %v20020_v33 }
 0x89b   :  { %10443 = vmatpush1.bf16.msra.mxu1 %v19933_v42  ;;  %10417 = vmatprep.subr.bf16.mxu0 %v20021_v5 }
 0x89c   :  { %10445 = vmatprep.subr.bf16.mxu1 %v17562_v55 }
 0x89e   :  { %10419 = vmatpush1.bf16.msra.mxu0 %v20022_v17 }
 0x89f   :  { %10447 = vmatpush1.bf16.msra.mxu1 %v17564_v60  ;;  %10421 = vmatprep.subr.bf16.mxu0 %v17664_v56 }
 0x8a0   :  { %10449 = vmatprep.subr.bf16.mxu1 %v19949_v63 }
 0x8a2   :  { %10423 = vmatpush1.bf16.msra.mxu0 %v17666_v35 }
 0x8a3   :  { %10451 = vmatpush1.bf16.msra.mxu1 %v19958_v41  ;;  %10425 = vmatprep.subr.bf16.mxu0 %v19948_v19 }
 0x8a4   :  { %10453 = vmatprep.subr.bf16.mxu1 %v17726_v45 }
 0x8a6   :  { %10427 = vmatpush1.bf16.msra.mxu0 %v19955_v12 }
 0x8a7   :  { %10455 = vmatpush1.bf16.msra.mxu1 %v17728_v50  ;;  %10429 = vmatprep.subr.bf16.mxu0 %v17791_v25 }
 0x8a8   :  { %10457 = vmatprep.subr.bf16.mxu1 %v19974_v44 }
 0x8aa   :  { %10431 = vmatpush1.bf16.msra.mxu0 %v17793_v1 }
 0x8ab   :  { %10459 = vmatpush1.bf16.msra.mxu1 %v19982_v58  ;;  %10465 = vmatprep.subr.bf16.mxu0 %v19983_v38 }
 0x8ac   :  { %10461 = vmatprep.subr.bf16.mxu1 %v17843_v51 }
 0x8ad   :  { %4925 = vmatmul.mubr.f32.vlgmr.msra.gmra.mrb[86].mxu0 %v8201_v21 }
 0x8ae   :  { %10467 = vmatpush1.bf16.msra.mxu0 %v19984_v13  ;;  %5068 = vmatprep.mubr.f32.mxu0 %v19845_v43 }
 0x8af   :  { %10463 = vmatpush1.bf16.msra.mxu1 %v17845_v11  ;;  %10469 = vmatprep.subr.bf16.mxu0 %v19985_v15 }
 0x8b0   :  { %10497 = vmatprep.subr.bf16.mxu1 %v19986_v39 }
 0x8b2   :  { %4996 = vmatmul.mubr.f32.vlgmr.msra.gmra.mrb[86].mxu1 %v8201_v21  ;;  %10471 = vmatpush1.bf16.msra.mxu0 %v19987_v46  ;;  %v8202_v21 = vld [vmem:[%s18566_s7 + $0x2] sm:$0x1] }
 0x8b3   :  { %10499 = vmatpush1.bf16.msra.mxu1 %v19988_v16  ;;  %10473 = vmatprep.subr.bf16.mxu0 %v19989_v57 }
 0x8b4   :  { %10501 = vmatprep.subr.bf16.mxu1 %v19990_v34  ;;  %5139 = vmatprep.mubr.f32.mxu1 %v19845_v43 }
 0x8b6   :  { %10475 = vmatpush1.bf16.msra.mxu0 %v19991_v4 }
 0x8b7   :  { %10503 = vmatpush1.bf16.msra.mxu1 %v19992_v53  ;;  %10477 = vmatprep.subr.bf16.mxu0 %v19993_v14 }
 0x8b8   :  { %10505 = vmatprep.subr.bf16.mxu1 %v19994_v23 }
 0x8ba   :  { %10479 = vmatpush1.bf16.msra.mxu0 %v19995_v47 }
 0x8bb   :  { %10507 = vmatpush1.bf16.msra.mxu1 %v19996_v7  ;;  %10481 = vmatprep.subr.bf16.mxu0 %v19997_v27 }
 0x8bc   :  { %10509 = vmatprep.subr.bf16.mxu1 %v19998_v18 }
 0x8be   :  { %10483 = vmatpush1.bf16.msra.mxu0 %v19999_v24 }
 0x8bf   :  { %10511 = vmatpush1.bf16.msra.mxu1 %v20000_v10  ;;  %10485 = vmatprep.subr.bf16.mxu0 %v20001_v8 }
 0x8c0   :  { %10513 = vmatprep.subr.bf16.mxu1 %v20002_v0 }
 0x8c2   :  { %10487 = vmatpush1.bf16.msra.mxu0 %v20003_v30 }
 0x8c3   :  { %10515 = vmatpush1.bf16.msra.mxu1 %v20004_v52  ;;  %10489 = vmatprep.subr.bf16.mxu0 %v20005_v29 }
 0x8c4   :  { %10517 = vmatprep.subr.bf16.mxu1 %v20006_v22 }
 0x8c6   :  { %10491 = vmatpush1.bf16.msra.mxu0 %v20007_v59 }
 0x8c7   :  { %10519 = vmatpush1.bf16.msra.mxu1 %v20008_v61  ;;  %10493 = vmatprep.subr.bf16.mxu0 %v20009_v32 }
 0x8c8   :  { %10521 = vmatprep.subr.bf16.mxu1 %v20010_v48 }
 0x8ca   :  { %10495 = vmatpush1.bf16.msra.mxu0 %v20011_v9  ;;  %v20023_v9 = vld [vmem:[#allocation85_spill] sm:$0xff] }
 0x8cb   :  { %10523 = vmatpush1.bf16.msra.mxu1 %v20012_v28  ;;  %10529 = vmatprep.subr.bf16.mxu0 %v20013_v36  ;;  %v20024_v28 = vld [vmem:[#allocation93_spill] sm:$0xff] }
 0x8cc   :  { %10525 = vmatprep.subr.bf16.mxu1 %v17492_v26 }
 0x8cd   :  { %5069 = vmatmul.mubr.f32.vlgmr.msra.gmra.mrb[88].mxu0 %v8202_v21 }
 0x8ce   :  { %10531 = vmatpush1.bf16.msra.mxu0 %v20014_v31  ;;  %5210 = vmatprep.mubr.f32.mxu0 %v19845_v43 }
 0x8cf   :  { %10527 = vmatpush1.bf16.msra.mxu1 %v17294_v6  ;;  %10533 = vmatprep.subr.bf16.mxu0 %v16891_v3 }
 0x8d0   :  { %10561 = vmatprep.subr.bf16.mxu1 %v19882_v2 }
 0x8d2   :  { %5140 = vmatmul.mubr.f32.vlgmr.msra.gmra.mrb[88].mxu1 %v8202_v21  ;;  %10535 = vmatpush1.bf16.msra.mxu0 %v20023_v9 }
 0x8d3   :  { %10563 = vmatpush1.bf16.msra.mxu1 %v19904_v37  ;;  %10537 = vmatprep.subr.bf16.mxu0 %v20024_v28 }
 0x8d4   :  { %10565 = vmatprep.subr.bf16.mxu1 %v20016_v54  ;;  %5281 = vmatprep.mubr.f32.mxu1 %v19845_v43 }
 0x8d6   :  { %10539 = vmatpush1.bf16.msra.mxu0 %v20017_v20 }
 0x8d7   :  { %10567 = vmatpush1.bf16.msra.mxu1 %v19920_v40  ;;  %10541 = vmatprep.subr.bf16.mxu0 %v20018_v62 }
 0x8d8   :  { %10569 = vmatprep.subr.bf16.mxu1 %v20019_v49 }
 0x8da   :  { %10543 = vmatpush1.bf16.msra.mxu0 %v20020_v33 }
 0x8db   :  { %10571 = vmatpush1.bf16.msra.mxu1 %v19933_v42  ;;  %10545 = vmatprep.subr.bf16.mxu0 %v20021_v5 }
 0x8dc   :  { %10573 = vmatprep.subr.bf16.mxu1 %v17562_v55 }
 0x8de   :  { %10547 = vmatpush1.bf16.msra.mxu0 %v20022_v17 }
 0x8df   :  { %10575 = vmatpush1.bf16.msra.mxu1 %v17564_v60  ;;  %10549 = vmatprep.subr.bf16.mxu0 %v17664_v56 }
 0x8e0   :  { %10577 = vmatprep.subr.bf16.mxu1 %v19949_v63 }
 0x8e2   :  { %10551 = vmatpush1.bf16.msra.mxu0 %v17666_v35 }
 0x8e3   :  { %10579 = vmatpush1.bf16.msra.mxu1 %v19958_v41  ;;  %10553 = vmatprep.subr.bf16.mxu0 %v19948_v19 }
 0x8e4   :  { %10581 = vmatprep.subr.bf16.mxu1 %v17726_v45 }
 0x8e6   :  { %10555 = vmatpush1.bf16.msra.mxu0 %v19955_v12 }
 0x8e7   :  { %10583 = vmatpush1.bf16.msra.mxu1 %v17728_v50  ;;  %10557 = vmatprep.subr.bf16.mxu0 %v17791_v25 }
 0x8e8   :  { %10585 = vmatprep.subr.bf16.mxu1 %v19974_v44 }
 0x8ea   :  { %10559 = vmatpush1.bf16.msra.mxu0 %v17793_v1 }
 0x8eb   :  { %10587 = vmatpush1.bf16.msra.mxu1 %v19982_v58  ;;  %10593 = vmatprep.subr.bf16.mxu0 %v19983_v38 }
 0x8ec   :  { %10589 = vmatprep.subr.bf16.mxu1 %v17843_v51 }
 0x8ed   :  { %5211 = vmatmul.mubr.f32.vlgmr.msra.gmra.mrb[90].mxu0 %v8202_v21 }
 0x8ee   :  { %10595 = vmatpush1.bf16.msra.mxu0 %v19984_v13  ;;  %5354 = vmatprep.mubr.f32.mxu0 %v19845_v43 }
 0x8ef   :  { %10591 = vmatpush1.bf16.msra.mxu1 %v17845_v11  ;;  %10597 = vmatprep.subr.bf16.mxu0 %v19985_v15 }
 0x8f0   :  { %10625 = vmatprep.subr.bf16.mxu1 %v19986_v39 }
 0x8f2   :  { %5282 = vmatmul.mubr.f32.vlgmr.msra.gmra.mrb[90].mxu1 %v8202_v21  ;;  %10599 = vmatpush1.bf16.msra.mxu0 %v19987_v46  ;;  %v20025_v21 = vld [vmem:[#allocation56_spill] sm:$0xff] }
 0x8f3   :  { %10627 = vmatpush1.bf16.msra.mxu1 %v19988_v16  ;;  %10601 = vmatprep.subr.bf16.mxu0 %v19989_v57 }
 0x8f4   :  { %10629 = vmatprep.subr.bf16.mxu1 %v19990_v34  ;;  %5425 = vmatprep.mubr.f32.mxu1 %v19845_v43 }
 0x8f6   :  { %10603 = vmatpush1.bf16.msra.mxu0 %v19991_v4 }
 0x8f7   :  { %10631 = vmatpush1.bf16.msra.mxu1 %v19992_v53  ;;  %10605 = vmatprep.subr.bf16.mxu0 %v19993_v14 }
 0x8f8   :  { %10633 = vmatprep.subr.bf16.mxu1 %v19994_v23 }
 0x8fa   :  { %10607 = vmatpush1.bf16.msra.mxu0 %v19995_v47 }
 0x8fb   :  { %10635 = vmatpush1.bf16.msra.mxu1 %v19996_v7  ;;  %10609 = vmatprep.subr.bf16.mxu0 %v19997_v27 }
 0x8fc   :  { %10637 = vmatprep.subr.bf16.mxu1 %v19998_v18 }
 0x8fe   :  { %10611 = vmatpush1.bf16.msra.mxu0 %v19999_v24 }
 0x8ff   :  { %10639 = vmatpush1.bf16.msra.mxu1 %v20000_v10  ;;  %10613 = vmatprep.subr.bf16.mxu0 %v20001_v8 }
 0x900   :  { %10641 = vmatprep.subr.bf16.mxu1 %v20002_v0 }
 0x902   :  { %10615 = vmatpush1.bf16.msra.mxu0 %v20003_v30  ;;  %v18028_v30 = vld [vmem:[%s18566_s7 + $0x3] sm:$0x1] }
 0x903   :  { %10643 = vmatpush1.bf16.msra.mxu1 %v20004_v52  ;;  %10617 = vmatprep.subr.bf16.mxu0 %v20005_v29  ;;  %v20026_v52 = vld [vmem:[#allocation21_spill] sm:$0xff] }
 0x904   :  { %10645 = vmatprep.subr.bf16.mxu1 %v20006_v22 }
 0x906   :  { %10619 = vmatpush1.bf16.msra.mxu0 %v20007_v59 }
 0x907   :  { %10647 = vmatpush1.bf16.msra.mxu1 %v20008_v61  ;;  %10621 = vmatprep.subr.bf16.mxu0 %v20009_v32 }
 0x908   :  { %10649 = vmatprep.subr.bf16.mxu1 %v20010_v48 }
 0x90a   :  { %10623 = vmatpush1.bf16.msra.mxu0 %v20025_v21  ;;  %v6722_v21 = vpop.permute.xlu1 %6721 }
 0x90b   :  { %10651 = vmatpush1.bf16.msra.mxu1 %v20026_v52  ;;  %10657 = vmatprep.subr.bf16.mxu0 %v20013_v36 }
 0x90c   :  { %10653 = vmatprep.subr.bf16.mxu1 %v17492_v26 }
 0x90d   :  { %5355 = vmatmul.mubr.f32.vlgmr.msra.gmra.mrb[92].mxu0 %v18028_v30 }
 0x90e   :  { %10659 = vmatpush1.bf16.msra.mxu0 %v20014_v31  ;;  %5496 = vmatprep.mubr.f32.mxu0 %v19845_v43  ;;  %v20027_v31 = vld [vmem:[#allocation75_spill] sm:$0xff] }
 0x90f   :  { %10655 = vmatpush1.bf16.msra.mxu1 %v17294_v6  ;;  %10661 = vmatprep.subr.bf16.mxu0 %v16891_v3  ;;  %v18046_v26 = vrot.slane %v6722_v21, %v20027_v31  ;;  %v4498_v3 = vpop.f32.mrb[80].mxu0 }
 0x910   :  { %10689 = vmatprep.subr.bf16.mxu1 %v19882_v2 }
 0x911   :  { %v6728_v2 = vadd.f32 %v18046_v26, %v4498_v3  ;;  %v4569_v3 = vpop.f32.mrb[80].mxu1 }
 0x912   :  { %5426 = vmatmul.mubr.f32.vlgmr.msra.gmra.mrb[92].mxu1 %v18028_v30  ;;  %10663 = vmatpush1.bf16.msra.mxu0 %v20023_v9  ;;  %v4500_v9 = vpop.f32.mrb[81].mxu0 }
 0x913   :  { %10691 = vmatpush1.bf16.msra.mxu1 %v19904_v37  ;;  %10665 = vmatprep.subr.bf16.mxu0 %v20024_v28  ;;  %v6729_v28 = vadd.f32 %v18046_v26, %v4500_v9 }
 0x914   :  { %10693 = vmatprep.subr.bf16.mxu1 %v20016_v54  ;;  %5567 = vmatprep.mubr.f32.mxu1 %v19845_v43  ;;  %v6792_v54 = vsub.f32 0.0, %v6728_v2  ;;  %v6730_v2 = vadd.f32 %v18046_v26, %v4569_v3 }
 0x915   :  { %v6793_v37 = vsub.f32 0.0, %v6729_v28 }
 0x916   :  { %10667 = vmatpush1.bf16.msra.mxu0 %v20017_v20  ;;  %v6856_v31 = vmul.f32 1.442695, %v6792_v54  ;;  %v6794_v28 = vsub.f32 0.0, %v6730_v2 }
 0x917   :  { %10695 = vmatpush1.bf16.msra.mxu1 %v19920_v40  ;;  %10669 = vmatprep.subr.bf16.mxu0 %v20018_v62  ;;  %v6858_v21 = vmul.f32 1.442695, %v6793_v37  ;;  %v4571_v37 = vpop.f32.mrb[81].mxu1 }
 0x918   :  { %10697 = vmatprep.subr.bf16.mxu1 %v20019_v49  ;;  %12090 = vpow2.f32 %v6856_v31  ;;  %v6731_v9 = vadd.f32 %v18046_v26, %v4571_v37  ;;  %v12361_v37 = vmov 1966171168  }
 0x919   :  { %12092 = vpow2.f32 %v6858_v21 }
 0x91a   :  { %10671 = vmatpush1.bf16.msra.mxu0 %v20020_v33  ;;  %v6795_v31 = vsub.f32 0.0, %v6731_v9  ;;  %v7181_v9 = vunpack.c.l.s4 %v12361_v37  ;;  %v20030_v37 = vld [vmem:[#allocation27_spill] sm:$0xff] }
 0x91b   :  { %10699 = vmatpush1.bf16.msra.mxu1 %v19933_v42  ;;  %10673 = vmatprep.subr.bf16.mxu0 %v20021_v5 }
 0x91c   :  { %10701 = vmatprep.subr.bf16.mxu1 %v17562_v55 }
 0x91e   :  { %10675 = vmatpush1.bf16.msra.mxu0 %v20022_v17 }
 0x91f   :  { %10703 = vmatpush1.bf16.msra.mxu1 %v17564_v60  ;;  %10677 = vmatprep.subr.bf16.mxu0 %v17664_v56 }
 0x920   :  { %10705 = vmatprep.subr.bf16.mxu1 %v19949_v63 }
 0x922   :  { %10679 = vmatpush1.bf16.msra.mxu0 %v17666_v35  ;;  %v12091_v54 = vpop.eup %12090  ;;  %v6862_v35 = vmul.f32 1.442695, %v6795_v31 }
 0x923   :  { %10707 = vmatpush1.bf16.msra.mxu1 %v19958_v41  ;;  %10681 = vmatprep.subr.bf16.mxu0 %v19948_v19  ;;  %v12093_v21 = vpop.eup %12092  ;;  %v6984_v41 = vadd.f32 1.0, %v12091_v54  ;;  %v6860_v19 = vmul.f32 1.442695, %v6794_v28  ;;  %v7182_v28 = vunpack.c.0.s8 %v7181_v9 }
 0x924   :  { %10709 = vmatprep.subr.bf16.mxu1 %v17726_v45  ;;  %v6985_v45 = vadd.f32 1.0, %v12093_v21 }
 0x925   :  { %12094 = vrcp.f32 %v6984_v41 }
 0x926   :  { %10683 = vmatpush1.bf16.msra.mxu0 %v19955_v12  ;;  %12096 = vrcp.f32 %v6985_v45 }
 0x927   :  { %10711 = vmatpush1.bf16.msra.mxu1 %v17728_v50  ;;  %10685 = vmatprep.subr.bf16.mxu0 %v17791_v25  ;;  %12098 = vpow2.f32 %v6860_v19 }
 0x928   :  { %10713 = vmatprep.subr.bf16.mxu1 %v19974_v44  ;;  %12100 = vpow2.f32 %v6862_v35 }
 0x92a   :  { %10687 = vmatpush1.bf16.msra.mxu0 %v17793_v1 }
 0x92b   :  { %10715 = vmatpush1.bf16.msra.mxu1 %v19982_v58  ;;  %10721 = vmatprep.subr.bf16.mxu0 %v19983_v38 }
 0x92c   :  { %10717 = vmatprep.subr.bf16.mxu1 %v17843_v51 }
 0x92d   :  { %5497 = vmatmul.mubr.f32.vlgmr.msra.gmra.mrb[94].mxu0 %v18028_v30 }
 0x92e   :  { %10723 = vmatpush1.bf16.msra.mxu0 %v19984_v13  ;;  %5640 = vmatprep.mubr.f32.mxu0 %v19845_v43 }
 0x92f   :  { %10719 = vmatpush1.bf16.msra.mxu1 %v17845_v11  ;;  %10725 = vmatprep.subr.bf16.mxu0 %v19985_v15  ;;  %v12095_v35 = vpop.eup %12094 }
 0x930   :  { %10753 = vmatprep.subr.bf16.mxu1 %v19986_v39  ;;  %v12097_v45 = vpop.eup %12096 }
 0x931   :  { %v12099_v19 = vpop.eup %12098  ;;  %v7176_v41 = vcombine.low %v12095_v35, %v12097_v45  ;;  %v20028_v45 = vld [vmem:[#allocation119_spill] sm:$0xff] }
 0x932   :  { %5568 = vmatmul.mubr.f32.vlgmr.msra.gmra.mrb[94].mxu1 %v18028_v30  ;;  %10727 = vmatpush1.bf16.msra.mxu0 %v19987_v46  ;;  %v12101_v3 = vpop.eup %12100  ;;  %v6986_v2 = vadd.f32 1.0, %v12099_v19 }
 0x933   :  { %10755 = vmatpush1.bf16.msra.mxu1 %v19988_v16  ;;  %10729 = vmatprep.subr.bf16.mxu0 %v19989_v57  ;;  %v6987_v30 = vadd.f32 1.0, %v12101_v3  ;;  %v20029_v3 = vld [vmem:[#allocation26_spill] sm:$0xff] }
 0x934   :  { %10757 = vmatprep.subr.bf16.mxu1 %v19990_v34  ;;  %5711 = vmatprep.mubr.f32.mxu1 %v19845_v43  ;;  %12102 = vrcp.f32 %v6986_v2  ;;  %v18104_v2 = vsub.s32 %v7182_v28, %v20029_v3  ;;  %v20031_v3 = vld [vmem:[#allocation56_spill] sm:$0xff] }
 0x935   :  { %12104 = vrcp.f32 %v6987_v30 }
 0x936   :  { %10731 = vmatpush1.bf16.msra.mxu0 %v19991_v4  ;;  %v18112_v28 = vrot.slane %v7176_v41, %v18104_v2 }
 0x937   :  { %10759 = vmatpush1.bf16.msra.mxu1 %v19992_v53  ;;  %10733 = vmatprep.subr.bf16.mxu0 %v19993_v14 }
 0x938   :  { %10761 = vmatprep.subr.bf16.mxu1 %v19994_v23 }
 0x93a   :  { %10735 = vmatpush1.bf16.msra.mxu0 %v19995_v47 }
 0x93b   :  { %10763 = vmatpush1.bf16.msra.mxu1 %v19996_v7  ;;  %10737 = vmatprep.subr.bf16.mxu0 %v19997_v27 }
 0x93c   :  { %10765 = vmatprep.subr.bf16.mxu1 %v19998_v18 }
 0x93e   :  { %10739 = vmatpush1.bf16.msra.mxu0 %v19999_v24  ;;  %v12103_v19 = vpop.eup %12102 }
 0x93f   :  { %10767 = vmatpush1.bf16.msra.mxu1 %v20000_v10  ;;  %10741 = vmatprep.subr.bf16.mxu0 %v20001_v8  ;;  %v12105_v9 = vpop.eup %12104 }
 0x940   :  { %10769 = vmatprep.subr.bf16.mxu1 %v20002_v0  ;;  %v4640_v54 = vpop.f32.mrb[82].mxu0  ;;  %v7177_v0 = vcombine.low %v12103_v19, %v12105_v9  ;;  %v20034_v9 = vld [vmem:[#allocation45_spill] sm:$0xff] }
 0x941   :  { %v6732_v31 = vadd.f32 %v18046_v26, %v4640_v54  ;;  %v4642_v21 = vpop.f32.mrb[83].mxu0 }
 0x942   :  { %v6733_v35 = vadd.f32 %v18046_v26, %v4642_v21  ;;  %10743 = vmatpush1.bf16.msra.mxu0 %v20028_v45 }
 0x943   :  { %v6796_v30 = vsub.f32 0.0, %v6732_v31  ;;  %10771 = vmatpush1.bf16.msra.mxu1 %v20030_v37  ;;  %10745 = vmatprep.subr.bf16.mxu0 %v20005_v29  ;;  %v18115_v31 = vrot.slane %v7177_v0, %v18104_v2  ;;  %v18127_v0 = vld [vmem:[%s18566_s7 + $0x4] sm:$0x1] }
 0x944   :  { %v6797_v8 = vsub.f32 0.0, %v6733_v35  ;;  %10773 = vmatprep.subr.bf16.mxu1 %v20006_v22 }
 0x945   :  { %v6864_v54 = vmul.f32 1.442695, %v6796_v30  ;;  %v4711_v10 = vpop.f32.mrb[82].mxu1  ;;  %v20033_v30 = vld [vmem:[#allocation18_spill] sm:$0xff] }
 0x946   :  { %v6866_v24 = vmul.f32 1.442695, %v6797_v8  ;;  %v6734_v21 = vadd.f32 %v18046_v26, %v4711_v10  ;;  %v4713_v45 = vpop.f32.mrb[83].mxu1  ;;  %10747 = vmatpush1.bf16.msra.mxu0 %v20007_v59  ;;  %v20038_v10 = vld [vmem:[#allocation93_spill] sm:$0xff] }
 0x947   :  { %12106 = vpow2.f32 %v6864_v54  ;;  %v6735_v35 = vadd.f32 %v18046_v26, %v4713_v45  ;;  %10775 = vmatpush1.bf16.msra.mxu1 %v20008_v61  ;;  %10749 = vmatprep.subr.bf16.mxu0 %v20009_v32  ;;  %v20035_v54 = vld [vmem:[#allocation24_spill] sm:$0xff] }
 0x948   :  { %12108 = vpow2.f32 %v6866_v24  ;;  %v6798_v8 = vsub.f32 0.0, %v6734_v21  ;;  %10777 = vmatprep.subr.bf16.mxu1 %v20010_v48  ;;  %v20032_v24 = vld [vmem:[#allocation79_spill] sm:$0xff] }
 0x949   :  { %v6799_v19 = vsub.f32 0.0, %v6735_v35 }
 0x94a   :  { %v6868_v41 = vmul.f32 1.442695, %v6798_v8  ;;  %10751 = vmatpush1.bf16.msra.mxu0 %v20031_v3 }
 0x94b   :  { %v6870_v45 = vmul.f32 1.442695, %v6799_v19  ;;  %10779 = vmatpush1.bf16.msra.mxu1 %v20026_v52  ;;  %10785 = vmatprep.subr.bf16.mxu0 %v20013_v36  ;;  %v20036_v19 = vld [vmem:[#allocation85_spill] sm:$0xff] }
 0x94c   :  { %12110 = vpow2.f32 %v6868_v41  ;;  %10781 = vmatprep.subr.bf16.mxu1 %v20032_v24 }
 0x94d   :  { %12112 = vpow2.f32 %v6870_v45  ;;  %5641 = vmatmul.mubr.f32.vlgmr.msra.gmra.mrb[96].mxu0 %v18127_v0  ;;  %v20037_v45 = vld [vmem:[#allocation25_spill] sm:$0xff] }
 0x94e   :  { %10787 = vmatpush1.bf16.msra.mxu0 %v20033_v30  ;;  %5782 = vmatprep.mubr.f32.mxu0 %v19845_v43  ;;  %v20039_v30 = vld [vmem:[#allocation4_spill] sm:$0xff] }
 0x94f   :  { %10783 = vmatpush1.bf16.msra.mxu1 %v17294_v6  ;;  %10789 = vmatprep.subr.bf16.mxu0 %v20034_v9 }
 0x950   :  { %10817 = vmatprep.subr.bf16.mxu1 %v20035_v54 }
 0x951   :  { %v12107_v21 = vpop.eup %12106 }
 0x952   :  { %v12109_v35 = vpop.eup %12108  ;;  %v6988_v8 = vadd.f32 1.0, %v12107_v21  ;;  %5712 = vmatmul.mubr.f32.vlgmr.msra.gmra.mrb[96].mxu1 %v18127_v0  ;;  %10791 = vmatpush1.bf16.msra.mxu0 %v20036_v19 }
 0x953   :  { %v6989_v41 = vadd.f32 1.0, %v12109_v35  ;;  %10819 = vmatpush1.bf16.msra.mxu1 %v20037_v45  ;;  %10793 = vmatprep.subr.bf16.mxu0 %v20038_v10 }
 0x954   :  { %12114 = vrcp.f32 %v6988_v8  ;;  %10821 = vmatprep.subr.bf16.mxu1 %v20039_v30  ;;  %5853 = vmatprep.mubr.f32.mxu1 %v19845_v43 }
 0x955   :  { %12116 = vrcp.f32 %v6989_v41 }
 0x956   :  { %v12111_v9 = vpop.eup %12110  ;;  %10795 = vmatpush1.bf16.msra.mxu0 %v20017_v20 }
 0x957   :  { %v12113_v54 = vpop.eup %12112  ;;  %v6990_v21 = vadd.f32 1.0, %v12111_v9  ;;  %10823 = vmatpush1.bf16.msra.mxu1 %v19920_v40  ;;  %10797 = vmatprep.subr.bf16.mxu0 %v20018_v62 }
 0x958   :  { %v6991_v35 = vadd.f32 1.0, %v12113_v54  ;;  %10825 = vmatprep.subr.bf16.mxu1 %v20019_v49  ;;  %v20041_v49 = vld [vmem:[#allocation58_spill] sm:$0xff] }
 0x959   :  { %12118 = vrcp.f32 %v6990_v21 }
 0x95a   :  { %12120 = vrcp.f32 %v6991_v35  ;;  %10799 = vmatpush1.bf16.msra.mxu0 %v20020_v33 }
 0x95b   :  { %10827 = vmatpush1.bf16.msra.mxu1 %v19933_v42  ;;  %10801 = vmatprep.subr.bf16.mxu0 %v20021_v5  ;;  %v20040_v5 = vld [vmem:[#allocation108_spill] sm:$0xff] }
 0x95c   :  { %10829 = vmatprep.subr.bf16.mxu1 %v17562_v55 }
 0x95e   :  { %v12115_v8 = vpop.eup %12114  ;;  %10803 = vmatpush1.bf16.msra.mxu0 %v20022_v17  ;;  %v20042_v17 = vld [vmem:[#allocation68_spill] sm:$0xff] }
 0x95f   :  { %v12117_v9 = vpop.eup %12116  ;;  %10831 = vmatpush1.bf16.msra.mxu1 %v17564_v60  ;;  %10805 = vmatprep.subr.bf16.mxu0 %v17664_v56  ;;  %v20043_v56 = vld [vmem:[#allocation87_spill] sm:$0xff] }
 0x960   :  { %v7178_v54 = vcombine.low %v12115_v8, %v12117_v9  ;;  %10833 = vmatprep.subr.bf16.mxu1 %v19949_v63  ;;  %v4784_v41 = vpop.f32.mrb[84].mxu0 }
 0x961   :  { %v6736_v21 = vadd.f32 %v18046_v26, %v4784_v41  ;;  %v4786_v35 = vpop.f32.mrb[85].mxu0 }
 0x962   :  { %v6737_v42 = vadd.f32 %v18046_v26, %v4786_v35  ;;  %10807 = vmatpush1.bf16.msra.mxu0 %v20040_v5  ;;  %v7200_v35 = vrot.slane %v7178_v54, %v18104_v2 }
 0x963   :  { %v12119_v55 = vpop.eup %12118  ;;  %v6800_v33 = vsub.f32 0.0, %v6736_v21  ;;  %10835 = vmatpush1.bf16.msra.mxu1 %v20041_v49  ;;  %10809 = vmatprep.subr.bf16.mxu0 %v20042_v17 }
 0x964   :  { %v12121_v60 = vpop.eup %12120  ;;  %v6801_v62 = vsub.f32 0.0, %v6737_v42  ;;  %10837 = vmatprep.subr.bf16.mxu1 %v20043_v56 }
 0x965   :  { %v7179_v8 = vcombine.low %v12119_v55, %v12121_v60  ;;  %v6872_v9 = vmul.f32 1.442695, %v6800_v33  ;;  %v4855_v63 = vpop.f32.mrb[84].mxu1 }
 0x966   :  { %v6874_v40 = vmul.f32 1.442695, %v6801_v62  ;;  %v6738_v41 = vadd.f32 %v18046_v26, %v4855_v63  ;;  %v4857_v20 = vpop.f32.mrb[85].mxu1  ;;  %10811 = vmatpush1.bf16.msra.mxu0 %v19955_v12  ;;  %v20044_v62 = vcombine.low %v18112_v28, %v18115_v31 }
 0x967   :  { %v7207_v21 = vrot.slane %v7179_v8, %v18104_v2  ;;  %12122 = vpow2.f32 %v6872_v9  ;;  %v6739_v17 = vadd.f32 %v18046_v26, %v4857_v20  ;;  %10839 = vmatpush1.bf16.msra.mxu1 %v17728_v50  ;;  %10813 = vmatprep.subr.bf16.mxu0 %v17791_v25 }
 0x968   :  { %12124 = vpow2.f32 %v6874_v40  ;;  %v6802_v55 = vsub.f32 0.0, %v6738_v41  ;;  %10841 = vmatprep.subr.bf16.mxu1 %v19974_v44  ;;  %v7216_v33 = vrot.slane %v20044_v62, %v18104_v2 }
 0x969   :  { %v7209_v60 = vcombine.low %v7200_v35, %v7207_v21  ;;  %v6803_v42 = vsub.f32 0.0, %v6739_v17 }
 0x96a   :  { %v6876_v63 = vmul.f32 1.442695, %v6802_v55  ;;  %10815 = vmatpush1.bf16.msra.mxu0 %v17793_v1  ;;  %v20045_v55 = vld [vmem:[#allocation83_spill] sm:$0xff] }
 0x96b   :  { %v7223_v20 = vrot.slane %v7209_v60, %v18104_v2  ;;  %v6878_v54 = vmul.f32 1.442695, %v6803_v42  ;;  %10843 = vmatpush1.bf16.msra.mxu1 %v19982_v58  ;;  %10849 = vmatprep.subr.bf16.mxu0 %v19983_v38  ;;  %v20046_v42 = vld [vmem:[#allocation62_spill] sm:$0xff] }
 0x96c   :  { %12126 = vpow2.f32 %v6876_v63  ;;  %10845 = vmatprep.subr.bf16.mxu1 %v17843_v51  ;;  %v20047_v63 = vld [vmem:[#allocation96_spill] sm:$0xff] }
 0x96d   :  { %v7224_v40 = vcombine.low %v7216_v33, %v7223_v20  ;;  %12128 = vpow2.f32 %v6878_v54  ;;  %5783 = vmatmul.mubr.f32.vlgmr.msra.gmra.mrb[98].mxu0 %v18127_v0  ;;  %v20048_v33 = vld [vmem:[#allocation30_spill] sm:$0xff] }
 0x96e   :  { %10851 = vmatpush1.bf16.msra.mxu0 %v19984_v13  ;;  %5926 = vmatprep.mubr.f32.mxu0 %v19845_v43 }
 0x96f   :  { %7576 = vst [vmem:[%s18567_s10] sm:$0xff] %v7224_v40  ;;  %10847 = vmatpush1.bf16.msra.mxu1 %v17845_v11  ;;  %10853 = vmatprep.subr.bf16.mxu0 %v19985_v15 }
 0x970   :  { %10881 = vmatprep.subr.bf16.mxu1 %v19986_v39 }
 0x971   :  { %v12123_v17 = vpop.eup %12122 }
 0x972   :  { %v12125_v28 = vpop.eup %12124  ;;  %v6992_v31 = vadd.f32 1.0, %v12123_v17  ;;  %5854 = vmatmul.mubr.f32.vlgmr.msra.gmra.mrb[98].mxu1 %v18127_v0  ;;  %10855 = vmatpush1.bf16.msra.mxu0 %v19987_v46 }
 0x973   :  { %v6993_v8 = vadd.f32 1.0, %v12125_v28  ;;  %10883 = vmatpush1.bf16.msra.mxu1 %v19988_v16  ;;  %10857 = vmatprep.subr.bf16.mxu0 %v19989_v57  ;;  %v20049_v28 = vld [vmem:[#allocation119_spill] sm:$0xff] }
 0x974   :  { %12130 = vrcp.f32 %v6992_v31  ;;  %10885 = vmatprep.subr.bf16.mxu1 %v19990_v34  ;;  %5997 = vmatprep.mubr.f32.mxu1 %v19845_v43 }
 0x975   :  { %12132 = vrcp.f32 %v6993_v8 }
 0x976   :  { %v12127_v9 = vpop.eup %12126  ;;  %10859 = vmatpush1.bf16.msra.mxu0 %v19991_v4 }
 0x977   :  { %v12129_v41 = vpop.eup %12128  ;;  %v6994_v35 = vadd.f32 1.0, %v12127_v9  ;;  %10887 = vmatpush1.bf16.msra.mxu1 %v19992_v53  ;;  %10861 = vmatprep.subr.bf16.mxu0 %v19993_v14 }
 0x978   :  { %v6995_v0 = vadd.f32 1.0, %v12129_v41  ;;  %10889 = vmatprep.subr.bf16.mxu1 %v19994_v23 }
 0x979   :  { %12134 = vrcp.f32 %v6994_v35 }
 0x97a   :  { %12136 = vrcp.f32 %v6995_v0  ;;  %10863 = vmatpush1.bf16.msra.mxu0 %v19995_v47 }
 0x97b   :  { %10891 = vmatpush1.bf16.msra.mxu1 %v19996_v7  ;;  %10865 = vmatprep.subr.bf16.mxu0 %v19997_v27 }
 0x97c   :  { %10893 = vmatprep.subr.bf16.mxu1 %v19998_v18 }
 0x97e   :  { %v12131_v21 = vpop.eup %12130  ;;  %10867 = vmatpush1.bf16.msra.mxu0 %v20045_v55 }
 0x97f   :  { %v12133_v60 = vpop.eup %12132  ;;  %10895 = vmatpush1.bf16.msra.mxu1 %v20046_v42  ;;  %10869 = vmatprep.subr.bf16.mxu0 %v20047_v63 }
 0x980   :  { %v7225_v62 = vcombine.low %v12131_v21, %v12133_v60  ;;  %10897 = vmatprep.subr.bf16.mxu1 %v20048_v33  ;;  %v4926_v20 = vpop.f32.mrb[86].mxu0 }
 0x981   :  { %v6740_v54 = vadd.f32 %v18046_v26, %v4926_v20  ;;  %v4928_v40 = vpop.f32.mrb[87].mxu0 }
 0x982   :  { %v6741_v17 = vadd.f32 %v18046_v26, %v4928_v40  ;;  %10871 = vmatpush1.bf16.msra.mxu0 %v20049_v28  ;;  %v18215_v40 = vrot.slane %v7225_v62, %v18104_v2 }
 0x983   :  { %v12135_v31 = vpop.eup %12134  ;;  %v6804_v8 = vsub.f32 0.0, %v6740_v54  ;;  %10899 = vmatpush1.bf16.msra.mxu1 %v20030_v37  ;;  %10873 = vmatprep.subr.bf16.mxu0 %v20005_v29 }
 0x984   :  { %v12137_v9 = vpop.eup %12136  ;;  %v6805_v41 = vsub.f32 0.0, %v6741_v17  ;;  %10901 = vmatprep.subr.bf16.mxu1 %v20006_v22 }
 0x985   :  { %v7226_v35 = vcombine.low %v12135_v31, %v12137_v9  ;;  %v6880_v0 = vmul.f32 1.442695, %v6804_v8  ;;  %v4997_v21 = vpop.f32.mrb[86].mxu1  ;;  %v20054_v8 = vld [vmem:[#allocation47_spill] sm:$0xff] }
 0x986   :  { %v6882_v60 = vmul.f32 1.442695, %v6805_v41  ;;  %v6742_v20 = vadd.f32 %v18046_v26, %v4997_v21  ;;  %v4999_v33 = vpop.f32.mrb[87].mxu1  ;;  %10875 = vmatpush1.bf16.msra.mxu0 %v20007_v59  ;;  %v18230_v41 = vld [vmem:[%s18566_s7 + $0x5] sm:$0x1]  ;;  %v20052_v21 = vld [vmem:[#allocation24_spill] sm:$0xff] }
 0x987   :  { %v18218_v54 = vrot.slane %v7226_v35, %v18104_v2  ;;  %12138 = vpow2.f32 %v6880_v0  ;;  %v6743_v17 = vadd.f32 %v18046_v26, %v4999_v33  ;;  %10903 = vmatpush1.bf16.msra.mxu1 %v20008_v61  ;;  %10877 = vmatprep.subr.bf16.mxu0 %v20009_v32  ;;  %v20050_v35 = vld [vmem:[#allocation18_spill] sm:$0xff]  ;;  %v20051_v0 = vld [vmem:[#allocation45_spill] sm:$0xff] }
 0x988   :  { %12140 = vpow2.f32 %v6882_v60  ;;  %v6806_v31 = vsub.f32 0.0, %v6742_v20  ;;  %10905 = vmatprep.subr.bf16.mxu1 %v20010_v48 }
 0x989   :  { %v6807_v9 = vsub.f32 0.0, %v6743_v17 }
 0x98a   :  { %v6884_v62 = vmul.f32 1.442695, %v6806_v31  ;;  %10879 = vmatpush1.bf16.msra.mxu0 %v20031_v3 }
 0x98b   :  { %v6886_v33 = vmul.f32 1.442695, %v6807_v9  ;;  %10907 = vmatpush1.bf16.msra.mxu1 %v20026_v52  ;;  %10913 = vmatprep.subr.bf16.mxu0 %v20013_v36 }
 0x98c   :  { %12142 = vpow2.f32 %v6884_v62  ;;  %10909 = vmatprep.subr.bf16.mxu1 %v20032_v24  ;;  %v20053_v62 = vld [vmem:[#allocation71_spill] sm:$0xff] }
 0x98d   :  { %12144 = vpow2.f32 %v6886_v33  ;;  %5927 = vmatmul.mubr.f32.vlgmr.msra.gmra.mrb[100].mxu0 %v18230_v41 }
 0x98e   :  { %10915 = vmatpush1.bf16.msra.mxu0 %v20050_v35  ;;  %6068 = vmatprep.mubr.f32.mxu0 %v19845_v43 }
 0x98f   :  { %10911 = vmatpush1.bf16.msra.mxu1 %v17294_v6  ;;  %10917 = vmatprep.subr.bf16.mxu0 %v20051_v0 }
 0x990   :  { %10945 = vmatprep.subr.bf16.mxu1 %v20052_v21  ;;  %v20055_v21 = vld [vmem:[#allocation98_spill] sm:$0xff] }
 0x991   :  { %v12139_v60 = vpop.eup %12138 }
 0x992   :  { %v12141_v20 = vpop.eup %12140  ;;  %v6996_v17 = vadd.f32 1.0, %v12139_v60  ;;  %5998 = vmatmul.mubr.f32.vlgmr.msra.gmra.mrb[100].mxu1 %v18230_v41  ;;  %10919 = vmatpush1.bf16.msra.mxu0 %v20036_v19  ;;  %v20056_v19 = vld [vmem:[#allocation106_spill] sm:$0xff] }
 0x993   :  { %v6997_v31 = vadd.f32 1.0, %v12141_v20  ;;  %10947 = vmatpush1.bf16.msra.mxu1 %v20037_v45  ;;  %10921 = vmatprep.subr.bf16.mxu0 %v20038_v10  ;;  %v20059_v10 = vld [vmem:[#allocation52_spill] sm:$0xff]  ;;  %v20061_v45 = vld [vmem:[#allocation97_spill] sm:$0xff] }
 0x994   :  { %12146 = vrcp.f32 %v6996_v17  ;;  %10949 = vmatprep.subr.bf16.mxu1 %v20039_v30  ;;  %6139 = vmatprep.mubr.f32.mxu1 %v19845_v43  ;;  %v20057_v17 = vld [vmem:[#allocation35_spill] sm:$0xff]  ;;  %v20058_v30 = vld [vmem:[#allocation94_spill] sm:$0xff] }
 0x995   :  { %12148 = vrcp.f32 %v6997_v31  ;;  %v20060_v31 = vld [vmem:[#allocation61_spill] sm:$0xff] }
 0x996   :  { %v12143_v9 = vpop.eup %12142  ;;  %10923 = vmatpush1.bf16.msra.mxu0 %v20053_v62 }
 0x997   :  { %v12145_v33 = vpop.eup %12144  ;;  %v6998_v60 = vadd.f32 1.0, %v12143_v9  ;;  %10951 = vmatpush1.bf16.msra.mxu1 %v20054_v8  ;;  %10925 = vmatprep.subr.bf16.mxu0 %v20055_v21  ;;  %v20062_v8 = vld [vmem:[#allocation110_spill] sm:$0xff]  ;;  %v20063_v21 = vld [vmem:[#allocation99_spill] sm:$0xff] }
 0x998   :  { %v6999_v20 = vadd.f32 1.0, %v12145_v33  ;;  %10953 = vmatprep.subr.bf16.mxu1 %v20056_v19  ;;  %v20064_v19 = vld [vmem:[#allocation80_spill] sm:$0xff] }
 0x999   :  { %12150 = vrcp.f32 %v6998_v60 }
 0x99a   :  { %12152 = vrcp.f32 %v6999_v20  ;;  %10927 = vmatpush1.bf16.msra.mxu0 %v20057_v17 }
 0x99b   :  { %10955 = vmatpush1.bf16.msra.mxu1 %v20058_v30  ;;  %10929 = vmatprep.subr.bf16.mxu0 %v20059_v10 }
 0x99c   :  { %10957 = vmatprep.subr.bf16.mxu1 %v20060_v31 }
 0x99e   :  { %v12147_v62 = vpop.eup %12146  ;;  %10931 = vmatpush1.bf16.msra.mxu0 %v20061_v45  ;;  %v20065_v45 = vld [vmem:[#allocation68_spill] sm:$0xff] }
 0x99f   :  { %v12149_v9 = vpop.eup %12148  ;;  %10959 = vmatpush1.bf16.msra.mxu1 %v20062_v8  ;;  %10933 = vmatprep.subr.bf16.mxu0 %v20063_v21 }
 0x9a0   :  { %v7227_v33 = vcombine.low %v12147_v62, %v12149_v9  ;;  %10961 = vmatprep.subr.bf16.mxu1 %v20064_v19  ;;  %v5070_v60 = vpop.f32.mrb[88].mxu0 }
 0x9a1   :  { %v6744_v20 = vadd.f32 %v18046_v26, %v5070_v60  ;;  %v5072_v17 = vpop.f32.mrb[89].mxu0 }
 0x9a2   :  { %v6745_v30 = vadd.f32 %v18046_v26, %v5072_v17  ;;  %10935 = vmatpush1.bf16.msra.mxu0 %v20040_v5  ;;  %v7249_v17 = vrot.slane %v7227_v33, %v18104_v2 }
 0x9a3   :  { %v12151_v31 = vpop.eup %12150  ;;  %v6808_v10 = vsub.f32 0.0, %v6744_v20  ;;  %10963 = vmatpush1.bf16.msra.mxu1 %v20041_v49  ;;  %10937 = vmatprep.subr.bf16.mxu0 %v20065_v45 }
 0x9a4   :  { %v12153_v8 = vpop.eup %12152  ;;  %v6809_v0 = vsub.f32 0.0, %v6745_v30  ;;  %10965 = vmatprep.subr.bf16.mxu1 %v20043_v56 }
 0x9a5   :  { %v7228_v62 = vcombine.low %v12151_v31, %v12153_v8  ;;  %v6888_v9 = vmul.f32 1.442695, %v6808_v10  ;;  %v5141_v19 = vpop.f32.mrb[88].mxu1 }
 0x9a6   :  { %v6890_v21 = vmul.f32 1.442695, %v6809_v0  ;;  %v6746_v60 = vadd.f32 %v18046_v26, %v5141_v19  ;;  %v5143_v6 = vpop.f32.mrb[89].mxu1  ;;  %10939 = vmatpush1.bf16.msra.mxu0 %v19955_v12  ;;  %v20066_v0 = vcombine.low %v18215_v40, %v18218_v54 }
 0x9a7   :  { %v7256_v20 = vrot.slane %v7228_v62, %v18104_v2  ;;  %12154 = vpow2.f32 %v6888_v9  ;;  %v6747_v45 = vadd.f32 %v18046_v26, %v5143_v6  ;;  %10967 = vmatpush1.bf16.msra.mxu1 %v17728_v50  ;;  %10941 = vmatprep.subr.bf16.mxu0 %v17791_v25 }
 0x9a8   :  { %12156 = vpow2.f32 %v6890_v21  ;;  %v6810_v10 = vsub.f32 0.0, %v6746_v60  ;;  %10969 = vmatprep.subr.bf16.mxu1 %v19974_v44  ;;  %v7265_v31 = vrot.slane %v20066_v0, %v18104_v2 }
 0x9a9   :  { %v7258_v30 = vcombine.low %v7249_v17, %v7256_v20  ;;  %v6811_v19 = vsub.f32 0.0, %v6747_v45 }
 0x9aa   :  { %v6892_v8 = vmul.f32 1.442695, %v6810_v10  ;;  %10943 = vmatpush1.bf16.msra.mxu0 %v17793_v1 }
 0x9ab   :  { %v7272_v6 = vrot.slane %v7258_v30, %v18104_v2  ;;  %v6894_v33 = vmul.f32 1.442695, %v6811_v19  ;;  %10971 = vmatpush1.bf16.msra.mxu1 %v19982_v58  ;;  %10977 = vmatprep.subr.bf16.mxu0 %v19983_v38  ;;  %v20067_v19 = vld [vmem:[#allocation30_spill] sm:$0xff] }
 0x9ac   :  { %12158 = vpow2.f32 %v6892_v8  ;;  %10973 = vmatprep.subr.bf16.mxu1 %v17843_v51 }
 0x9ad   :  { %v7273_v21 = vcombine.low %v7265_v31, %v7272_v6  ;;  %12160 = vpow2.f32 %v6894_v33  ;;  %6069 = vmatmul.mubr.f32.vlgmr.msra.gmra.mrb[102].mxu0 %v18230_v41 }
 0x9ae   :  { %10979 = vmatpush1.bf16.msra.mxu0 %v19984_v13  ;;  %6212 = vmatprep.mubr.f32.mxu0 %v19845_v43 }
 0x9af   :  { %7577 = vst [vmem:[%s18567_s10 + $0x8] sm:$0xff] %v7273_v21  ;;  %10975 = vmatpush1.bf16.msra.mxu1 %v17845_v11  ;;  %10981 = vmatprep.subr.bf16.mxu0 %v19985_v15 }
 0x9b0   :  { %11009 = vmatprep.subr.bf16.mxu1 %v19986_v39 }
 0x9b1   :  { %v12155_v45 = vpop.eup %12154 }
 0x9b2   :  { %v12157_v40 = vpop.eup %12156  ;;  %v7000_v54 = vadd.f32 1.0, %v12155_v45  ;;  %6140 = vmatmul.mubr.f32.vlgmr.msra.gmra.mrb[102].mxu1 %v18230_v41  ;;  %10983 = vmatpush1.bf16.msra.mxu0 %v19987_v46 }
 0x9b3   :  { %v7001_v62 = vadd.f32 1.0, %v12157_v40  ;;  %11011 = vmatpush1.bf16.msra.mxu1 %v19988_v16  ;;  %10985 = vmatprep.subr.bf16.mxu0 %v19989_v57 }
 0x9b4   :  { %12162 = vrcp.f32 %v7000_v54  ;;  %11013 = vmatprep.subr.bf16.mxu1 %v19990_v34  ;;  %6283 = vmatprep.mubr.f32.mxu1 %v19845_v43 }
 0x9b5   :  { %12164 = vrcp.f32 %v7001_v62 }
 0x9b6   :  { %v12159_v9 = vpop.eup %12158  ;;  %10987 = vmatpush1.bf16.msra.mxu0 %v19991_v4 }
 0x9b7   :  { %v12161_v60 = vpop.eup %12160  ;;  %v7002_v17 = vadd.f32 1.0, %v12159_v9  ;;  %11015 = vmatpush1.bf16.msra.mxu1 %v19992_v53  ;;  %10989 = vmatprep.subr.bf16.mxu0 %v19993_v14 }
 0x9b8   :  { %v7003_v41 = vadd.f32 1.0, %v12161_v60  ;;  %11017 = vmatprep.subr.bf16.mxu1 %v19994_v23 }
 0x9b9   :  { %12166 = vrcp.f32 %v7002_v17 }
 0x9ba   :  { %12168 = vrcp.f32 %v7003_v41  ;;  %10991 = vmatpush1.bf16.msra.mxu0 %v19995_v47 }
 0x9bb   :  { %11019 = vmatpush1.bf16.msra.mxu1 %v19996_v7  ;;  %10993 = vmatprep.subr.bf16.mxu0 %v19997_v27 }
 0x9bc   :  { %11021 = vmatprep.subr.bf16.mxu1 %v19998_v18 }
 0x9be   :  { %v12163_v20 = vpop.eup %12162  ;;  %10995 = vmatpush1.bf16.msra.mxu0 %v20045_v55 }
 0x9bf   :  { %v12165_v10 = vpop.eup %12164  ;;  %11023 = vmatpush1.bf16.msra.mxu1 %v20046_v42  ;;  %10997 = vmatprep.subr.bf16.mxu0 %v20047_v63 }
 0x9c0   :  { %v7274_v30 = vcombine.low %v12163_v20, %v12165_v10  ;;  %11025 = vmatprep.subr.bf16.mxu1 %v20067_v19  ;;  %v5212_v8 = vpop.f32.mrb[90].mxu0 }
 0x9c1   :  { %v6748_v0 = vadd.f32 %v18046_v26, %v5212_v8  ;;  %v5214_v31 = vpop.f32.mrb[91].mxu0 }
 0x9c2   :  { %v6749_v6 = vadd.f32 %v18046_v26, %v5214_v31  ;;  %10999 = vmatpush1.bf16.msra.mxu0 %v20049_v28  ;;  %v18318_v20 = vrot.slane %v7274_v30, %v18104_v2 }
 0x9c3   :  { %v12167_v33 = vpop.eup %12166  ;;  %v6812_v21 = vsub.f32 0.0, %v6748_v0  ;;  %11027 = vmatpush1.bf16.msra.mxu1 %v20030_v37  ;;  %11001 = vmatprep.subr.bf16.mxu0 %v20005_v29 }
 0x9c4   :  { %v12169_v45 = vpop.eup %12168  ;;  %v6813_v40 = vsub.f32 0.0, %v6749_v6  ;;  %11029 = vmatprep.subr.bf16.mxu1 %v20006_v22 }
 0x9c5   :  { %v7275_v54 = vcombine.low %v12167_v33, %v12169_v45  ;;  %v6896_v62 = vmul.f32 1.442695, %v6812_v21  ;;  %v5283_v9 = vpop.f32.mrb[90].mxu1  ;;  %v18333_v33 = vld [vmem:[%s18566_s7 + $0x6] sm:$0x1]  ;;  %v20068_v45 = vld [vmem:[#allocation84_spill] sm:$0xff] }
 0x9c6   :  { %v6898_v60 = vmul.f32 1.442695, %v6813_v40  ;;  %v6750_v17 = vadd.f32 %v18046_v26, %v5283_v9  ;;  %v5285_v41 = vpop.f32.mrb[91].mxu1  ;;  %11003 = vmatpush1.bf16.msra.mxu0 %v20007_v59  ;;  %v20069_v40 = vld [vmem:[#allocation45_spill] sm:$0xff] }
 0x9c7   :  { %v18321_v10 = vrot.slane %v7275_v54, %v18104_v2  ;;  %12170 = vpow2.f32 %v6896_v62  ;;  %v6751_v8 = vadd.f32 %v18046_v26, %v5285_v41  ;;  %11031 = vmatpush1.bf16.msra.mxu1 %v20008_v61  ;;  %11005 = vmatprep.subr.bf16.mxu0 %v20009_v32  ;;  %v20070_v54 = vld [vmem:[#allocation24_spill] sm:$0xff] }
 0x9c8   :  { %12172 = vpow2.f32 %v6898_v60  ;;  %v6814_v0 = vsub.f32 0.0, %v6750_v17  ;;  %11033 = vmatprep.subr.bf16.mxu1 %v20010_v48  ;;  %v20071_v17 = vld [vmem:[#allocation85_spill] sm:$0xff] }
 0x9c9   :  { %v6815_v6 = vsub.f32 0.0, %v6751_v8  ;;  %v20072_v8 = vld [vmem:[#allocation25_spill] sm:$0xff] }
 0x9ca   :  { %v6900_v30 = vmul.f32 1.442695, %v6814_v0  ;;  %11007 = vmatpush1.bf16.msra.mxu0 %v20031_v3  ;;  %v20073_v0 = vld [vmem:[#allocation93_spill] sm:$0xff] }
 0x9cb   :  { %v6902_v21 = vmul.f32 1.442695, %v6815_v6  ;;  %11035 = vmatpush1.bf16.msra.mxu1 %v20026_v52  ;;  %11041 = vmatprep.subr.bf16.mxu0 %v20013_v36  ;;  %v20074_v6 = vld [vmem:[#allocation4_spill] sm:$0xff] }
 0x9cc   :  { %12174 = vpow2.f32 %v6900_v30  ;;  %11037 = vmatprep.subr.bf16.mxu1 %v20032_v24 }
 0x9cd   :  { %12176 = vpow2.f32 %v6902_v21  ;;  %6213 = vmatmul.mubr.f32.vlgmr.msra.gmra.mrb[104].mxu0 %v18333_v33  ;;  %v20075_v21 = vld [vmem:[#allocation71_spill] sm:$0xff] }
 0x9ce   :  { %11043 = vmatpush1.bf16.msra.mxu0 %v20050_v35  ;;  %6354 = vmatprep.mubr.f32.mxu0 %v19845_v43 }
 0x9cf   :  { %11039 = vmatpush1.bf16.msra.mxu1 %v20068_v45  ;;  %11045 = vmatprep.subr.bf16.mxu0 %v20069_v40  ;;  %v20077_v40 = vld [vmem:[#allocation98_spill] sm:$0xff] }
 0x9d0   :  { %11073 = vmatprep.subr.bf16.mxu1 %v20070_v54  ;;  %v20076_v54 = vld [vmem:[#allocation47_spill] sm:$0xff] }
 0x9d1   :  { %v12171_v62 = vpop.eup %12170 }
 0x9d2   :  { %v12173_v9 = vpop.eup %12172  ;;  %v7004_v60 = vadd.f32 1.0, %v12171_v62  ;;  %6284 = vmatmul.mubr.f32.vlgmr.msra.gmra.mrb[104].mxu1 %v18333_v33  ;;  %11047 = vmatpush1.bf16.msra.mxu0 %v20071_v17  ;;  %v20078_v17 = vld [vmem:[#allocation106_spill] sm:$0xff] }
 0x9d3   :  { %v7005_v41 = vadd.f32 1.0, %v12173_v9  ;;  %11075 = vmatpush1.bf16.msra.mxu1 %v20072_v8  ;;  %11049 = vmatprep.subr.bf16.mxu0 %v20073_v0  ;;  %v20081_v0 = vld [vmem:[#allocation52_spill] sm:$0xff]  ;;  %v20083_v8 = vld [vmem:[#allocation97_spill] sm:$0xff] }
 0x9d4   :  { %12178 = vrcp.f32 %v7004_v60  ;;  %11077 = vmatprep.subr.bf16.mxu1 %v20074_v6  ;;  %6425 = vmatprep.mubr.f32.mxu1 %v19845_v43  ;;  %v20079_v60 = vld [vmem:[#allocation35_spill] sm:$0xff]  ;;  %v20080_v6 = vld [vmem:[#allocation94_spill] sm:$0xff] }
 0x9d5   :  { %12180 = vrcp.f32 %v7005_v41  ;;  %v20082_v41 = vld [vmem:[#allocation61_spill] sm:$0xff] }
 0x9d6   :  { %v12175_v30 = vpop.eup %12174  ;;  %11051 = vmatpush1.bf16.msra.mxu0 %v20075_v21 }
 0x9d7   :  { %v12177_v31 = vpop.eup %12176  ;;  %v7006_v62 = vadd.f32 1.0, %v12175_v30  ;;  %11079 = vmatpush1.bf16.msra.mxu1 %v20076_v54  ;;  %11053 = vmatprep.subr.bf16.mxu0 %v20077_v40  ;;  %v20084_v54 = vld [vmem:[#allocation110_spill] sm:$0xff]  ;;  %v20085_v40 = vld [vmem:[#allocation99_spill] sm:$0xff] }
 0x9d8   :  { %v7007_v9 = vadd.f32 1.0, %v12177_v31  ;;  %11081 = vmatprep.subr.bf16.mxu1 %v20078_v17  ;;  %v20086_v17 = vld [vmem:[#allocation80_spill] sm:$0xff] }
 0x9d9   :  { %12182 = vrcp.f32 %v7006_v62 }
 0x9da   :  { %12184 = vrcp.f32 %v7007_v9  ;;  %11055 = vmatpush1.bf16.msra.mxu0 %v20079_v60 }
 0x9db   :  { %11083 = vmatpush1.bf16.msra.mxu1 %v20080_v6  ;;  %11057 = vmatprep.subr.bf16.mxu0 %v20081_v0 }
 0x9dc   :  { %11085 = vmatprep.subr.bf16.mxu1 %v20082_v41 }
 0x9de   :  { %v12179_v21 = vpop.eup %12178  ;;  %11059 = vmatpush1.bf16.msra.mxu0 %v20083_v8  ;;  %v20087_v8 = vld [vmem:[#allocation68_spill] sm:$0xff] }
 0x9df   :  { %v12181_v30 = vpop.eup %12180  ;;  %11087 = vmatpush1.bf16.msra.mxu1 %v20084_v54  ;;  %11061 = vmatprep.subr.bf16.mxu0 %v20085_v40 }
 0x9e0   :  { %v7276_v31 = vcombine.low %v12179_v21, %v12181_v30  ;;  %11089 = vmatprep.subr.bf16.mxu1 %v20086_v17  ;;  %v5356_v62 = vpop.f32.mrb[92].mxu0 }
 0x9e1   :  { %v6752_v9 = vadd.f32 %v18046_v26, %v5356_v62  ;;  %v5358_v60 = vpop.f32.mrb[93].mxu0 }
 0x9e2   :  { %v6753_v6 = vadd.f32 %v18046_v26, %v5358_v60  ;;  %11063 = vmatpush1.bf16.msra.mxu0 %v20040_v5  ;;  %v7298_v60 = vrot.slane %v7276_v31, %v18104_v2 }
 0x9e3   :  { %v12183_v41 = vpop.eup %12182  ;;  %v6816_v0 = vsub.f32 0.0, %v6752_v9  ;;  %11091 = vmatpush1.bf16.msra.mxu1 %v20041_v49  ;;  %11065 = vmatprep.subr.bf16.mxu0 %v20087_v8 }
 0x9e4   :  { %v12185_v54 = vpop.eup %12184  ;;  %v6817_v45 = vsub.f32 0.0, %v6753_v6  ;;  %11093 = vmatprep.subr.bf16.mxu1 %v20043_v56  ;;  %v20088_v6 = vcombine.low %v18318_v20, %v18321_v10 }
 0x9e5   :  { %v7277_v21 = vcombine.low %v12183_v41, %v12185_v54  ;;  %v6904_v30 = vmul.f32 1.442695, %v6816_v0  ;;  %v5427_v17 = vpop.f32.mrb[92].mxu1 }
 0x9e6   :  { %v6906_v40 = vmul.f32 1.442695, %v6817_v45  ;;  %v6754_v62 = vadd.f32 %v18046_v26, %v5427_v17  ;;  %v5429_v35 = vpop.f32.mrb[93].mxu1  ;;  %11067 = vmatpush1.bf16.msra.mxu0 %v19955_v12  ;;  %v7314_v41 = vrot.slane %v20088_v6, %v18104_v2  ;;  %v20096_v6 = vld [vmem:[#allocation4_spill] sm:$0xff] }
 0x9e7   :  { %v7305_v9 = vrot.slane %v7277_v21, %v18104_v2  ;;  %12186 = vpow2.f32 %v6904_v30  ;;  %v6755_v8 = vadd.f32 %v18046_v26, %v5429_v35  ;;  %11095 = vmatpush1.bf16.msra.mxu1 %v17728_v50  ;;  %11069 = vmatprep.subr.bf16.mxu0 %v17791_v25 }
 0x9e8   :  { %12188 = vpow2.f32 %v6906_v40  ;;  %v6818_v54 = vsub.f32 0.0, %v6754_v62  ;;  %11097 = vmatprep.subr.bf16.mxu1 %v19974_v44 }
 0x9e9   :  { %v7307_v45 = vcombine.low %v7298_v60, %v7305_v9  ;;  %v6819_v17 = vsub.f32 0.0, %v6755_v8  ;;  %v18436_v60 = vld [vmem:[%s18566_s7 + $0x7] sm:$0x1] }
 0x9ea   :  { %v6908_v0 = vmul.f32 1.442695, %v6818_v54  ;;  %11071 = vmatpush1.bf16.msra.mxu0 %v17793_v1 }
 0x9eb   :  { %v7321_v35 = vrot.slane %v7307_v45, %v18104_v2  ;;  %v6910_v31 = vmul.f32 1.442695, %v6819_v17  ;;  %11099 = vmatpush1.bf16.msra.mxu1 %v19982_v58  ;;  %11105 = vmatprep.subr.bf16.mxu0 %v19983_v38  ;;  %v20094_v17 = vld [vmem:[#allocation25_spill] sm:$0xff] }
 0x9ec   :  { %12190 = vpow2.f32 %v6908_v0  ;;  %11101 = vmatprep.subr.bf16.mxu1 %v17843_v51  ;;  %v20095_v0 = vld [vmem:[#allocation93_spill] sm:$0xff] }
 0x9ed   :  { %v7322_v40 = vcombine.low %v7314_v41, %v7321_v35  ;;  %12192 = vpow2.f32 %v6910_v31  ;;  %6355 = vmatmul.mubr.f32.vlgmr.msra.gmra.mrb[106].mxu0 %v18333_v33  ;;  %v20097_v35 = vld [vmem:[#allocation71_spill] sm:$0xff] }
 0x9ee   :  { %11107 = vmatpush1.bf16.msra.mxu0 %v19984_v13  ;;  %6498 = vmatprep.mubr.f32.mxu0 %v19845_v43 }
 0x9ef   :  { %7578 = vst [vmem:[%s18567_s10 + $0x10] sm:$0xff] %v7322_v40  ;;  %11103 = vmatpush1.bf16.msra.mxu1 %v17845_v11  ;;  %11109 = vmatprep.subr.bf16.mxu0 %v19985_v15 }
 0x9f0   :  { %11137 = vmatprep.subr.bf16.mxu1 %v19986_v39 }
 0x9f1   :  { %v12187_v38 = vpop.eup %12186 }
 0x9f2   :  { %v12189_v20 = vpop.eup %12188  ;;  %v7008_v10 = vadd.f32 1.0, %v12187_v38  ;;  %6426 = vmatmul.mubr.f32.vlgmr.msra.gmra.mrb[106].mxu1 %v18333_v33  ;;  %11111 = vmatpush1.bf16.msra.mxu0 %v19987_v46  ;;  %v20098_v38 = vld [vmem:[#allocation47_spill] sm:$0xff] }
 0x9f3   :  { %v7009_v13 = vadd.f32 1.0, %v12189_v20  ;;  %11139 = vmatpush1.bf16.msra.mxu1 %v19988_v16  ;;  %11113 = vmatprep.subr.bf16.mxu0 %v19989_v57  ;;  %v20099_v20 = vld [vmem:[#allocation98_spill] sm:$0xff] }
 0x9f4   :  { %12194 = vrcp.f32 %v7008_v10  ;;  %11141 = vmatprep.subr.bf16.mxu1 %v19990_v34  ;;  %6569 = vmatprep.mubr.f32.mxu1 %v19845_v43 }
 0x9f5   :  { %12196 = vrcp.f32 %v7009_v13  ;;  %v20100_v13 = vld [vmem:[#allocation106_spill] sm:$0xff] }
 0x9f6   :  { %v12191_v15 = vpop.eup %12190  ;;  %11115 = vmatpush1.bf16.msra.mxu0 %v19991_v4 }
 0x9f7   :  { %v12193_v39 = vpop.eup %12192  ;;  %v7010_v8 = vadd.f32 1.0, %v12191_v15  ;;  %11143 = vmatpush1.bf16.msra.mxu1 %v19992_v53  ;;  %11117 = vmatprep.subr.bf16.mxu0 %v19993_v14  ;;  %v20101_v15 = vld [vmem:[#allocation35_spill] sm:$0xff] }
 0x9f8   :  { %v7011_v46 = vadd.f32 1.0, %v12193_v39  ;;  %11145 = vmatprep.subr.bf16.mxu1 %v19994_v23  ;;  %v20102_v39 = vld [vmem:[#allocation94_spill] sm:$0xff] }
 0x9f9   :  { %12198 = vrcp.f32 %v7010_v8  ;;  %v20104_v8 = vld [vmem:[#allocation61_spill] sm:$0xff] }
 0x9fa   :  { %12200 = vrcp.f32 %v7011_v46  ;;  %11119 = vmatpush1.bf16.msra.mxu0 %v19995_v47 }
 0x9fb   :  { %11147 = vmatpush1.bf16.msra.mxu1 %v19996_v7  ;;  %11121 = vmatprep.subr.bf16.mxu0 %v19997_v27 }
 0x9fc   :  { %11149 = vmatprep.subr.bf16.mxu1 %v19998_v18 }
 0x9fe   :  { %v12195_v16 = vpop.eup %12194  ;;  %11123 = vmatpush1.bf16.msra.mxu0 %v20045_v55 }
 0x9ff   :  { %v12197_v57 = vpop.eup %12196  ;;  %11151 = vmatpush1.bf16.msra.mxu1 %v20046_v42  ;;  %11125 = vmatprep.subr.bf16.mxu0 %v20047_v63 }
 0xa00   :  { %v7323_v34 = vcombine.low %v12195_v16, %v12197_v57  ;;  %11153 = vmatprep.subr.bf16.mxu1 %v20067_v19  ;;  %v5498_v4 = vpop.f32.mrb[94].mxu0  ;;  %v20105_v16 = vld [vmem:[#allocation97_spill] sm:$0xff] }
 0xa01   :  { %v6756_v53 = vadd.f32 %v18046_v26, %v5498_v4  ;;  %v5500_v14 = vpop.f32.mrb[95].mxu0  ;;  %v20107_v4 = vld [vmem:[#allocation99_spill] sm:$0xff] }
 0xa02   :  { %v6757_v23 = vadd.f32 %v18046_v26, %v5500_v14  ;;  %11127 = vmatpush1.bf16.msra.mxu0 %v20049_v28  ;;  %v18421_v28 = vrot.slane %v7323_v34, %v18104_v2  ;;  %v20106_v34 = vld [vmem:[#allocation110_spill] sm:$0xff]  ;;  %v20108_v14 = vld [vmem:[#allocation80_spill] sm:$0xff] }
 0xa03   :  { %v12199_v47 = vpop.eup %12198  ;;  %v6820_v7 = vsub.f32 0.0, %v6756_v53  ;;  %11155 = vmatpush1.bf16.msra.mxu1 %v20030_v37  ;;  %11129 = vmatprep.subr.bf16.mxu0 %v20005_v29 }
 0xa04   :  { %v12201_v27 = vpop.eup %12200  ;;  %v6821_v18 = vsub.f32 0.0, %v6757_v23  ;;  %11157 = vmatprep.subr.bf16.mxu1 %v20006_v22 }
 0xa05   :  { %v7324_v55 = vcombine.low %v12199_v47, %v12201_v27  ;;  %v6912_v42 = vmul.f32 1.442695, %v6820_v7  ;;  %v5569_v63 = vpop.f32.mrb[94].mxu1 }
 0xa06   :  { %v6914_v19 = vmul.f32 1.442695, %v6821_v18  ;;  %v6758_v33 = vadd.f32 %v18046_v26, %v5569_v63  ;;  %v5571_v21 = vpop.f32.mrb[95].mxu1  ;;  %11131 = vmatpush1.bf16.msra.mxu0 %v20007_v59 }
 0xa07   :  { %v18424_v37 = vrot.slane %v7324_v55, %v18104_v2  ;;  %12202 = vpow2.f32 %v6912_v42  ;;  %v6759_v29 = vadd.f32 %v18046_v26, %v5571_v21  ;;  %11159 = vmatpush1.bf16.msra.mxu1 %v20008_v61  ;;  %11133 = vmatprep.subr.bf16.mxu0 %v20009_v32  ;;  %v20089_v61 = vld [vmem:[#allocation18_spill] sm:$0xff]  ;;  %v20090_v32 = vld [vmem:[#allocation84_spill] sm:$0xff] }
 0xa08   :  { %12204 = vpow2.f32 %v6914_v19  ;;  %v6822_v22 = vsub.f32 0.0, %v6758_v33  ;;  %11161 = vmatprep.subr.bf16.mxu1 %v20010_v48  ;;  %v20091_v48 = vld [vmem:[#allocation45_spill] sm:$0xff]  ;;  %v20109_v42 = vld [vmem:[#allocation68_spill] sm:$0xff] }
 0xa09   :  { %v7355_v59 = vcombine.low %v18421_v28, %v18424_v37  ;;  %v6823_v30 = vsub.f32 0.0, %v6759_v29 }
 0xa0a   :  { %v6916_v62 = vmul.f32 1.442695, %v6822_v22  ;;  %11135 = vmatpush1.bf16.msra.mxu0 %v20031_v3  ;;  %v20092_v3 = vld [vmem:[#allocation24_spill] sm:$0xff] }
 0xa0b   :  { %v6918_v9 = vmul.f32 1.442695, %v6823_v30  ;;  %11163 = vmatpush1.bf16.msra.mxu1 %v20026_v52  ;;  %11169 = vmatprep.subr.bf16.mxu0 %v20013_v36  ;;  %v20093_v36 = vld [vmem:[#allocation85_spill] sm:$0xff] }
 0xa0c   :  { %12206 = vpow2.f32 %v6916_v62  ;;  %11165 = vmatprep.subr.bf16.mxu1 %v20032_v24 }
 0xa0d   :  { %12208 = vpow2.f32 %v6918_v9  ;;  %6499 = vmatmul.mubr.f32.vlgmr.msra.gmra.mrb[108].mxu0 %v18436_v60 }
 0xa0e   :  { %11171 = vmatpush1.bf16.msra.mxu0 %v20089_v61  ;;  %6640 = vmatprep.mubr.f32.mxu0 %v19845_v43 }
 0xa0f   :  { %11167 = vmatpush1.bf16.msra.mxu1 %v20090_v32  ;;  %11173 = vmatprep.subr.bf16.mxu0 %v20091_v48 }
 0xa10   :  { %11201 = vmatprep.subr.bf16.mxu1 %v20092_v3 }
 0xa11   :  { %v12203_v54 = vpop.eup %12202 }
 0xa12   :  { %v12205_v52 = vpop.eup %12204  ;;  %v7012_v45 = vadd.f32 1.0, %v12203_v54  ;;  %6570 = vmatmul.mubr.f32.vlgmr.msra.gmra.mrb[108].mxu1 %v18436_v60  ;;  %11175 = vmatpush1.bf16.msra.mxu0 %v20093_v36 }
 0xa13   :  { %v7013_v24 = vadd.f32 1.0, %v12205_v52  ;;  %11203 = vmatpush1.bf16.msra.mxu1 %v20094_v17  ;;  %11177 = vmatprep.subr.bf16.mxu0 %v20095_v0 }
 0xa14   :  { %12210 = vrcp.f32 %v7012_v45  ;;  %11205 = vmatprep.subr.bf16.mxu1 %v20096_v6  ;;  %6711 = vmatprep.mubr.f32.mxu1 %v19845_v43  ;;  %v20103_v43 = vld [vmem:[#allocation52_spill] sm:$0xff] }
 0xa15   :  { %12212 = vrcp.f32 %v7013_v24 }
 0xa16   :  { %v12207_v41 = vpop.eup %12206  ;;  %11179 = vmatpush1.bf16.msra.mxu0 %v20097_v35 }
 0xa17   :  { %v12209_v31 = vpop.eup %12208  ;;  %v7014_v40 = vadd.f32 1.0, %v12207_v41  ;;  %11207 = vmatpush1.bf16.msra.mxu1 %v20098_v38  ;;  %11181 = vmatprep.subr.bf16.mxu0 %v20099_v20 }
 0xa18   :  { %v7015_v10 = vadd.f32 1.0, %v12209_v31  ;;  %11209 = vmatprep.subr.bf16.mxu1 %v20100_v13 }
 0xa19   :  { %12214 = vrcp.f32 %v7014_v40 }
 0xa1a   :  { %12216 = vrcp.f32 %v7015_v10  ;;  %11183 = vmatpush1.bf16.msra.mxu0 %v20101_v15 }
 0xa1b   :  { %11211 = vmatpush1.bf16.msra.mxu1 %v20102_v39  ;;  %11185 = vmatprep.subr.bf16.mxu0 %v20103_v43 }
 0xa1c   :  { %11213 = vmatprep.subr.bf16.mxu1 %v20104_v8 }
 0xa1e   :  { %v12211_v46 = vpop.eup %12210  ;;  %11187 = vmatpush1.bf16.msra.mxu0 %v20105_v16 }
 0xa1f   :  { %v12213_v57 = vpop.eup %12212  ;;  %11215 = vmatpush1.bf16.msra.mxu1 %v20106_v34  ;;  %11189 = vmatprep.subr.bf16.mxu0 %v20107_v4 }
 0xa20   :  { %v7325_v53 = vcombine.low %v12211_v46, %v12213_v57  ;;  %11217 = vmatprep.subr.bf16.mxu1 %v20108_v14  ;;  %v5642_v23 = vpop.f32.mrb[96].mxu0 }
 0xa21   :  { %v6760_v47 = vadd.f32 %v18046_v26, %v5642_v23  ;;  %v5644_v7 = vpop.f32.mrb[97].mxu0 }
 0xa22   :  { %v6761_v27 = vadd.f32 %v18046_v26, %v5644_v7  ;;  %11191 = vmatpush1.bf16.msra.mxu0 %v20040_v5  ;;  %v7347_v5 = vrot.slane %v7325_v53, %v18104_v2 }
 0xa23   :  { %v12215_v18 = vpop.eup %12214  ;;  %v6824_v55 = vsub.f32 0.0, %v6760_v47  ;;  %11219 = vmatpush1.bf16.msra.mxu1 %v20041_v49  ;;  %11193 = vmatprep.subr.bf16.mxu0 %v20109_v42 }
 0xa24   :  { %v12217_v63 = vpop.eup %12216  ;;  %v6825_v19 = vsub.f32 0.0, %v6761_v27  ;;  %11221 = vmatprep.subr.bf16.mxu1 %v20043_v56 }
 0xa25   :  { %v7326_v33 = vcombine.low %v12215_v18, %v12217_v63  ;;  %v6920_v21 = vmul.f32 1.442695, %v6824_v55  ;;  %v5713_v29 = vpop.f32.mrb[96].mxu1 }
 0xa26   :  { %v6922_v22 = vmul.f32 1.442695, %v6825_v19  ;;  %v6762_v30 = vadd.f32 %v18046_v26, %v5713_v29  ;;  %v5715_v62 = vpop.f32.mrb[97].mxu1  ;;  %11195 = vmatpush1.bf16.msra.mxu0 %v19955_v12  ;;  %v7363_v12 = vrot.slane %v7355_v59, %v18104_v2 }
 0xa27   :  { %v7354_v9 = vrot.slane %v7326_v33, %v18104_v2  ;;  %12218 = vpow2.f32 %v6920_v21  ;;  %v6763_v49 = vadd.f32 %v18046_v26, %v5715_v62  ;;  %11223 = vmatpush1.bf16.msra.mxu1 %v17728_v50  ;;  %11197 = vmatprep.subr.bf16.mxu0 %v17791_v25 }
 0xa28   :  { %12220 = vpow2.f32 %v6922_v22  ;;  %v6826_v56 = vsub.f32 0.0, %v6762_v30  ;;  %11225 = vmatprep.subr.bf16.mxu1 %v19974_v44 }
 0xa29   :  { %v7356_v61 = vcombine.low %v7347_v5, %v7354_v9  ;;  %v6827_v32 = vsub.f32 0.0, %v6763_v49 }
 0xa2a   :  { %v6924_v48 = vmul.f32 1.442695, %v6826_v56  ;;  %11199 = vmatpush1.bf16.msra.mxu0 %v17793_v1 }
 0xa2b   :  { %v7370_v3 = vrot.slane %v7356_v61, %v18104_v2  ;;  %v6926_v54 = vmul.f32 1.442695, %v6827_v32  ;;  %11227 = vmatpush1.bf16.msra.mxu1 %v19982_v58 }
 0xa2c   :  { %12222 = vpow2.f32 %v6924_v48  ;;  %11229 = vmatprep.subr.bf16.mxu1 %v17843_v51 }
 0xa2d   :  { %v7371_v50 = vcombine.low %v7363_v12, %v7370_v3  ;;  %12224 = vpow2.f32 %v6926_v54  ;;  %6641 = vmatmul.mubr.f32.vlgmr.msra.gmra.mrb[110].mxu0 %v18436_v60 }
 0xa2f   :  { %7579 = vst [vmem:[%s18567_s10 + $0x18] sm:$0xff] %v7371_v50  ;;  %11231 = vmatpush1.bf16.msra.mxu1 %v17845_v11 }
 0xa31   :  { %v12219_v25 = vpop.eup %12218 }
 0xa32   :  { %v12221_v1 = vpop.eup %12220  ;;  %v7016_v44 = vadd.f32 1.0, %v12219_v25  ;;  %6712 = vmatmul.mubr.f32.vlgmr.msra.gmra.mrb[110].mxu1 %v18436_v60 }
 0xa33   :  { %v7017_v28 = vadd.f32 1.0, %v12221_v1 }
 0xa34   :  { %12226 = vrcp.f32 %v7016_v44 }
 0xa35   :  { %12228 = vrcp.f32 %v7017_v28 }
 0xa36   :  { %v12223_v58 = vpop.eup %12222 }
 0xa37   :  { %v12225_v51 = vpop.eup %12224  ;;  %v7018_v37 = vadd.f32 1.0, %v12223_v58 }
 0xa38   :  { %v7019_v59 = vadd.f32 1.0, %v12225_v51 }
 0xa39   :  { %12230 = vrcp.f32 %v7018_v37 }
 0xa3a   :  { %12232 = vrcp.f32 %v7019_v59 }
 0xa3e   :  { %v12227_v52 = vpop.eup %12226 }
 0xa3f   :  { %v12229_v45 = vpop.eup %12228 }
 0xa40   :  { %v7372_v36 = vcombine.low %v12227_v52, %v12229_v45  ;;  %v5784_v24 = vpop.f32.mrb[98].mxu0 }
 0xa41   :  { %v6764_v11 = vadd.f32 %v18046_v26, %v5784_v24  ;;  %v5786_v17 = vpop.f32.mrb[99].mxu0 }
 0xa42   :  { %v6765_v0 = vadd.f32 %v18046_v26, %v5786_v17  ;;  %v7382_v15 = vrot.slane %v7372_v36, %v18104_v2 }
 0xa43   :  { %v12231_v6 = vpop.eup %12230  ;;  %v6828_v60 = vsub.f32 0.0, %v6764_v11 }
 0xa44   :  { %v12233_v41 = vpop.eup %12232  ;;  %v6829_v35 = vsub.f32 0.0, %v6765_v0 }
 0xa45   :  { %v7373_v31 = vcombine.low %v12231_v6, %v12233_v41  ;;  %v6928_v40 = vmul.f32 1.442695, %v6828_v60  ;;  %v5855_v38 = vpop.f32.mrb[98].mxu1 }
 0xa46   :  { %v6930_v20 = vmul.f32 1.442695, %v6829_v35  ;;  %v6766_v10 = vadd.f32 %v18046_v26, %v5855_v38  ;;  %v5857_v13 = vpop.f32.mrb[99].mxu1 }
 0xa47   :  { %v7389_v39 = vrot.slane %v7373_v31, %v18104_v2  ;;  %12234 = vpow2.f32 %v6928_v40  ;;  %v6767_v43 = vadd.f32 %v18046_v26, %v5857_v13 }
 0xa48   :  { %12236 = vpow2.f32 %v6930_v20  ;;  %v6830_v8 = vsub.f32 0.0, %v6766_v10 }
 0xa49   :  { %v7404_v46 = vcombine.low %v7382_v15, %v7389_v39  ;;  %v6831_v16 = vsub.f32 0.0, %v6767_v43 }
 0xa4a   :  { %v6932_v57 = vmul.f32 1.442695, %v6830_v8 }
 0xa4b   :  { %v6934_v34 = vmul.f32 1.442695, %v6831_v16  ;;  %v7412_v28 = vrot.slane %v7404_v46, %v18104_v2 }
 0xa4c   :  { %12238 = vpow2.f32 %v6932_v57 }
 0xa4d   :  { %12240 = vpow2.f32 %v6934_v34 }
 0xa51   :  { %v12235_v4 = vpop.eup %12234 }
 0xa52   :  { %v12237_v53 = vpop.eup %12236  ;;  %v7020_v14 = vadd.f32 1.0, %v12235_v4 }
 0xa53   :  { %v7021_v23 = vadd.f32 1.0, %v12237_v53 }
 0xa54   :  { %12242 = vrcp.f32 %v7020_v14 }
 0xa55   :  { %12244 = vrcp.f32 %v7021_v23 }
 0xa56   :  { %v12239_v47 = vpop.eup %12238 }
 0xa57   :  { %v12241_v7 = vpop.eup %12240  ;;  %v7022_v27 = vadd.f32 1.0, %v12239_v47 }
 0xa58   :  { %v7023_v18 = vadd.f32 1.0, %v12241_v7 }
 0xa59   :  { %12246 = vrcp.f32 %v7022_v27 }
 0xa5a   :  { %12248 = vrcp.f32 %v7023_v18 }
 0xa5e   :  { %v12243_v55 = vpop.eup %12242 }
 0xa5f   :  { %v12245_v42 = vpop.eup %12244 }
 0xa60   :  { %v7374_v63 = vcombine.low %v12243_v55, %v12245_v42  ;;  %v5928_v19 = vpop.f32.mrb[100].mxu0 }
 0xa61   :  { %v6768_v33 = vadd.f32 %v18046_v26, %v5928_v19  ;;  %v5930_v21 = vpop.f32.mrb[101].mxu0 }
 0xa62   :  { %v6769_v29 = vadd.f32 %v18046_v26, %v5930_v21  ;;  %v7396_v12 = vrot.slane %v7374_v63, %v18104_v2 }
 0xa63   :  { %v12247_v22 = vpop.eup %12246  ;;  %v6832_v30 = vsub.f32 0.0, %v6768_v33 }
 0xa64   :  { %v12249_v62 = vpop.eup %12248  ;;  %v6833_v5 = vsub.f32 0.0, %v6769_v29 }
 0xa65   :  { %v7375_v9 = vcombine.low %v12247_v22, %v12249_v62  ;;  %v6936_v49 = vmul.f32 1.442695, %v6832_v30  ;;  %v5999_v56 = vpop.f32.mrb[100].mxu1 }
 0xa66   :  { %v6938_v61 = vmul.f32 1.442695, %v6833_v5  ;;  %v6770_v32 = vadd.f32 %v18046_v26, %v5999_v56  ;;  %v6001_v48 = vpop.f32.mrb[101].mxu1 }
 0xa67   :  { %v7403_v3 = vrot.slane %v7375_v9, %v18104_v2  ;;  %12250 = vpow2.f32 %v6936_v49  ;;  %v6771_v54 = vadd.f32 %v18046_v26, %v6001_v48 }
 0xa68   :  { %12252 = vpow2.f32 %v6938_v61  ;;  %v6834_v50 = vsub.f32 0.0, %v6770_v32 }
 0xa69   :  { %v7405_v25 = vcombine.low %v7396_v12, %v7403_v3  ;;  %v6835_v1 = vsub.f32 0.0, %v6771_v54 }
 0xa6a   :  { %v6940_v44 = vmul.f32 1.442695, %v6834_v50 }
 0xa6b   :  { %v7419_v58 = vrot.slane %v7405_v25, %v18104_v2  ;;  %v6942_v51 = vmul.f32 1.442695, %v6835_v1 }
 0xa6c   :  { %12254 = vpow2.f32 %v6940_v44 }
 0xa6d   :  { %v7420_v37 = vcombine.low %v7412_v28, %v7419_v58  ;;  %12256 = vpow2.f32 %v6942_v51 }
 0xa6f   :  { %7580 = vst [vmem:[%s18567_s10 + $0x20] sm:$0xff] %v7420_v37 }
 0xa71   :  { %v12251_v59 = vpop.eup %12250 }
 0xa72   :  { %v12253_v52 = vpop.eup %12252  ;;  %v7024_v45 = vadd.f32 1.0, %v12251_v59 }
 0xa73   :  { %v7025_v36 = vadd.f32 1.0, %v12253_v52 }
 0xa74   :  { %12258 = vrcp.f32 %v7024_v45 }
 0xa75   :  { %12260 = vrcp.f32 %v7025_v36 }
 0xa76   :  { %v12255_v24 = vpop.eup %12254 }
 0xa77   :  { %v12257_v11 = vpop.eup %12256  ;;  %v7026_v17 = vadd.f32 1.0, %v12255_v24 }
 0xa78   :  { %v7027_v0 = vadd.f32 1.0, %v12257_v11 }
 0xa79   :  { %12262 = vrcp.f32 %v7026_v17 }
 0xa7a   :  { %12264 = vrcp.f32 %v7027_v0 }
 0xa7e   :  { %v12259_v6 = vpop.eup %12258 }
 0xa7f   :  { %v12261_v60 = vpop.eup %12260 }
 0xa80   :  { %v7421_v41 = vcombine.low %v12259_v6, %v12261_v60  ;;  %v6070_v35 = vpop.f32.mrb[102].mxu0 }
 0xa81   :  { %v6772_v31 = vadd.f32 %v18046_v26, %v6070_v35  ;;  %v6072_v40 = vpop.f32.mrb[103].mxu0 }
 0xa82   :  { %v6773_v38 = vadd.f32 %v18046_v26, %v6072_v40  ;;  %v7431_v34 = vrot.slane %v7421_v41, %v18104_v2 }
 0xa83   :  { %v12263_v20 = vpop.eup %12262  ;;  %v6836_v10 = vsub.f32 0.0, %v6772_v31 }
 0xa84   :  { %v12265_v13 = vpop.eup %12264  ;;  %v6837_v15 = vsub.f32 0.0, %v6773_v38 }
 0xa85   :  { %v7422_v39 = vcombine.low %v12263_v20, %v12265_v13  ;;  %v6944_v43 = vmul.f32 1.442695, %v6836_v10  ;;  %v6141_v8 = vpop.f32.mrb[102].mxu1 }
 0xa86   :  { %v6946_v46 = vmul.f32 1.442695, %v6837_v15  ;;  %v6774_v16 = vadd.f32 %v18046_v26, %v6141_v8  ;;  %v6143_v57 = vpop.f32.mrb[103].mxu1 }
 0xa87   :  { %v7438_v4 = vrot.slane %v7422_v39, %v18104_v2  ;;  %12266 = vpow2.f32 %v6944_v43  ;;  %v6775_v53 = vadd.f32 %v18046_v26, %v6143_v57 }
 0xa88   :  { %12268 = vpow2.f32 %v6946_v46  ;;  %v6838_v14 = vsub.f32 0.0, %v6774_v16 }
 0xa89   :  { %v7453_v23 = vcombine.low %v7431_v34, %v7438_v4  ;;  %v6839_v47 = vsub.f32 0.0, %v6775_v53 }
 0xa8a   :  { %v6948_v7 = vmul.f32 1.442695, %v6838_v14 }
 0xa8b   :  { %v6950_v27 = vmul.f32 1.442695, %v6839_v47  ;;  %v7461_v36 = vrot.slane %v7453_v23, %v18104_v2 }
 0xa8c   :  { %12270 = vpow2.f32 %v6948_v7 }
 0xa8d   :  { %12272 = vpow2.f32 %v6950_v27 }
 0xa91   :  { %v12267_v18 = vpop.eup %12266 }
 0xa92   :  { %v12269_v55 = vpop.eup %12268  ;;  %v7028_v42 = vadd.f32 1.0, %v12267_v18 }
 0xa93   :  { %v7029_v63 = vadd.f32 1.0, %v12269_v55 }
 0xa94   :  { %12274 = vrcp.f32 %v7028_v42 }
 0xa95   :  { %12276 = vrcp.f32 %v7029_v63 }
 0xa96   :  { %v12271_v19 = vpop.eup %12270 }
 0xa97   :  { %v12273_v33 = vpop.eup %12272  ;;  %v7030_v21 = vadd.f32 1.0, %v12271_v19 }
 0xa98   :  { %v7031_v29 = vadd.f32 1.0, %v12273_v33 }
 0xa99   :  { %12278 = vrcp.f32 %v7030_v21 }
 0xa9a   :  { %12280 = vrcp.f32 %v7031_v29 }
 0xa9e   :  { %v12275_v22 = vpop.eup %12274 }
 0xa9f   :  { %v12277_v30 = vpop.eup %12276 }
 0xaa0   :  { %v7423_v62 = vcombine.low %v12275_v22, %v12277_v30  ;;  %v6214_v5 = vpop.f32.mrb[104].mxu0 }
 0xaa1   :  { %v6776_v9 = vadd.f32 %v18046_v26, %v6214_v5  ;;  %v6216_v49 = vpop.f32.mrb[105].mxu0 }
 0xaa2   :  { %v6777_v56 = vadd.f32 %v18046_v26, %v6216_v49  ;;  %v7445_v28 = vrot.slane %v7423_v62, %v18104_v2 }
 0xaa3   :  { %v12279_v61 = vpop.eup %12278  ;;  %v6840_v32 = vsub.f32 0.0, %v6776_v9 }
 0xaa4   :  { %v12281_v48 = vpop.eup %12280  ;;  %v6841_v12 = vsub.f32 0.0, %v6777_v56 }
 0xaa5   :  { %v7424_v3 = vcombine.low %v12279_v61, %v12281_v48  ;;  %v6952_v54 = vmul.f32 1.442695, %v6840_v32  ;;  %v6285_v50 = vpop.f32.mrb[104].mxu1 }
 0xaa6   :  { %v6954_v25 = vmul.f32 1.442695, %v6841_v12  ;;  %v6778_v1 = vadd.f32 %v18046_v26, %v6285_v50  ;;  %v6287_v44 = vpop.f32.mrb[105].mxu1 }
 0xaa7   :  { %v7452_v58 = vrot.slane %v7424_v3, %v18104_v2  ;;  %12282 = vpow2.f32 %v6952_v54  ;;  %v6779_v51 = vadd.f32 %v18046_v26, %v6287_v44 }
 0xaa8   :  { %12284 = vpow2.f32 %v6954_v25  ;;  %v6842_v37 = vsub.f32 0.0, %v6778_v1 }
 0xaa9   :  { %v7454_v59 = vcombine.low %v7445_v28, %v7452_v58  ;;  %v6843_v52 = vsub.f32 0.0, %v6779_v51 }
 0xaaa   :  { %v6956_v45 = vmul.f32 1.442695, %v6842_v37 }
 0xaab   :  { %v7468_v24 = vrot.slane %v7454_v59, %v18104_v2  ;;  %v6958_v11 = vmul.f32 1.442695, %v6843_v52 }
 0xaac   :  { %12286 = vpow2.f32 %v6956_v45 }
 0xaad   :  { %v7469_v17 = vcombine.low %v7461_v36, %v7468_v24  ;;  %12288 = vpow2.f32 %v6958_v11 }
 0xaaf   :  { %7581 = vst [vmem:[%s18567_s10 + $0x28] sm:$0xff] %v7469_v17 }
 0xab1   :  { %v12283_v0 = vpop.eup %12282 }
 0xab2   :  { %v12285_v6 = vpop.eup %12284  ;;  %v7032_v60 = vadd.f32 1.0, %v12283_v0 }
 0xab3   :  { %v7033_v41 = vadd.f32 1.0, %v12285_v6 }
 0xab4   :  { %12290 = vrcp.f32 %v7032_v60 }
 0xab5   :  { %12292 = vrcp.f32 %v7033_v41 }
 0xab6   :  { %v12287_v35 = vpop.eup %12286 }
 0xab7   :  { %v12289_v31 = vpop.eup %12288  ;;  %v7034_v40 = vadd.f32 1.0, %v12287_v35 }
 0xab8   :  { %v7035_v38 = vadd.f32 1.0, %v12289_v31 }
 0xab9   :  { %12294 = vrcp.f32 %v7034_v40 }
 0xaba   :  { %12296 = vrcp.f32 %v7035_v38 }
 0xabe   :  { %v12291_v20 = vpop.eup %12290 }
 0xabf   :  { %v12293_v10 = vpop.eup %12292 }
 0xac0   :  { %v7470_v13 = vcombine.low %v12291_v20, %v12293_v10  ;;  %v6356_v15 = vpop.f32.mrb[106].mxu0 }
 0xac1   :  { %v6780_v39 = vadd.f32 %v18046_v26, %v6356_v15  ;;  %v6358_v43 = vpop.f32.mrb[107].mxu0 }
 0xac2   :  { %v6781_v8 = vadd.f32 %v18046_v26, %v6358_v43  ;;  %v7480_v27 = vrot.slane %v7470_v13, %v18104_v2 }
 0xac3   :  { %v12295_v46 = vpop.eup %12294  ;;  %v6844_v16 = vsub.f32 0.0, %v6780_v39 }
 0xac4   :  { %v12297_v57 = vpop.eup %12296  ;;  %v6845_v34 = vsub.f32 0.0, %v6781_v8 }
 0xac5   :  { %v7471_v4 = vcombine.low %v12295_v46, %v12297_v57  ;;  %v6960_v53 = vmul.f32 1.442695, %v6844_v16  ;;  %v6427_v14 = vpop.f32.mrb[106].mxu1 }
 0xac6   :  { %v6962_v23 = vmul.f32 1.442695, %v6845_v34  ;;  %v6782_v47 = vadd.f32 %v18046_v26, %v6427_v14  ;;  %v6429_v7 = vpop.f32.mrb[107].mxu1 }
 0xac7   :  { %v7487_v18 = vrot.slane %v7471_v4, %v18104_v2  ;;  %12298 = vpow2.f32 %v6960_v53  ;;  %v6783_v55 = vadd.f32 %v18046_v26, %v6429_v7 }
 0xac8   :  { %12300 = vpow2.f32 %v6962_v23  ;;  %v6846_v42 = vsub.f32 0.0, %v6782_v47 }
 0xac9   :  { %v7502_v63 = vcombine.low %v7480_v27, %v7487_v18  ;;  %v6847_v19 = vsub.f32 0.0, %v6783_v55 }
 0xaca   :  { %v6964_v33 = vmul.f32 1.442695, %v6846_v42 }
 0xacb   :  { %v6966_v21 = vmul.f32 1.442695, %v6847_v19  ;;  %v7510_v41 = vrot.slane %v7502_v63, %v18104_v2 }
 0xacc   :  { %12302 = vpow2.f32 %v6964_v33 }
 0xacd   :  { %12304 = vpow2.f32 %v6966_v21 }
 0xad1   :  { %v12299_v29 = vpop.eup %12298 }
 0xad2   :  { %v12301_v22 = vpop.eup %12300  ;;  %v7036_v30 = vadd.f32 1.0, %v12299_v29 }
 0xad3   :  { %v7037_v62 = vadd.f32 1.0, %v12301_v22 }
 0xad4   :  { %12306 = vrcp.f32 %v7036_v30 }
 0xad5   :  { %12308 = vrcp.f32 %v7037_v62 }
 0xad6   :  { %v12303_v5 = vpop.eup %12302 }
 0xad7   :  { %v12305_v9 = vpop.eup %12304  ;;  %v7038_v49 = vadd.f32 1.0, %v12303_v5 }
 0xad8   :  { %v7039_v56 = vadd.f32 1.0, %v12305_v9 }
 0xad9   :  { %12310 = vrcp.f32 %v7038_v49 }
 0xada   :  { %12312 = vrcp.f32 %v7039_v56 }
 0xade   :  { %v12307_v61 = vpop.eup %12306 }
 0xadf   :  { %v12309_v32 = vpop.eup %12308 }
 0xae0   :  { %v7472_v48 = vcombine.low %v12307_v61, %v12309_v32  ;;  %v6500_v12 = vpop.f32.mrb[108].mxu0 }
 0xae1   :  { %v6784_v3 = vadd.f32 %v18046_v26, %v6500_v12  ;;  %v6502_v54 = vpop.f32.mrb[109].mxu0 }
 0xae2   :  { %v6785_v50 = vadd.f32 %v18046_v26, %v6502_v54  ;;  %v7494_v36 = vrot.slane %v7472_v48, %v18104_v2 }
 0xae3   :  { %v12311_v25 = vpop.eup %12310  ;;  %v6848_v1 = vsub.f32 0.0, %v6784_v3 }
 0xae4   :  { %v12313_v44 = vpop.eup %12312  ;;  %v6849_v28 = vsub.f32 0.0, %v6785_v50 }
 0xae5   :  { %v7473_v58 = vcombine.low %v12311_v25, %v12313_v44  ;;  %v6968_v51 = vmul.f32 1.442695, %v6848_v1  ;;  %v6571_v37 = vpop.f32.mrb[108].mxu1 }
 0xae6   :  { %v6970_v59 = vmul.f32 1.442695, %v6849_v28  ;;  %v6786_v52 = vadd.f32 %v18046_v26, %v6571_v37  ;;  %v6573_v45 = vpop.f32.mrb[109].mxu1 }
 0xae7   :  { %v7501_v24 = vrot.slane %v7473_v58, %v18104_v2  ;;  %12314 = vpow2.f32 %v6968_v51  ;;  %v6787_v11 = vadd.f32 %v18046_v26, %v6573_v45 }
 0xae8   :  { %12316 = vpow2.f32 %v6970_v59  ;;  %v6850_v17 = vsub.f32 0.0, %v6786_v52 }
 0xae9   :  { %v7503_v0 = vcombine.low %v7494_v36, %v7501_v24  ;;  %v6851_v6 = vsub.f32 0.0, %v6787_v11 }
 0xaea   :  { %v6972_v60 = vmul.f32 1.442695, %v6850_v17 }
 0xaeb   :  { %v7517_v35 = vrot.slane %v7503_v0, %v18104_v2  ;;  %v6974_v31 = vmul.f32 1.442695, %v6851_v6 }
 0xaec   :  { %12318 = vpow2.f32 %v6972_v60 }
 0xaed   :  { %v7518_v40 = vcombine.low %v7510_v41, %v7517_v35  ;;  %12320 = vpow2.f32 %v6974_v31 }
 0xaef   :  { %7582 = vst [vmem:[%s18567_s10 + $0x30] sm:$0xff] %v7518_v40 }
 0xaf1   :  { %v12315_v38 = vpop.eup %12314 }
 0xaf2   :  { %v12317_v20 = vpop.eup %12316  ;;  %v7040_v10 = vadd.f32 1.0, %v12315_v38 }
 0xaf3   :  { %v7041_v13 = vadd.f32 1.0, %v12317_v20 }
 0xaf4   :  { %12322 = vrcp.f32 %v7040_v10 }
 0xaf5   :  { %12324 = vrcp.f32 %v7041_v13 }
 0xaf6   :  { %v12319_v15 = vpop.eup %12318 }
 0xaf7   :  { %v12321_v39 = vpop.eup %12320  ;;  %v7042_v43 = vadd.f32 1.0, %v12319_v15 }
 0xaf8   :  { %v7043_v8 = vadd.f32 1.0, %v12321_v39 }
 0xaf9   :  { %12326 = vrcp.f32 %v7042_v43 }
 0xafa   :  { %12328 = vrcp.f32 %v7043_v8 }
 0xafe   :  { %v12323_v46 = vpop.eup %12322 }
 0xaff   :  { %v12325_v16 = vpop.eup %12324 }
 0xb00   :  { %v7519_v57 = vcombine.low %v12323_v46, %v12325_v16  ;;  %v6642_v34 = vpop.f32.mrb[110].mxu0 }
 0xb01   :  { %v6788_v4 = vadd.f32 %v18046_v26, %v6642_v34  ;;  %v6644_v53 = vpop.f32.mrb[111].mxu0 }
 0xb02   :  { %v6789_v14 = vadd.f32 %v18046_v26, %v6644_v53  ;;  %v7529_v21 = vrot.slane %v7519_v57, %v18104_v2 }
 0xb03   :  { %v12327_v23 = vpop.eup %12326  ;;  %v6852_v47 = vsub.f32 0.0, %v6788_v4 }
 0xb04   :  { %v12329_v7 = vpop.eup %12328  ;;  %v6853_v27 = vsub.f32 0.0, %v6789_v14 }
 0xb05   :  { %v7520_v18 = vcombine.low %v12327_v23, %v12329_v7  ;;  %v6976_v55 = vmul.f32 1.442695, %v6852_v47  ;;  %v6713_v42 = vpop.f32.mrb[110].mxu1 }
 0xb06   :  { %v6978_v63 = vmul.f32 1.442695, %v6853_v27  ;;  %v6790_v19 = vadd.f32 %v18046_v26, %v6713_v42  ;;  %v6715_v33 = vpop.f32.mrb[111].mxu1 }
 0xb07   :  { %v7536_v29 = vrot.slane %v7520_v18, %v18104_v2  ;;  %12330 = vpow2.f32 %v6976_v55  ;;  %v6791_v22 = vadd.f32 %v18046_v26, %v6715_v33 }
 0xb08   :  { %12332 = vpow2.f32 %v6978_v63  ;;  %v6854_v30 = vsub.f32 0.0, %v6790_v19 }
 0xb09   :  { %v7551_v62 = vcombine.low %v7529_v21, %v7536_v29  ;;  %v6855_v5 = vsub.f32 0.0, %v6791_v22 }
 0xb0a   :  { %v6980_v9 = vmul.f32 1.442695, %v6854_v30 }
 0xb0b   :  { %v6982_v49 = vmul.f32 1.442695, %v6855_v5  ;;  %v7559_v52 = vrot.slane %v7551_v62, %v18104_v2 }
 0xb0c   :  { %12334 = vpow2.f32 %v6980_v9 }
 0xb0d   :  { %12336 = vpow2.f32 %v6982_v49 }
 0xb11   :  { %v12331_v56 = vpop.eup %12330 }
 0xb12   :  { %v12333_v61 = vpop.eup %12332  ;;  %v7044_v32 = vadd.f32 1.0, %v12331_v56 }
 0xb13   :  { %v7045_v48 = vadd.f32 1.0, %v12333_v61 }
 0xb14   :  { %12338 = vrcp.f32 %v7044_v32 }
 0xb15   :  { %12340 = vrcp.f32 %v7045_v48 }
 0xb16   :  { %v12335_v12 = vpop.eup %12334 }
 0xb17   :  { %v12337_v3 = vpop.eup %12336  ;;  %v7046_v54 = vadd.f32 1.0, %v12335_v12 }
 0xb18   :  { %v7047_v50 = vadd.f32 1.0, %v12337_v3 }
 0xb19   :  { %12342 = vrcp.f32 %v7046_v54 }
 0xb1a   :  { %12344 = vrcp.f32 %v7047_v50 }
 0xb1e   :  { %v12339_v26 = vpop.eup %12338 }
 0xb1f   :  { %v12341_v25 = vpop.eup %12340 }
 0xb20   :  { %v7521_v1 = vcombine.low %v12339_v26, %v12341_v25 }
 0xb22   :  { %v7543_v51 = vrot.slane %v7521_v1, %v18104_v2 }
 0xb23   :  { %v12343_v44 = vpop.eup %12342 }
 0xb24   :  { %v12345_v28 = vpop.eup %12344 }
 0xb25   :  { %v7522_v58 = vcombine.low %v12343_v44, %v12345_v28 }
 0xb27   :  { %v7550_v37 = vrot.slane %v7522_v58, %v18104_v2 }
 0xb29   :  { %v7552_v59 = vcombine.low %v7543_v51, %v7550_v37 }
 0xb2b   :  { %v7566_v45 = vrot.slane %v7552_v59, %v18104_v2 }
 0xb2d   :  { %v7567_v36 = vcombine.low %v7559_v52, %v7566_v45 }
 0xb2f   :  { %7583 = vst [vmem:[%s18567_s10 + $0x38] sm:$0xff] %v7567_v36 }

</bundles_post_ra>
